<compile_context>
chip_gen: v5e
topology: v5e:2x2
jax: 0.10.0
libtpu: 0.0.40
codegen_flags: <defaults>
</compile_context>

<pallas_src>
import functools

import jax
import jax.numpy as jnp
from jax import lax
from jax.experimental import pallas as pl
from jax.experimental.pallas import tpu as pltpu

K = 20                  # number of nearest neighbors (hard-coded in the module)
EMB_DIM = 50
EMB_PAD = 64            # embedding / conv5 channel axis zero-padded 50 -> 64
VOCAB = 6187
OUTPUT_CHANNELS = 8     # args.output_channels
BN_EPS = 1e-5
LRELU_SLOPE = 0.2


def _leaky_relu(v):
    # maximum(v, a*v) == LeakyReLU(v) for 0 < a < 1; 2 VALU ops instead of 3.
    return jnp.maximum(v, LRELU_SLOPE * v)


# ---------------------------------------------------------------------------
# Pallas kernels
# ---------------------------------------------------------------------------

def _pairdist_kernel(x_ref, o_ref):
    """Layer-1 pairwise 'distance' used only for top-k; all batches in one
    grid step.  pd[i,j] = 2 x_i.x_j - ||x_j||^2 (the -||x_i||^2 term is
    constant per row and cannot change the per-row top-k, so it is dropped)."""
    x = x_ref[...]                                            # (B, N, C) bf16
    gram = jnp.einsum('bnc,bmc->bnm', x, x,
                      preferred_element_type=jnp.float32)     # (B, N, N)
    sq = jnp.sum(jnp.square(x.astype(jnp.float32)), axis=-1)  # (B, N)
    o_ref[...] = 2.0 * gram - sq[:, None, :]


def _edge_conv_kernel(idx_ref, x_ref, wt_ref, wd_ref, sh_ref, o_ref, *rest,
                      n, k, compute_pd):
    """One batch per grid step.

    G = x @ (W_top * bn_scale)                (neighbor term, N rows)
    H = x @ ((W_bot - W_top) * bn_scale)      (center term,   N rows)
    out[n] = LeakyReLU( max_k G[idx[n,k]] + H[n] + bn_shift )

    idx_ref: flattened (B*N*K,) knn indices in SMEM (scalar prefetch).
    Optionally also emits the pairwise distance of its own output so the next
    layer needs no separate pairwise-distance kernel."""
    if compute_pd:
        pd_ref, g_scr, mx_scr = rest
    else:
        g_scr, mx_scr = rest

    b = pl.program_id(0)
    x = x_ref[0]                                              # (N, C) bf16

    # Neighbor-independent projection, BN scale already folded into columns.
    g_scr[...] = jnp.dot(x, wt_ref[...], preferred_element_type=jnp.float32)

    # Gather + max over the k neighbors, driven by SMEM indices.
    def body(i, carry):
        base = (b * n + i) * k
        m = g_scr[pl.ds(idx_ref[base], 1), :]                 # (1, cout)
        for kk in range(1, k):
            m = jnp.maximum(m, g_scr[pl.ds(idx_ref[base + kk], 1), :])
        mx_scr[pl.ds(i, 1), :] = m
        return carry

    lax.fori_loop(0, n, body, 0)

    # Center term + epilogue, applied only to the max-reduced (N, cout) tile.
    h = jnp.dot(x, wd_ref[...], preferred_element_type=jnp.float32)
    v = mx_scr[...] + h + sh_ref[...]
    act = _leaky_relu(v).astype(o_ref.dtype)                  # (N, cout) bf16
    o_ref[0] = act

    if compute_pd:
        gram = lax.dot_general(act, act, (((1,), (1,)), ((), ())),
                               preferred_element_type=jnp.float32)   # (N, N)
        sq = jnp.sum(jnp.square(act.astype(jnp.float32)), axis=-1)   # (N,)
        pd_ref[0] = 2.0 * gram - sq[None, :]


def _tail_kernel(x1_ref, x2_ref, x3_ref, x4_ref,
                 w5a_ref, w5b_ref, w5c_ref, w5d_ref, sh5_ref,
                 w6a_ref, w6b_ref, sh6_ref,
                 w7_ref, sh7_ref, w8_ref, b8_ref, o_ref):
    """One batch per grid step: conv5 (split over the four branch inputs, no
    concat) + bn5 + LeakyReLU, max/avg pooling over the N points, linear1+bn6,
    linear2(+bias)+bn7, linear3 -- all fused in VMEM."""
    y = (jnp.dot(x1_ref[0], w5a_ref[...], preferred_element_type=jnp.float32)
         + jnp.dot(x2_ref[0], w5b_ref[...], preferred_element_type=jnp.float32)
         + jnp.dot(x3_ref[0], w5c_ref[...], preferred_element_type=jnp.float32)
         + jnp.dot(x4_ref[0], w5d_ref[...], preferred_element_type=jnp.float32))
    y = _leaky_relu(y + sh5_ref[...])                         # (N, 64) f32
    h_max = jnp.max(y, axis=0, keepdims=True)                 # (1, 64)
    h_avg = jnp.mean(y, axis=0, keepdims=True)                # (1, 64)

    # linear1 on concat([max, avg]) == max @ W6a + avg @ W6b
    h = (jnp.dot(h_max.astype(w6a_ref.dtype), w6a_ref[...],
                 preferred_element_type=jnp.float32)
         + jnp.dot(h_avg.astype(w6b_ref.dtype), w6b_ref[...],
                   preferred_element_type=jnp.float32))
    h = _leaky_relu(h + sh6_ref[...])                         # (1, 256)
    # dp1: eval-mode dropout = identity

    h = jnp.dot(h.astype(w7_ref.dtype), w7_ref[...],
                preferred_element_type=jnp.float32)
    h = _leaky_relu(h + sh7_ref[...])                         # (1, 128)
    # dp2: eval-mode dropout = identity

    out = jnp.dot(h.astype(w8_ref.dtype), w8_ref[...],
                  preferred_element_type=jnp.float32) + b8_ref[...]
    o_ref[0] = out                                            # (1, out_channels)


# ---------------------------------------------------------------------------
# Pallas wrappers
# ---------------------------------------------------------------------------

def pairwise_distance(x):
    """x: (B, N, C) bf16 -> (B, N, N) f32 (up to a per-row constant)."""
    B, N, C = x.shape
    return pl.pallas_call(
        _pairdist_kernel,
        out_shape=jax.ShapeDtypeStruct((B, N, N), jnp.float32),
        grid_spec=pltpu.PrefetchScalarGridSpec(
            num_scalar_prefetch=0,
            grid=(1,),
            in_specs=[pl.BlockSpec((B, N, C), lambda i: (0, 0, 0))],
            out_specs=pl.BlockSpec((B, N, N), lambda i: (0, 0, 0)),
        ),
    )(x)


def edge_conv(x, idx, w_top, w_delta, shift, *, compute_pd):
    """x: (B, N, C) bf16; idx: (B, N, K) int32; weights (C, cout) bf16 with the
    BN scale folded in; shift: (1, cout) f32.  Returns the (B, N, cout) bf16
    activation and, when compute_pd, the (B, N, N) f32 pairwise distance of
    that activation (for the next layer's knn)."""
    B, N, C = x.shape
    cout = w_top.shape[1]
    idx_flat = idx.reshape(-1).astype(jnp.int32)    # 1-D -> compact SMEM pad

    out_shape = [jax.ShapeDtypeStruct((B, N, cout), jnp.bfloat16)]
    out_specs = [pl.BlockSpec((1, N, cout), lambda b, idx_r: (b, 0, 0))]
    if compute_pd:
        out_shape.append(jax.ShapeDtypeStruct((B, N, N), jnp.float32))
        out_specs.append(pl.BlockSpec((1, N, N), lambda b, idx_r: (b, 0, 0)))

    res = pl.pallas_call(
        functools.partial(_edge_conv_kernel, n=N, k=K, compute_pd=compute_pd),
        out_shape=tuple(out_shape),
        grid_spec=pltpu.PrefetchScalarGridSpec(
            num_scalar_prefetch=1,
            grid=(B,),
            in_specs=[
                pl.BlockSpec((1, N, C), lambda b, idx_r: (b, 0, 0)),
                pl.BlockSpec((C, cout), lambda b, idx_r: (0, 0)),
                pl.BlockSpec((C, cout), lambda b, idx_r: (0, 0)),
                pl.BlockSpec((1, cout), lambda b, idx_r: (0, 0)),
            ],
            out_specs=tuple(out_specs),
            scratch_shapes=[pltpu.VMEM((N, cout), jnp.float32),   # G
                            pltpu.VMEM((N, cout), jnp.float32)],  # max-over-k
        ),
        compiler_params=pltpu.CompilerParams(
            dimension_semantics=("parallel",)),
    )(idx_flat, x, w_top, w_delta, shift)
    if compute_pd:
        return res[0], res[1]
    return res[0], None


def tail_fused(x1, x2, x3, x4, params):
    """Fused conv5 + pooling + FC chain; grid over batches (>=2 parallel
    blocks for v7x).  Inputs stay bf16; only (B, out_channels) hits HBM."""
    B, N, _ = x1.shape
    s5, sh5 = fold_bn(params["bn5"])
    s6, sh6 = fold_bn(params["bn6"])
    s7, sh7 = fold_bn(params["bn7"])

    # conv5: fold bn5 scale into columns, pad 50 -> 64, split per branch.
    w5 = params["w5"] * s5[None, :]                                 # (1536, 50)
    w5 = jnp.pad(w5, ((0, 0), (0, EMB_PAD - EMB_DIM))).astype(jnp.bfloat16)
    w5a, w5b, w5c, w5d = w5[:256], w5[256:512], w5[512:1024], w5[1024:1536]
    sh5_p = jnp.pad(sh5, (0, EMB_PAD - EMB_DIM)).reshape(1, EMB_PAD)

    # linear1: fold bn6 scale into columns, pad the 50-row branches to 64.
    w6 = params["w_lin1"] * s6[None, :]                             # (100, 256)
    w6a = jnp.pad(w6[:EMB_DIM], ((0, EMB_PAD - EMB_DIM), (0, 0))).astype(jnp.bfloat16)
    w6b = jnp.pad(w6[EMB_DIM:], ((0, EMB_PAD - EMB_DIM), (0, 0))).astype(jnp.bfloat16)
    sh6_p = sh6.reshape(1, -1)

    # linear2 (+bias) folded with bn7.
    w7 = (params["w_lin2"] * s7[None, :]).astype(jnp.bfloat16)
    sh7_eff = (params["b_lin2"] * s7 + sh7).reshape(1, -1)

    w8 = params["w_lin3"].astype(jnp.bfloat16)
    b8 = params["b_lin3"].reshape(1, -1)

    args = [x1, x2, x3, x4, w5a, w5b, w5c, w5d, sh5_p,
            w6a, w6b, sh6_p, w7, sh7_eff, w8, b8]

    def xspec(c):
        return pl.BlockSpec((1, N, c), lambda b: (b, 0, 0))

    def wspec(shape):
        nd = len(shape)
        return pl.BlockSpec(shape, lambda b, _nd=nd: (0,) * _nd)

    in_specs = [xspec(x1.shape[-1]), xspec(x2.shape[-1]),
                xspec(x3.shape[-1]), xspec(x4.shape[-1])]
    in_specs += [wspec(a.shape) for a in args[4:]]

    out = pl.pallas_call(
        _tail_kernel,
        out_shape=jax.ShapeDtypeStruct((B, 1, OUTPUT_CHANNELS), jnp.float32),
        grid_spec=pltpu.PrefetchScalarGridSpec(
            num_scalar_prefetch=0,
            grid=(B,),
            in_specs=in_specs,
            out_specs=pl.BlockSpec((1, 1, OUTPUT_CHANNELS), lambda b: (b, 0, 0)),
        ),
        compiler_params=pltpu.CompilerParams(
            dimension_semantics=("parallel",)),
    )(*args)
    return out.reshape(B, OUTPUT_CHANNELS)


# ---------------------------------------------------------------------------
# JAX glue (embedding lookup, knn top-k, weight folding)
# ---------------------------------------------------------------------------

def fold_bn(bn):
    gamma, beta, mean, var = bn
    scale = gamma * lax.rsqrt(var + BN_EPS)
    shift = beta - mean * scale
    return scale, shift


def edge_block(x, pd, w, bn, *, compute_pd):
    """x: (B, N, C) bf16; pd: (B, N, N) f32 (distances of x, from the previous
    stage).  Returns activation (B, N, cout) bf16 and, optionally, its
    pairwise distance for the next layer."""
    B, N, C = x.shape
    # TODO(synk): top-k stays in plain JAX (no clean dense-tile Pallas top-k).
    idx = lax.top_k(pd, K)[1]                                   # (B, N, K)

    scale, shift = fold_bn(bn)
    cin = w.shape[0] // 2
    w_top = w[:cin] * scale[None, :]                 # multiplies (nbr - center) term
    w_delta = (w[cin:] - w[:cin]) * scale[None, :]   # multiplies the center term
    if cin < C:                                      # layer 1: pad rows 50 -> 64
        w_top = jnp.pad(w_top, ((0, C - cin), (0, 0)))
        w_delta = jnp.pad(w_delta, ((0, C - cin), (0, 0)))

    return edge_conv(x, idx,
                     w_top.astype(jnp.bfloat16),
                     w_delta.astype(jnp.bfloat16),
                     shift.reshape(1, -1).astype(jnp.float32),
                     compute_pd=compute_pd)


def dgcnn_forward(tokens, params):
    B, N = tokens.shape
    # TODO(synk): embedding lookup stays in XLA (data-dependent row gather).
    x = params["embedding"][tokens]                  # (B, N, 64) bf16, zero-padded

    pd = pairwise_distance(x)                        # Pallas, layer-1 knn input

    x1, pd = edge_block(x,  pd, params["w1"], params["bn1"], compute_pd=True)
    x2, pd = edge_block(x1, pd, params["w2"], params["bn2"], compute_pd=True)
    x3, pd = edge_block(x2, pd, params["w3"], params["bn3"], compute_pd=True)
    x4, _  = edge_block(x3, pd, params["w4"], params["bn4"], compute_pd=False)

    return tail_fused(x1, x2, x3, x4, params)        # (B, OUTPUT_CHANNELS)


# ---------------------------------------------------------------------------
# Deterministic parameter construction
# ---------------------------------------------------------------------------

def make_params(key):
    keys = jax.random.split(key, 12)

    def w(k, cin, cout, scale=0.05):
        # stored transposed: (Cin, Cout), so y = x @ w
        return (scale * jax.random.normal(k, (cin, cout))).astype(jnp.float32)

    def bn(c):
        return (jnp.ones((c,), jnp.float32),    # gamma
                jnp.zeros((c,), jnp.float32),   # beta
                jnp.zeros((c,), jnp.float32),   # running_mean
                jnp.ones((c,), jnp.float32))    # running_var

    emb = 0.05 * jax.random.normal(keys[0], (VOCAB, EMB_DIM))
    # Pad channels 50 -> 64 with zeros and store bf16 at construction (review:
    # no separate pad/cast passes; zero pad is inert through dot products).
    emb = jnp.pad(emb, ((0, 0), (0, EMB_PAD - EMB_DIM))).astype(jnp.bfloat16)

    params = {
        "embedding": emb,
        "w1": w(keys[1], 100, 256),
        "w2": w(keys[2], 512, 256),
        "w3": w(keys[3], 512, 512),
        "w4": w(keys[4], 1024, 512),
        "w5": w(keys[5], 1536, 50),
        "w_lin1": w(keys[6], 100, 256),
        "w_lin2": w(keys[7], 256, 128),
        "b_lin2": (0.05 * jax.random.normal(keys[8], (128,))).astype(jnp.float32),
        "w_lin3": w(keys[9], 128, OUTPUT_CHANNELS),
        "b_lin3": (0.05 * jax.random.normal(keys[10], (OUTPUT_CHANNELS,))).astype(jnp.float32),
        "bn1": bn(256), "bn2": bn(256), "bn3": bn(512), "bn4": bn(512),
        "bn5": bn(50), "bn6": bn(256), "bn7": bn(128),
    }
    return params


# ---------------------------------------------------------------------------
# Main
# ---------------------------------------------------------------------------

if __name__ == "__main__":
    key = jax.random.PRNGKey(0)
    pkey, xkey = jax.random.split(key)

    params = make_params(pkey)

    B, N = 2, 32   # batch of 2 point "sentences" with 32 points each (N > k=20)
    tokens = jax.random.randint(xkey, (B, N), 0, VOCAB, dtype=jnp.int32)

    fwd = jax.jit(dgcnn_forward)
    out = jax.block_until_ready(fwd(tokens, params))

    assert out.shape == (B, OUTPUT_CHANNELS), out.shape
    assert bool(jnp.all(jnp.isfinite(out)))
    print("KERNEL_OK")
</pallas_src>

<mosaic_0001>
module attributes {stable_mosaic.version = 11 : i64} {
  func.func @_pairdist_kernel(%arg0: i32, %arg1: memref<2x32x64xbf16, #tpu.memory_space<vmem>>, %arg2: memref<2x32x32xf32, #tpu.memory_space<vmem>>) attributes {dimension_semantics = [#tpu.dimension_semantics<arbitrary>], iteration_bounds = array<i64: 1>, scalar_prefetch = 0 : i64, scratch_operands = 0 : i64, tpu.core_type = #tpu.core_type<tc>, window_params = [{pipeline_mode = #tpu.pipeline_mode<synchronous>, transform_indices = @transform_0, window_bounds = array<i64: 2, 32, 64>}, {pipeline_mode = #tpu.pipeline_mode<synchronous>, transform_indices = @transform_1, window_bounds = array<i64: 2, 32, 32>}]} {
    %c0 = arith.constant 0 : index
    %c0_0 = arith.constant 0 : index
    %c0_1 = arith.constant 0 : index
    %0 = vector.load %arg1[%c0, %c0_0, %c0_1] : memref<2x32x64xbf16, #tpu.memory_space<vmem>>, vector<2x32x64xbf16>
    "tpu.trace_start"() <{level = 10 : i32, message = "bnc,bmc->bnm"}> : () -> ()
    %cst = arith.constant dense<0.000000e+00> : vector<2x32x32xf32>
    %1 = tpu.matmul %0, %0, %cst {dimension_numbers = #tpu.dot_dimension_numbers<[2], [2], [1], [1], [0, 0, 0, 1, 1, 1], [0], [0]>} : vector<2x32x64xbf16>, vector<2x32x64xbf16>, vector<2x32x32xf32> -> vector<2x32x32xf32>
    "tpu.trace_stop"() : () -> ()
    %2 = arith.extf %0 : vector<2x32x64xbf16> to vector<2x32x64xf32>
    %3 = arith.mulf %2, %2 : vector<2x32x64xf32>
    %cst_2 = arith.constant dense<0.000000e+00> : vector<2x32xf32>
    %4 = vector.multi_reduction <add>, %3, %cst_2 [2] : vector<2x32x64xf32> to vector<2x32xf32>
    %cst_3 = arith.constant 2.000000e+00 : f32
    %5 = vector.broadcast %cst_3 : f32 to vector<2x32x32xf32>
    %6 = arith.mulf %5, %1 : vector<2x32x32xf32>
    %7 = vector.shape_cast %4 : vector<2x32xf32> to vector<2x1x32xf32>
    %8 = vector.broadcast %7 : vector<2x1x32xf32> to vector<2x32x32xf32>
    %9 = arith.subf %6, %8 : vector<2x32x32xf32>
    %c0_4 = arith.constant 0 : index
    %c0_5 = arith.constant 0 : index
    %c0_6 = arith.constant 0 : index
    %10 = vector.load %arg2[%c0_4, %c0_5, %c0_6] : memref<2x32x32xf32, #tpu.memory_space<vmem>>, vector<2x32x32xf32>
    tpu.vector_store %arg2[%c0_4, %c0_5, %c0_6], %9 {strides = array<i32>} : memref<2x32x32xf32, #tpu.memory_space<vmem>>, vector<2x32x32xf32>,
    return
  }
  func.func @transform_0(%arg0: i32) -> (i32, i32, i32) {
    %c0_i32 = arith.constant 0 : i32
    %c0_i32_0 = arith.constant 0 : i32
    %c0_i32_1 = arith.constant 0 : i32
    %c0_i32_2 = arith.constant 0 : i32
    return %c0_i32, %c0_i32_0, %c0_i32_1 : i32, i32, i32
  }
  func.func @transform_1(%arg0: i32) -> (i32, i32, i32) {
    %c0_i32 = arith.constant 0 : i32
    %c0_i32_0 = arith.constant 0 : i32
    %c0_i32_1 = arith.constant 0 : i32
    %c0_i32_2 = arith.constant 0 : i32
    return %c0_i32, %c0_i32_0, %c0_i32_1 : i32, i32, i32
  }
}

module attributes {stable_mosaic.version = 11 : i64} {
  func.func @_edge_conv_kernel(%arg0: i32, %arg1: memref<1280xi32, #tpu.memory_space<smem>>, %arg2: memref<1x32x256xbf16, #tpu.memory_space<vmem>>, %arg3: memref<256x256xbf16, #tpu.memory_space<vmem>>, %arg4: memref<256x256xbf16, #tpu.memory_space<vmem>>, %arg5: memref<1x256xf32, #tpu.memory_space<vmem>>, %arg6: memref<1x32x256xbf16, #tpu.memory_space<vmem>>, %arg7: memref<1x32x32xf32, #tpu.memory_space<vmem>>, %arg8: memref<32x256xf32, #tpu.memory_space<vmem>>, %arg9: memref<32x256xf32, #tpu.memory_space<vmem>>) attributes {dimension_semantics = [#tpu.dimension_semantics<parallel>], iteration_bounds = array<i64: 2>, scalar_prefetch = 1 : i64, scratch_operands = 2 : i64, tpu.core_type = #tpu.core_type<tc>, window_params = [{transform_indices = @transform_0, window_bounds = array<i64: 1, 32, 256>}, {pipeline_mode = #tpu.pipeline_mode<synchronous>, transform_indices = @transform_1, window_bounds = array<i64: 256, 256>}, {pipeline_mode = #tpu.pipeline_mode<synchronous>, transform_indices = @transform_2, window_bounds = array<i64: 256, 256>}, {pipeline_mode = #tpu.pipeline_mode<synchronous>, transform_indices = @transform_3, window_bounds = array<i64: 1, 256>}, {transform_indices = @transform_4, window_bounds = array<i64: 1, 32, 256>}, {transform_indices = @transform_5, window_bounds = array<i64: 1, 32, 32>}]} {
    %c0 = arith.constant 0 : index
    %c0_0 = arith.constant 0 : index
    %c0_1 = arith.constant 0 : index
    %0 = vector.load %arg2[%c0, %c0_0, %c0_1] : memref<1x32x256xbf16, #tpu.memory_space<vmem>>, vector<1x32x256xbf16>
    %1 = vector.shape_cast %0 : vector<1x32x256xbf16> to vector<32x256xbf16>
    %c0_2 = arith.constant 0 : index
    %c0_3 = arith.constant 0 : index
    %2 = vector.load %arg3[%c0_2, %c0_3] : memref<256x256xbf16, #tpu.memory_space<vmem>>, vector<256x256xbf16>
    %cst = arith.constant dense<0.000000e+00> : vector<32x256xf32>
    %3 = tpu.matmul %1, %2, %cst {dimension_numbers = #tpu.dot_dimension_numbers<[1], [0], [0], [1], [0, 0, 1, 1], [], []>} : vector<32x256xbf16>, vector<256x256xbf16>, vector<32x256xf32> -> vector<32x256xf32>
    %c0_4 = arith.constant 0 : index
    %c0_5 = arith.constant 0 : index
    %4 = vector.load %arg8[%c0_4, %c0_5] : memref<32x256xf32, #tpu.memory_space<vmem>>, vector<32x256xf32>
    tpu.vector_store %arg8[%c0_4, %c0_5], %3 {strides = array<i32>} : memref<32x256xf32, #tpu.memory_space<vmem>>, vector<32x256xf32>,
    %c0_i32 = arith.constant 0 : i32
    %c32_i32 = arith.constant 32 : i32
    %5 = arith.addi %c0_i32, %c32_i32 : i32
    %c1_i32 = arith.constant 1 : i32
    scf.for %arg10 = %c0_i32 to %5 step %c1_i32  : i32 {
      %c32_i32_24 = arith.constant 32 : i32
      %32 = arith.muli %arg0, %c32_i32_24 : i32
      %33 = arith.addi %32, %arg10 : i32
      %c20_i32 = arith.constant 20 : i32
      %34 = arith.muli %33, %c20_i32 : i32
      %35 = arith.index_cast %34 : i32 to index
      %36 = memref.load %arg1[%35] : memref<1280xi32, #tpu.memory_space<smem>>
      %37 = arith.index_cast %36 : i32 to index
      %c0_25 = arith.constant 0 : index
      %38 = vector.load %arg8[%37, %c0_25] : memref<32x256xf32, #tpu.memory_space<vmem>>, vector<1x256xf32>
      %c1_i32_26 = arith.constant 1 : i32
      %39 = arith.addi %34, %c1_i32_26 : i32
      %40 = arith.index_cast %39 : i32 to index
      %41 = memref.load %arg1[%40] : memref<1280xi32, #tpu.memory_space<smem>>
      %42 = arith.index_cast %41 : i32 to index
      %c0_27 = arith.constant 0 : index
      %43 = vector.load %arg8[%42, %c0_27] : memref<32x256xf32, #tpu.memory_space<vmem>>, vector<1x256xf32>
      %44 = arith.maximumf %38, %43 : vector<1x256xf32>
      %c2_i32 = arith.constant 2 : i32
      %45 = arith.addi %34, %c2_i32 : i32
      %46 = arith.index_cast %45 : i32 to index
      %47 = memref.load %arg1[%46] : memref<1280xi32, #tpu.memory_space<smem>>
      %48 = arith.index_cast %47 : i32 to index
      %c0_28 = arith.constant 0 : index
      %49 = vector.load %arg8[%48, %c0_28] : memref<32x256xf32, #tpu.memory_space<vmem>>, vector<1x256xf32>
      %50 = arith.maximumf %44, %49 : vector<1x256xf32>
      %c3_i32 = arith.constant 3 : i32
      %51 = arith.addi %34, %c3_i32 : i32
      %52 = arith.index_cast %51 : i32 to index
      %53 = memref.load %arg1[%52] : memref<1280xi32, #tpu.memory_space<smem>>
      %54 = arith.index_cast %53 : i32 to index
      %c0_29 = arith.constant 0 : index
      %55 = vector.load %arg8[%54, %c0_29] : memref<32x256xf32, #tpu.memory_space<vmem>>, vector<1x256xf32>
      %56 = arith.maximumf %50, %55 : vector<1x256xf32>
      %c4_i32 = arith.constant 4 : i32
      %57 = arith.addi %34, %c4_i32 : i32
      %58 = arith.index_cast %57 : i32 to index
      %59 = memref.load %arg1[%58] : memref<1280xi32, #tpu.memory_space<smem>>
      %60 = arith.index_cast %59 : i32 to index
      %c0_30 = arith.constant 0 : index
      %61 = vector.load %arg8[%60, %c0_30] : memref<32x256xf32, #tpu.memory_space<vmem>>, vector<1x256xf32>
      %62 = arith.maximumf %56, %61 : vector<1x256xf32>
      %c5_i32 = arith.constant 5 : i32
      %63 = arith.addi %34, %c5_i32 : i32
      %64 = arith.index_cast %63 : i32 to index
      %65 = memref.load %arg1[%64] : memref<1280xi32, #tpu.memory_space<smem>>
      %66 = arith.index_cast %65 : i32 to index
      %c0_31 = arith.constant 0 : index
      %67 = vector.load %arg8[%66, %c0_31] : memref<32x256xf32, #tpu.memory_space<vmem>>, vector<1x256xf32>
      %68 = arith.maximumf %62, %67 : vector<1x256xf32>
      %c6_i32 = arith.constant 6 : i32
      %69 = arith.addi %34, %c6_i32 : i32
      %70 = arith.index_cast %69 : i32 to index
      %71 = memref.load %arg1[%70] : memref<1280xi32, #tpu.memory_space<smem>>
      %72 = arith.index_cast %71 : i32 to index
      %c0_32 = arith.constant 0 : index
      %73 = vector.load %arg8[%72, %c0_32] : memref<32x256xf32, #tpu.memory_space<vmem>>, vector<1x256xf32>
      %74 = arith.maximumf %68, %73 : vector<1x256xf32>
      %c7_i32 = arith.constant 7 : i32
      %75 = arith.addi %34, %c7_i32 : i32
      %76 = arith.index_cast %75 : i32 to index
      %77 = memref.load %arg1[%76] : memref<1280xi32, #tpu.memory_space<smem>>
      %78 = arith.index_cast %77 : i32 to index
      %c0_33 = arith.constant 0 : index
      %79 = vector.load %arg8[%78, %c0_33] : memref<32x256xf32, #tpu.memory_space<vmem>>, vector<1x256xf32>
      %80 = arith.maximumf %74, %79 : vector<1x256xf32>
      %c8_i32 = arith.constant 8 : i32
      %81 = arith.addi %34, %c8_i32 : i32
      %82 = arith.index_cast %81 : i32 to index
      %83 = memref.load %arg1[%82] : memref<1280xi32, #tpu.memory_space<smem>>
      %84 = arith.index_cast %83 : i32 to index
      %c0_34 = arith.constant 0 : index
      %85 = vector.load %arg8[%84, %c0_34] : memref<32x256xf32, #tpu.memory_space<vmem>>, vector<1x256xf32>
      %86 = arith.maximumf %80, %85 : vector<1x256xf32>
      %c9_i32 = arith.constant 9 : i32
      %87 = arith.addi %34, %c9_i32 : i32
      %88 = arith.index_cast %87 : i32 to index
      %89 = memref.load %arg1[%88] : memref<1280xi32, #tpu.memory_space<smem>>
      %90 = arith.index_cast %89 : i32 to index
      %c0_35 = arith.constant 0 : index
      %91 = vector.load %arg8[%90, %c0_35] : memref<32x256xf32, #tpu.memory_space<vmem>>, vector<1x256xf32>
      %92 = arith.maximumf %86, %91 : vector<1x256xf32>
      %c10_i32 = arith.constant 10 : i32
      %93 = arith.addi %34, %c10_i32 : i32
      %94 = arith.index_cast %93 : i32 to index
      %95 = memref.load %arg1[%94] : memref<1280xi32, #tpu.memory_space<smem>>
      %96 = arith.index_cast %95 : i32 to index
      %c0_36 = arith.constant 0 : index
      %97 = vector.load %arg8[%96, %c0_36] : memref<32x256xf32, #tpu.memory_space<vmem>>, vector<1x256xf32>
      %98 = arith.maximumf %92, %97 : vector<1x256xf32>
      %c11_i32 = arith.constant 11 : i32
      %99 = arith.addi %34, %c11_i32 : i32
      %100 = arith.index_cast %99 : i32 to index
      %101 = memref.load %arg1[%100] : memref<1280xi32, #tpu.memory_space<smem>>
      %102 = arith.index_cast %101 : i32 to index
      %c0_37 = arith.constant 0 : index
      %103 = vector.load %arg8[%102, %c0_37] : memref<32x256xf32, #tpu.memory_space<vmem>>, vector<1x256xf32>
      %104 = arith.maximumf %98, %103 : vector<1x256xf32>
      %c12_i32 = arith.constant 12 : i32
      %105 = arith.addi %34, %c12_i32 : i32
      %106 = arith.index_cast %105 : i32 to index
      %107 = memref.load %arg1[%106] : memref<1280xi32, #tpu.memory_space<smem>>
      %108 = arith.index_cast %107 : i32 to index
      %c0_38 = arith.constant 0 : index
      %109 = vector.load %arg8[%108, %c0_38] : memref<32x256xf32, #tpu.memory_space<vmem>>, vector<1x256xf32>
      %110 = arith.maximumf %104, %109 : vector<1x256xf32>
      %c13_i32 = arith.constant 13 : i32
      %111 = arith.addi %34, %c13_i32 : i32
      %112 = arith.index_cast %111 : i32 to index
      %113 = memref.load %arg1[%112] : memref<1280xi32, #tpu.memory_space<smem>>
      %114 = arith.index_cast %113 : i32 to index
      %c0_39 = arith.constant 0 : index
      %115 = vector.load %arg8[%114, %c0_39] : memref<32x256xf32, #tpu.memory_space<vmem>>, vector<1x256xf32>
      %116 = arith.maximumf %110, %115 : vector<1x256xf32>
      %c14_i32 = arith.constant 14 : i32
      %117 = arith.addi %34, %c14_i32 : i32
      %118 = arith.index_cast %117 : i32 to index
      %119 = memref.load %arg1[%118] : memref<1280xi32, #tpu.memory_space<smem>>
      %120 = arith.index_cast %119 : i32 to index
      %c0_40 = arith.constant 0 : index
      %121 = vector.load %arg8[%120, %c0_40] : memref<32x256xf32, #tpu.memory_space<vmem>>, vector<1x256xf32>
      %122 = arith.maximumf %116, %121 : vector<1x256xf32>
      %c15_i32 = arith.constant 15 : i32
      %123 = arith.addi %34, %c15_i32 : i32
      %124 = arith.index_cast %123 : i32 to index
      %125 = memref.load %arg1[%124] : memref<1280xi32, #tpu.memory_space<smem>>
      %126 = arith.index_cast %125 : i32 to index
      %c0_41 = arith.constant 0 : index
      %127 = vector.load %arg8[%126, %c0_41] : memref<32x256xf32, #tpu.memory_space<vmem>>, vector<1x256xf32>
      %128 = arith.maximumf %122, %127 : vector<1x256xf32>
      %c16_i32 = arith.constant 16 : i32
      %129 = arith.addi %34, %c16_i32 : i32
      %130 = arith.index_cast %129 : i32 to index
      %131 = memref.load %arg1[%130] : memref<1280xi32, #tpu.memory_space<smem>>
      %132 = arith.index_cast %131 : i32 to index
      %c0_42 = arith.constant 0 : index
      %133 = vector.load %arg8[%132, %c0_42] : memref<32x256xf32, #tpu.memory_space<vmem>>, vector<1x256xf32>
      %134 = arith.maximumf %128, %133 : vector<1x256xf32>
      %c17_i32 = arith.constant 17 : i32
      %135 = arith.addi %34, %c17_i32 : i32
      %136 = arith.index_cast %135 : i32 to index
      %137 = memref.load %arg1[%136] : memref<1280xi32, #tpu.memory_space<smem>>
      %138 = arith.index_cast %137 : i32 to index
      %c0_43 = arith.constant 0 : index
      %139 = vector.load %arg8[%138, %c0_43] : memref<32x256xf32, #tpu.memory_space<vmem>>, vector<1x256xf32>
      %140 = arith.maximumf %134, %139 : vector<1x256xf32>
      %c18_i32 = arith.constant 18 : i32
      %141 = arith.addi %34, %c18_i32 : i32
      %142 = arith.index_cast %141 : i32 to index
      %143 = memref.load %arg1[%142] : memref<1280xi32, #tpu.memory_space<smem>>
      %144 = arith.index_cast %143 : i32 to index
      %c0_44 = arith.constant 0 : index
      %145 = vector.load %arg8[%144, %c0_44] : memref<32x256xf32, #tpu.memory_space<vmem>>, vector<1x256xf32>
      %146 = arith.maximumf %140, %145 : vector<1x256xf32>
      %c19_i32 = arith.constant 19 : i32
      %147 = arith.addi %34, %c19_i32 : i32
      %148 = arith.index_cast %147 : i32 to index
      %149 = memref.load %arg1[%148] : memref<1280xi32, #tpu.memory_space<smem>>
      %150 = arith.index_cast %149 : i32 to index
      %c0_45 = arith.constant 0 : index
      %151 = vector.load %arg8[%150, %c0_45] : memref<32x256xf32, #tpu.memory_space<vmem>>, vector<1x256xf32>
      %152 = arith.maximumf %146, %151 : vector<1x256xf32>
      %153 = arith.index_cast %arg10 : i32 to index
      %c0_46 = arith.constant 0 : index
      %154 = vector.load %arg9[%153, %c0_46] : memref<32x256xf32, #tpu.memory_space<vmem>>, vector<1x256xf32>
      tpu.vector_store %arg9[%153, %c0_46], %152 {strides = array<i32>} : memref<32x256xf32, #tpu.memory_space<vmem>>, vector<1x256xf32>,
    }
    %c32_i32_6 = arith.constant 32 : i32
    %c0_7 = arith.constant 0 : index
    %c0_8 = arith.constant 0 : index
    %6 = vector.load %arg4[%c0_7, %c0_8] : memref<256x256xbf16, #tpu.memory_space<vmem>>, vector<256x256xbf16>
    %cst_9 = arith.constant dense<0.000000e+00> : vector<32x256xf32>
    %7 = tpu.matmul %1, %6, %cst_9 {dimension_numbers = #tpu.dot_dimension_numbers<[1], [0], [0], [1], [0, 0, 1, 1], [], []>} : vector<32x256xbf16>, vector<256x256xbf16>, vector<32x256xf32> -> vector<32x256xf32>
    %c0_10 = arith.constant 0 : index
    %c0_11 = arith.constant 0 : index
    %8 = vector.load %arg9[%c0_10, %c0_11] : memref<32x256xf32, #tpu.memory_space<vmem>>, vector<32x256xf32>
    %9 = arith.addf %8, %7 : vector<32x256xf32>
    %c0_12 = arith.constant 0 : index
    %c0_13 = arith.constant 0 : index
    %10 = vector.load %arg5[%c0_12, %c0_13] : memref<1x256xf32, #tpu.memory_space<vmem>>, vector<1x256xf32>
    %11 = vector.broadcast %10 : vector<1x256xf32> to vector<32x256xf32>
    %12 = arith.addf %9, %11 : vector<32x256xf32>
    %cst_14 = arith.constant 2.000000e-01 : f32
    %13 = vector.broadcast %cst_14 : f32 to vector<32x256xf32>
    %14 = arith.mulf %13, %12 : vector<32x256xf32>
    %15 = arith.maximumf %12, %14 : vector<32x256xf32>
    %16 = arith.truncf %15 : vector<32x256xf32> to vector<32x256xbf16>
    %c0_15 = arith.constant 0 : index
    %c0_16 = arith.constant 0 : index
    %c0_17 = arith.constant 0 : index
    %17 = vector.load %arg6[%c0_15, %c0_16, %c0_17] : memref<1x32x256xbf16, #tpu.memory_space<vmem>>, vector<1x32x256xbf16>
    %18 = vector.shape_cast %17 : vector<1x32x256xbf16> to vector<32x256xbf16>
    %19 = vector.shape_cast %16 : vector<32x256xbf16> to vector<1x32x256xbf16>
    tpu.vector_store %arg6[%c0_15, %c0_16, %c0_17], %19 {strides = array<i32>} : memref<1x32x256xbf16, #tpu.memory_space<vmem>>, vector<1x32x256xbf16>,
    %cst_18 = arith.constant dense<0.000000e+00> : vector<32x32xf32>
    %20 = tpu.matmul %16, %16, %cst_18 {dimension_numbers = #tpu.dot_dimension_numbers<[1], [1], [0], [0], [0, 0, 1, 0], [], []>} : vector<32x256xbf16>, vector<32x256xbf16>, vector<32x32xf32> -> vector<32x32xf32>
    %21 = arith.extf %16 : vector<32x256xbf16> to vector<32x256xf32>
    %22 = arith.mulf %21, %21 : vector<32x256xf32>
    %cst_19 = arith.constant dense<0.000000e+00> : vector<32xf32>
    %23 = vector.multi_reduction <add>, %22, %cst_19 [1] : vector<32x256xf32> to vector<32xf32>
    %cst_20 = arith.constant 2.000000e+00 : f32
    %24 = vector.broadcast %cst_20 : f32 to vector<32x32xf32>
    %25 = arith.mulf %24, %20 : vector<32x32xf32>
    %26 = vector.shape_cast %23 : vector<32xf32> to vector<1x32xf32>
    %27 = vector.broadcast %26 : vector<1x32xf32> to vector<32x32xf32>
    %28 = arith.subf %25, %27 : vector<32x32xf32>
    %c0_21 = arith.constant 0 : index
    %c0_22 = arith.constant 0 : index
    %c0_23 = arith.constant 0 : index
    %29 = vector.load %arg7[%c0_21, %c0_22, %c0_23] : memref<1x32x32xf32, #tpu.memory_space<vmem>>, vector<1x32x32xf32>
    %30 = vector.shape_cast %29 : vector<1x32x32xf32> to vector<32x32xf32>
    %31 = vector.shape_cast %28 : vector<32x32xf32> to vector<1x32x32xf32>
    tpu.vector_store %arg7[%c0_21, %c0_22, %c0_23], %31 {strides = array<i32>} : memref<1x32x32xf32, #tpu.memory_space<vmem>>, vector<1x32x32xf32>,
    return
  }
  func.func @transform_0(%arg0: i32, %arg1: memref<1280xi32, #tpu.memory_space<smem>>) -> (i32, i32, i32) {
    %c0_i32 = arith.constant 0 : i32
    %c0_i32_0 = arith.constant 0 : i32
    %c0_i32_1 = arith.constant 0 : i32
    return %arg0, %c0_i32, %c0_i32_0 : i32, i32, i32
  }
  func.func @transform_1(%arg0: i32, %arg1: memref<1280xi32, #tpu.memory_space<smem>>) -> (i32, i32) {
    %c0_i32 = arith.constant 0 : i32
    %c0_i32_0 = arith.constant 0 : i32
    %c0_i32_1 = arith.constant 0 : i32
    return %c0_i32, %c0_i32_0 : i32, i32
  }
  func.func @transform_2(%arg0: i32, %arg1: memref<1280xi32, #tpu.memory_space<smem>>) -> (i32, i32) {
    %c0_i32 = arith.constant 0 : i32
    %c0_i32_0 = arith.constant 0 : i32
    %c0_i32_1 = arith.constant 0 : i32
    return %c0_i32, %c0_i32_0 : i32, i32
  }
  func.func @transform_3(%arg0: i32, %arg1: memref<1280xi32, #tpu.memory_space<smem>>) -> (i32, i32) {
    %c0_i32 = arith.constant 0 : i32
    %c0_i32_0 = arith.constant 0 : i32
    %c0_i32_1 = arith.constant 0 : i32
    return %c0_i32, %c0_i32_0 : i32, i32
  }
  func.func @transform_4(%arg0: i32, %arg1: memref<1280xi32, #tpu.memory_space<smem>>) -> (i32, i32, i32) {
    %c0_i32 = arith.constant 0 : i32
    %c0_i32_0 = arith.constant 0 : i32
    %c0_i32_1 = arith.constant 0 : i32
    return %arg0, %c0_i32, %c0_i32_0 : i32, i32, i32
  }
  func.func @transform_5(%arg0: i32, %arg1: memref<1280xi32, #tpu.memory_space<smem>>) -> (i32, i32, i32) {
    %c0_i32 = arith.constant 0 : i32
    %c0_i32_0 = arith.constant 0 : i32
    %c0_i32_1 = arith.constant 0 : i32
    return %arg0, %c0_i32, %c0_i32_0 : i32, i32, i32
  }
}

module attributes {stable_mosaic.version = 11 : i64} {
  func.func @_edge_conv_kernel(%arg0: i32, %arg1: memref<1280xi32, #tpu.memory_space<smem>>, %arg2: memref<1x32x64xbf16, #tpu.memory_space<vmem>>, %arg3: memref<64x256xbf16, #tpu.memory_space<vmem>>, %arg4: memref<64x256xbf16, #tpu.memory_space<vmem>>, %arg5: memref<1x256xf32, #tpu.memory_space<vmem>>, %arg6: memref<1x32x256xbf16, #tpu.memory_space<vmem>>, %arg7: memref<1x32x32xf32, #tpu.memory_space<vmem>>, %arg8: memref<32x256xf32, #tpu.memory_space<vmem>>, %arg9: memref<32x256xf32, #tpu.memory_space<vmem>>) attributes {dimension_semantics = [#tpu.dimension_semantics<parallel>], iteration_bounds = array<i64: 2>, scalar_prefetch = 1 : i64, scratch_operands = 2 : i64, tpu.core_type = #tpu.core_type<tc>, window_params = [{transform_indices = @transform_0, window_bounds = array<i64: 1, 32, 64>}, {pipeline_mode = #tpu.pipeline_mode<synchronous>, transform_indices = @transform_1, window_bounds = array<i64: 64, 256>}, {pipeline_mode = #tpu.pipeline_mode<synchronous>, transform_indices = @transform_2, window_bounds = array<i64: 64, 256>}, {pipeline_mode = #tpu.pipeline_mode<synchronous>, transform_indices = @transform_3, window_bounds = array<i64: 1, 256>}, {transform_indices = @transform_4, window_bounds = array<i64: 1, 32, 256>}, {transform_indices = @transform_5, window_bounds = array<i64: 1, 32, 32>}]} {
    %c0 = arith.constant 0 : index
    %c0_0 = arith.constant 0 : index
    %c0_1 = arith.constant 0 : index
    %0 = vector.load %arg2[%c0, %c0_0, %c0_1] : memref<1x32x64xbf16, #tpu.memory_space<vmem>>, vector<1x32x64xbf16>
    %1 = vector.shape_cast %0 : vector<1x32x64xbf16> to vector<32x64xbf16>
    %c0_2 = arith.constant 0 : index
    %c0_3 = arith.constant 0 : index
    %2 = vector.load %arg3[%c0_2, %c0_3] : memref<64x256xbf16, #tpu.memory_space<vmem>>, vector<64x256xbf16>
    %cst = arith.constant dense<0.000000e+00> : vector<32x256xf32>
    %3 = tpu.matmul %1, %2, %cst {dimension_numbers = #tpu.dot_dimension_numbers<[1], [0], [0], [1], [0, 0, 1, 1], [], []>} : vector<32x64xbf16>, vector<64x256xbf16>, vector<32x256xf32> -> vector<32x256xf32>
    %c0_4 = arith.constant 0 : index
    %c0_5 = arith.constant 0 : index
    %4 = vector.load %arg8[%c0_4, %c0_5] : memref<32x256xf32, #tpu.memory_space<vmem>>, vector<32x256xf32>
    tpu.vector_store %arg8[%c0_4, %c0_5], %3 {strides = array<i32>} : memref<32x256xf32, #tpu.memory_space<vmem>>, vector<32x256xf32>,
    %c0_i32 = arith.constant 0 : i32
    %c32_i32 = arith.constant 32 : i32
    %5 = arith.addi %c0_i32, %c32_i32 : i32
    %c1_i32 = arith.constant 1 : i32
    scf.for %arg10 = %c0_i32 to %5 step %c1_i32  : i32 {
      %c32_i32_24 = arith.constant 32 : i32
      %32 = arith.muli %arg0, %c32_i32_24 : i32
      %33 = arith.addi %32, %arg10 : i32
      %c20_i32 = arith.constant 20 : i32
      %34 = arith.muli %33, %c20_i32 : i32
      %35 = arith.index_cast %34 : i32 to index
      %36 = memref.load %arg1[%35] : memref<1280xi32, #tpu.memory_space<smem>>
      %37 = arith.index_cast %36 : i32 to index
      %c0_25 = arith.constant 0 : index
      %38 = vector.load %arg8[%37, %c0_25] : memref<32x256xf32, #tpu.memory_space<vmem>>, vector<1x256xf32>
      %c1_i32_26 = arith.constant 1 : i32
      %39 = arith.addi %34, %c1_i32_26 : i32
      %40 = arith.index_cast %39 : i32 to index
      %41 = memref.load %arg1[%40] : memref<1280xi32, #tpu.memory_space<smem>>
      %42 = arith.index_cast %41 : i32 to index
      %c0_27 = arith.constant 0 : index
      %43 = vector.load %arg8[%42, %c0_27] : memref<32x256xf32, #tpu.memory_space<vmem>>, vector<1x256xf32>
      %44 = arith.maximumf %38, %43 : vector<1x256xf32>
      %c2_i32 = arith.constant 2 : i32
      %45 = arith.addi %34, %c2_i32 : i32
      %46 = arith.index_cast %45 : i32 to index
      %47 = memref.load %arg1[%46] : memref<1280xi32, #tpu.memory_space<smem>>
      %48 = arith.index_cast %47 : i32 to index
      %c0_28 = arith.constant 0 : index
      %49 = vector.load %arg8[%48, %c0_28] : memref<32x256xf32, #tpu.memory_space<vmem>>, vector<1x256xf32>
      %50 = arith.maximumf %44, %49 : vector<1x256xf32>
      %c3_i32 = arith.constant 3 : i32
      %51 = arith.addi %34, %c3_i32 : i32
      %52 = arith.index_cast %51 : i32 to index
      %53 = memref.load %arg1[%52] : memref<1280xi32, #tpu.memory_space<smem>>
      %54 = arith.index_cast %53 : i32 to index
      %c0_29 = arith.constant 0 : index
      %55 = vector.load %arg8[%54, %c0_29] : memref<32x256xf32, #tpu.memory_space<vmem>>, vector<1x256xf32>
      %56 = arith.maximumf %50, %55 : vector<1x256xf32>
      %c4_i32 = arith.constant 4 : i32
      %57 = arith.addi %34, %c4_i32 : i32
      %58 = arith.index_cast %57 : i32 to index
      %59 = memref.load %arg1[%58] : memref<1280xi32, #tpu.memory_space<smem>>
      %60 = arith.index_cast %59 : i32 to index
      %c0_30 = arith.constant 0 : index
      %61 = vector.load %arg8[%60, %c0_30] : memref<32x256xf32, #tpu.memory_space<vmem>>, vector<1x256xf32>
      %62 = arith.maximumf %56, %61 : vector<1x256xf32>
      %c5_i32 = arith.constant 5 : i32
      %63 = arith.addi %34, %c5_i32 : i32
      %64 = arith.index_cast %63 : i32 to index
      %65 = memref.load %arg1[%64] : memref<1280xi32, #tpu.memory_space<smem>>
      %66 = arith.index_cast %65 : i32 to index
      %c0_31 = arith.constant 0 : index
      %67 = vector.load %arg8[%66, %c0_31] : memref<32x256xf32, #tpu.memory_space<vmem>>, vector<1x256xf32>
      %68 = arith.maximumf %62, %67 : vector<1x256xf32>
      %c6_i32 = arith.constant 6 : i32
      %69 = arith.addi %34, %c6_i32 : i32
      %70 = arith.index_cast %69 : i32 to index
      %71 = memref.load %arg1[%70] : memref<1280xi32, #tpu.memory_space<smem>>
      %72 = arith.index_cast %71 : i32 to index
      %c0_32 = arith.constant 0 : index
      %73 = vector.load %arg8[%72, %c0_32] : memref<32x256xf32, #tpu.memory_space<vmem>>, vector<1x256xf32>
      %74 = arith.maximumf %68, %73 : vector<1x256xf32>
      %c7_i32 = arith.constant 7 : i32
      %75 = arith.addi %34, %c7_i32 : i32
      %76 = arith.index_cast %75 : i32 to index
      %77 = memref.load %arg1[%76] : memref<1280xi32, #tpu.memory_space<smem>>
      %78 = arith.index_cast %77 : i32 to index
      %c0_33 = arith.constant 0 : index
      %79 = vector.load %arg8[%78, %c0_33] : memref<32x256xf32, #tpu.memory_space<vmem>>, vector<1x256xf32>
      %80 = arith.maximumf %74, %79 : vector<1x256xf32>
      %c8_i32 = arith.constant 8 : i32
      %81 = arith.addi %34, %c8_i32 : i32
      %82 = arith.index_cast %81 : i32 to index
      %83 = memref.load %arg1[%82] : memref<1280xi32, #tpu.memory_space<smem>>
      %84 = arith.index_cast %83 : i32 to index
      %c0_34 = arith.constant 0 : index
      %85 = vector.load %arg8[%84, %c0_34] : memref<32x256xf32, #tpu.memory_space<vmem>>, vector<1x256xf32>
      %86 = arith.maximumf %80, %85 : vector<1x256xf32>
      %c9_i32 = arith.constant 9 : i32
      %87 = arith.addi %34, %c9_i32 : i32
      %88 = arith.index_cast %87 : i32 to index
      %89 = memref.load %arg1[%88] : memref<1280xi32, #tpu.memory_space<smem>>
      %90 = arith.index_cast %89 : i32 to index
      %c0_35 = arith.constant 0 : index
      %91 = vector.load %arg8[%90, %c0_35] : memref<32x256xf32, #tpu.memory_space<vmem>>, vector<1x256xf32>
      %92 = arith.maximumf %86, %91 : vector<1x256xf32>
      %c10_i32 = arith.constant 10 : i32
      %93 = arith.addi %34, %c10_i32 : i32
      %94 = arith.index_cast %93 : i32 to index
      %95 = memref.load %arg1[%94] : memref<1280xi32, #tpu.memory_space<smem>>
      %96 = arith.index_cast %95 : i32 to index
      %c0_36 = arith.constant 0 : index
      %97 = vector.load %arg8[%96, %c0_36] : memref<32x256xf32, #tpu.memory_space<vmem>>, vector<1x256xf32>
      %98 = arith.maximumf %92, %97 : vector<1x256xf32>
      %c11_i32 = arith.constant 11 : i32
      %99 = arith.addi %34, %c11_i32 : i32
      %100 = arith.index_cast %99 : i32 to index
      %101 = memref.load %arg1[%100] : memref<1280xi32, #tpu.memory_space<smem>>
      %102 = arith.index_cast %101 : i32 to index
      %c0_37 = arith.constant 0 : index
      %103 = vector.load %arg8[%102, %c0_37] : memref<32x256xf32, #tpu.memory_space<vmem>>, vector<1x256xf32>
      %104 = arith.maximumf %98, %103 : vector<1x256xf32>
      %c12_i32 = arith.constant 12 : i32
      %105 = arith.addi %34, %c12_i32 : i32
      %106 = arith.index_cast %105 : i32 to index
      %107 = memref.load %arg1[%106] : memref<1280xi32, #tpu.memory_space<smem>>
      %108 = arith.index_cast %107 : i32 to index
      %c0_38 = arith.constant 0 : index
      %109 = vector.load %arg8[%108, %c0_38] : memref<32x256xf32, #tpu.memory_space<vmem>>, vector<1x256xf32>
      %110 = arith.maximumf %104, %109 : vector<1x256xf32>
      %c13_i32 = arith.constant 13 : i32
      %111 = arith.addi %34, %c13_i32 : i32
      %112 = arith.index_cast %111 : i32 to index
      %113 = memref.load %arg1[%112] : memref<1280xi32, #tpu.memory_space<smem>>
      %114 = arith.index_cast %113 : i32 to index
      %c0_39 = arith.constant 0 : index
      %115 = vector.load %arg8[%114, %c0_39] : memref<32x256xf32, #tpu.memory_space<vmem>>, vector<1x256xf32>
      %116 = arith.maximumf %110, %115 : vector<1x256xf32>
      %c14_i32 = arith.constant 14 : i32
      %117 = arith.addi %34, %c14_i32 : i32
      %118 = arith.index_cast %117 : i32 to index
      %119 = memref.load %arg1[%118] : memref<1280xi32, #tpu.memory_space<smem>>
      %120 = arith.index_cast %119 : i32 to index
      %c0_40 = arith.constant 0 : index
      %121 = vector.load %arg8[%120, %c0_40] : memref<32x256xf32, #tpu.memory_space<vmem>>, vector<1x256xf32>
      %122 = arith.maximumf %116, %121 : vector<1x256xf32>
      %c15_i32 = arith.constant 15 : i32
      %123 = arith.addi %34, %c15_i32 : i32
      %124 = arith.index_cast %123 : i32 to index
      %125 = memref.load %arg1[%124] : memref<1280xi32, #tpu.memory_space<smem>>
      %126 = arith.index_cast %125 : i32 to index
      %c0_41 = arith.constant 0 : index
      %127 = vector.load %arg8[%126, %c0_41] : memref<32x256xf32, #tpu.memory_space<vmem>>, vector<1x256xf32>
      %128 = arith.maximumf %122, %127 : vector<1x256xf32>
      %c16_i32 = arith.constant 16 : i32
      %129 = arith.addi %34, %c16_i32 : i32
      %130 = arith.index_cast %129 : i32 to index
      %131 = memref.load %arg1[%130] : memref<1280xi32, #tpu.memory_space<smem>>
      %132 = arith.index_cast %131 : i32 to index
      %c0_42 = arith.constant 0 : index
      %133 = vector.load %arg8[%132, %c0_42] : memref<32x256xf32, #tpu.memory_space<vmem>>, vector<1x256xf32>
      %134 = arith.maximumf %128, %133 : vector<1x256xf32>
      %c17_i32 = arith.constant 17 : i32
      %135 = arith.addi %34, %c17_i32 : i32
      %136 = arith.index_cast %135 : i32 to index
      %137 = memref.load %arg1[%136] : memref<1280xi32, #tpu.memory_space<smem>>
      %138 = arith.index_cast %137 : i32 to index
      %c0_43 = arith.constant 0 : index
      %139 = vector.load %arg8[%138, %c0_43] : memref<32x256xf32, #tpu.memory_space<vmem>>, vector<1x256xf32>
      %140 = arith.maximumf %134, %139 : vector<1x256xf32>
      %c18_i32 = arith.constant 18 : i32
      %141 = arith.addi %34, %c18_i32 : i32
      %142 = arith.index_cast %141 : i32 to index
      %143 = memref.load %arg1[%142] : memref<1280xi32, #tpu.memory_space<smem>>
      %144 = arith.index_cast %143 : i32 to index
      %c0_44 = arith.constant 0 : index
      %145 = vector.load %arg8[%144, %c0_44] : memref<32x256xf32, #tpu.memory_space<vmem>>, vector<1x256xf32>
      %146 = arith.maximumf %140, %145 : vector<1x256xf32>
      %c19_i32 = arith.constant 19 : i32
      %147 = arith.addi %34, %c19_i32 : i32
      %148 = arith.index_cast %147 : i32 to index
      %149 = memref.load %arg1[%148] : memref<1280xi32, #tpu.memory_space<smem>>
      %150 = arith.index_cast %149 : i32 to index
      %c0_45 = arith.constant 0 : index
      %151 = vector.load %arg8[%150, %c0_45] : memref<32x256xf32, #tpu.memory_space<vmem>>, vector<1x256xf32>
      %152 = arith.maximumf %146, %151 : vector<1x256xf32>
      %153 = arith.index_cast %arg10 : i32 to index
      %c0_46 = arith.constant 0 : index
      %154 = vector.load %arg9[%153, %c0_46] : memref<32x256xf32, #tpu.memory_space<vmem>>, vector<1x256xf32>
      tpu.vector_store %arg9[%153, %c0_46], %152 {strides = array<i32>} : memref<32x256xf32, #tpu.memory_space<vmem>>, vector<1x256xf32>,
    }
    %c32_i32_6 = arith.constant 32 : i32
    %c0_7 = arith.constant 0 : index
    %c0_8 = arith.constant 0 : index
    %6 = vector.load %arg4[%c0_7, %c0_8] : memref<64x256xbf16, #tpu.memory_space<vmem>>, vector<64x256xbf16>
    %cst_9 = arith.constant dense<0.000000e+00> : vector<32x256xf32>
    %7 = tpu.matmul %1, %6, %cst_9 {dimension_numbers = #tpu.dot_dimension_numbers<[1], [0], [0], [1], [0, 0, 1, 1], [], []>} : vector<32x64xbf16>, vector<64x256xbf16>, vector<32x256xf32> -> vector<32x256xf32>
    %c0_10 = arith.constant 0 : index
    %c0_11 = arith.constant 0 : index
    %8 = vector.load %arg9[%c0_10, %c0_11] : memref<32x256xf32, #tpu.memory_space<vmem>>, vector<32x256xf32>
    %9 = arith.addf %8, %7 : vector<32x256xf32>
    %c0_12 = arith.constant 0 : index
    %c0_13 = arith.constant 0 : index
    %10 = vector.load %arg5[%c0_12, %c0_13] : memref<1x256xf32, #tpu.memory_space<vmem>>, vector<1x256xf32>
    %11 = vector.broadcast %10 : vector<1x256xf32> to vector<32x256xf32>
    %12 = arith.addf %9, %11 : vector<32x256xf32>
    %cst_14 = arith.constant 2.000000e-01 : f32
    %13 = vector.broadcast %cst_14 : f32 to vector<32x256xf32>
    %14 = arith.mulf %13, %12 : vector<32x256xf32>
    %15 = arith.maximumf %12, %14 : vector<32x256xf32>
    %16 = arith.truncf %15 : vector<32x256xf32> to vector<32x256xbf16>
    %c0_15 = arith.constant 0 : index
    %c0_16 = arith.constant 0 : index
    %c0_17 = arith.constant 0 : index
    %17 = vector.load %arg6[%c0_15, %c0_16, %c0_17] : memref<1x32x256xbf16, #tpu.memory_space<vmem>>, vector<1x32x256xbf16>
    %18 = vector.shape_cast %17 : vector<1x32x256xbf16> to vector<32x256xbf16>
    %19 = vector.shape_cast %16 : vector<32x256xbf16> to vector<1x32x256xbf16>
    tpu.vector_store %arg6[%c0_15, %c0_16, %c0_17], %19 {strides = array<i32>} : memref<1x32x256xbf16, #tpu.memory_space<vmem>>, vector<1x32x256xbf16>,
    %cst_18 = arith.constant dense<0.000000e+00> : vector<32x32xf32>
    %20 = tpu.matmul %16, %16, %cst_18 {dimension_numbers = #tpu.dot_dimension_numbers<[1], [1], [0], [0], [0, 0, 1, 0], [], []>} : vector<32x256xbf16>, vector<32x256xbf16>, vector<32x32xf32> -> vector<32x32xf32>
    %21 = arith.extf %16 : vector<32x256xbf16> to vector<32x256xf32>
    %22 = arith.mulf %21, %21 : vector<32x256xf32>
    %cst_19 = arith.constant dense<0.000000e+00> : vector<32xf32>
    %23 = vector.multi_reduction <add>, %22, %cst_19 [1] : vector<32x256xf32> to vector<32xf32>
    %cst_20 = arith.constant 2.000000e+00 : f32
    %24 = vector.broadcast %cst_20 : f32 to vector<32x32xf32>
    %25 = arith.mulf %24, %20 : vector<32x32xf32>
    %26 = vector.shape_cast %23 : vector<32xf32> to vector<1x32xf32>
    %27 = vector.broadcast %26 : vector<1x32xf32> to vector<32x32xf32>
    %28 = arith.subf %25, %27 : vector<32x32xf32>
    %c0_21 = arith.constant 0 : index
    %c0_22 = arith.constant 0 : index
    %c0_23 = arith.constant 0 : index
    %29 = vector.load %arg7[%c0_21, %c0_22, %c0_23] : memref<1x32x32xf32, #tpu.memory_space<vmem>>, vector<1x32x32xf32>
    %30 = vector.shape_cast %29 : vector<1x32x32xf32> to vector<32x32xf32>
    %31 = vector.shape_cast %28 : vector<32x32xf32> to vector<1x32x32xf32>
    tpu.vector_store %arg7[%c0_21, %c0_22, %c0_23], %31 {strides = array<i32>} : memref<1x32x32xf32, #tpu.memory_space<vmem>>, vector<1x32x32xf32>,
    return
  }
  func.func @transform_0(%arg0: i32, %arg1: memref<1280xi32, #tpu.memory_space<smem>>) -> (i32, i32, i32) {
    %c0_i32 = arith.constant 0 : i32
    %c0_i32_0 = arith.constant 0 : i32
    %c0_i32_1 = arith.constant 0 : i32
    return %arg0, %c0_i32, %c0_i32_0 : i32, i32, i32
  }
  func.func @transform_1(%arg0: i32, %arg1: memref<1280xi32, #tpu.memory_space<smem>>) -> (i32, i32) {
    %c0_i32 = arith.constant 0 : i32
    %c0_i32_0 = arith.constant 0 : i32
    %c0_i32_1 = arith.constant 0 : i32
    return %c0_i32, %c0_i32_0 : i32, i32
  }
  func.func @transform_2(%arg0: i32, %arg1: memref<1280xi32, #tpu.memory_space<smem>>) -> (i32, i32) {
    %c0_i32 = arith.constant 0 : i32
    %c0_i32_0 = arith.constant 0 : i32
    %c0_i32_1 = arith.constant 0 : i32
    return %c0_i32, %c0_i32_0 : i32, i32
  }
  func.func @transform_3(%arg0: i32, %arg1: memref<1280xi32, #tpu.memory_space<smem>>) -> (i32, i32) {
    %c0_i32 = arith.constant 0 : i32
    %c0_i32_0 = arith.constant 0 : i32
    %c0_i32_1 = arith.constant 0 : i32
    return %c0_i32, %c0_i32_0 : i32, i32
  }
  func.func @transform_4(%arg0: i32, %arg1: memref<1280xi32, #tpu.memory_space<smem>>) -> (i32, i32, i32) {
    %c0_i32 = arith.constant 0 : i32
    %c0_i32_0 = arith.constant 0 : i32
    %c0_i32_1 = arith.constant 0 : i32
    return %arg0, %c0_i32, %c0_i32_0 : i32, i32, i32
  }
  func.func @transform_5(%arg0: i32, %arg1: memref<1280xi32, #tpu.memory_space<smem>>) -> (i32, i32, i32) {
    %c0_i32 = arith.constant 0 : i32
    %c0_i32_0 = arith.constant 0 : i32
    %c0_i32_1 = arith.constant 0 : i32
    return %arg0, %c0_i32, %c0_i32_0 : i32, i32, i32
  }
}

module attributes {stable_mosaic.version = 11 : i64} {
  func.func @_edge_conv_kernel(%arg0: i32, %arg1: memref<1280xi32, #tpu.memory_space<smem>>, %arg2: memref<1x32x256xbf16, #tpu.memory_space<vmem>>, %arg3: memref<256x512xbf16, #tpu.memory_space<vmem>>, %arg4: memref<256x512xbf16, #tpu.memory_space<vmem>>, %arg5: memref<1x512xf32, #tpu.memory_space<vmem>>, %arg6: memref<1x32x512xbf16, #tpu.memory_space<vmem>>, %arg7: memref<1x32x32xf32, #tpu.memory_space<vmem>>, %arg8: memref<32x512xf32, #tpu.memory_space<vmem>>, %arg9: memref<32x512xf32, #tpu.memory_space<vmem>>) attributes {dimension_semantics = [#tpu.dimension_semantics<parallel>], iteration_bounds = array<i64: 2>, scalar_prefetch = 1 : i64, scratch_operands = 2 : i64, tpu.core_type = #tpu.core_type<tc>, window_params = [{transform_indices = @transform_0, window_bounds = array<i64: 1, 32, 256>}, {pipeline_mode = #tpu.pipeline_mode<synchronous>, transform_indices = @transform_1, window_bounds = array<i64: 256, 512>}, {pipeline_mode = #tpu.pipeline_mode<synchronous>, transform_indices = @transform_2, window_bounds = array<i64: 256, 512>}, {pipeline_mode = #tpu.pipeline_mode<synchronous>, transform_indices = @transform_3, window_bounds = array<i64: 1, 512>}, {transform_indices = @transform_4, window_bounds = array<i64: 1, 32, 512>}, {transform_indices = @transform_5, window_bounds = array<i64: 1, 32, 32>}]} {
    %c0 = arith.constant 0 : index
    %c0_0 = arith.constant 0 : index
    %c0_1 = arith.constant 0 : index
    %0 = vector.load %arg2[%c0, %c0_0, %c0_1] : memref<1x32x256xbf16, #tpu.memory_space<vmem>>, vector<1x32x256xbf16>
    %1 = vector.shape_cast %0 : vector<1x32x256xbf16> to vector<32x256xbf16>
    %c0_2 = arith.constant 0 : index
    %c0_3 = arith.constant 0 : index
    %2 = vector.load %arg3[%c0_2, %c0_3] : memref<256x512xbf16, #tpu.memory_space<vmem>>, vector<256x512xbf16>
    %cst = arith.constant dense<0.000000e+00> : vector<32x512xf32>
    %3 = tpu.matmul %1, %2, %cst {dimension_numbers = #tpu.dot_dimension_numbers<[1], [0], [0], [1], [0, 0, 1, 1], [], []>} : vector<32x256xbf16>, vector<256x512xbf16>, vector<32x512xf32> -> vector<32x512xf32>
    %c0_4 = arith.constant 0 : index
    %c0_5 = arith.constant 0 : index
    %4 = vector.load %arg8[%c0_4, %c0_5] : memref<32x512xf32, #tpu.memory_space<vmem>>, vector<32x512xf32>
    tpu.vector_store %arg8[%c0_4, %c0_5], %3 {strides = array<i32>} : memref<32x512xf32, #tpu.memory_space<vmem>>, vector<32x512xf32>,
    %c0_i32 = arith.constant 0 : i32
    %c32_i32 = arith.constant 32 : i32
    %5 = arith.addi %c0_i32, %c32_i32 : i32
    %c1_i32 = arith.constant 1 : i32
    scf.for %arg10 = %c0_i32 to %5 step %c1_i32  : i32 {
      %c32_i32_24 = arith.constant 32 : i32
      %32 = arith.muli %arg0, %c32_i32_24 : i32
      %33 = arith.addi %32, %arg10 : i32
      %c20_i32 = arith.constant 20 : i32
      %34 = arith.muli %33, %c20_i32 : i32
      %35 = arith.index_cast %34 : i32 to index
      %36 = memref.load %arg1[%35] : memref<1280xi32, #tpu.memory_space<smem>>
      %37 = arith.index_cast %36 : i32 to index
      %c0_25 = arith.constant 0 : index
      %38 = vector.load %arg8[%37, %c0_25] : memref<32x512xf32, #tpu.memory_space<vmem>>, vector<1x512xf32>
      %c1_i32_26 = arith.constant 1 : i32
      %39 = arith.addi %34, %c1_i32_26 : i32
      %40 = arith.index_cast %39 : i32 to index
      %41 = memref.load %arg1[%40] : memref<1280xi32, #tpu.memory_space<smem>>
      %42 = arith.index_cast %41 : i32 to index
      %c0_27 = arith.constant 0 : index
      %43 = vector.load %arg8[%42, %c0_27] : memref<32x512xf32, #tpu.memory_space<vmem>>, vector<1x512xf32>
      %44 = arith.maximumf %38, %43 : vector<1x512xf32>
      %c2_i32 = arith.constant 2 : i32
      %45 = arith.addi %34, %c2_i32 : i32
      %46 = arith.index_cast %45 : i32 to index
      %47 = memref.load %arg1[%46] : memref<1280xi32, #tpu.memory_space<smem>>
      %48 = arith.index_cast %47 : i32 to index
      %c0_28 = arith.constant 0 : index
      %49 = vector.load %arg8[%48, %c0_28] : memref<32x512xf32, #tpu.memory_space<vmem>>, vector<1x512xf32>
      %50 = arith.maximumf %44, %49 : vector<1x512xf32>
      %c3_i32 = arith.constant 3 : i32
      %51 = arith.addi %34, %c3_i32 : i32
      %52 = arith.index_cast %51 : i32 to index
      %53 = memref.load %arg1[%52] : memref<1280xi32, #tpu.memory_space<smem>>
      %54 = arith.index_cast %53 : i32 to index
      %c0_29 = arith.constant 0 : index
      %55 = vector.load %arg8[%54, %c0_29] : memref<32x512xf32, #tpu.memory_space<vmem>>, vector<1x512xf32>
      %56 = arith.maximumf %50, %55 : vector<1x512xf32>
      %c4_i32 = arith.constant 4 : i32
      %57 = arith.addi %34, %c4_i32 : i32
      %58 = arith.index_cast %57 : i32 to index
      %59 = memref.load %arg1[%58] : memref<1280xi32, #tpu.memory_space<smem>>
      %60 = arith.index_cast %59 : i32 to index
      %c0_30 = arith.constant 0 : index
      %61 = vector.load %arg8[%60, %c0_30] : memref<32x512xf32, #tpu.memory_space<vmem>>, vector<1x512xf32>
      %62 = arith.maximumf %56, %61 : vector<1x512xf32>
      %c5_i32 = arith.constant 5 : i32
      %63 = arith.addi %34, %c5_i32 : i32
      %64 = arith.index_cast %63 : i32 to index
      %65 = memref.load %arg1[%64] : memref<1280xi32, #tpu.memory_space<smem>>
      %66 = arith.index_cast %65 : i32 to index
      %c0_31 = arith.constant 0 : index
      %67 = vector.load %arg8[%66, %c0_31] : memref<32x512xf32, #tpu.memory_space<vmem>>, vector<1x512xf32>
      %68 = arith.maximumf %62, %67 : vector<1x512xf32>
      %c6_i32 = arith.constant 6 : i32
      %69 = arith.addi %34, %c6_i32 : i32
      %70 = arith.index_cast %69 : i32 to index
      %71 = memref.load %arg1[%70] : memref<1280xi32, #tpu.memory_space<smem>>
      %72 = arith.index_cast %71 : i32 to index
      %c0_32 = arith.constant 0 : index
      %73 = vector.load %arg8[%72, %c0_32] : memref<32x512xf32, #tpu.memory_space<vmem>>, vector<1x512xf32>
      %74 = arith.maximumf %68, %73 : vector<1x512xf32>
      %c7_i32 = arith.constant 7 : i32
      %75 = arith.addi %34, %c7_i32 : i32
      %76 = arith.index_cast %75 : i32 to index
      %77 = memref.load %arg1[%76] : memref<1280xi32, #tpu.memory_space<smem>>
      %78 = arith.index_cast %77 : i32 to index
      %c0_33 = arith.constant 0 : index
      %79 = vector.load %arg8[%78, %c0_33] : memref<32x512xf32, #tpu.memory_space<vmem>>, vector<1x512xf32>
      %80 = arith.maximumf %74, %79 : vector<1x512xf32>
      %c8_i32 = arith.constant 8 : i32
      %81 = arith.addi %34, %c8_i32 : i32
      %82 = arith.index_cast %81 : i32 to index
      %83 = memref.load %arg1[%82] : memref<1280xi32, #tpu.memory_space<smem>>
      %84 = arith.index_cast %83 : i32 to index
      %c0_34 = arith.constant 0 : index
      %85 = vector.load %arg8[%84, %c0_34] : memref<32x512xf32, #tpu.memory_space<vmem>>, vector<1x512xf32>
      %86 = arith.maximumf %80, %85 : vector<1x512xf32>
      %c9_i32 = arith.constant 9 : i32
      %87 = arith.addi %34, %c9_i32 : i32
      %88 = arith.index_cast %87 : i32 to index
      %89 = memref.load %arg1[%88] : memref<1280xi32, #tpu.memory_space<smem>>
      %90 = arith.index_cast %89 : i32 to index
      %c0_35 = arith.constant 0 : index
      %91 = vector.load %arg8[%90, %c0_35] : memref<32x512xf32, #tpu.memory_space<vmem>>, vector<1x512xf32>
      %92 = arith.maximumf %86, %91 : vector<1x512xf32>
      %c10_i32 = arith.constant 10 : i32
      %93 = arith.addi %34, %c10_i32 : i32
      %94 = arith.index_cast %93 : i32 to index
      %95 = memref.load %arg1[%94] : memref<1280xi32, #tpu.memory_space<smem>>
      %96 = arith.index_cast %95 : i32 to index
      %c0_36 = arith.constant 0 : index
      %97 = vector.load %arg8[%96, %c0_36] : memref<32x512xf32, #tpu.memory_space<vmem>>, vector<1x512xf32>
      %98 = arith.maximumf %92, %97 : vector<1x512xf32>
      %c11_i32 = arith.constant 11 : i32
      %99 = arith.addi %34, %c11_i32 : i32
      %100 = arith.index_cast %99 : i32 to index
      %101 = memref.load %arg1[%100] : memref<1280xi32, #tpu.memory_space<smem>>
      %102 = arith.index_cast %101 : i32 to index
      %c0_37 = arith.constant 0 : index
      %103 = vector.load %arg8[%102, %c0_37] : memref<32x512xf32, #tpu.memory_space<vmem>>, vector<1x512xf32>
      %104 = arith.maximumf %98, %103 : vector<1x512xf32>
      %c12_i32 = arith.constant 12 : i32
      %105 = arith.addi %34, %c12_i32 : i32
      %106 = arith.index_cast %105 : i32 to index
      %107 = memref.load %arg1[%106] : memref<1280xi32, #tpu.memory_space<smem>>
      %108 = arith.index_cast %107 : i32 to index
      %c0_38 = arith.constant 0 : index
      %109 = vector.load %arg8[%108, %c0_38] : memref<32x512xf32, #tpu.memory_space<vmem>>, vector<1x512xf32>
      %110 = arith.maximumf %104, %109 : vector<1x512xf32>
      %c13_i32 = arith.constant 13 : i32
      %111 = arith.addi %34, %c13_i32 : i32
      %112 = arith.index_cast %111 : i32 to index
      %113 = memref.load %arg1[%112] : memref<1280xi32, #tpu.memory_space<smem>>
      %114 = arith.index_cast %113 : i32 to index
      %c0_39 = arith.constant 0 : index
      %115 = vector.load %arg8[%114, %c0_39] : memref<32x512xf32, #tpu.memory_space<vmem>>, vector<1x512xf32>
      %116 = arith.maximumf %110, %115 : vector<1x512xf32>
      %c14_i32 = arith.constant 14 : i32
      %117 = arith.addi %34, %c14_i32 : i32
      %118 = arith.index_cast %117 : i32 to index
      %119 = memref.load %arg1[%118] : memref<1280xi32, #tpu.memory_space<smem>>
      %120 = arith.index_cast %119 : i32 to index
      %c0_40 = arith.constant 0 : index
      %121 = vector.load %arg8[%120, %c0_40] : memref<32x512xf32, #tpu.memory_space<vmem>>, vector<1x512xf32>
      %122 = arith.maximumf %116, %121 : vector<1x512xf32>
      %c15_i32 = arith.constant 15 : i32
      %123 = arith.addi %34, %c15_i32 : i32
      %124 = arith.index_cast %123 : i32 to index
      %125 = memref.load %arg1[%124] : memref<1280xi32, #tpu.memory_space<smem>>
      %126 = arith.index_cast %125 : i32 to index
      %c0_41 = arith.constant 0 : index
      %127 = vector.load %arg8[%126, %c0_41] : memref<32x512xf32, #tpu.memory_space<vmem>>, vector<1x512xf32>
      %128 = arith.maximumf %122, %127 : vector<1x512xf32>
      %c16_i32 = arith.constant 16 : i32
      %129 = arith.addi %34, %c16_i32 : i32
      %130 = arith.index_cast %129 : i32 to index
      %131 = memref.load %arg1[%130] : memref<1280xi32, #tpu.memory_space<smem>>
      %132 = arith.index_cast %131 : i32 to index
      %c0_42 = arith.constant 0 : index
      %133 = vector.load %arg8[%132, %c0_42] : memref<32x512xf32, #tpu.memory_space<vmem>>, vector<1x512xf32>
      %134 = arith.maximumf %128, %133 : vector<1x512xf32>
      %c17_i32 = arith.constant 17 : i32
      %135 = arith.addi %34, %c17_i32 : i32
      %136 = arith.index_cast %135 : i32 to index
      %137 = memref.load %arg1[%136] : memref<1280xi32, #tpu.memory_space<smem>>
      %138 = arith.index_cast %137 : i32 to index
      %c0_43 = arith.constant 0 : index
      %139 = vector.load %arg8[%138, %c0_43] : memref<32x512xf32, #tpu.memory_space<vmem>>, vector<1x512xf32>
      %140 = arith.maximumf %134, %139 : vector<1x512xf32>
      %c18_i32 = arith.constant 18 : i32
      %141 = arith.addi %34, %c18_i32 : i32
      %142 = arith.index_cast %141 : i32 to index
      %143 = memref.load %arg1[%142] : memref<1280xi32, #tpu.memory_space<smem>>
      %144 = arith.index_cast %143 : i32 to index
      %c0_44 = arith.constant 0 : index
      %145 = vector.load %arg8[%144, %c0_44] : memref<32x512xf32, #tpu.memory_space<vmem>>, vector<1x512xf32>
      %146 = arith.maximumf %140, %145 : vector<1x512xf32>
      %c19_i32 = arith.constant 19 : i32
      %147 = arith.addi %34, %c19_i32 : i32
      %148 = arith.index_cast %147 : i32 to index
      %149 = memref.load %arg1[%148] : memref<1280xi32, #tpu.memory_space<smem>>
      %150 = arith.index_cast %149 : i32 to index
      %c0_45 = arith.constant 0 : index
      %151 = vector.load %arg8[%150, %c0_45] : memref<32x512xf32, #tpu.memory_space<vmem>>, vector<1x512xf32>
      %152 = arith.maximumf %146, %151 : vector<1x512xf32>
      %153 = arith.index_cast %arg10 : i32 to index
      %c0_46 = arith.constant 0 : index
      %154 = vector.load %arg9[%153, %c0_46] : memref<32x512xf32, #tpu.memory_space<vmem>>, vector<1x512xf32>
      tpu.vector_store %arg9[%153, %c0_46], %152 {strides = array<i32>} : memref<32x512xf32, #tpu.memory_space<vmem>>, vector<1x512xf32>,
    }
    %c32_i32_6 = arith.constant 32 : i32
    %c0_7 = arith.constant 0 : index
    %c0_8 = arith.constant 0 : index
    %6 = vector.load %arg4[%c0_7, %c0_8] : memref<256x512xbf16, #tpu.memory_space<vmem>>, vector<256x512xbf16>
    %cst_9 = arith.constant dense<0.000000e+00> : vector<32x512xf32>
    %7 = tpu.matmul %1, %6, %cst_9 {dimension_numbers = #tpu.dot_dimension_numbers<[1], [0], [0], [1], [0, 0, 1, 1], [], []>} : vector<32x256xbf16>, vector<256x512xbf16>, vector<32x512xf32> -> vector<32x512xf32>
    %c0_10 = arith.constant 0 : index
    %c0_11 = arith.constant 0 : index
    %8 = vector.load %arg9[%c0_10, %c0_11] : memref<32x512xf32, #tpu.memory_space<vmem>>, vector<32x512xf32>
    %9 = arith.addf %8, %7 : vector<32x512xf32>
    %c0_12 = arith.constant 0 : index
    %c0_13 = arith.constant 0 : index
    %10 = vector.load %arg5[%c0_12, %c0_13] : memref<1x512xf32, #tpu.memory_space<vmem>>, vector<1x512xf32>
    %11 = vector.broadcast %10 : vector<1x512xf32> to vector<32x512xf32>
    %12 = arith.addf %9, %11 : vector<32x512xf32>
    %cst_14 = arith.constant 2.000000e-01 : f32
    %13 = vector.broadcast %cst_14 : f32 to vector<32x512xf32>
    %14 = arith.mulf %13, %12 : vector<32x512xf32>
    %15 = arith.maximumf %12, %14 : vector<32x512xf32>
    %16 = arith.truncf %15 : vector<32x512xf32> to vector<32x512xbf16>
    %c0_15 = arith.constant 0 : index
    %c0_16 = arith.constant 0 : index
    %c0_17 = arith.constant 0 : index
    %17 = vector.load %arg6[%c0_15, %c0_16, %c0_17] : memref<1x32x512xbf16, #tpu.memory_space<vmem>>, vector<1x32x512xbf16>
    %18 = vector.shape_cast %17 : vector<1x32x512xbf16> to vector<32x512xbf16>
    %19 = vector.shape_cast %16 : vector<32x512xbf16> to vector<1x32x512xbf16>
    tpu.vector_store %arg6[%c0_15, %c0_16, %c0_17], %19 {strides = array<i32>} : memref<1x32x512xbf16, #tpu.memory_space<vmem>>, vector<1x32x512xbf16>,
    %cst_18 = arith.constant dense<0.000000e+00> : vector<32x32xf32>
    %20 = tpu.matmul %16, %16, %cst_18 {dimension_numbers = #tpu.dot_dimension_numbers<[1], [1], [0], [0], [0, 0, 1, 0], [], []>} : vector<32x512xbf16>, vector<32x512xbf16>, vector<32x32xf32> -> vector<32x32xf32>
    %21 = arith.extf %16 : vector<32x512xbf16> to vector<32x512xf32>
    %22 = arith.mulf %21, %21 : vector<32x512xf32>
    %cst_19 = arith.constant dense<0.000000e+00> : vector<32xf32>
    %23 = vector.multi_reduction <add>, %22, %cst_19 [1] : vector<32x512xf32> to vector<32xf32>
    %cst_20 = arith.constant 2.000000e+00 : f32
    %24 = vector.broadcast %cst_20 : f32 to vector<32x32xf32>
    %25 = arith.mulf %24, %20 : vector<32x32xf32>
    %26 = vector.shape_cast %23 : vector<32xf32> to vector<1x32xf32>
    %27 = vector.broadcast %26 : vector<1x32xf32> to vector<32x32xf32>
    %28 = arith.subf %25, %27 : vector<32x32xf32>
    %c0_21 = arith.constant 0 : index
    %c0_22 = arith.constant 0 : index
    %c0_23 = arith.constant 0 : index
    %29 = vector.load %arg7[%c0_21, %c0_22, %c0_23] : memref<1x32x32xf32, #tpu.memory_space<vmem>>, vector<1x32x32xf32>
    %30 = vector.shape_cast %29 : vector<1x32x32xf32> to vector<32x32xf32>
    %31 = vector.shape_cast %28 : vector<32x32xf32> to vector<1x32x32xf32>
    tpu.vector_store %arg7[%c0_21, %c0_22, %c0_23], %31 {strides = array<i32>} : memref<1x32x32xf32, #tpu.memory_space<vmem>>, vector<1x32x32xf32>,
    return
  }
  func.func @transform_0(%arg0: i32, %arg1: memref<1280xi32, #tpu.memory_space<smem>>) -> (i32, i32, i32) {
    %c0_i32 = arith.constant 0 : i32
    %c0_i32_0 = arith.constant 0 : i32
    %c0_i32_1 = arith.constant 0 : i32
    return %arg0, %c0_i32, %c0_i32_0 : i32, i32, i32
  }
  func.func @transform_1(%arg0: i32, %arg1: memref<1280xi32, #tpu.memory_space<smem>>) -> (i32, i32) {
    %c0_i32 = arith.constant 0 : i32
    %c0_i32_0 = arith.constant 0 : i32
    %c0_i32_1 = arith.constant 0 : i32
    return %c0_i32, %c0_i32_0 : i32, i32
  }
  func.func @transform_2(%arg0: i32, %arg1: memref<1280xi32, #tpu.memory_space<smem>>) -> (i32, i32) {
    %c0_i32 = arith.constant 0 : i32
    %c0_i32_0 = arith.constant 0 : i32
    %c0_i32_1 = arith.constant 0 : i32
    return %c0_i32, %c0_i32_0 : i32, i32
  }
  func.func @transform_3(%arg0: i32, %arg1: memref<1280xi32, #tpu.memory_space<smem>>) -> (i32, i32) {
    %c0_i32 = arith.constant 0 : i32
    %c0_i32_0 = arith.constant 0 : i32
    %c0_i32_1 = arith.constant 0 : i32
    return %c0_i32, %c0_i32_0 : i32, i32
  }
  func.func @transform_4(%arg0: i32, %arg1: memref<1280xi32, #tpu.memory_space<smem>>) -> (i32, i32, i32) {
    %c0_i32 = arith.constant 0 : i32
    %c0_i32_0 = arith.constant 0 : i32
    %c0_i32_1 = arith.constant 0 : i32
    return %arg0, %c0_i32, %c0_i32_0 : i32, i32, i32
  }
  func.func @transform_5(%arg0: i32, %arg1: memref<1280xi32, #tpu.memory_space<smem>>) -> (i32, i32, i32) {
    %c0_i32 = arith.constant 0 : i32
    %c0_i32_0 = arith.constant 0 : i32
    %c0_i32_1 = arith.constant 0 : i32
    return %arg0, %c0_i32, %c0_i32_0 : i32, i32, i32
  }
}

module attributes {stable_mosaic.version = 11 : i64} {
  func.func @_edge_conv_kernel(%arg0: i32, %arg1: memref<1280xi32, #tpu.memory_space<smem>>, %arg2: memref<1x32x512xbf16, #tpu.memory_space<vmem>>, %arg3: memref<512x512xbf16, #tpu.memory_space<vmem>>, %arg4: memref<512x512xbf16, #tpu.memory_space<vmem>>, %arg5: memref<1x512xf32, #tpu.memory_space<vmem>>, %arg6: memref<1x32x512xbf16, #tpu.memory_space<vmem>>, %arg7: memref<32x512xf32, #tpu.memory_space<vmem>>, %arg8: memref<32x512xf32, #tpu.memory_space<vmem>>) attributes {dimension_semantics = [#tpu.dimension_semantics<parallel>], iteration_bounds = array<i64: 2>, scalar_prefetch = 1 : i64, scratch_operands = 2 : i64, tpu.core_type = #tpu.core_type<tc>, window_params = [{transform_indices = @transform_0, window_bounds = array<i64: 1, 32, 512>}, {pipeline_mode = #tpu.pipeline_mode<synchronous>, transform_indices = @transform_1, window_bounds = array<i64: 512, 512>}, {pipeline_mode = #tpu.pipeline_mode<synchronous>, transform_indices = @transform_2, window_bounds = array<i64: 512, 512>}, {pipeline_mode = #tpu.pipeline_mode<synchronous>, transform_indices = @transform_3, window_bounds = array<i64: 1, 512>}, {transform_indices = @transform_4, window_bounds = array<i64: 1, 32, 512>}]} {
    %c0 = arith.constant 0 : index
    %c0_0 = arith.constant 0 : index
    %c0_1 = arith.constant 0 : index
    %0 = vector.load %arg2[%c0, %c0_0, %c0_1] : memref<1x32x512xbf16, #tpu.memory_space<vmem>>, vector<1x32x512xbf16>
    %1 = vector.shape_cast %0 : vector<1x32x512xbf16> to vector<32x512xbf16>
    %c0_2 = arith.constant 0 : index
    %c0_3 = arith.constant 0 : index
    %2 = vector.load %arg3[%c0_2, %c0_3] : memref<512x512xbf16, #tpu.memory_space<vmem>>, vector<512x512xbf16>
    %cst = arith.constant dense<0.000000e+00> : vector<32x512xf32>
    %3 = tpu.matmul %1, %2, %cst {dimension_numbers = #tpu.dot_dimension_numbers<[1], [0], [0], [1], [0, 0, 1, 1], [], []>} : vector<32x512xbf16>, vector<512x512xbf16>, vector<32x512xf32> -> vector<32x512xf32>
    %c0_4 = arith.constant 0 : index
    %c0_5 = arith.constant 0 : index
    %4 = vector.load %arg7[%c0_4, %c0_5] : memref<32x512xf32, #tpu.memory_space<vmem>>, vector<32x512xf32>
    tpu.vector_store %arg7[%c0_4, %c0_5], %3 {strides = array<i32>} : memref<32x512xf32, #tpu.memory_space<vmem>>, vector<32x512xf32>,
    %c0_i32 = arith.constant 0 : i32
    %c32_i32 = arith.constant 32 : i32
    %5 = arith.addi %c0_i32, %c32_i32 : i32
    %c1_i32 = arith.constant 1 : i32
    scf.for %arg9 = %c0_i32 to %5 step %c1_i32  : i32 {
      %c32_i32_18 = arith.constant 32 : i32
      %20 = arith.muli %arg0, %c32_i32_18 : i32
      %21 = arith.addi %20, %arg9 : i32
      %c20_i32 = arith.constant 20 : i32
      %22 = arith.muli %21, %c20_i32 : i32
      %23 = arith.index_cast %22 : i32 to index
      %24 = memref.load %arg1[%23] : memref<1280xi32, #tpu.memory_space<smem>>
      %25 = arith.index_cast %24 : i32 to index
      %c0_19 = arith.constant 0 : index
      %26 = vector.load %arg7[%25, %c0_19] : memref<32x512xf32, #tpu.memory_space<vmem>>, vector<1x512xf32>
      %c1_i32_20 = arith.constant 1 : i32
      %27 = arith.addi %22, %c1_i32_20 : i32
      %28 = arith.index_cast %27 : i32 to index
      %29 = memref.load %arg1[%28] : memref<1280xi32, #tpu.memory_space<smem>>
      %30 = arith.index_cast %29 : i32 to index
      %c0_21 = arith.constant 0 : index
      %31 = vector.load %arg7[%30, %c0_21] : memref<32x512xf32, #tpu.memory_space<vmem>>, vector<1x512xf32>
      %32 = arith.maximumf %26, %31 : vector<1x512xf32>
      %c2_i32 = arith.constant 2 : i32
      %33 = arith.addi %22, %c2_i32 : i32
      %34 = arith.index_cast %33 : i32 to index
      %35 = memref.load %arg1[%34] : memref<1280xi32, #tpu.memory_space<smem>>
      %36 = arith.index_cast %35 : i32 to index
      %c0_22 = arith.constant 0 : index
      %37 = vector.load %arg7[%36, %c0_22] : memref<32x512xf32, #tpu.memory_space<vmem>>, vector<1x512xf32>
      %38 = arith.maximumf %32, %37 : vector<1x512xf32>
      %c3_i32 = arith.constant 3 : i32
      %39 = arith.addi %22, %c3_i32 : i32
      %40 = arith.index_cast %39 : i32 to index
      %41 = memref.load %arg1[%40] : memref<1280xi32, #tpu.memory_space<smem>>
      %42 = arith.index_cast %41 : i32 to index
      %c0_23 = arith.constant 0 : index
      %43 = vector.load %arg7[%42, %c0_23] : memref<32x512xf32, #tpu.memory_space<vmem>>, vector<1x512xf32>
      %44 = arith.maximumf %38, %43 : vector<1x512xf32>
      %c4_i32 = arith.constant 4 : i32
      %45 = arith.addi %22, %c4_i32 : i32
      %46 = arith.index_cast %45 : i32 to index
      %47 = memref.load %arg1[%46] : memref<1280xi32, #tpu.memory_space<smem>>
      %48 = arith.index_cast %47 : i32 to index
      %c0_24 = arith.constant 0 : index
      %49 = vector.load %arg7[%48, %c0_24] : memref<32x512xf32, #tpu.memory_space<vmem>>, vector<1x512xf32>
      %50 = arith.maximumf %44, %49 : vector<1x512xf32>
      %c5_i32 = arith.constant 5 : i32
      %51 = arith.addi %22, %c5_i32 : i32
      %52 = arith.index_cast %51 : i32 to index
      %53 = memref.load %arg1[%52] : memref<1280xi32, #tpu.memory_space<smem>>
      %54 = arith.index_cast %53 : i32 to index
      %c0_25 = arith.constant 0 : index
      %55 = vector.load %arg7[%54, %c0_25] : memref<32x512xf32, #tpu.memory_space<vmem>>, vector<1x512xf32>
      %56 = arith.maximumf %50, %55 : vector<1x512xf32>
      %c6_i32 = arith.constant 6 : i32
      %57 = arith.addi %22, %c6_i32 : i32
      %58 = arith.index_cast %57 : i32 to index
      %59 = memref.load %arg1[%58] : memref<1280xi32, #tpu.memory_space<smem>>
      %60 = arith.index_cast %59 : i32 to index
      %c0_26 = arith.constant 0 : index
      %61 = vector.load %arg7[%60, %c0_26] : memref<32x512xf32, #tpu.memory_space<vmem>>, vector<1x512xf32>
      %62 = arith.maximumf %56, %61 : vector<1x512xf32>
      %c7_i32 = arith.constant 7 : i32
      %63 = arith.addi %22, %c7_i32 : i32
      %64 = arith.index_cast %63 : i32 to index
      %65 = memref.load %arg1[%64] : memref<1280xi32, #tpu.memory_space<smem>>
      %66 = arith.index_cast %65 : i32 to index
      %c0_27 = arith.constant 0 : index
      %67 = vector.load %arg7[%66, %c0_27] : memref<32x512xf32, #tpu.memory_space<vmem>>, vector<1x512xf32>
      %68 = arith.maximumf %62, %67 : vector<1x512xf32>
      %c8_i32 = arith.constant 8 : i32
      %69 = arith.addi %22, %c8_i32 : i32
      %70 = arith.index_cast %69 : i32 to index
      %71 = memref.load %arg1[%70] : memref<1280xi32, #tpu.memory_space<smem>>
      %72 = arith.index_cast %71 : i32 to index
      %c0_28 = arith.constant 0 : index
      %73 = vector.load %arg7[%72, %c0_28] : memref<32x512xf32, #tpu.memory_space<vmem>>, vector<1x512xf32>
      %74 = arith.maximumf %68, %73 : vector<1x512xf32>
      %c9_i32 = arith.constant 9 : i32
      %75 = arith.addi %22, %c9_i32 : i32
      %76 = arith.index_cast %75 : i32 to index
      %77 = memref.load %arg1[%76] : memref<1280xi32, #tpu.memory_space<smem>>
      %78 = arith.index_cast %77 : i32 to index
      %c0_29 = arith.constant 0 : index
      %79 = vector.load %arg7[%78, %c0_29] : memref<32x512xf32, #tpu.memory_space<vmem>>, vector<1x512xf32>
      %80 = arith.maximumf %74, %79 : vector<1x512xf32>
      %c10_i32 = arith.constant 10 : i32
      %81 = arith.addi %22, %c10_i32 : i32
      %82 = arith.index_cast %81 : i32 to index
      %83 = memref.load %arg1[%82] : memref<1280xi32, #tpu.memory_space<smem>>
      %84 = arith.index_cast %83 : i32 to index
      %c0_30 = arith.constant 0 : index
      %85 = vector.load %arg7[%84, %c0_30] : memref<32x512xf32, #tpu.memory_space<vmem>>, vector<1x512xf32>
      %86 = arith.maximumf %80, %85 : vector<1x512xf32>
      %c11_i32 = arith.constant 11 : i32
      %87 = arith.addi %22, %c11_i32 : i32
      %88 = arith.index_cast %87 : i32 to index
      %89 = memref.load %arg1[%88] : memref<1280xi32, #tpu.memory_space<smem>>
      %90 = arith.index_cast %89 : i32 to index
      %c0_31 = arith.constant 0 : index
      %91 = vector.load %arg7[%90, %c0_31] : memref<32x512xf32, #tpu.memory_space<vmem>>, vector<1x512xf32>
      %92 = arith.maximumf %86, %91 : vector<1x512xf32>
      %c12_i32 = arith.constant 12 : i32
      %93 = arith.addi %22, %c12_i32 : i32
      %94 = arith.index_cast %93 : i32 to index
      %95 = memref.load %arg1[%94] : memref<1280xi32, #tpu.memory_space<smem>>
      %96 = arith.index_cast %95 : i32 to index
      %c0_32 = arith.constant 0 : index
      %97 = vector.load %arg7[%96, %c0_32] : memref<32x512xf32, #tpu.memory_space<vmem>>, vector<1x512xf32>
      %98 = arith.maximumf %92, %97 : vector<1x512xf32>
      %c13_i32 = arith.constant 13 : i32
      %99 = arith.addi %22, %c13_i32 : i32
      %100 = arith.index_cast %99 : i32 to index
      %101 = memref.load %arg1[%100] : memref<1280xi32, #tpu.memory_space<smem>>
      %102 = arith.index_cast %101 : i32 to index
      %c0_33 = arith.constant 0 : index
      %103 = vector.load %arg7[%102, %c0_33] : memref<32x512xf32, #tpu.memory_space<vmem>>, vector<1x512xf32>
      %104 = arith.maximumf %98, %103 : vector<1x512xf32>
      %c14_i32 = arith.constant 14 : i32
      %105 = arith.addi %22, %c14_i32 : i32
      %106 = arith.index_cast %105 : i32 to index
      %107 = memref.load %arg1[%106] : memref<1280xi32, #tpu.memory_space<smem>>
      %108 = arith.index_cast %107 : i32 to index
      %c0_34 = arith.constant 0 : index
      %109 = vector.load %arg7[%108, %c0_34] : memref<32x512xf32, #tpu.memory_space<vmem>>, vector<1x512xf32>
      %110 = arith.maximumf %104, %109 : vector<1x512xf32>
      %c15_i32 = arith.constant 15 : i32
      %111 = arith.addi %22, %c15_i32 : i32
      %112 = arith.index_cast %111 : i32 to index
      %113 = memref.load %arg1[%112] : memref<1280xi32, #tpu.memory_space<smem>>
      %114 = arith.index_cast %113 : i32 to index
      %c0_35 = arith.constant 0 : index
      %115 = vector.load %arg7[%114, %c0_35] : memref<32x512xf32, #tpu.memory_space<vmem>>, vector<1x512xf32>
      %116 = arith.maximumf %110, %115 : vector<1x512xf32>
      %c16_i32 = arith.constant 16 : i32
      %117 = arith.addi %22, %c16_i32 : i32
      %118 = arith.index_cast %117 : i32 to index
      %119 = memref.load %arg1[%118] : memref<1280xi32, #tpu.memory_space<smem>>
      %120 = arith.index_cast %119 : i32 to index
      %c0_36 = arith.constant 0 : index
      %121 = vector.load %arg7[%120, %c0_36] : memref<32x512xf32, #tpu.memory_space<vmem>>, vector<1x512xf32>
      %122 = arith.maximumf %116, %121 : vector<1x512xf32>
      %c17_i32 = arith.constant 17 : i32
      %123 = arith.addi %22, %c17_i32 : i32
      %124 = arith.index_cast %123 : i32 to index
      %125 = memref.load %arg1[%124] : memref<1280xi32, #tpu.memory_space<smem>>
      %126 = arith.index_cast %125 : i32 to index
      %c0_37 = arith.constant 0 : index
      %127 = vector.load %arg7[%126, %c0_37] : memref<32x512xf32, #tpu.memory_space<vmem>>, vector<1x512xf32>
      %128 = arith.maximumf %122, %127 : vector<1x512xf32>
      %c18_i32 = arith.constant 18 : i32
      %129 = arith.addi %22, %c18_i32 : i32
      %130 = arith.index_cast %129 : i32 to index
      %131 = memref.load %arg1[%130] : memref<1280xi32, #tpu.memory_space<smem>>
      %132 = arith.index_cast %131 : i32 to index
      %c0_38 = arith.constant 0 : index
      %133 = vector.load %arg7[%132, %c0_38] : memref<32x512xf32, #tpu.memory_space<vmem>>, vector<1x512xf32>
      %134 = arith.maximumf %128, %133 : vector<1x512xf32>
      %c19_i32 = arith.constant 19 : i32
      %135 = arith.addi %22, %c19_i32 : i32
      %136 = arith.index_cast %135 : i32 to index
      %137 = memref.load %arg1[%136] : memref<1280xi32, #tpu.memory_space<smem>>
      %138 = arith.index_cast %137 : i32 to index
      %c0_39 = arith.constant 0 : index
      %139 = vector.load %arg7[%138, %c0_39] : memref<32x512xf32, #tpu.memory_space<vmem>>, vector<1x512xf32>
      %140 = arith.maximumf %134, %139 : vector<1x512xf32>
      %141 = arith.index_cast %arg9 : i32 to index
      %c0_40 = arith.constant 0 : index
      %142 = vector.load %arg8[%141, %c0_40] : memref<32x512xf32, #tpu.memory_space<vmem>>, vector<1x512xf32>
      tpu.vector_store %arg8[%141, %c0_40], %140 {strides = array<i32>} : memref<32x512xf32, #tpu.memory_space<vmem>>, vector<1x512xf32>,
    }
    %c32_i32_6 = arith.constant 32 : i32
    %c0_7 = arith.constant 0 : index
    %c0_8 = arith.constant 0 : index
    %6 = vector.load %arg4[%c0_7, %c0_8] : memref<512x512xbf16, #tpu.memory_space<vmem>>, vector<512x512xbf16>
    %cst_9 = arith.constant dense<0.000000e+00> : vector<32x512xf32>
    %7 = tpu.matmul %1, %6, %cst_9 {dimension_numbers = #tpu.dot_dimension_numbers<[1], [0], [0], [1], [0, 0, 1, 1], [], []>} : vector<32x512xbf16>, vector<512x512xbf16>, vector<32x512xf32> -> vector<32x512xf32>
    %c0_10 = arith.constant 0 : index
    %c0_11 = arith.constant 0 : index
    %8 = vector.load %arg8[%c0_10, %c0_11] : memref<32x512xf32, #tpu.memory_space<vmem>>, vector<32x512xf32>
    %9 = arith.addf %8, %7 : vector<32x512xf32>
    %c0_12 = arith.constant 0 : index
    %c0_13 = arith.constant 0 : index
    %10 = vector.load %arg5[%c0_12, %c0_13] : memref<1x512xf32, #tpu.memory_space<vmem>>, vector<1x512xf32>
    %11 = vector.broadcast %10 : vector<1x512xf32> to vector<32x512xf32>
    %12 = arith.addf %9, %11 : vector<32x512xf32>
    %cst_14 = arith.constant 2.000000e-01 : f32
    %13 = vector.broadcast %cst_14 : f32 to vector<32x512xf32>
    %14 = arith.mulf %13, %12 : vector<32x512xf32>
    %15 = arith.maximumf %12, %14 : vector<32x512xf32>
    %16 = arith.truncf %15 : vector<32x512xf32> to vector<32x512xbf16>
    %c0_15 = arith.constant 0 : index
    %c0_16 = arith.constant 0 : index
    %c0_17 = arith.constant 0 : index
    %17 = vector.load %arg6[%c0_15, %c0_16, %c0_17] : memref<1x32x512xbf16, #tpu.memory_space<vmem>>, vector<1x32x512xbf16>
    %18 = vector.shape_cast %17 : vector<1x32x512xbf16> to vector<32x512xbf16>
    %19 = vector.shape_cast %16 : vector<32x512xbf16> to vector<1x32x512xbf16>
    tpu.vector_store %arg6[%c0_15, %c0_16, %c0_17], %19 {strides = array<i32>} : memref<1x32x512xbf16, #tpu.memory_space<vmem>>, vector<1x32x512xbf16>,
    return
  }
  func.func @transform_0(%arg0: i32, %arg1: memref<1280xi32, #tpu.memory_space<smem>>) -> (i32, i32, i32) {
    %c0_i32 = arith.constant 0 : i32
    %c0_i32_0 = arith.constant 0 : i32
    %c0_i32_1 = arith.constant 0 : i32
    return %arg0, %c0_i32, %c0_i32_0 : i32, i32, i32
  }
  func.func @transform_1(%arg0: i32, %arg1: memref<1280xi32, #tpu.memory_space<smem>>) -> (i32, i32) {
    %c0_i32 = arith.constant 0 : i32
    %c0_i32_0 = arith.constant 0 : i32
    %c0_i32_1 = arith.constant 0 : i32
    return %c0_i32, %c0_i32_0 : i32, i32
  }
  func.func @transform_2(%arg0: i32, %arg1: memref<1280xi32, #tpu.memory_space<smem>>) -> (i32, i32) {
    %c0_i32 = arith.constant 0 : i32
    %c0_i32_0 = arith.constant 0 : i32
    %c0_i32_1 = arith.constant 0 : i32
    return %c0_i32, %c0_i32_0 : i32, i32
  }
  func.func @transform_3(%arg0: i32, %arg1: memref<1280xi32, #tpu.memory_space<smem>>) -> (i32, i32) {
    %c0_i32 = arith.constant 0 : i32
    %c0_i32_0 = arith.constant 0 : i32
    %c0_i32_1 = arith.constant 0 : i32
    return %c0_i32, %c0_i32_0 : i32, i32
  }
  func.func @transform_4(%arg0: i32, %arg1: memref<1280xi32, #tpu.memory_space<smem>>) -> (i32, i32, i32) {
    %c0_i32 = arith.constant 0 : i32
    %c0_i32_0 = arith.constant 0 : i32
    %c0_i32_1 = arith.constant 0 : i32
    return %arg0, %c0_i32, %c0_i32_0 : i32, i32, i32
  }
}

module attributes {stable_mosaic.version = 11 : i64} {
  func.func @_tail_kernel(%arg0: i32, %arg1: memref<1x32x256xbf16, #tpu.memory_space<vmem>>, %arg2: memref<1x32x256xbf16, #tpu.memory_space<vmem>>, %arg3: memref<1x32x512xbf16, #tpu.memory_space<vmem>>, %arg4: memref<1x32x512xbf16, #tpu.memory_space<vmem>>, %arg5: memref<256x64xbf16, #tpu.memory_space<vmem>>, %arg6: memref<256x64xbf16, #tpu.memory_space<vmem>>, %arg7: memref<512x64xbf16, #tpu.memory_space<vmem>>, %arg8: memref<512x64xbf16, #tpu.memory_space<vmem>>, %arg9: memref<1x64xf32, #tpu.memory_space<vmem>>, %arg10: memref<64x256xbf16, #tpu.memory_space<vmem>>, %arg11: memref<64x256xbf16, #tpu.memory_space<vmem>>, %arg12: memref<1x256xf32, #tpu.memory_space<vmem>>, %arg13: memref<256x128xbf16, #tpu.memory_space<vmem>>, %arg14: memref<1x128xf32, #tpu.memory_space<vmem>>, %arg15: memref<128x8xbf16, #tpu.memory_space<vmem>>, %arg16: memref<1x8xf32, #tpu.memory_space<vmem>>, %arg17: memref<1x1x8xf32, #tpu.memory_space<vmem>>) attributes {dimension_semantics = [#tpu.dimension_semantics<parallel>], iteration_bounds = array<i64: 2>, scalar_prefetch = 0 : i64, scratch_operands = 0 : i64, tpu.core_type = #tpu.core_type<tc>, window_params = [{transform_indices = @transform_0, window_bounds = array<i64: 1, 32, 256>}, {transform_indices = @transform_1, window_bounds = array<i64: 1, 32, 256>}, {transform_indices = @transform_2, window_bounds = array<i64: 1, 32, 512>}, {transform_indices = @transform_3, window_bounds = array<i64: 1, 32, 512>}, {pipeline_mode = #tpu.pipeline_mode<synchronous>, transform_indices = @transform_4, window_bounds = array<i64: 256, 64>}, {pipeline_mode = #tpu.pipeline_mode<synchronous>, transform_indices = @transform_5, window_bounds = array<i64: 256, 64>}, {pipeline_mode = #tpu.pipeline_mode<synchronous>, transform_indices = @transform_6, window_bounds = array<i64: 512, 64>}, {pipeline_mode = #tpu.pipeline_mode<synchronous>, transform_indices = @transform_7, window_bounds = array<i64: 512, 64>}, {pipeline_mode = #tpu.pipeline_mode<synchronous>, transform_indices = @transform_8, window_bounds = array<i64: 1, 64>}, {pipeline_mode = #tpu.pipeline_mode<synchronous>, transform_indices = @transform_9, window_bounds = array<i64: 64, 256>}, {pipeline_mode = #tpu.pipeline_mode<synchronous>, transform_indices = @transform_10, window_bounds = array<i64: 64, 256>}, {pipeline_mode = #tpu.pipeline_mode<synchronous>, transform_indices = @transform_11, window_bounds = array<i64: 1, 256>}, {pipeline_mode = #tpu.pipeline_mode<synchronous>, transform_indices = @transform_12, window_bounds = array<i64: 256, 128>}, {pipeline_mode = #tpu.pipeline_mode<synchronous>, transform_indices = @transform_13, window_bounds = array<i64: 1, 128>}, {pipeline_mode = #tpu.pipeline_mode<synchronous>, transform_indices = @transform_14, window_bounds = array<i64: 128, 8>}, {pipeline_mode = #tpu.pipeline_mode<synchronous>, transform_indices = @transform_15, window_bounds = array<i64: 1, 8>}, {transform_indices = @transform_16, window_bounds = array<i64: 1, 1, 8>}]} {
    %c0 = arith.constant 0 : index
    %c0_0 = arith.constant 0 : index
    %c0_1 = arith.constant 0 : index
    %0 = vector.load %arg1[%c0, %c0_0, %c0_1] : memref<1x32x256xbf16, #tpu.memory_space<vmem>>, vector<1x32x256xbf16>
    %1 = vector.shape_cast %0 : vector<1x32x256xbf16> to vector<32x256xbf16>
    %c0_2 = arith.constant 0 : index
    %c0_3 = arith.constant 0 : index
    %2 = vector.load %arg5[%c0_2, %c0_3] : memref<256x64xbf16, #tpu.memory_space<vmem>>, vector<256x64xbf16>
    %cst = arith.constant dense<0.000000e+00> : vector<32x64xf32>
    %3 = tpu.matmul %1, %2, %cst {dimension_numbers = #tpu.dot_dimension_numbers<[1], [0], [0], [1], [0, 0, 1, 1], [], []>} : vector<32x256xbf16>, vector<256x64xbf16>, vector<32x64xf32> -> vector<32x64xf32>
    %c0_4 = arith.constant 0 : index
    %c0_5 = arith.constant 0 : index
    %c0_6 = arith.constant 0 : index
    %4 = vector.load %arg2[%c0_4, %c0_5, %c0_6] : memref<1x32x256xbf16, #tpu.memory_space<vmem>>, vector<1x32x256xbf16>
    %5 = vector.shape_cast %4 : vector<1x32x256xbf16> to vector<32x256xbf16>
    %c0_7 = arith.constant 0 : index
    %c0_8 = arith.constant 0 : index
    %6 = vector.load %arg6[%c0_7, %c0_8] : memref<256x64xbf16, #tpu.memory_space<vmem>>, vector<256x64xbf16>
    %cst_9 = arith.constant dense<0.000000e+00> : vector<32x64xf32>
    %7 = tpu.matmul %5, %6, %cst_9 {dimension_numbers = #tpu.dot_dimension_numbers<[1], [0], [0], [1], [0, 0, 1, 1], [], []>} : vector<32x256xbf16>, vector<256x64xbf16>, vector<32x64xf32> -> vector<32x64xf32>
    %8 = arith.addf %3, %7 : vector<32x64xf32>
    %c0_10 = arith.constant 0 : index
    %c0_11 = arith.constant 0 : index
    %c0_12 = arith.constant 0 : index
    %9 = vector.load %arg3[%c0_10, %c0_11, %c0_12] : memref<1x32x512xbf16, #tpu.memory_space<vmem>>, vector<1x32x512xbf16>
    %10 = vector.shape_cast %9 : vector<1x32x512xbf16> to vector<32x512xbf16>
    %c0_13 = arith.constant 0 : index
    %c0_14 = arith.constant 0 : index
    %11 = vector.load %arg7[%c0_13, %c0_14] : memref<512x64xbf16, #tpu.memory_space<vmem>>, vector<512x64xbf16>
    %cst_15 = arith.constant dense<0.000000e+00> : vector<32x64xf32>
    %12 = tpu.matmul %10, %11, %cst_15 {dimension_numbers = #tpu.dot_dimension_numbers<[1], [0], [0], [1], [0, 0, 1, 1], [], []>} : vector<32x512xbf16>, vector<512x64xbf16>, vector<32x64xf32> -> vector<32x64xf32>
    %13 = arith.addf %8, %12 : vector<32x64xf32>
    %c0_16 = arith.constant 0 : index
    %c0_17 = arith.constant 0 : index
    %c0_18 = arith.constant 0 : index
    %14 = vector.load %arg4[%c0_16, %c0_17, %c0_18] : memref<1x32x512xbf16, #tpu.memory_space<vmem>>, vector<1x32x512xbf16>
    %15 = vector.shape_cast %14 : vector<1x32x512xbf16> to vector<32x512xbf16>
    %c0_19 = arith.constant 0 : index
    %c0_20 = arith.constant 0 : index
    %16 = vector.load %arg8[%c0_19, %c0_20] : memref<512x64xbf16, #tpu.memory_space<vmem>>, vector<512x64xbf16>
    %cst_21 = arith.constant dense<0.000000e+00> : vector<32x64xf32>
    %17 = tpu.matmul %15, %16, %cst_21 {dimension_numbers = #tpu.dot_dimension_numbers<[1], [0], [0], [1], [0, 0, 1, 1], [], []>} : vector<32x512xbf16>, vector<512x64xbf16>, vector<32x64xf32> -> vector<32x64xf32>
    %18 = arith.addf %13, %17 : vector<32x64xf32>
    %c0_22 = arith.constant 0 : index
    %c0_23 = arith.constant 0 : index
    %19 = vector.load %arg9[%c0_22, %c0_23] : memref<1x64xf32, #tpu.memory_space<vmem>>, vector<1x64xf32>
    %20 = vector.broadcast %19 : vector<1x64xf32> to vector<32x64xf32>
    %21 = arith.addf %18, %20 : vector<32x64xf32>
    %cst_24 = arith.constant 2.000000e-01 : f32
    %22 = vector.broadcast %cst_24 : f32 to vector<32x64xf32>
    %23 = arith.mulf %22, %21 : vector<32x64xf32>
    %24 = arith.maximumf %21, %23 : vector<32x64xf32>
    %cst_25 = arith.constant dense<0xFF800000> : vector<64xf32>
    %25 = vector.multi_reduction <maximumf>, %24, %cst_25 [0] : vector<32x64xf32> to vector<64xf32>
    %26 = vector.shape_cast %25 : vector<64xf32> to vector<1x64xf32>
    %cst_26 = arith.constant dense<0.000000e+00> : vector<64xf32>
    %27 = vector.multi_reduction <add>, %24, %cst_26 [0] : vector<32x64xf32> to vector<64xf32>
    %28 = vector.shape_cast %27 : vector<64xf32> to vector<1x64xf32>
    %cst_27 = arith.constant 3.200000e+01 : f32
    %29 = vector.broadcast %cst_27 : f32 to vector<1x64xf32>
    %30 = arith.divf %28, %29 : vector<1x64xf32>
    %31 = arith.truncf %26 : vector<1x64xf32> to vector<1x64xbf16>
    %c0_28 = arith.constant 0 : index
    %c0_29 = arith.constant 0 : index
    %32 = vector.load %arg10[%c0_28, %c0_29] : memref<64x256xbf16, #tpu.memory_space<vmem>>, vector<64x256xbf16>
    %cst_30 = arith.constant dense<0.000000e+00> : vector<1x256xf32>
    %33 = tpu.matmul %31, %32, %cst_30 {dimension_numbers = #tpu.dot_dimension_numbers<[1], [0], [0], [1], [0, 0, 1, 1], [], []>} : vector<1x64xbf16>, vector<64x256xbf16>, vector<1x256xf32> -> vector<1x256xf32>
    %34 = arith.truncf %30 : vector<1x64xf32> to vector<1x64xbf16>
    %c0_31 = arith.constant 0 : index
    %c0_32 = arith.constant 0 : index
    %35 = vector.load %arg11[%c0_31, %c0_32] : memref<64x256xbf16, #tpu.memory_space<vmem>>, vector<64x256xbf16>
    %cst_33 = arith.constant dense<0.000000e+00> : vector<1x256xf32>
    %36 = tpu.matmul %34, %35, %cst_33 {dimension_numbers = #tpu.dot_dimension_numbers<[1], [0], [0], [1], [0, 0, 1, 1], [], []>} : vector<1x64xbf16>, vector<64x256xbf16>, vector<1x256xf32> -> vector<1x256xf32>
    %37 = arith.addf %33, %36 : vector<1x256xf32>
    %c0_34 = arith.constant 0 : index
    %c0_35 = arith.constant 0 : index
    %38 = vector.load %arg12[%c0_34, %c0_35] : memref<1x256xf32, #tpu.memory_space<vmem>>, vector<1x256xf32>
    %39 = arith.addf %37, %38 : vector<1x256xf32>
    %cst_36 = arith.constant 2.000000e-01 : f32
    %40 = vector.broadcast %cst_36 : f32 to vector<1x256xf32>
    %41 = arith.mulf %40, %39 : vector<1x256xf32>
    %42 = arith.maximumf %39, %41 : vector<1x256xf32>
    %43 = arith.truncf %42 : vector<1x256xf32> to vector<1x256xbf16>
    %c0_37 = arith.constant 0 : index
    %c0_38 = arith.constant 0 : index
    %44 = vector.load %arg13[%c0_37, %c0_38] : memref<256x128xbf16, #tpu.memory_space<vmem>>, vector<256x128xbf16>
    %cst_39 = arith.constant dense<0.000000e+00> : vector<1x128xf32>
    %45 = tpu.matmul %43, %44, %cst_39 {dimension_numbers = #tpu.dot_dimension_numbers<[1], [0], [0], [1], [0, 0, 1, 1], [], []>} : vector<1x256xbf16>, vector<256x128xbf16>, vector<1x128xf32> -> vector<1x128xf32>
    %c0_40 = arith.constant 0 : index
    %c0_41 = arith.constant 0 : index
    %46 = vector.load %arg14[%c0_40, %c0_41] : memref<1x128xf32, #tpu.memory_space<vmem>>, vector<1x128xf32>
    %47 = arith.addf %45, %46 : vector<1x128xf32>
    %cst_42 = arith.constant 2.000000e-01 : f32
    %48 = vector.broadcast %cst_42 : f32 to vector<1x128xf32>
    %49 = arith.mulf %48, %47 : vector<1x128xf32>
    %50 = arith.maximumf %47, %49 : vector<1x128xf32>
    %51 = arith.truncf %50 : vector<1x128xf32> to vector<1x128xbf16>
    %c0_43 = arith.constant 0 : index
    %c0_44 = arith.constant 0 : index
    %52 = vector.load %arg15[%c0_43, %c0_44] : memref<128x8xbf16, #tpu.memory_space<vmem>>, vector<128x8xbf16>
    %cst_45 = arith.constant dense<0.000000e+00> : vector<1x8xf32>
    %53 = tpu.matmul %51, %52, %cst_45 {dimension_numbers = #tpu.dot_dimension_numbers<[1], [0], [0], [1], [0, 0, 1, 1], [], []>} : vector<1x128xbf16>, vector<128x8xbf16>, vector<1x8xf32> -> vector<1x8xf32>
    %c0_46 = arith.constant 0 : index
    %c0_47 = arith.constant 0 : index
    %54 = vector.load %arg16[%c0_46, %c0_47] : memref<1x8xf32, #tpu.memory_space<vmem>>, vector<1x8xf32>
    %55 = arith.addf %53, %54 : vector<1x8xf32>
    %c0_48 = arith.constant 0 : index
    %c0_49 = arith.constant 0 : index
    %c0_50 = arith.constant 0 : index
    %56 = vector.load %arg17[%c0_48, %c0_49, %c0_50] : memref<1x1x8xf32, #tpu.memory_space<vmem>>, vector<1x1x8xf32>
    %57 = vector.shape_cast %56 : vector<1x1x8xf32> to vector<1x8xf32>
    %58 = vector.shape_cast %55 : vector<1x8xf32> to vector<1x1x8xf32>
    tpu.vector_store %arg17[%c0_48, %c0_49, %c0_50], %58 {strides = array<i32>} : memref<1x1x8xf32, #tpu.memory_space<vmem>>, vector<1x1x8xf32>,
    return
  }
  func.func @transform_0(%arg0: i32) -> (i32, i32, i32) {
    %c0_i32 = arith.constant 0 : i32
    %c0_i32_0 = arith.constant 0 : i32
    %c0_i32_1 = arith.constant 0 : i32
    return %arg0, %c0_i32, %c0_i32_0 : i32, i32, i32
  }
  func.func @transform_1(%arg0: i32) -> (i32, i32, i32) {
    %c0_i32 = arith.constant 0 : i32
    %c0_i32_0 = arith.constant 0 : i32
    %c0_i32_1 = arith.constant 0 : i32
    return %arg0, %c0_i32, %c0_i32_0 : i32, i32, i32
  }
  func.func @transform_2(%arg0: i32) -> (i32, i32, i32) {
    %c0_i32 = arith.constant 0 : i32
    %c0_i32_0 = arith.constant 0 : i32
    %c0_i32_1 = arith.constant 0 : i32
    return %arg0, %c0_i32, %c0_i32_0 : i32, i32, i32
  }
  func.func @transform_3(%arg0: i32) -> (i32, i32, i32) {
    %c0_i32 = arith.constant 0 : i32
    %c0_i32_0 = arith.constant 0 : i32
    %c0_i32_1 = arith.constant 0 : i32
    return %arg0, %c0_i32, %c0_i32_0 : i32, i32, i32
  }
  func.func @transform_4(%arg0: i32) -> (i32, i32) {
    %c0_i32 = arith.constant 0 : i32
    %c0_i32_0 = arith.constant 0 : i32
    %c0_i32_1 = arith.constant 0 : i32
    return %c0_i32, %c0_i32_0 : i32, i32
  }
  func.func @transform_5(%arg0: i32) -> (i32, i32) {
    %c0_i32 = arith.constant 0 : i32
    %c0_i32_0 = arith.constant 0 : i32
    %c0_i32_1 = arith.constant 0 : i32
    return %c0_i32, %c0_i32_0 : i32, i32
  }
  func.func @transform_6(%arg0: i32) -> (i32, i32) {
    %c0_i32 = arith.constant 0 : i32
    %c0_i32_0 = arith.constant 0 : i32
    %c0_i32_1 = arith.constant 0 : i32
    return %c0_i32, %c0_i32_0 : i32, i32
  }
  func.func @transform_7(%arg0: i32) -> (i32, i32) {
    %c0_i32 = arith.constant 0 : i32
    %c0_i32_0 = arith.constant 0 : i32
    %c0_i32_1 = arith.constant 0 : i32
    return %c0_i32, %c0_i32_0 : i32, i32
  }
  func.func @transform_8(%arg0: i32) -> (i32, i32) {
    %c0_i32 = arith.constant 0 : i32
    %c0_i32_0 = arith.constant 0 : i32
    %c0_i32_1 = arith.constant 0 : i32
    return %c0_i32, %c0_i32_0 : i32, i32
  }
  func.func @transform_9(%arg0: i32) -> (i32, i32) {
    %c0_i32 = arith.constant 0 : i32
    %c0_i32_0 = arith.constant 0 : i32
    %c0_i32_1 = arith.constant 0 : i32
    return %c0_i32, %c0_i32_0 : i32, i32
  }
  func.func @transform_10(%arg0: i32) -> (i32, i32) {
    %c0_i32 = arith.constant 0 : i32
    %c0_i32_0 = arith.constant 0 : i32
    %c0_i32_1 = arith.constant 0 : i32
    return %c0_i32, %c0_i32_0 : i32, i32
  }
  func.func @transform_11(%arg0: i32) -> (i32, i32) {
    %c0_i32 = arith.constant 0 : i32
    %c0_i32_0 = arith.constant 0 : i32
    %c0_i32_1 = arith.constant 0 : i32
    return %c0_i32, %c0_i32_0 : i32, i32
  }
  func.func @transform_12(%arg0: i32) -> (i32, i32) {
    %c0_i32 = arith.constant 0 : i32
    %c0_i32_0 = arith.constant 0 : i32
    %c0_i32_1 = arith.constant 0 : i32
    return %c0_i32, %c0_i32_0 : i32, i32
  }
  func.func @transform_13(%arg0: i32) -> (i32, i32) {
    %c0_i32 = arith.constant 0 : i32
    %c0_i32_0 = arith.constant 0 : i32
    %c0_i32_1 = arith.constant 0 : i32
    return %c0_i32, %c0_i32_0 : i32, i32
  }
  func.func @transform_14(%arg0: i32) -> (i32, i32) {
    %c0_i32 = arith.constant 0 : i32
    %c0_i32_0 = arith.constant 0 : i32
    %c0_i32_1 = arith.constant 0 : i32
    return %c0_i32, %c0_i32_0 : i32, i32
  }
  func.func @transform_15(%arg0: i32) -> (i32, i32) {
    %c0_i32 = arith.constant 0 : i32
    %c0_i32_0 = arith.constant 0 : i32
    %c0_i32_1 = arith.constant 0 : i32
    return %c0_i32, %c0_i32_0 : i32, i32
  }
  func.func @transform_16(%arg0: i32) -> (i32, i32, i32) {
    %c0_i32 = arith.constant 0 : i32
    %c0_i32_0 = arith.constant 0 : i32
    %c0_i32_1 = arith.constant 0 : i32
    return %arg0, %c0_i32, %c0_i32_0 : i32, i32, i32
  }
}

</mosaic_0001>

<bundles_post_ra>
// kernel: dgcnn_forward.6
= control target key start
LH: loop header
LB: loop body
LE: loop exit
PB: predicated region body
PF: predicated region fallthrough
CT: control target
= control target key end

     0   :  { %vm27_vm0 = vcmask 523264   ;;  %v144_v36 = vlaneseq  ;;  %vm149_vm1 = vcmask 130112   ;;  %vm153_vm2 = vcmask 195712   ;;  %s317_s0 = inlined_call_operand.vmem [shape: bf16[2,32,64], index: 0, kind: input, shape index: {}]   ;;  %s318_s1 = inlined_call_operand.vmem [shape: f32[2,32,32], index: 1, kind: output, shape index: {}]  }
   0x1   :  { %v228_v0 = vld [vmem:[%s317_s0 + $0x8] sm:$0xff]  ;;  %v230_v1 = vld [vmem:[%s317_s0 + $0x18] sm:$0xff]  ;;  %v13_v2 = vld [vmem:[%s317_s0 + $0x10] sm:$0xff]   ;;  %vm157_vm3 = vcmask 261312   ;;  %vm194_vm4 = vcmask 261120  }
   0x2   :  { %v9_v3 = vld [vmem:[%s317_s0] sm:$0xff]   ;;  %v32_v4 = vsel %vm27_vm0, %v228_v0, 0  ;;  %v67_v5 = vsel %vm27_vm0, %v230_v1, 0  ;;  %v92_v6 = vunpack.c.l.bf16 %v13_v2  ;;  %v11_v7 = vld [vmem:[%s317_s0 + $0x8] sm:$0xff]   ;;  %v15_v8 = vld [vmem:[%s317_s0 + $0x18] sm:$0xff]   ;;  %v93_v13 = vunpack.c.h.bf16 %v13_v2 }
   0x3   :  { %40 = vmatpush.bf16.xpose.msra.mxu0 %v32_v4  ;;  %231 = vmatpush.bf16.xpose.msra.mxu2 %v32_v4  ;;  %v88_v9 = vunpack.c.l.bf16 %v9_v3  ;;  %v90_v10 = vunpack.c.l.bf16 %v11_v7  ;;  %v227_v12 = vld [vmem:[%s317_s0] sm:$0xff]  ;;  %v229_v14 = vld [vmem:[%s317_s0 + $0x10] sm:$0xff]  ;;  %v89_v17 = vunpack.c.h.bf16 %v9_v3  ;;  %v94_v18 = vunpack.c.l.bf16 %v15_v8 }
   0x4   :  { %75 = vmatpush.bf16.xpose.msra.mxu1 %v67_v5  ;;  %233 = vmatpush.bf16.xpose.msra.mxu3 %v67_v5  ;;  %v100_v11 = vmul.f32 %v92_v6, %v92_v6  ;;  %v29_v22 = vsel %vm27_vm0, %v227_v12, 0  ;;  %v101_v23 = vmul.f32 %v93_v13, %v93_v13  ;;  %v64_v24 = vsel %vm27_vm0, %v229_v14, 0 }
   0x5   :  { %v96_v15 = vmul.f32 %v88_v9, %v88_v9  ;;  %v98_v16 = vmul.f32 %v90_v10, %v90_v10  ;;  %v97_v25 = vmul.f32 %v89_v17, %v89_v17  ;;  %v102_v26 = vmul.f32 %v94_v18, %v94_v18 }
   0x6   :  { %v116_v19 = vsel %vm27_vm0, %v100_v11, 0.0  ;;  %v119_v27 = vsel %vm27_vm0, %v101_v23, 0.0  ;;  %v95_v28 = vunpack.c.h.bf16 %v15_v8  ;;  %v91_v31 = vunpack.c.h.bf16 %v11_v7 }
   0x7   :  { %117 = vadd.xlane.f32.xlu1 %v116_v19  ;;  %v104_v20 = vsel %vm27_vm0, %v96_v15, 0.0  ;;  %v110_v21 = vsel %vm27_vm0, %v98_v16, 0.0  ;;  %v107_v29 = vsel %vm27_vm0, %v97_v25, 0.0  ;;  %v122_v30 = vsel %vm27_vm0, %v102_v26, 0.0 }
   0x8   :  { %105 = vadd.xlane.f32.xlu0 %v104_v20  ;;  %111 = vadd.xlane.f32.xlu2 %v110_v21  ;;  %v103_v32 = vmul.f32 %v95_v28, %v95_v28  ;;  %v99_v33 = vmul.f32 %v91_v31, %v91_v31  ;;  %v145_v40 = vand.u32 127, %v144_v36 }
   0xa   :  { %v125_v34 = vsel %vm27_vm0, %v103_v32, 0.0  ;;  %v113_v35 = vsel %vm27_vm0, %v99_v33, 0.0  ;;  %v147_v41 = vadd.s32 4294967288, %v145_v40  ;;  %v151_v44 = vadd.s32 4294967280, %v145_v40 }
   0xb   :  { %41 = vmatpush.bf16.xpose.msra.mxu0 %v29_v22  ;;  %232 = vmatpush.bf16.xpose.msra.mxu2 %v29_v22  ;;  %v155_v51 = vadd.s32 4294967272, %v145_v40 }
   0xc   :  { %76 = vmatpush.bf16.xpose.msra.mxu1 %v64_v24  ;;  %234 = vmatpush.bf16.xpose.msra.mxu3 %v64_v24 }
   0xf   :  { %120 = vadd.xlane.f32.xlu1 %v119_v27 }
  0x10   :  { %108 = vadd.xlane.f32.xlu0 %v107_v29  ;;  %123 = vadd.xlane.f32.xlu2 %v122_v30 }
  0x12   :  { %215 = vmatmul.msk.bf16.vlgmr.msra.gmra.mxu0 %vm27_vm0, %v227_v12  ;;  %216 = vmatmul.msk.bf16.vlgmr.msra.gmra.mxu2 %vm27_vm0, %v228_v0 }
  0x13   :  { %225 = vmatmul.msk.bf16.vlgmr.msra.gmra.mxu1 %vm27_vm0, %v229_v14  ;;  %226 = vmatmul.msk.bf16.vlgmr.msra.gmra.mxu3 %vm27_vm0, %v230_v1 }
  0x17   :  { %126 = vadd.xlane.f32.xlu1 %v125_v34 }
  0x18   :  { %114 = vadd.xlane.f32.xlu0 %v113_v35 }
  0x7a   :  { %v118_v37 = vpop.xlane.xlu1 %117 }
  0x7b   :  { %v106_v38 = vpop.xlane.xlu0 %105  ;;  %v112_v39 = vpop.xlane.xlu2 %111  ;;  %v159_v47 = vperm.slane %v118_v37, %v145_v40 }
  0x7c   :  { %v146_v45 = vperm.slane %v106_v38, %v145_v40  ;;  %v152_v50 = vperm.slane %v112_v39, %v151_v44 }
  0x82   :  { %v121_v42 = vpop.xlane.xlu1 %120 }
  0x83   :  { %v109_v43 = vpop.xlane.xlu0 %108  ;;  %v160_v48 = vperm.slane %v121_v42, %v147_v41  ;;  %v124_v49 = vpop.xlane.xlu2 %123 }
  0x84   :  { %v148_v46 = vperm.slane %v109_v43, %v147_v41  ;;  %v162_v53 = vperm.slane %v124_v49, %v151_v44 }
  0x85   :  { %v161_v54 = vsel %vm149_vm1, %v160_v48, %v159_v47 }
  0x86   :  { %v150_v52 = vsel %vm149_vm1, %v148_v46, %v146_v45  ;;  %v163_v60 = vsel %vm153_vm2, %v162_v53, %v161_v54 }
  0x87   :  { %v154_v58 = vsel %vm153_vm2, %v152_v50, %v150_v52 }
  0x8a   :  { %v127_v55 = vpop.xlane.xlu1 %126 }
  0x8b   :  { %v115_v56 = vpop.xlane.xlu0 %114  ;;  %v164_v57 = vperm.slane %v127_v55, %v155_v51 }
  0x8c   :  { %v156_v59 = vperm.slane %v115_v56, %v155_v51 }
  0x8d   :  { %v165_v63 = vsel %vm157_vm3, %v164_v57, %v163_v60 }
  0x8e   :  { %v158_v61 = vsel %vm157_vm3, %v156_v59, %v154_v58 }
  0x8f   :  { %v43_v62 = vpop.f32.mrf.mxu0 }
  0x90   :  { %v128_v0 = vmul.f32 2.0, %v43_v62  ;;  %v78_v1 = vpop.f32.mrf.mxu1 }
  0x91   :  { %v132_v2 = vmul.f32 2.0, %v78_v1 }
  0x92   :  { %v186_v3 = vsub.f32 %v128_v0, %v158_v61 }
  0x93   :  { %v190_v4 = vsub.f32 %v132_v2, %v165_v63 }
  0x94   :  { %195 = vst.msk [vmem:[%s318_s1] sm:$0xff] %vm194_vm4, %v186_v3 }
  0x95   :  { %199 = vst.msk [vmem:[%s318_s1 + $0x20] sm:$0xff] %vm194_vm4, %v190_v4  ;;  %v48_v5 = vpop.f32.mrf.mxu2 }
  0x96   :  { %v130_v6 = vmul.f32 2.0, %v48_v5  ;;  %v83_v7 = vpop.f32.mrf.mxu3 }
  0x97   :  { %v134_v8 = vmul.f32 2.0, %v83_v7  ;;  %v45_v9 = vpop.f32.mrf.mxu0 }
  0x98   :  { %v188_v10 = vsub.f32 %v130_v6, %v158_v61  ;;  %v129_v11 = vmul.f32 2.0, %v45_v9  ;;  %v80_v12 = vpop.f32.mrf.mxu1 }
  0x99   :  { %v192_v13 = vsub.f32 %v134_v8, %v165_v63  ;;  %v133_v14 = vmul.f32 2.0, %v80_v12 }
  0x9a   :  { %197 = vst.msk [vmem:[%s318_s1 + $0x10] sm:$0xff] %vm194_vm4, %v188_v10  ;;  %v187_v15 = vsub.f32 %v129_v11, %v158_v61 }
  0x9b   :  { %201 = vst.msk [vmem:[%s318_s1 + $0x30] sm:$0xff] %vm194_vm4, %v192_v13  ;;  %v191_v16 = vsub.f32 %v133_v14, %v165_v63 }
  0x9c   :  { %196 = vst.msk [vmem:[%s318_s1 + $0x8] sm:$0xff] %vm194_vm4, %v187_v15 }
  0x9d   :  { %200 = vst.msk [vmem:[%s318_s1 + $0x28] sm:$0xff] %vm194_vm4, %v191_v16  ;;  %v50_v17 = vpop.f32.mrf.mxu2 }
  0x9e   :  { %v131_v18 = vmul.f32 2.0, %v50_v17  ;;  %v85_v19 = vpop.f32.mrf.mxu3 }
  0x9f   :  { %v135_v20 = vmul.f32 2.0, %v85_v19 }
  0xa0   :  { %v189_v21 = vsub.f32 %v131_v18, %v158_v61 }
  0xa1   :  { %v193_v22 = vsub.f32 %v135_v20, %v165_v63 }
  0xa2   :  { %198 = vst.msk [vmem:[%s318_s1 + $0x18] sm:$0xff] %vm194_vm4, %v189_v21 }
  0xa3   :  { %202 = vst.msk [vmem:[%s318_s1 + $0x38] sm:$0xff] %vm194_vm4, %v193_v22 }

// kernel: dgcnn_forward.7
= control target key start
LH: loop header
LB: loop body
LE: loop exit
PB: predicated region body
PF: predicated region fallthrough
CT: control target
= control target key end

     0   :  { %s1284_s24 = smov [#allocation5]   ;;  %s1563_s0 = inlined_call_operand.vmem [shape: s32[1280], index: 0, kind: input, shape index: {}]   ;;  %s1564_s1 = inlined_call_operand.vmem [shape: bf16[2,32,64], index: 1, kind: input, shape index: {}]   ;;  %s1565_s2 = inlined_call_operand.vmem [shape: bf16[64,256], index: 2, kind: input, shape index: {}]   ;;  %s1566_s3 = inlined_call_operand.vmem [shape: bf16[64,256], index: 3, kind: input, shape index: {}]   ;;  %s1567_s4 = inlined_call_operand.vmem [shape: f32[1,256], index: 4, kind: input, shape index: {}]   ;;  %s1568_s5 = inlined_call_operand.vmem [shape: bf16[2,32,256], index: 5, kind: output, shape index: {0}]   ;;  %s1569_s6 = inlined_call_operand.vmem [shape: f32[2,32,32], index: 6, kind: output, shape index: {1}]  }
   0x1   :  { %1570 = sst [smem:[#allocation7_spill]] %s1564_s1  ;;  %s13_s23 = sshll.u32 %s1563_s0, 4  ;;  %s14_s23 = int_to_ptr.vmem [resolvable:$true] %s13_s23 }
   0x2   :  { %1571 = sst [smem:[#allocation8_spill]] %s1565_s2 }
   0x3   :  { %16 = dma.vmem_to_smem %s14_s23, 160, %s1284_s24, [#allocation4] }
   0x4   :  { %1274 = dma.done.wait [#allocation4], 160 }
   0x5   :  { %1275 = vsyncadd [#allocation4], 4294967136 }
   0x6   :  { %19 = sfence }
   0x7   :  { %s1323_s25 = smov 0  }
   0x8 LB: > { %s1329_s26 = sadd.s32 4294967295, %s1278_s25   ;;  %p1055_p0 = scmp.ge.s32.totalorder %s1278_s25, 1  ;;  %s1278_s25 = sphi %s1323_s25, %s25_s25  }
   0x9   : > { %p199_p1 = scmp.lt.s32.totalorder %s1278_s25, 3 }
   0xb   : > { %p200_p2 = pnand %p1055_p0, %p199_p1 }
   0xc   : > { %s1572_s2 = sld [smem:[#allocation8_spill]] (!%p200_p2)  ;;  %p232_p3 = scmp.lt.s32.totalorder (!%p200_p2), %s1329_s26, 1 }
   0xd   : > { %203 = sbr.rel (%p200_p2) target bundleno = 612 (0x264), region = 36  ;;  %s1573_s1 = sld [smem:[#allocation7_spill]] (!%p200_p2) }
   0xe   : > { %s1408_s23 = smov (!%p200_p2), 0  }
  0x12   : > { %v1096_v0 = vld [vmem:[%s1572_s2 + $0x30] sm:$0xf]  ;;  %v1199_v1 = vld [vmem:[%s1572_s2 + $0x34] sm:$0xf0]  ;;  %v1198_v2 = vld [vmem:[%s1572_s2 + $0x34] sm:$0xf] }
  0x13   : > { %v1097_v3 = vor.u32 %v1199_v1, %v1096_v0  ;;  %v1098_v4 = vld [vmem:[%s1572_s2 + $0x38] sm:$0xf0]  ;;  %v1088_v5 = vld [vmem:[%s1572_s2 + $0x20] sm:$0xf]  ;;  %v1197_v6 = vld [vmem:[%s1572_s2 + $0x24] sm:$0xf0] }
  0x14   : > { %v1101_v7 = vor.u32 %v1198_v2, %v1098_v4  ;;  %v1196_v8 = vld [vmem:[%s1572_s2 + $0x24] sm:$0xf]  ;;  %v1090_v9 = vld [vmem:[%s1572_s2 + $0x28] sm:$0xf0]  ;;  %v1089_v10 = vor.u32 %v1197_v6, %v1088_v5  ;;  %v1080_v12 = vld [vmem:[%s1572_s2 + $0x10] sm:$0xf] }
  0x15   : > { %321 = vmatpush.bf16.msra.mxu0 %v1097_v3  ;;  %1229 = vmatpush.bf16.msra.mxu2 %v1097_v3  ;;  %v1093_v11 = vor.u32 %v1196_v8, %v1090_v9  ;;  %v1195_v13 = vld [vmem:[%s1572_s2 + $0x14] sm:$0xf0]  ;;  %v1194_v14 = vld [vmem:[%s1572_s2 + $0x14] sm:$0xf]  ;;  %v1082_v15 = vld [vmem:[%s1572_s2 + $0x18] sm:$0xf0] }
  0x16   : > { %340 = vmatpush.bf16.msra.mxu1 %v1101_v7  ;;  %1233 = vmatpush.bf16.msra.mxu3 %v1101_v7  ;;  %v1081_v16 = vor.u32 %v1195_v13, %v1080_v12  ;;  %s233_s27 = scalar_select %p232_p3, %s1329_s26, 1  ;;  %v1085_v17 = vor.u32 %v1194_v14, %v1082_v15  ;;  %v1072_v18 = vld [vmem:[%s1572_s2] sm:$0xf]  ;;  %v1193_v19 = vld [vmem:[%s1572_s2 + $0x4] sm:$0xf0]  ;;  %vm310_vm0 = vcmask 523264  }
  0x17   : > { %v1192_v20 = vld [vmem:[%s1572_s2 + $0x4] sm:$0xf]  ;;  %v1074_v21 = vld [vmem:[%s1572_s2 + $0x8] sm:$0xf0]  ;;  %v1073_v22 = vor.u32 %v1193_v19, %v1072_v18 }
  0x18   : > { %s1187_s12 = sshll.u32 %s233_s27, 4  ;;  %s1188_s13 = sshll.u32 %s233_s27, 5  ;;  %v1077_v23 = vor.u32 %v1192_v20, %v1074_v21 }
  0x19   : > { %322 = vmatpush.bf16.msra.mxu0 %v1089_v10  ;;  %1230 = vmatpush.bf16.msra.mxu2 %v1089_v10  ;;  %s1386_s16 = scalar_lea.vmem %s1568_s5, %s1188_s13  ;;  %s236_s19 = scalar_lea.vmem %s1573_s1, %s1187_s12 }
  0x1a   : > { %341 = vmatpush.bf16.msra.mxu1 %v1093_v11  ;;  %1234 = vmatpush.bf16.msra.mxu3 %v1093_v11  ;;  %s1394_s22 = scalar_lea.vmem %s1569_s6, %s1188_s13  ;;  %v1396_v24 = vld [vmem:[%s236_s19] sm:$0xff]  ;;  %v1398_v25 = vld [vmem:[%s236_s19 + $0x8] sm:$0xff] }
  0x1d   : > { %323 = vmatpush.bf16.msra.mxu0 %v1081_v16  ;;  %1231 = vmatpush.bf16.msra.mxu2 %v1081_v16 }
  0x1e   : > { %342 = vmatpush.bf16.msra.mxu1 %v1085_v17  ;;  %1235 = vmatpush.bf16.msra.mxu3 %v1085_v17 }
  0x21   : > { %324 = vmatpush.bf16.msra.mxu0 %v1073_v22  ;;  %1232 = vmatpush.bf16.msra.mxu2 %v1073_v22 }
  0x22   : > { %343 = vmatpush.bf16.msra.mxu1 %v1077_v23  ;;  %1236 = vmatpush.bf16.msra.mxu3 %v1077_v23 }
  0x24   : > { %1102 = vmatmul.msk.bf16.vlgmr.msra.gmra.mxu0 %vm310_vm0, %v1396_v24  ;;  %1103 = vmatmul.msk.bf16.vlgmr.msra.gmra.mxu2 %vm310_vm0, %v1398_v25 }
  0x25   : > { %1104 = vmatmul.msk.bf16.vlgmr.msra.gmra.mxu1 %vm310_vm0, %v1396_v24  ;;  %1105 = vmatmul.msk.bf16.vlgmr.msra.gmra.mxu3 %vm310_vm0, %v1398_v25 }
  0xa1   : > { %v326_v26 = vpop.f32.mrf.mxu0 }
  0xa2   : > { %355 = vst [vmem:[#allocation2] sm:$0xff] %v326_v26  ;;  %v345_v27 = vpop.f32.mrf.mxu1 }
  0xa3   : > { %356 = vst [vmem:[#allocation2 + $0x8] sm:$0xff] %v345_v27 }
  0xa7   : > { %v331_v28 = vpop.f32.mrf.mxu2 }
  0xa8   : > { %359 = vst [vmem:[#allocation2 + $0x20] sm:$0xff] %v331_v28  ;;  %v350_v29 = vpop.f32.mrf.mxu3 }
  0xa9   : > { %360 = vst [vmem:[#allocation2 + $0x28] sm:$0xff] %v350_v29  ;;  %v328_v30 = vpop.f32.mrf.mxu0 }
  0xaa   : > { %357 = vst [vmem:[#allocation2 + $0x10] sm:$0xff] %v328_v30  ;;  %v347_v31 = vpop.f32.mrf.mxu1 }
  0xab   : > { %358 = vst [vmem:[#allocation2 + $0x18] sm:$0xff] %v347_v31 }
  0xaf   : > { %v333_v32 = vpop.f32.mrf.mxu2 }
  0xb0   : > { %361 = vst [vmem:[#allocation2 + $0x30] sm:$0xff] %v333_v32  ;;  %v352_v33 = vpop.f32.mrf.mxu3 }
  0xb1   : > { %362 = vst [vmem:[#allocation2 + $0x38] sm:$0xff] %v352_v33 }
  0xb2 LB: >> { %s1106_s24 = sshll.u32 %s1329_s26, 5  ;;  %v610_v5 = vlaneseq  ;;  %s1282_s23 = sphi %s1408_s23, %s368_s23  }
  0xb3   : >> { %s370_s0 = sadd.s32 %s1282_s23, %s1106_s24 }
  0xb4   : >> { %s1415_s27 = smul.u32 20, %s370_s0  ;;  %vm612_vm1 = vcmp.lt.s32.totalorder %v610_v5, 256 }
  0xb6   : >> { %s372_s28 = sld [smem:[#allocation5 + %s1415_s27]]  ;;  %s382_s29 = sadd.s32 1, %s1415_s27 }
  0xb7   : >> { %s383_s30 = sld [smem:[#allocation5 + %s382_s29]]  ;;  %s394_s7 = sadd.s32 2, %s1415_s27 }
  0xb8   : >> { %s395_s8 = sld [smem:[#allocation5 + %s394_s7]]  ;;  %s406_s9 = sadd.s32 3, %s1415_s27 }
  0xb9   : >> { %s1421_s10 = sld [smem:[#allocation5 + %s406_s9]]  ;;  %s418_s11 = sadd.s32 4, %s1415_s27 }
  0xba   : >> { %s1424_s12 = sld [smem:[#allocation5 + %s418_s11]]  ;;  %s430_s13 = sadd.s32 5, %s1415_s27 }
  0xbb   : >> { %s1427_s14 = sld [smem:[#allocation5 + %s430_s13]] }
  0xbc   : >> { %s373_s17 = sshra.s32 %s372_s28, 3  ;;  %s376_s18 = sand.u32 7, %s372_s28 }
  0xbd   : >> { %s1200_s19 = sshll.u32 %s373_s17, 4  ;;  %s384_s20 = sshra.s32 %s383_s30, 3 }
  0xbe   : >> { %s379_s21 = sadd.s32 %s1200_s19, %s376_s18  ;;  %s387_s24 = sand.u32 7, %s383_s30 }
  0xbf   : >> { %s1201_s0 = sshll.u32 %s384_s20, 4  ;;  %s380_s29 = scalar_lea.vmem [#allocation2], %s379_s21 }
  0xc0   : >> { %v381_v34 = vld [vmem:[%s380_s29] ss:$8 sm:$0x3]  ;;  %s390_s7 = sadd.s32 %s1201_s0, %s387_s24  ;;  %s396_s9 = sshra.s32 %s395_s8, 3 }
  0xc1   : >> { %s399_s11 = sand.u32 7, %s395_s8  ;;  %s391_s1 = scalar_lea.vmem [#allocation2], %s390_s7 }
  0xc2   : >> { %v392_v35 = vld [vmem:[%s391_s1] ss:$8 sm:$0x3]  ;;  %s1202_s13 = sshll.u32 %s396_s9, 4  ;;  %s408_s15 = sshra.s32 %s1421_s10, 3 }
  0xc3   : >> { %v393_v36 = vmax.f32 %v381_v34, %v392_v35  ;;  %s402_s28 = sadd.s32 %s1202_s13, %s399_s11  ;;  %s411_s17 = sand.u32 7, %s1421_s10 }
  0xc4   : >> { %s1203_s2 = sshll.u32 %s408_s15, 4  ;;  %s403_s18 = scalar_lea.vmem [#allocation2], %s402_s28 }
  0xc5   : >> { %v404_v37 = vld [vmem:[%s403_s18] ss:$8 sm:$0x3]  ;;  %s414_s30 = sadd.s32 %s1203_s2, %s411_s17  ;;  %s420_s19 = sshra.s32 %s1424_s12, 3 }
  0xc6   : >> { %v405_v38 = vmax.f32 %v393_v36, %v404_v37  ;;  %s423_s20 = sand.u32 7, %s1424_s12  ;;  %s415_s8 = scalar_lea.vmem [#allocation2], %s414_s30 }
  0xc7   : >> { %v416_v39 = vld [vmem:[%s415_s8] ss:$8 sm:$0x3]  ;;  %s1204_s1 = sshll.u32 %s420_s19, 4  ;;  %s432_s21 = sshra.s32 %s1427_s14, 3 }
  0xc8   : >> { %s426_s24 = sadd.s32 %s1204_s1, %s423_s20  ;;  %s435_s0 = sand.u32 7, %s1427_s14  ;;  %v417_v40 = vmax.f32 %v405_v38, %v416_v39 }
  0xc9   : >> { %s1205_s10 = sshll.u32 %s432_s21, 4  ;;  %s427_s15 = scalar_lea.vmem [#allocation2], %s426_s24 }
  0xca   : >> { %v428_v41 = vld [vmem:[%s427_s15] ss:$8 sm:$0x3]  ;;  %s438_s29 = sadd.s32 %s1205_s10, %s435_s0  ;;  %s1574_s2 = sadd.s32 6, %s1415_s27 }
  0xcb   : >> { %s443_s7 = sld [smem:[#allocation5 + %s1574_s2]]  ;;  %s454_s9 = sadd.s32 7, %s1415_s27  ;;  %v429_v42 = vmax.f32 %v417_v40, %v428_v41 }
  0xcc   : >> { %s455_s11 = sld [smem:[#allocation5 + %s454_s9]]  ;;  %s466_s13 = sadd.s32 8, %s1415_s27 }
  0xcd   : >> { %s467_s12 = sld [smem:[#allocation5 + %s466_s13]]  ;;  %s478_s28 = sadd.s32 9, %s1415_s27 }
  0xce   : >> { %s439_s17 = scalar_lea.vmem [#allocation2], %s438_s29  ;;  %s1441_s18 = sld [smem:[#allocation5 + %s478_s28]] }
  0xcf   : >> { %v440_v43 = vld [vmem:[%s439_s17] ss:$8 sm:$0x3]  ;;  %s490_s14 = sadd.s32 10, %s1415_s27  ;;  %s502_s19 = sadd.s32 11, %s1415_s27 }
  0xd0   : >> { %s1444_s30 = sld [smem:[#allocation5 + %s490_s14]]  ;;  %v441_v44 = vmax.f32 %v429_v42, %v440_v43 }
  0xd1   : >> { %s444_s20 = sshra.s32 %s443_s7, 3  ;;  %s447_s8 = sand.u32 7, %s443_s7 }
  0xd2   : >> { %s1206_s1 = sshll.u32 %s444_s20, 4  ;;  %s1447_s21 = sld [smem:[#allocation5 + %s502_s19]] }
  0xd3   : >> { %s450_s24 = sadd.s32 %s1206_s1, %s447_s8  ;;  %s456_s0 = sshra.s32 %s455_s11, 3 }
  0xd4   : >> { %s459_s10 = sand.u32 7, %s455_s11  ;;  %s451_s15 = scalar_lea.vmem [#allocation2], %s450_s24 }
  0xd5   : >> { %v452_v45 = vld [vmem:[%s451_s15] ss:$8 sm:$0x3]  ;;  %s1207_s29 = sshll.u32 %s456_s0, 4  ;;  %s468_s2 = sshra.s32 %s467_s12, 3 }
  0xd6   : >> { %v453_v46 = vmax.f32 %v441_v44, %v452_v45  ;;  %s462_s9 = sadd.s32 %s1207_s29, %s459_s10  ;;  %s471_s13 = sand.u32 7, %s467_s12 }
  0xd7   : >> { %s1208_s28 = sshll.u32 %s468_s2, 4  ;;  %s463_s7 = scalar_lea.vmem [#allocation2], %s462_s9 }
  0xd8   : >> { %v464_v47 = vld [vmem:[%s463_s7] ss:$8 sm:$0x3]  ;;  %s474_s17 = sadd.s32 %s1208_s28, %s471_s13  ;;  %s480_s14 = sshra.s32 %s1441_s18, 3 }
  0xd9   : >> { %v465_v48 = vmax.f32 %v453_v46, %v464_v47  ;;  %s483_s19 = sand.u32 7, %s1441_s18  ;;  %s475_s11 = scalar_lea.vmem [#allocation2], %s474_s17 }
  0xda   : >> { %v476_v49 = vld [vmem:[%s475_s11] ss:$8 sm:$0x3]  ;;  %s1209_s20 = sshll.u32 %s480_s14, 4  ;;  %s492_s8 = sshra.s32 %s1444_s30, 3 }
  0xdb   : >> { %v477_v50 = vmax.f32 %v465_v48, %v476_v49  ;;  %s486_s1 = sadd.s32 %s1209_s20, %s483_s19  ;;  %s495_s24 = sand.u32 7, %s1444_s30 }
  0xdc   : >> { %s1210_s12 = sshll.u32 %s492_s8, 4  ;;  %s487_s0 = scalar_lea.vmem [#allocation2], %s486_s1 }
  0xdd   : >> { %v488_v51 = vld [vmem:[%s487_s0] ss:$8 sm:$0x3]  ;;  %s498_s10 = sadd.s32 %s1210_s12, %s495_s24  ;;  %s504_s15 = sshra.s32 %s1447_s21, 3 }
  0xde   : >> { %s507_s29 = sand.u32 7, %s1447_s21  ;;  %v489_v52 = vmax.f32 %v477_v50, %v488_v51  ;;  %s1211_s18 = sshll.u32 %s504_s15, 4 }
  0xdf   : >> { %s514_s2 = sadd.s32 12, %s1415_s27  ;;  %s499_s9 = scalar_lea.vmem [#allocation2], %s498_s10 }
  0xe0   : >> { %v500_v53 = vld [vmem:[%s499_s9] ss:$8 sm:$0x3]  ;;  %s510_s13 = sadd.s32 %s1211_s18, %s507_s29  ;;  %s515_s28 = sld [smem:[#allocation5 + %s514_s2]] }
  0xe1   : >> { %s526_s7 = sadd.s32 13, %s1415_s27  ;;  %s538_s30 = sadd.s32 14, %s1415_s27  ;;  %v501_v54 = vmax.f32 %v489_v52, %v500_v53 }
  0xe2   : >> { %s527_s17 = sld [smem:[#allocation5 + %s526_s7]]  ;;  %s550_s19 = sadd.s32 15, %s1415_s27 }
  0xe3   : >> { %s539_s14 = sld [smem:[#allocation5 + %s538_s30]]  ;;  %s511_s11 = scalar_lea.vmem [#allocation2], %s510_s13 }
  0xe4   : >> { %v512_v55 = vld [vmem:[%s511_s11] ss:$8 sm:$0x3]  ;;  %s1459_s20 = sld [smem:[#allocation5 + %s550_s19]]  ;;  %s562_s21 = sadd.s32 16, %s1415_s27 }
  0xe5   : >> { %s1462_s8 = sld [smem:[#allocation5 + %s562_s21]]  ;;  %s574_s1 = sadd.s32 17, %s1415_s27  ;;  %v513_v56 = vmax.f32 %v501_v54, %v512_v55 }
  0xe6   : >> { %s516_s24 = sshra.s32 %s515_s28, 3  ;;  %s519_s12 = sand.u32 7, %s515_s28 }
  0xe7   : >> { %s1212_s0 = sshll.u32 %s516_s24, 4  ;;  %s1465_s10 = sld [smem:[#allocation5 + %s574_s1]] }
  0xe8   : >> { %s522_s15 = sadd.s32 %s1212_s0, %s519_s12  ;;  %s528_s29 = sshra.s32 %s527_s17, 3 }
  0xe9   : >> { %s531_s18 = sand.u32 7, %s527_s17  ;;  %s523_s2 = scalar_lea.vmem [#allocation2], %s522_s15 }
  0xea   : >> { %v524_v57 = vld [vmem:[%s523_s2] ss:$8 sm:$0x3]  ;;  %s1213_s9 = sshll.u32 %s528_s29, 4  ;;  %s540_s13 = sshra.s32 %s539_s14, 3 }
  0xeb   : >> { %v525_v58 = vmax.f32 %v513_v56, %v524_v57  ;;  %s534_s7 = sadd.s32 %s1213_s9, %s531_s18  ;;  %s543_s30 = sand.u32 7, %s539_s14 }
  0xec   : >> { %s1214_s19 = sshll.u32 %s540_s13, 4  ;;  %s535_s28 = scalar_lea.vmem [#allocation2], %s534_s7 }
  0xed   : >> { %v536_v59 = vld [vmem:[%s535_s28] ss:$8 sm:$0x3]  ;;  %s546_s11 = sadd.s32 %s1214_s19, %s543_s30  ;;  %s552_s21 = sshra.s32 %s1459_s20, 3 }
  0xee   : >> { %v537_v60 = vmax.f32 %v525_v58, %v536_v59  ;;  %s555_s1 = sand.u32 7, %s1459_s20  ;;  %s547_s17 = scalar_lea.vmem [#allocation2], %s546_s11 }
  0xef   : >> { %v548_v61 = vld [vmem:[%s547_s17] ss:$8 sm:$0x3]  ;;  %s1215_s24 = sshll.u32 %s552_s21, 4  ;;  %s564_s12 = sshra.s32 %s1462_s8, 3 }
  0xf0   : >> { %v549_v62 = vmax.f32 %v537_v60, %v548_v61  ;;  %s558_s0 = sadd.s32 %s1215_s24, %s555_s1  ;;  %s567_s15 = sand.u32 7, %s1462_s8 }
  0xf1   : >> { %s1216_s29 = sshll.u32 %s564_s12, 4  ;;  %s559_s14 = scalar_lea.vmem [#allocation2], %s558_s0 }
  0xf2   : >> { %v560_v63 = vld [vmem:[%s559_s14] ss:$8 sm:$0x3]  ;;  %s570_s18 = sadd.s32 %s1216_s29, %s567_s15  ;;  %s576_s2 = sshra.s32 %s1465_s10, 3 }
  0xf3   : >> { %s579_s9 = sand.u32 7, %s1465_s10  ;;  %v561_v0 = vmax.f32 %v549_v62, %v560_v63  ;;  %s1217_s13 = sshll.u32 %s576_s2, 4 }
  0xf4   : >> { %s586_s20 = sadd.s32 18, %s1415_s27  ;;  %s571_s7 = scalar_lea.vmem [#allocation2], %s570_s18 }
  0xf5   : >> { %v572_v1 = vld [vmem:[%s571_s7] ss:$8 sm:$0x3]  ;;  %s582_s30 = sadd.s32 %s1217_s13, %s579_s9  ;;  %s587_s19 = sld [smem:[#allocation5 + %s586_s20]] }
  0xf6   : >> { %s598_s28 = sadd.s32 19, %s1415_s27  ;;  %v573_v2 = vmax.f32 %v561_v0, %v572_v1  ;;  %s583_s21 = scalar_lea.vmem [#allocation2], %s582_s30 }
  0xf7   : >> { %s599_s11 = sld [smem:[#allocation5 + %s598_s28]]  ;;  %v584_v3 = vld [vmem:[%s583_s21] ss:$8 sm:$0x3]  ;;  %s614_s8 = sshra.s32 %s1282_s23, 3 }
  0xf8   : >> { %s617_s1 = sand.u32 7, %s1282_s23  ;;  %v585_v4 = vmax.f32 %v573_v2, %v584_v3  ;;  %s1220_s0 = sshll.u32 %s614_s8, 4 }
  0xf9   : >> { %s620_s2 = sadd.s32 %s1220_s0, %s617_s1  ;;  %s368_s23 = sadd.s32 1, %s1282_s23  }
  0xfa   : >> { %s621_s13 = scalar_lea.vmem [#allocation3], %s620_s2  ;;  %p365_p4 = scmp.ge.s32.totalorder %s368_s23, 32  }
  0xfb   : >> { %s588_s17 = sshra.s32 %s587_s19, 3  ;;  %s591_s24 = sand.u32 7, %s587_s19  ;;  %v1175_v10 = vld [vmem:[%s1566_s3 + $0x30] sm:$0xf] (%p365_p4)  ;;  %v1228_v11 = vld [vmem:[%s1566_s3 + $0x34] sm:$0xf0] (%p365_p4) }
  0xfc   : >> { %s1218_s12 = sshll.u32 %s588_s17, 4  ;;  %v1227_v12 = vld [vmem:[%s1566_s3 + $0x34] sm:$0xf] (%p365_p4)  ;;  %v1176_v13 = vor.u32 (%p365_p4), %v1228_v11, %v1175_v10  ;;  %v1177_v14 = vld [vmem:[%s1566_s3 + $0x38] sm:$0xf0] (%p365_p4)  ;;  %vm863_vm2 = vcmask (%p365_p4), 130112  }
  0xfd   : >> { %s594_s10 = sadd.s32 %s1218_s12, %s591_s24  ;;  %s600_s15 = sshra.s32 %s599_s11, 3  ;;  %v1167_v15 = vld [vmem:[%s1566_s3 + $0x20] sm:$0xf] (%p365_p4)  ;;  %v1226_v16 = vld [vmem:[%s1566_s3 + $0x24] sm:$0xf0] (%p365_p4)  ;;  %v1180_v17 = vor.u32 (%p365_p4), %v1227_v12, %v1177_v14  ;;  %vm867_vm3 = vcmask (%p365_p4), 195712  }
  0xfe   : >> { %s603_s29 = sand.u32 7, %s599_s11  ;;  %s595_s14 = scalar_lea.vmem [#allocation2], %s594_s10  ;;  %v1225_v18 = vld [vmem:[%s1566_s3 + $0x24] sm:$0xf] (%p365_p4)  ;;  %v1169_v19 = vld [vmem:[%s1566_s3 + $0x28] sm:$0xf0] (%p365_p4)  ;;  %676 = vmatpush.bf16.msrb.mxu2 (%p365_p4), %v1176_v13  ;;  %v1168_v20 = vor.u32 (%p365_p4), %v1226_v16, %v1167_v15 }
  0xff   : >> { %v596_v6 = vld [vmem:[%s595_s14] ss:$8 sm:$0x3]  ;;  %s1219_s18 = sshll.u32 %s600_s15, 4  ;;  %695 = vmatpush.bf16.msrb.mxu3 (%p365_p4), %v1180_v17  ;;  %v1172_v21 = vor.u32 (%p365_p4), %v1225_v18, %v1169_v19  ;;  %v1159_v22 = vld [vmem:[%s1566_s3 + $0x10] sm:$0xf] (%p365_p4) }
 0x100   : >> { %v597_v7 = vmax.f32 %v585_v4, %v596_v6  ;;  %s606_s27 = sadd.s32 %s1219_s18, %s603_s29  ;;  %v1224_v23 = vld [vmem:[%s1566_s3 + $0x14] sm:$0xf0] (%p365_p4)  ;;  %v1223_v26 = vld [vmem:[%s1566_s3 + $0x14] sm:$0xf] (%p365_p4)  ;;  %v1161_v27 = vld [vmem:[%s1566_s3 + $0x18] sm:$0xf0] (%p365_p4) }
 0x101   : >> { %s607_s9 = scalar_lea.vmem [#allocation2], %s606_s27  ;;  %367 = sbr.rel (!%p365_p4) target bundleno = 178 (0xb2), region = 106  ;;  %v1160_v28 = vor.u32 (%p365_p4), %v1224_v23, %v1159_v22  ;;  %v1164_v29 = vor.u32 (%p365_p4), %v1223_v26, %v1161_v27  ;;  %v1151_v30 = vld [vmem:[%s1566_s3] sm:$0xf] (%p365_p4)  ;;  %v1222_v31 = vld [vmem:[%s1566_s3 + $0x4] sm:$0xf0] (%p365_p4) }
 0x102   : >> { %v608_v8 = vld [vmem:[%s607_s9] ss:$8 sm:$0x3]  ;;  %677 = vmatpush.bf16.msrb.mxu2 (%p365_p4), %v1168_v20  ;;  %v1221_v32 = vld [vmem:[%s1566_s3 + $0x4] sm:$0xf] (%p365_p4)  ;;  %v1152_v34 = vor.u32 (%p365_p4), %v1222_v31, %v1151_v30  ;;  %vm871_vm4 = vcmask (%p365_p4), 261312  }
 0x103   : >> { %v609_v9 = vmax.f32 %v597_v7, %v608_v8  ;;  %696 = vmatpush.bf16.msrb.mxu3 (%p365_p4), %v1172_v21  ;;  %v1153_v33 = vld [vmem:[%s1566_s3 + $0x8] sm:$0xf0] (%p365_p4)  ;;  %v726_v36 = vld [vmem:[%s1567_s4] sm:$0x3] (%p365_p4)  ;;  %vm890_vm5 = vcmask (%p365_p4), 261120  }
 0x104   : > { %v1156_v35 = vor.u32 (%p365_p4), %v1221_v32, %v1153_v33  ;;  %v728_v38 = vperm.slane (%p365_p4), %v726_v36, 0  ;;  %v729_v41 = vperm.slane (%p365_p4), %v726_v36, 1 }
 0x105   : >> { %622 = vst.msk [vmem:[%s621_s13] ss:$8 sm:$0x3] %vm612_vm1, %v609_v9 }
 0x106   : > { %678 = vmatpush.bf16.msrb.mxu2 %v1160_v28 }
 0x107   : > { %697 = vmatpush.bf16.msrb.mxu3 %v1164_v29 }
 0x10a   : > { %679 = vmatpush.bf16.msrb.mxu2 %v1152_v34 }
 0x10b   : > { %698 = vmatpush.bf16.msrb.mxu3 %v1156_v35 }
 0x10c   : > { %v710_v37 = vld [vmem:[#allocation3] sm:$0xff]  ;;  %v711_v39 = vld [vmem:[#allocation3 + $0x8] sm:$0xff]  ;;  %v712_v48 = vld [vmem:[#allocation3 + $0x10] sm:$0xff] }
 0x10d   : > { %1181 = vmatmul.msk.bf16.vlgmr.msrb.gmra.mxu2 %vm310_vm0, %v1396_v24  ;;  %v714_v62 = vld [vmem:[#allocation3 + $0x20] sm:$0xff]  ;;  %v715_v2 = vld [vmem:[#allocation3 + $0x28] sm:$0xff]  ;;  %v716_v17 = vld [vmem:[#allocation3 + $0x30] sm:$0xff] }
 0x10e   : > { %1183 = vmatmul.msk.bf16.vlgmr.msrb.gmra.mxu3 %vm310_vm0, %v1396_v24  ;;  %v717_v21 = vld [vmem:[#allocation3 + $0x38] sm:$0xff] }
 0x11d   : > { %1182 = vmatmul.msk.bf16.gmra.mxu2 %vm310_vm0, %v1398_v25 }
 0x11e   : > { %1184 = vmatmul.msk.bf16.gmra.mxu3 %vm310_vm0, %v1398_v25  ;;  %v713_v25 = vld [vmem:[#allocation3 + $0x18] sm:$0xff] }
 0x190   : > { %v681_v40 = vpop.f32.mrf.mxu2 }
 0x191   : > { %v718_v42 = vadd.f32 %v710_v37, %v681_v40  ;;  %v700_v43 = vpop.f32.mrf.mxu3 }
 0x192   : > { %v719_v44 = vadd.f32 %v711_v39, %v700_v43 }
 0x193   : > { %v732_v24 = vadd.f32 %v728_v38, %v718_v42 }
 0x194   : > { %v733_v45 = vadd.f32 %v729_v41, %v719_v44 }
 0x195   : > { %v740_v46 = vmul.f32 0.2, %v732_v24 }
 0x196   : > { %v741_v47 = vmul.f32 0.2, %v733_v45 }
 0x197   : > { %v748_v49 = vmax.f32 %v732_v24, %v740_v46 }
 0x198   : > { %v749_v50 = vmax.f32 %v733_v45, %v741_v47  ;;  %v683_v51 = vpop.f32.mrf.mxu2 }
 0x199   : > { %v720_v52 = vadd.f32 %v712_v48, %v683_v51  ;;  %v702_v53 = vpop.f32.mrf.mxu3 }
 0x19a   : > { %v1540_v54 = vpack.c.bf16 %v749_v50, %v748_v49  ;;  %v721_v55 = vadd.f32 %v713_v25, %v702_v53 }
 0x19b   : > { %v734_v56 = vadd.f32 %v728_v38, %v720_v52 }
 0x19c   : > { %760 = vst [vmem:[%s1386_s16] sm:$0xff] %v1540_v54  ;;  %v735_v57 = vadd.f32 %v729_v41, %v721_v55  ;;  %v822_v58 = vunpack.c.l.bf16 %v1540_v54  ;;  %v823_v59 = vunpack.c.h.bf16 %v1540_v54  ;;  %v768_v55 = vunpack.c.l.b16 %v1540_v54 }
 0x19d   : > { %v742_v60 = vmul.f32 0.2, %v734_v56 }
 0x19e   : > { %v743_v61 = vmul.f32 0.2, %v735_v57  ;;  %v830_v63 = vmul.f32 %v822_v58, %v822_v58  ;;  %v831_v0 = vmul.f32 %v823_v59, %v823_v59 }
 0x19f   : > { %v750_v1 = vmax.f32 %v734_v56, %v742_v60  ;;  %v769_v56 = vunpack.c.h.b16 %v1540_v54 }
 0x1a0   : > { %v751_v3 = vmax.f32 %v735_v57, %v743_v61  ;;  %v686_v4 = vpop.f32.mrf.mxu2  ;;  %v838_v6 = vadd.f32 %v831_v0, %v830_v63  ;;  %v859_v61 = vand.u32 127, %v610_v5 }
 0x1a1   : > { %v722_v7 = vadd.f32 %v714_v62, %v686_v4  ;;  %v705_v8 = vpop.f32.mrf.mxu3 }
 0x1a2   : > { %v757_v9 = vpack.c.bf16 %v751_v3, %v750_v1  ;;  %v723_v10 = vadd.f32 %v715_v2, %v705_v8  ;;  %839 = vadd.xlane.f32.xlu0 %v838_v6  ;;  %v861_v62 = vadd.s32 4294967288, %v859_v61  ;;  %v865_v0 = vadd.s32 4294967280, %v859_v61 }
 0x1a3   : > { %v736_v11 = vadd.f32 %v728_v38, %v722_v7  ;;  %v869_v1 = vadd.s32 4294967272, %v859_v61 }
 0x1a4   : > { %761 = vst [vmem:[%s1386_s16 + $0x8] sm:$0xff] %v757_v9  ;;  %v737_v12 = vadd.f32 %v729_v41, %v723_v10  ;;  %v824_v13 = vunpack.c.l.bf16 %v757_v9  ;;  %v825_v14 = vunpack.c.h.bf16 %v757_v9  ;;  %v770_v52 = vunpack.c.l.b16 %v757_v9 }
 0x1a5   : > { %v744_v15 = vmul.f32 0.2, %v736_v11  ;;  %v771_v53 = vunpack.c.h.b16 %v757_v9 }
 0x1a6   : > { %v745_v16 = vmul.f32 0.2, %v737_v12  ;;  %v832_v18 = vmul.f32 %v824_v13, %v824_v13  ;;  %v833_v19 = vmul.f32 %v825_v14, %v825_v14  ;;  %v776_v57 = vpack.c.b16 %v770_v52, %v768_v55 }
 0x1a7   : > { %v752_v20 = vmax.f32 %v736_v11, %v744_v15  ;;  %v777_v58 = vpack.c.b16 %v771_v53, %v769_v56 }
 0x1a8   : > { %v753_v22 = vmax.f32 %v737_v12, %v745_v16  ;;  %v688_v23 = vpop.f32.mrf.mxu2  ;;  %v841_v26 = vadd.f32 %v833_v19, %v832_v18 }
 0x1a9   : > { %v724_v27 = vadd.f32 %v716_v17, %v688_v23  ;;  %v707_v28 = vpop.f32.mrf.mxu3 }
 0x1aa   : > { %v758_v29 = vpack.c.bf16 %v753_v22, %v752_v20  ;;  %v725_v30 = vadd.f32 %v717_v21, %v707_v28  ;;  %842 = vadd.xlane.f32.xlu0 %v841_v26 }
 0x1ab   : > { %v738_v31 = vadd.f32 %v728_v38, %v724_v27 }
 0x1ac   : > { %762 = vst [vmem:[%s1386_s16 + $0x10] sm:$0xff] %v758_v29  ;;  %v739_v32 = vadd.f32 %v729_v41, %v725_v30  ;;  %v826_v33 = vunpack.c.l.bf16 %v758_v29  ;;  %v827_v34 = vunpack.c.h.bf16 %v758_v29  ;;  %v772_v24 = vunpack.c.l.b16 %v758_v29 }
 0x1ad   : > { %v746_v35 = vmul.f32 0.2, %v738_v31  ;;  %v773_v45 = vunpack.c.h.b16 %v758_v29 }
 0x1ae   : > { %v747_v36 = vmul.f32 0.2, %v739_v32  ;;  %v834_v37 = vmul.f32 %v826_v33, %v826_v33  ;;  %v835_v39 = vmul.f32 %v827_v34, %v827_v34 }
 0x1af   : > { %v754_v40 = vmax.f32 %v738_v31, %v746_v35 }
 0x1b0   : > { %v755_v42 = vmax.f32 %v739_v32, %v747_v36  ;;  %v844_v43 = vadd.f32 %v835_v39, %v834_v37 }
 0x1b2   : > { %v759_v44 = vpack.c.bf16 %v755_v42, %v754_v40  ;;  %845 = vadd.xlane.f32.xlu1 %v844_v43 }
 0x1b4   : > { %763 = vst [vmem:[%s1386_s16 + $0x18] sm:$0xff] %v759_v44  ;;  %v774_v46 = vunpack.c.l.b16 %v759_v44  ;;  %v775_v47 = vunpack.c.h.b16 %v759_v44  ;;  %v828_v38 = vunpack.c.l.bf16 %v759_v44  ;;  %v829_v48 = vunpack.c.h.bf16 %v759_v44 }
 0x1b6   : > { %v778_v49 = vpack.c.b16 %v774_v46, %v772_v24  ;;  %v779_v41 = vpack.c.b16 %v775_v47, %v773_v45  ;;  %v836_v25 = vmul.f32 %v828_v38, %v828_v38  ;;  %v837_v50 = vmul.f32 %v829_v48, %v829_v48 }
 0x1b8   : > { %790 = vmatpush.bf16.xpose.msrb.mxu0 %v778_v49  ;;  %809 = vmatpush.bf16.xpose.msrb.mxu1 %v779_v41  ;;  %v847_v51 = vadd.f32 %v837_v50, %v836_v25 }
 0x1ba   : > { %848 = vadd.xlane.f32.xlu1 %v847_v51 }
 0x1c0   : > { %791 = vmatpush.bf16.xpose.msrb.mxu0 %v776_v57  ;;  %810 = vmatpush.bf16.xpose.msrb.mxu1 %v777_v58 }
 0x1c7   : > { %792 = vmatmul.bf16.vlgmr.msrb.gmra.mxu0 %v776_v57  ;;  %811 = vmatmul.bf16.vlgmr.msrb.gmra.mxu1 %v777_v58 }
 0x1d7   : > { %797 = vmatmul.bf16.gmra.mxu0 %v778_v49  ;;  %816 = vmatmul.bf16.gmra.mxu1 %v779_v41 }
 0x215   : > { %v840_v59 = vpop.xlane.xlu0 %839 }
 0x216   : > { %v860_v4 = vperm.slane %v840_v59, %v859_v61 }
 0x21d   : > { %v843_v63 = vpop.xlane.xlu0 %842 }
 0x21e   : > { %v862_v3 = vperm.slane %v843_v63, %v861_v62 }
 0x220   : > { %v864_v10 = vsel %vm863_vm2, %v862_v3, %v860_v4 }
 0x225   : > { %v846_v60 = vpop.xlane.xlu1 %845 }
 0x226   : > { %v866_v54 = vperm.slane %v846_v60, %v865_v0 }
 0x228   : > { %v868_v11 = vsel %vm867_vm3, %v866_v54, %v864_v10 }
 0x22d   : > { %v849_v2 = vpop.xlane.xlu1 %848 }
 0x22e   : > { %v870_v6 = vperm.slane %v849_v2, %v869_v1 }
 0x230   : > { %v872_v12 = vsel %vm871_vm4, %v870_v6, %v868_v11 }
 0x244   : > { %v793_v7 = vpop.f32.mrf.mxu0  ;;  %v812_v8 = vpop.f32.mrf.mxu1 }
 0x245   : > { %v813_v9 = vadd.f32 %v812_v8, %v793_v7 }
 0x247   : > { %v850_v5 = vmul.f32 2.0, %v813_v9 }
 0x249   : > { %v886_v13 = vsub.f32 %v850_v5, %v872_v12 }
 0x24b   : > { %891 = vst.msk [vmem:[%s1394_s22] sm:$0xff] %vm890_vm5, %v886_v13 }
 0x24c   : > { %v795_v14 = vpop.f32.mrf.mxu0  ;;  %v814_v15 = vpop.f32.mrf.mxu1 }
 0x24d   : > { %v815_v16 = vadd.f32 %v814_v15, %v795_v14 }
 0x24f   : > { %v851_v17 = vmul.f32 2.0, %v815_v16 }
 0x251   : > { %v887_v18 = vsub.f32 %v851_v17, %v872_v12 }
 0x253   : > { %892 = vst.msk [vmem:[%s1394_s22 + $0x8] sm:$0xff] %vm890_vm5, %v887_v18 }
 0x254   : > { %v798_v19 = vpop.f32.mrf.mxu0  ;;  %v817_v20 = vpop.f32.mrf.mxu1 }
 0x255   : > { %v818_v21 = vadd.f32 %v817_v20, %v798_v19 }
 0x257   : > { %v852_v22 = vmul.f32 2.0, %v818_v21 }
 0x259   : > { %v888_v23 = vsub.f32 %v852_v22, %v872_v12 }
 0x25b   : > { %893 = vst.msk [vmem:[%s1394_s22 + $0x10] sm:$0xff] %vm890_vm5, %v888_v23 }
 0x25c   : > { %v800_v26 = vpop.f32.mrf.mxu0  ;;  %v819_v27 = vpop.f32.mrf.mxu1 }
 0x25d   : > { %v820_v28 = vadd.f32 %v819_v27, %v800_v26 }
 0x25f   : > { %v853_v29 = vmul.f32 2.0, %v820_v28 }
 0x261   : > { %v889_v30 = vsub.f32 %v853_v29, %v872_v12 }
 0x263   : > { %894 = vst.msk [vmem:[%s1394_s22 + $0x18] sm:$0xff] %vm890_vm5, %v889_v30 }
 0x264 PF: > { %s25_s25 = sadd.s32 1, %s1278_s25  }
 0x265   : > { %p22_p5 = scmp.ge.s32.totalorder %s25_s25, 4  }
 0x267   :  { %24 = sbr.rel (!%p22_p5) target bundleno = 8 (0x8), region = 117 }

// kernel: dgcnn_forward.8
= control target key start
LH: loop header
LB: loop body
LE: loop exit
PB: predicated region body
PF: predicated region fallthrough
CT: control target
= control target key end

     0   :  { %s1889_s24 = smov [#allocation5]   ;;  %s2472_s0 = inlined_call_operand.vmem [shape: s32[1280], index: 0, kind: input, shape index: {}]   ;;  %s2473_s1 = inlined_call_operand.vmem [shape: bf16[2,32,256], index: 1, kind: input, shape index: {}]   ;;  %s2474_s2 = inlined_call_operand.vmem [shape: bf16[256,256], index: 2, kind: input, shape index: {}]   ;;  %s2475_s3 = inlined_call_operand.vmem [shape: bf16[256,256], index: 3, kind: input, shape index: {}]   ;;  %s2476_s4 = inlined_call_operand.vmem [shape: f32[1,256], index: 4, kind: input, shape index: {}]   ;;  %s2477_s5 = inlined_call_operand.vmem [shape: bf16[2,32,256], index: 5, kind: output, shape index: {0}]   ;;  %s2478_s6 = inlined_call_operand.vmem [shape: f32[2,32,32], index: 6, kind: output, shape index: {1}]  }
   0x1   :  { %2479 = sst [smem:[#allocation7_spill]] %s2473_s1  ;;  %s13_s23 = sshll.u32 %s2472_s0, 4  ;;  %s14_s23 = int_to_ptr.vmem [resolvable:$true] %s13_s23 }
   0x2   :  { %2480 = sst [smem:[#allocation8_spill]] %s2474_s2 }
   0x3   :  { %16 = dma.vmem_to_smem %s14_s23, 160, %s1889_s24, [#allocation4] }
   0x4   :  { %1879 = dma.done.wait [#allocation4], 160 }
   0x5   :  { %1880 = vsyncadd [#allocation4], 4294967136 }
   0x6   :  { %19 = sfence }
   0x7   :  { %s1928_s25 = smov 0  }
   0x8 LB: > { %s1934_s26 = sadd.s32 4294967295, %s1883_s25   ;;  %p1422_p0 = scmp.ge.s32.totalorder %s1883_s25, 1  ;;  %s1883_s25 = sphi %s1928_s25, %s25_s25  }
   0x9   : > { %p199_p1 = scmp.lt.s32.totalorder %s1883_s25, 3 }
   0xb   : > { %p200_p2 = pnand %p1422_p0, %p199_p1 }
   0xc   : > { %s2481_s2 = sld [smem:[#allocation8_spill]] (!%p200_p2)  ;;  %p232_p3 = scmp.lt.s32.totalorder (!%p200_p2), %s1934_s26, 1 }
   0xd   : > { %203 = sbr.rel (%p200_p2) target bundleno = 659 (0x293), region = 36  ;;  %s2482_s1 = sld [smem:[#allocation7_spill]] (!%p200_p2) }
   0xe   : > { %s2161_s27 = smov (!%p200_p2), 0  }
  0x12   : > { %v1503_v0 = vld [vmem:[%s2481_s2 + $0x70] sm:$0xf]  ;;  %v1768_v1 = vld [vmem:[%s2481_s2 + $0x74] sm:$0xf0]  ;;  %v1767_v5 = vld [vmem:[%s2481_s2 + $0x74] sm:$0xf] }
  0x13   : > { %v1567_v2 = vld [vmem:[%s2481_s2 + $0xf0] sm:$0xf]  ;;  %v1504_v3 = vor.u32 %v1768_v1, %v1503_v0  ;;  %v1784_v4 = vld [vmem:[%s2481_s2 + $0xf4] sm:$0xf0]  ;;  %v1505_v6 = vld [vmem:[%s2481_s2 + $0x78] sm:$0xf0] }
  0x14   : > { %v1568_v7 = vor.u32 %v1784_v4, %v1567_v2  ;;  %v1508_v8 = vor.u32 %v1767_v5, %v1505_v6  ;;  %v1783_v9 = vld [vmem:[%s2481_s2 + $0xf4] sm:$0xf]  ;;  %v1569_v10 = vld [vmem:[%s2481_s2 + $0xf8] sm:$0xf0]  ;;  %v1495_v11 = vld [vmem:[%s2481_s2 + $0x60] sm:$0xf] }
  0x15   : > { %464 = vmatpush.bf16.msra.mxu0 %v1504_v3  ;;  %v1572_v12 = vor.u32 %v1783_v9, %v1569_v10  ;;  %v1766_v13 = vld [vmem:[%s2481_s2 + $0x64] sm:$0xf0]  ;;  %v1559_v14 = vld [vmem:[%s2481_s2 + $0xe0] sm:$0xf]  ;;  %v1765_v18 = vld [vmem:[%s2481_s2 + $0x64] sm:$0xf] }
  0x16   : > { %v1782_v15 = vld [vmem:[%s2481_s2 + $0xe4] sm:$0xf0]  ;;  %483 = vmatpush.bf16.msra.mxu1 %v1568_v7  ;;  %502 = vmatpush.bf16.msra.mxu2 %v1508_v8  ;;  %v1496_v16 = vor.u32 %v1766_v13, %v1495_v11  ;;  %v1497_v19 = vld [vmem:[%s2481_s2 + $0x68] sm:$0xf0]  ;;  %v1781_v20 = vld [vmem:[%s2481_s2 + $0xe4] sm:$0xf] }
  0x17   : > { %v1560_v17 = vor.u32 %v1782_v15, %v1559_v14  ;;  %521 = vmatpush.bf16.msra.mxu3 %v1572_v12  ;;  %v1500_v21 = vor.u32 %v1765_v18, %v1497_v19  ;;  %v1561_v22 = vld [vmem:[%s2481_s2 + $0xe8] sm:$0xf0]  ;;  %v1487_v23 = vld [vmem:[%s2481_s2 + $0x50] sm:$0xf]  ;;  %v1764_v24 = vld [vmem:[%s2481_s2 + $0x54] sm:$0xf0] }
  0x18   : > { %v1564_v25 = vor.u32 %v1781_v20, %v1561_v22  ;;  %v1551_v26 = vld [vmem:[%s2481_s2 + $0xd0] sm:$0xf]  ;;  %v1780_v27 = vld [vmem:[%s2481_s2 + $0xd4] sm:$0xf0]  ;;  %v1763_v28 = vld [vmem:[%s2481_s2 + $0x54] sm:$0xf]  ;;  %v1488_v29 = vor.u32 %v1764_v24, %v1487_v23 }
  0x19   : > { %465 = vmatpush.bf16.msra.mxu0 %v1496_v16  ;;  %v1489_v30 = vld [vmem:[%s2481_s2 + $0x58] sm:$0xf0]  ;;  %v1779_v31 = vld [vmem:[%s2481_s2 + $0xd4] sm:$0xf]  ;;  %v1552_v33 = vor.u32 %v1780_v27, %v1551_v26  ;;  %v1479_v35 = vld [vmem:[%s2481_s2 + $0x40] sm:$0xf] }
  0x1a   : > { %v1553_v32 = vld [vmem:[%s2481_s2 + $0xd8] sm:$0xf0]  ;;  %484 = vmatpush.bf16.msra.mxu1 %v1560_v17  ;;  %503 = vmatpush.bf16.msra.mxu2 %v1500_v21  ;;  %v1492_v34 = vor.u32 %v1763_v28, %v1489_v30  ;;  %v1762_v36 = vld [vmem:[%s2481_s2 + $0x44] sm:$0xf0]  ;;  %v1543_v37 = vld [vmem:[%s2481_s2 + $0xc0] sm:$0xf] }
  0x1b   : > { %522 = vmatpush.bf16.msra.mxu3 %v1564_v25  ;;  %v1556_v38 = vor.u32 %v1779_v31, %v1553_v32  ;;  %v1778_v39 = vld [vmem:[%s2481_s2 + $0xc4] sm:$0xf0]  ;;  %v1761_v40 = vld [vmem:[%s2481_s2 + $0x44] sm:$0xf]  ;;  %v1481_v41 = vld [vmem:[%s2481_s2 + $0x48] sm:$0xf0]  ;;  %v1480_v44 = vor.u32 %v1762_v36, %v1479_v35 }
  0x1c   : > { %v1777_v42 = vld [vmem:[%s2481_s2 + $0xc4] sm:$0xf]  ;;  %v1545_v43 = vld [vmem:[%s2481_s2 + $0xc8] sm:$0xf0]  ;;  %v1544_v45 = vor.u32 %v1778_v39, %v1543_v37  ;;  %v1484_v46 = vor.u32 %v1761_v40, %v1481_v41  ;;  %v1471_v47 = vld [vmem:[%s2481_s2 + $0x30] sm:$0xf] }
  0x1d   : > { %466 = vmatpush.bf16.msra.mxu0 %v1488_v29  ;;  %v1760_v48 = vld [vmem:[%s2481_s2 + $0x34] sm:$0xf0]  ;;  %v1535_v49 = vld [vmem:[%s2481_s2 + $0xb0] sm:$0xf]  ;;  %v1548_v50 = vor.u32 %v1777_v42, %v1545_v43  ;;  %v1759_v52 = vld [vmem:[%s2481_s2 + $0x34] sm:$0xf] }
  0x1e   : > { %485 = vmatpush.bf16.msra.mxu1 %v1552_v33  ;;  %504 = vmatpush.bf16.msra.mxu2 %v1492_v34  ;;  %v1776_v51 = vld [vmem:[%s2481_s2 + $0xb4] sm:$0xf0]  ;;  %v1473_v53 = vld [vmem:[%s2481_s2 + $0x38] sm:$0xf0]  ;;  %v1775_v54 = vld [vmem:[%s2481_s2 + $0xb4] sm:$0xf]  ;;  %v1472_v56 = vor.u32 %v1760_v48, %v1471_v47 }
  0x1f   : > { %523 = vmatpush.bf16.msra.mxu3 %v1556_v38  ;;  %v1537_v55 = vld [vmem:[%s2481_s2 + $0xb8] sm:$0xf0]  ;;  %v1536_v57 = vor.u32 %v1776_v51, %v1535_v49  ;;  %v1476_v58 = vor.u32 %v1759_v52, %v1473_v53  ;;  %v1463_v59 = vld [vmem:[%s2481_s2 + $0x20] sm:$0xf]  ;;  %v1758_v60 = vld [vmem:[%s2481_s2 + $0x24] sm:$0xf0] }
  0x20   : > { %v1527_v61 = vld [vmem:[%s2481_s2 + $0xa0] sm:$0xf]  ;;  %v1540_v62 = vor.u32 %v1775_v54, %v1537_v55  ;;  %v1774_v63 = vld [vmem:[%s2481_s2 + $0xa4] sm:$0xf0]  ;;  %v1757_v0 = vld [vmem:[%s2481_s2 + $0x24] sm:$0xf]  ;;  %v1464_v4 = vor.u32 %v1758_v60, %v1463_v59 }
  0x21   : > { %467 = vmatpush.bf16.msra.mxu0 %v1480_v44  ;;  %v1465_v1 = vld [vmem:[%s2481_s2 + $0x28] sm:$0xf0]  ;;  %v1773_v2 = vld [vmem:[%s2481_s2 + $0xa4] sm:$0xf]  ;;  %v1455_v5 = vld [vmem:[%s2481_s2 + $0x10] sm:$0xf]  ;;  %v1528_v6 = vor.u32 %v1774_v63, %v1527_v61 }
  0x22   : > { %486 = vmatpush.bf16.msra.mxu1 %v1544_v45  ;;  %505 = vmatpush.bf16.msra.mxu2 %v1484_v46  ;;  %v1529_v3 = vld [vmem:[%s2481_s2 + $0xa8] sm:$0xf0]  ;;  %v1468_v7 = vor.u32 %v1757_v0, %v1465_v1  ;;  %v1756_v8 = vld [vmem:[%s2481_s2 + $0x14] sm:$0xf0]  ;;  %v1519_v9 = vld [vmem:[%s2481_s2 + $0x90] sm:$0xf] }
  0x23   : > { %524 = vmatpush.bf16.msra.mxu3 %v1548_v50  ;;  %v1772_v10 = vld [vmem:[%s2481_s2 + $0x94] sm:$0xf0]  ;;  %v1532_v11 = vor.u32 %v1773_v2, %v1529_v3  ;;  %v1755_v12 = vld [vmem:[%s2481_s2 + $0x14] sm:$0xf]  ;;  %v1457_v13 = vld [vmem:[%s2481_s2 + $0x18] sm:$0xf0]  ;;  %v1456_v16 = vor.u32 %v1756_v8, %v1455_v5 }
  0x24   : > { %v1771_v14 = vld [vmem:[%s2481_s2 + $0x94] sm:$0xf]  ;;  %v1521_v15 = vld [vmem:[%s2481_s2 + $0x98] sm:$0xf0]  ;;  %v1447_v17 = vld [vmem:[%s2481_s2] sm:$0xf]  ;;  %v1520_v18 = vor.u32 %v1772_v10, %v1519_v9  ;;  %v1460_v19 = vor.u32 %v1755_v12, %v1457_v13 }
  0x25   : > { %468 = vmatpush.bf16.msra.mxu0 %v1472_v56  ;;  %s233_s24 = scalar_select %p232_p3, %s1934_s26, 1  ;;  %v1754_v20 = vld [vmem:[%s2481_s2 + $0x4] sm:$0xf0]  ;;  %v1511_v21 = vld [vmem:[%s2481_s2 + $0x80] sm:$0xf]  ;;  %v1524_v23 = vor.u32 %v1771_v14, %v1521_v15 }
  0x26   : > { %487 = vmatpush.bf16.msra.mxu1 %v1536_v57  ;;  %506 = vmatpush.bf16.msra.mxu2 %v1476_v58  ;;  %v1770_v22 = vld [vmem:[%s2481_s2 + $0x84] sm:$0xf0]  ;;  %v1753_v24 = vld [vmem:[%s2481_s2 + $0x4] sm:$0xf]  ;;  %v1449_v25 = vld [vmem:[%s2481_s2 + $0x8] sm:$0xf0]  ;;  %v1448_v28 = vor.u32 %v1754_v20, %v1447_v17 }
  0x27   : > { %525 = vmatpush.bf16.msra.mxu3 %v1540_v62  ;;  %s1746_s12 = sshll.u32 %s233_s24, 5  ;;  %v1769_v26 = vld [vmem:[%s2481_s2 + $0x84] sm:$0xf]  ;;  %v1513_v27 = vld [vmem:[%s2481_s2 + $0x88] sm:$0xf0]  ;;  %v1512_v31 = vor.u32 %v1770_v22, %v1511_v21  ;;  %v1452_v32 = vor.u32 %v1753_v24, %v1449_v25 }
  0x28   : > { %s236_s19 = scalar_lea.vmem %s2482_s1, %s1746_s12  ;;  %s2138_s22 = scalar_lea.vmem %s2477_s5, %s1746_s12  ;;  %v1516_v35 = vor.u32 %v1769_v26, %v1513_v27 }
  0x29   : > { %469 = vmatpush.bf16.msra.mxu0 %v1464_v4  ;;  %s2143_s0 = scalar_lea.vmem %s2478_s6, %s1746_s12  ;;  %v1431_v29 = vld [vmem:[%s236_s19] sm:$0xf]  ;;  %v1750_v30 = vld [vmem:[%s236_s19 + $0x4] sm:$0xf0]  ;;  %v1749_v33 = vld [vmem:[%s236_s19 + $0x4] sm:$0xf] }
  0x2a   : > { %488 = vmatpush.bf16.msra.mxu1 %v1528_v6  ;;  %507 = vmatpush.bf16.msra.mxu2 %v1468_v7  ;;  %v1433_v34 = vld [vmem:[%s236_s19 + $0x8] sm:$0xf0]  ;;  %v2145_v36 = vor.u32 %v1750_v30, %v1431_v29  ;;  %v1439_v38 = vld [vmem:[%s236_s19 + $0x10] sm:$0xf]  ;;  %v1752_v39 = vld [vmem:[%s236_s19 + $0x14] sm:$0xf0] }
  0x2b   : > { %526 = vmatpush.bf16.msra.mxu3 %v1532_v11  ;;  %v2147_v37 = vor.u32 %v1749_v33, %v1433_v34  ;;  %v1751_v40 = vld [vmem:[%s236_s19 + $0x14] sm:$0xf]  ;;  %v1441_v41 = vld [vmem:[%s236_s19 + $0x18] sm:$0xf0]  ;;  %v2153_v42 = vor.u32 %v1752_v39, %v1439_v38 }
  0x2c   : > { %v2155_v43 = vor.u32 %v1751_v40, %v1441_v41 }
  0x2d   : > { %470 = vmatpush.bf16.msra.mxu0 %v1456_v16 }
  0x2e   : > { %489 = vmatpush.bf16.msra.mxu1 %v1520_v18  ;;  %508 = vmatpush.bf16.msra.mxu2 %v1460_v19 }
  0x2f   : > { %527 = vmatpush.bf16.msra.mxu3 %v1524_v23 }
  0x31   : > { %471 = vmatpush.bf16.msra.mxu0 %v1448_v28 }
  0x32   : > { %490 = vmatpush.bf16.msra.mxu1 %v1512_v31  ;;  %509 = vmatpush.bf16.msra.mxu2 %v1452_v32 }
  0x33   : > { %528 = vmatpush.bf16.msra.mxu3 %v1516_v35 }
  0x34   : > { %472 = vmatmul.bf16.vlgmr.msra.gmra.mxu0 %v2145_v36 }
  0x35   : > { %491 = vmatmul.bf16.vlgmr.msra.gmra.mxu1 %v2147_v37  ;;  %510 = vmatmul.bf16.vlgmr.msra.gmra.mxu2 %v2145_v36 }
  0x36   : > { %529 = vmatmul.bf16.vlgmr.msra.gmra.mxu3 %v2147_v37 }
  0x44   : > { %477 = vmatmul.bf16.gmra.mxu0 %v2153_v42 }
  0x45   : > { %496 = vmatmul.bf16.gmra.mxu1 %v2155_v43  ;;  %515 = vmatmul.bf16.gmra.mxu2 %v2153_v42 }
  0x46   : > { %534 = vmatmul.bf16.gmra.mxu3 %v2155_v43 }
  0xb1   : > { %v473_v44 = vpop.f32.mrf.mxu0 }
  0xb2   : > { %v492_v45 = vpop.f32.mrf.mxu1 }
  0xb3   : > { %v493_v46 = vadd.f32 %v492_v45, %v473_v44 }
  0xb5   : > { %540 = vst [vmem:[#allocation2] sm:$0xff] %v493_v46 }
  0xb8   : > { %v511_v47 = vpop.f32.mrf.mxu2 }
  0xb9   : > { %v530_v48 = vpop.f32.mrf.mxu3  ;;  %v475_v49 = vpop.f32.mrf.mxu0 }
  0xba   : > { %v531_v50 = vadd.f32 %v530_v48, %v511_v47  ;;  %v494_v51 = vpop.f32.mrf.mxu1 }
  0xbb   : > { %v495_v52 = vadd.f32 %v494_v51, %v475_v49 }
  0xbc   : > { %541 = vst [vmem:[#allocation2 + $0x8] sm:$0xff] %v531_v50 }
  0xbd   : > { %542 = vst [vmem:[#allocation2 + $0x10] sm:$0xff] %v495_v52 }
  0xc0   : > { %v513_v53 = vpop.f32.mrf.mxu2 }
  0xc1   : > { %v532_v54 = vpop.f32.mrf.mxu3  ;;  %v478_v55 = vpop.f32.mrf.mxu0 }
  0xc2   : > { %v533_v56 = vadd.f32 %v532_v54, %v513_v53  ;;  %v497_v57 = vpop.f32.mrf.mxu1 }
  0xc3   : > { %v498_v58 = vadd.f32 %v497_v57, %v478_v55 }
  0xc4   : > { %543 = vst [vmem:[#allocation2 + $0x18] sm:$0xff] %v533_v56 }
  0xc5   : > { %544 = vst [vmem:[#allocation2 + $0x20] sm:$0xff] %v498_v58 }
  0xc8   : > { %v516_v59 = vpop.f32.mrf.mxu2 }
  0xc9   : > { %v535_v60 = vpop.f32.mrf.mxu3  ;;  %v480_v61 = vpop.f32.mrf.mxu0 }
  0xca   : > { %v536_v62 = vadd.f32 %v535_v60, %v516_v59  ;;  %v499_v63 = vpop.f32.mrf.mxu1 }
  0xcb   : > { %v500_v0 = vadd.f32 %v499_v63, %v480_v61 }
  0xcc   : > { %545 = vst [vmem:[#allocation2 + $0x28] sm:$0xff] %v536_v62 }
  0xcd   : > { %546 = vst [vmem:[#allocation2 + $0x30] sm:$0xff] %v500_v0 }
  0xd0   : > { %v518_v1 = vpop.f32.mrf.mxu2 }
  0xd1   : > { %v537_v2 = vpop.f32.mrf.mxu3 }
  0xd2   : > { %v538_v3 = vadd.f32 %v537_v2, %v518_v1 }
  0xd4   : > { %547 = vst [vmem:[#allocation2 + $0x38] sm:$0xff] %v538_v3 }
  0xd5 LB: >> { %s1573_s28 = sshll.u32 %s1934_s26, 5  ;;  %v795_v41 = vlaneseq  ;;  %s1887_s27 = sphi %s2161_s27, %s553_s27  }
  0xd6   : >> { %s555_s29 = sadd.s32 %s1887_s27, %s1573_s28 }
  0xd7   : >> { %s2168_s30 = smul.u32 20, %s555_s29  ;;  %vm797_vm0 = vcmp.lt.s32.totalorder %v795_v41, 256 }
  0xd9   : >> { %s557_s7 = sld [smem:[#allocation5 + %s2168_s30]]  ;;  %s567_s8 = sadd.s32 1, %s2168_s30 }
  0xda   : >> { %s568_s9 = sld [smem:[#allocation5 + %s567_s8]]  ;;  %s579_s10 = sadd.s32 2, %s2168_s30 }
  0xdb   : >> { %s580_s11 = sld [smem:[#allocation5 + %s579_s10]]  ;;  %s591_s12 = sadd.s32 3, %s2168_s30 }
  0xdc   : >> { %s2174_s13 = sld [smem:[#allocation5 + %s591_s12]]  ;;  %s603_s14 = sadd.s32 4, %s2168_s30 }
  0xdd   : >> { %s2177_s15 = sld [smem:[#allocation5 + %s603_s14]]  ;;  %s615_s16 = sadd.s32 5, %s2168_s30 }
  0xde   : >> { %s2180_s17 = sld [smem:[#allocation5 + %s615_s16]] }
  0xdf   : >> { %s558_s19 = sshra.s32 %s557_s7, 3  ;;  %s561_s20 = sand.u32 7, %s557_s7 }
  0xe0   : >> { %s1785_s21 = sshll.u32 %s558_s19, 4  ;;  %s569_s23 = sshra.s32 %s568_s9, 3 }
  0xe1   : >> { %s564_s24 = sadd.s32 %s1785_s21, %s561_s20  ;;  %s572_s28 = sand.u32 7, %s568_s9 }
  0xe2   : >> { %s1786_s29 = sshll.u32 %s569_s23, 4  ;;  %s565_s8 = scalar_lea.vmem [#allocation2], %s564_s24 }
  0xe3   : >> { %v566_v4 = vld [vmem:[%s565_s8] ss:$8 sm:$0x3]  ;;  %s575_s10 = sadd.s32 %s1786_s29, %s572_s28  ;;  %s581_s12 = sshra.s32 %s580_s11, 3 }
  0xe4   : >> { %s584_s14 = sand.u32 7, %s580_s11  ;;  %s576_s1 = scalar_lea.vmem [#allocation2], %s575_s10 }
  0xe5   : >> { %v577_v5 = vld [vmem:[%s576_s1] ss:$8 sm:$0x3]  ;;  %s1787_s16 = sshll.u32 %s581_s12, 4  ;;  %s593_s18 = sshra.s32 %s2174_s13, 3 }
  0xe6   : >> { %v578_v6 = vmax.f32 %v566_v4, %v577_v5  ;;  %s587_s7 = sadd.s32 %s1787_s16, %s584_s14  ;;  %s596_s19 = sand.u32 7, %s2174_s13 }
  0xe7   : >> { %s1788_s2 = sshll.u32 %s593_s18, 4  ;;  %s588_s20 = scalar_lea.vmem [#allocation2], %s587_s7 }
  0xe8   : >> { %v589_v7 = vld [vmem:[%s588_s20] ss:$8 sm:$0x3]  ;;  %s599_s9 = sadd.s32 %s1788_s2, %s596_s19  ;;  %s605_s21 = sshra.s32 %s2177_s15, 3 }
  0xe9   : >> { %v590_v8 = vmax.f32 %v578_v6, %v589_v7  ;;  %s608_s23 = sand.u32 7, %s2177_s15  ;;  %s600_s11 = scalar_lea.vmem [#allocation2], %s599_s9 }
  0xea   : >> { %v601_v9 = vld [vmem:[%s600_s11] ss:$8 sm:$0x3]  ;;  %s1789_s1 = sshll.u32 %s605_s21, 4  ;;  %s617_s24 = sshra.s32 %s2180_s17, 3 }
  0xeb   : >> { %s611_s28 = sadd.s32 %s1789_s1, %s608_s23  ;;  %s620_s29 = sand.u32 7, %s2180_s17  ;;  %v602_v10 = vmax.f32 %v590_v8, %v601_v9 }
  0xec   : >> { %s1790_s13 = sshll.u32 %s617_s24, 4  ;;  %s612_s18 = scalar_lea.vmem [#allocation2], %s611_s28 }
  0xed   : >> { %v613_v11 = vld [vmem:[%s612_s18] ss:$8 sm:$0x3]  ;;  %s623_s8 = sadd.s32 %s1790_s13, %s620_s29  ;;  %s2483_s2 = sadd.s32 6, %s2168_s30 }
  0xee   : >> { %s628_s10 = sld [smem:[#allocation5 + %s2483_s2]]  ;;  %s639_s12 = sadd.s32 7, %s2168_s30  ;;  %v614_v12 = vmax.f32 %v602_v10, %v613_v11 }
  0xef   : >> { %s640_s14 = sld [smem:[#allocation5 + %s639_s12]]  ;;  %s651_s16 = sadd.s32 8, %s2168_s30 }
  0xf0   : >> { %s652_s15 = sld [smem:[#allocation5 + %s651_s16]]  ;;  %s663_s7 = sadd.s32 9, %s2168_s30 }
  0xf1   : >> { %s624_s19 = scalar_lea.vmem [#allocation2], %s623_s8  ;;  %s2194_s20 = sld [smem:[#allocation5 + %s663_s7]] }
  0xf2   : >> { %v625_v13 = vld [vmem:[%s624_s19] ss:$8 sm:$0x3]  ;;  %s675_s17 = sadd.s32 10, %s2168_s30  ;;  %s687_s21 = sadd.s32 11, %s2168_s30 }
  0xf3   : >> { %s2197_s9 = sld [smem:[#allocation5 + %s675_s17]]  ;;  %v626_v14 = vmax.f32 %v614_v12, %v625_v13 }
  0xf4   : >> { %s629_s23 = sshra.s32 %s628_s10, 3  ;;  %s632_s11 = sand.u32 7, %s628_s10 }
  0xf5   : >> { %s1791_s1 = sshll.u32 %s629_s23, 4  ;;  %s2200_s24 = sld [smem:[#allocation5 + %s687_s21]] }
  0xf6   : >> { %s635_s28 = sadd.s32 %s1791_s1, %s632_s11  ;;  %s641_s29 = sshra.s32 %s640_s14, 3 }
  0xf7   : >> { %s644_s13 = sand.u32 7, %s640_s14  ;;  %s636_s18 = scalar_lea.vmem [#allocation2], %s635_s28 }
  0xf8   : >> { %v637_v15 = vld [vmem:[%s636_s18] ss:$8 sm:$0x3]  ;;  %s1792_s8 = sshll.u32 %s641_s29, 4  ;;  %s653_s2 = sshra.s32 %s652_s15, 3 }
  0xf9   : >> { %v638_v16 = vmax.f32 %v626_v14, %v637_v15  ;;  %s647_s12 = sadd.s32 %s1792_s8, %s644_s13  ;;  %s656_s16 = sand.u32 7, %s652_s15 }
  0xfa   : >> { %s1793_s7 = sshll.u32 %s653_s2, 4  ;;  %s648_s10 = scalar_lea.vmem [#allocation2], %s647_s12 }
  0xfb   : >> { %v649_v17 = vld [vmem:[%s648_s10] ss:$8 sm:$0x3]  ;;  %s659_s19 = sadd.s32 %s1793_s7, %s656_s16  ;;  %s665_s17 = sshra.s32 %s2194_s20, 3 }
  0xfc   : >> { %v650_v18 = vmax.f32 %v638_v16, %v649_v17  ;;  %s668_s21 = sand.u32 7, %s2194_s20  ;;  %s660_s14 = scalar_lea.vmem [#allocation2], %s659_s19 }
  0xfd   : >> { %v661_v19 = vld [vmem:[%s660_s14] ss:$8 sm:$0x3]  ;;  %s1794_s23 = sshll.u32 %s665_s17, 4  ;;  %s677_s11 = sshra.s32 %s2197_s9, 3 }
  0xfe   : >> { %v662_v20 = vmax.f32 %v650_v18, %v661_v19  ;;  %s671_s1 = sadd.s32 %s1794_s23, %s668_s21  ;;  %s680_s28 = sand.u32 7, %s2197_s9 }
  0xff   : >> { %s1795_s15 = sshll.u32 %s677_s11, 4  ;;  %s672_s29 = scalar_lea.vmem [#allocation2], %s671_s1 }
 0x100   : >> { %v673_v21 = vld [vmem:[%s672_s29] ss:$8 sm:$0x3]  ;;  %s683_s13 = sadd.s32 %s1795_s15, %s680_s28  ;;  %s689_s18 = sshra.s32 %s2200_s24, 3 }
 0x101   : >> { %s692_s8 = sand.u32 7, %s2200_s24  ;;  %v674_v22 = vmax.f32 %v662_v20, %v673_v21  ;;  %s1796_s20 = sshll.u32 %s689_s18, 4 }
 0x102   : >> { %s699_s2 = sadd.s32 12, %s2168_s30  ;;  %s684_s12 = scalar_lea.vmem [#allocation2], %s683_s13 }
 0x103   : >> { %v685_v23 = vld [vmem:[%s684_s12] ss:$8 sm:$0x3]  ;;  %s695_s16 = sadd.s32 %s1796_s20, %s692_s8  ;;  %s700_s7 = sld [smem:[#allocation5 + %s699_s2]] }
 0x104   : >> { %s711_s10 = sadd.s32 13, %s2168_s30  ;;  %s723_s9 = sadd.s32 14, %s2168_s30  ;;  %v686_v24 = vmax.f32 %v674_v22, %v685_v23 }
 0x105   : >> { %s712_s19 = sld [smem:[#allocation5 + %s711_s10]]  ;;  %s735_s21 = sadd.s32 15, %s2168_s30 }
 0x106   : >> { %s724_s17 = sld [smem:[#allocation5 + %s723_s9]]  ;;  %s696_s14 = scalar_lea.vmem [#allocation2], %s695_s16 }
 0x107   : >> { %v697_v25 = vld [vmem:[%s696_s14] ss:$8 sm:$0x3]  ;;  %s2212_s23 = sld [smem:[#allocation5 + %s735_s21]]  ;;  %s747_s24 = sadd.s32 16, %s2168_s30 }
 0x108   : >> { %s2215_s11 = sld [smem:[#allocation5 + %s747_s24]]  ;;  %s759_s1 = sadd.s32 17, %s2168_s30  ;;  %v698_v26 = vmax.f32 %v686_v24, %v697_v25 }
 0x109   : >> { %s701_s28 = sshra.s32 %s700_s7, 3  ;;  %s704_s15 = sand.u32 7, %s700_s7 }
 0x10a   : >> { %s1797_s29 = sshll.u32 %s701_s28, 4  ;;  %s2218_s13 = sld [smem:[#allocation5 + %s759_s1]] }
 0x10b   : >> { %s707_s18 = sadd.s32 %s1797_s29, %s704_s15  ;;  %s713_s8 = sshra.s32 %s712_s19, 3 }
 0x10c   : >> { %s716_s20 = sand.u32 7, %s712_s19  ;;  %s708_s2 = scalar_lea.vmem [#allocation2], %s707_s18 }
 0x10d   : >> { %v709_v27 = vld [vmem:[%s708_s2] ss:$8 sm:$0x3]  ;;  %s1798_s12 = sshll.u32 %s713_s8, 4  ;;  %s725_s16 = sshra.s32 %s724_s17, 3 }
 0x10e   : >> { %v710_v28 = vmax.f32 %v698_v26, %v709_v27  ;;  %s719_s10 = sadd.s32 %s1798_s12, %s716_s20  ;;  %s728_s9 = sand.u32 7, %s724_s17 }
 0x10f   : >> { %s1799_s21 = sshll.u32 %s725_s16, 4  ;;  %s720_s7 = scalar_lea.vmem [#allocation2], %s719_s10 }
 0x110   : >> { %v721_v29 = vld [vmem:[%s720_s7] ss:$8 sm:$0x3]  ;;  %s731_s14 = sadd.s32 %s1799_s21, %s728_s9  ;;  %s737_s24 = sshra.s32 %s2212_s23, 3 }
 0x111   : >> { %v722_v30 = vmax.f32 %v710_v28, %v721_v29  ;;  %s740_s1 = sand.u32 7, %s2212_s23  ;;  %s732_s19 = scalar_lea.vmem [#allocation2], %s731_s14 }
 0x112   : >> { %v733_v31 = vld [vmem:[%s732_s19] ss:$8 sm:$0x3]  ;;  %s1800_s28 = sshll.u32 %s737_s24, 4  ;;  %s749_s15 = sshra.s32 %s2215_s11, 3 }
 0x113   : >> { %v734_v32 = vmax.f32 %v722_v30, %v733_v31  ;;  %s743_s29 = sadd.s32 %s1800_s28, %s740_s1  ;;  %s752_s18 = sand.u32 7, %s2215_s11 }
 0x114   : >> { %s1801_s8 = sshll.u32 %s749_s15, 4  ;;  %s744_s17 = scalar_lea.vmem [#allocation2], %s743_s29 }
 0x115   : >> { %v745_v33 = vld [vmem:[%s744_s17] ss:$8 sm:$0x3]  ;;  %s755_s20 = sadd.s32 %s1801_s8, %s752_s18  ;;  %s761_s2 = sshra.s32 %s2218_s13, 3 }
 0x116   : >> { %s764_s12 = sand.u32 7, %s2218_s13  ;;  %v746_v34 = vmax.f32 %v734_v32, %v745_v33  ;;  %s1802_s16 = sshll.u32 %s761_s2, 4 }
 0x117   : >> { %s771_s23 = sadd.s32 18, %s2168_s30  ;;  %s756_s10 = scalar_lea.vmem [#allocation2], %s755_s20 }
 0x118   : >> { %v757_v35 = vld [vmem:[%s756_s10] ss:$8 sm:$0x3]  ;;  %s767_s9 = sadd.s32 %s1802_s16, %s764_s12  ;;  %s772_s21 = sld [smem:[#allocation5 + %s771_s23]] }
 0x119   : >> { %s783_s7 = sadd.s32 19, %s2168_s30  ;;  %v758_v38 = vmax.f32 %v746_v34, %v757_v35  ;;  %s768_s24 = scalar_lea.vmem [#allocation2], %s767_s9 }
 0x11a   : >> { %s784_s14 = sld [smem:[#allocation5 + %s783_s7]]  ;;  %v769_v39 = vld [vmem:[%s768_s24] ss:$8 sm:$0x3]  ;;  %s799_s11 = sshra.s32 %s1887_s27, 3 }
 0x11b   : >> { %s802_s1 = sand.u32 7, %s1887_s27  ;;  %v770_v40 = vmax.f32 %v758_v38, %v769_v39  ;;  %s1805_s29 = sshll.u32 %s799_s11, 4 }
 0x11c   : >> { %s805_s2 = sadd.s32 %s1805_s29, %s802_s1  ;;  %s553_s27 = sadd.s32 1, %s1887_s27  }
 0x11d   : >> { %s806_s16 = scalar_lea.vmem [#allocation3], %s805_s2  ;;  %p550_p4 = scmp.ge.s32.totalorder %s553_s27, 32  }
 0x11e   : >> { %s773_s19 = sshra.s32 %s772_s21, 3  ;;  %s776_s28 = sand.u32 7, %s772_s21  ;;  %v1674_v48 = vld [vmem:[%s2475_s3 + $0x70] sm:$0xf] (%p550_p4)  ;;  %v1821_v49 = vld [vmem:[%s2475_s3 + $0x74] sm:$0xf0] (%p550_p4) }
 0x11f   : >> { %s1803_s15 = sshll.u32 %s773_s19, 4  ;;  %v1738_v50 = vld [vmem:[%s2475_s3 + $0xf0] sm:$0xf] (%p550_p4)  ;;  %v1675_v51 = vor.u32 (%p550_p4), %v1821_v49, %v1674_v48  ;;  %v1837_v52 = vld [vmem:[%s2475_s3 + $0xf4] sm:$0xf0] (%p550_p4)  ;;  %vm1230_vm1 = vcmask (%p550_p4), 130112  }
 0x120   : >> { %s779_s13 = sadd.s32 %s1803_s15, %s776_s28  ;;  %s785_s18 = sshra.s32 %s784_s14, 3  ;;  %v1820_v53 = vld [vmem:[%s2475_s3 + $0x74] sm:$0xf] (%p550_p4)  ;;  %v1676_v54 = vld [vmem:[%s2475_s3 + $0x78] sm:$0xf0] (%p550_p4)  ;;  %v1739_v55 = vor.u32 (%p550_p4), %v1837_v52, %v1738_v50  ;;  %vm1234_vm2 = vcmask (%p550_p4), 195712  }
 0x121   : >> { %s788_s8 = sand.u32 7, %s784_s14  ;;  %s780_s17 = scalar_lea.vmem [#allocation2], %s779_s13  ;;  %v1679_v56 = vor.u32 (%p550_p4), %v1820_v53, %v1676_v54  ;;  %v1836_v57 = vld [vmem:[%s2475_s3 + $0xf4] sm:$0xf] (%p550_p4)  ;;  %v1740_v58 = vld [vmem:[%s2475_s3 + $0xf8] sm:$0xf0] (%p550_p4)  ;;  %1001 = vmatpush.bf16.msrb.mxu0 (%p550_p4), %v1675_v51 }
 0x122   : >> { %v781_v44 = vld [vmem:[%s780_s17] ss:$8 sm:$0x3]  ;;  %s1804_s20 = sshll.u32 %s785_s18, 4  ;;  %v1743_v60 = vor.u32 (%p550_p4), %v1836_v57, %v1740_v58  ;;  %1020 = vmatpush.bf16.msrb.mxu1 (%p550_p4), %v1739_v55  ;;  %v1818_v2 = vld [vmem:[%s2475_s3 + $0x64] sm:$0xf] (%p550_p4) }
 0x123   : >> { %v782_v45 = vmax.f32 %v770_v40, %v781_v44  ;;  %s791_s30 = sadd.s32 %s1804_s20, %s788_s8  ;;  %v1666_v59 = vld [vmem:[%s2475_s3 + $0x60] sm:$0xf] (%p550_p4)  ;;  %v1819_v61 = vld [vmem:[%s2475_s3 + $0x64] sm:$0xf0] (%p550_p4)  ;;  %1039 = vmatpush.bf16.msrb.mxu2 (%p550_p4), %v1679_v56  ;;  %v1668_v3 = vld [vmem:[%s2475_s3 + $0x68] sm:$0xf0] (%p550_p4) }
 0x124   : >> { %s792_s12 = scalar_lea.vmem [#allocation2], %s791_s30  ;;  %552 = sbr.rel (!%p550_p4) target bundleno = 213 (0xd5), region = 106  ;;  %v1730_v62 = vld [vmem:[%s2475_s3 + $0xe0] sm:$0xf] (%p550_p4)  ;;  %v1835_v63 = vld [vmem:[%s2475_s3 + $0xe4] sm:$0xf0] (%p550_p4)  ;;  %v1667_v0 = vor.u32 (%p550_p4), %v1819_v61, %v1666_v59  ;;  %1058 = vmatpush.bf16.msrb.mxu3 (%p550_p4), %v1743_v60  ;;  %v1671_v5 = vor.u32 (%p550_p4), %v1818_v2, %v1668_v3 }
 0x125   : >> { %v793_v46 = vld [vmem:[%s792_s12] ss:$8 sm:$0x3]  ;;  %v1731_v1 = vor.u32 (%p550_p4), %v1835_v63, %v1730_v62  ;;  %v1834_v4 = vld [vmem:[%s2475_s3 + $0xe4] sm:$0xf] (%p550_p4)  ;;  %vm1238_vm3 = vcmask (%p550_p4), 261312  }
 0x126   : >> { %v794_v47 = vmax.f32 %v782_v45, %v793_v46  ;;  %v1732_v6 = vld [vmem:[%s2475_s3 + $0xe8] sm:$0xf0] (%p550_p4)  ;;  %v1658_v7 = vld [vmem:[%s2475_s3 + $0x50] sm:$0xf] (%p550_p4)  ;;  %v1817_v8 = vld [vmem:[%s2475_s3 + $0x54] sm:$0xf0] (%p550_p4)  ;;  %1002 = vmatpush.bf16.msrb.mxu0 (%p550_p4), %v1667_v0 }
 0x127   : > { %v1735_v9 = vor.u32 (%p550_p4), %v1834_v4, %v1732_v6  ;;  %v1722_v10 = vld [vmem:[%s2475_s3 + $0xd0] sm:$0xf] (%p550_p4)  ;;  %v1833_v11 = vld [vmem:[%s2475_s3 + $0xd4] sm:$0xf0] (%p550_p4)  ;;  %v1816_v12 = vld [vmem:[%s2475_s3 + $0x54] sm:$0xf] (%p550_p4)  ;;  %v1659_v13 = vor.u32 (%p550_p4), %v1817_v8, %v1658_v7  ;;  %1021 = vmatpush.bf16.msrb.mxu1 (%p550_p4), %v1731_v1  ;;  %1040 = vmatpush.bf16.msrb.mxu2 (%p550_p4), %v1671_v5 }
 0x128   : >> { %807 = vst.msk [vmem:[%s806_s16] ss:$8 sm:$0x3] %vm797_vm0, %v794_v47  ;;  %v1660_v14 = vld [vmem:[%s2475_s3 + $0x58] sm:$0xf0] (%p550_p4)  ;;  %v1723_v17 = vor.u32 (%p550_p4), %v1833_v11, %v1722_v10  ;;  %vm1257_vm4 = vcmask (%p550_p4), 261120  }
 0x129   : > { %v1832_v15 = vld [vmem:[%s2475_s3 + $0xd4] sm:$0xf]  ;;  %v1724_v16 = vld [vmem:[%s2475_s3 + $0xd8] sm:$0xf0]  ;;  %v1663_v18 = vor.u32 %v1816_v12, %v1660_v14  ;;  %v1650_v19 = vld [vmem:[%s2475_s3 + $0x40] sm:$0xf]  ;;  %1059 = vmatpush.bf16.msrb.mxu3 %v1735_v9 }
 0x12a   : > { %v1815_v20 = vld [vmem:[%s2475_s3 + $0x44] sm:$0xf0]  ;;  %v1714_v21 = vld [vmem:[%s2475_s3 + $0xc0] sm:$0xf]  ;;  %v1727_v22 = vor.u32 %v1832_v15, %v1724_v16  ;;  %v1814_v24 = vld [vmem:[%s2475_s3 + $0x44] sm:$0xf]  ;;  %1003 = vmatpush.bf16.msrb.mxu0 %v1659_v13 }
 0x12b   : > { %v1831_v23 = vld [vmem:[%s2475_s3 + $0xc4] sm:$0xf0]  ;;  %v1652_v25 = vld [vmem:[%s2475_s3 + $0x48] sm:$0xf0]  ;;  %v1830_v26 = vld [vmem:[%s2475_s3 + $0xc4] sm:$0xf]  ;;  %v1651_v28 = vor.u32 %v1815_v20, %v1650_v19  ;;  %1022 = vmatpush.bf16.msrb.mxu1 %v1723_v17  ;;  %1041 = vmatpush.bf16.msrb.mxu2 %v1663_v18 }
 0x12c   : > { %v1716_v27 = vld [vmem:[%s2475_s3 + $0xc8] sm:$0xf0]  ;;  %v1715_v29 = vor.u32 %v1831_v23, %v1714_v21  ;;  %v1655_v30 = vor.u32 %v1814_v24, %v1652_v25  ;;  %v1642_v31 = vld [vmem:[%s2475_s3 + $0x30] sm:$0xf]  ;;  %v1813_v32 = vld [vmem:[%s2475_s3 + $0x34] sm:$0xf0] }
 0x12d   : > { %v1706_v33 = vld [vmem:[%s2475_s3 + $0xb0] sm:$0xf]  ;;  %1060 = vmatpush.bf16.msrb.mxu3 %v1727_v22  ;;  %v1719_v34 = vor.u32 %v1830_v26, %v1716_v27  ;;  %v1829_v35 = vld [vmem:[%s2475_s3 + $0xb4] sm:$0xf0]  ;;  %v1812_v38 = vld [vmem:[%s2475_s3 + $0x34] sm:$0xf]  ;;  %v1643_v45 = vor.u32 %v1813_v32, %v1642_v31 }
 0x12e   : > { %v1644_v39 = vld [vmem:[%s2475_s3 + $0x38] sm:$0xf0]  ;;  %v1828_v40 = vld [vmem:[%s2475_s3 + $0xb4] sm:$0xf]  ;;  %1004 = vmatpush.bf16.msrb.mxu0 %v1651_v28  ;;  %v1707_v46 = vor.u32 %v1829_v35, %v1706_v33  ;;  %v1634_v48 = vld [vmem:[%s2475_s3 + $0x20] sm:$0xf] }
 0x12f   : > { %v1708_v44 = vld [vmem:[%s2475_s3 + $0xb8] sm:$0xf0]  ;;  %1023 = vmatpush.bf16.msrb.mxu1 %v1715_v29  ;;  %1042 = vmatpush.bf16.msrb.mxu2 %v1655_v30  ;;  %v1647_v47 = vor.u32 %v1812_v38, %v1644_v39  ;;  %v1811_v49 = vld [vmem:[%s2475_s3 + $0x24] sm:$0xf0]  ;;  %v1698_v50 = vld [vmem:[%s2475_s3 + $0xa0] sm:$0xf] }
 0x130   : > { %v1711_v51 = vor.u32 %v1828_v40, %v1708_v44  ;;  %v1827_v52 = vld [vmem:[%s2475_s3 + $0xa4] sm:$0xf0]  ;;  %v1810_v53 = vld [vmem:[%s2475_s3 + $0x24] sm:$0xf]  ;;  %v1636_v54 = vld [vmem:[%s2475_s3 + $0x28] sm:$0xf0]  ;;  %v1635_v57 = vor.u32 %v1811_v49, %v1634_v48 }
 0x131   : > { %1061 = vmatpush.bf16.msrb.mxu3 %v1719_v34  ;;  %v1826_v55 = vld [vmem:[%s2475_s3 + $0xa4] sm:$0xf]  ;;  %v1700_v56 = vld [vmem:[%s2475_s3 + $0xa8] sm:$0xf0]  ;;  %v1699_v58 = vor.u32 %v1827_v52, %v1698_v50  ;;  %v1639_v59 = vor.u32 %v1810_v53, %v1636_v54  ;;  %v1626_v60 = vld [vmem:[%s2475_s3 + $0x10] sm:$0xf] }
 0x132   : > { %1005 = vmatpush.bf16.msrb.mxu0 %v1643_v45  ;;  %v1809_v61 = vld [vmem:[%s2475_s3 + $0x14] sm:$0xf0]  ;;  %v1690_v62 = vld [vmem:[%s2475_s3 + $0x90] sm:$0xf]  ;;  %v1703_v63 = vor.u32 %v1826_v55, %v1700_v56  ;;  %v1808_v1 = vld [vmem:[%s2475_s3 + $0x14] sm:$0xf] }
 0x133   : > { %1024 = vmatpush.bf16.msrb.mxu1 %v1707_v46  ;;  %1043 = vmatpush.bf16.msrb.mxu2 %v1647_v47  ;;  %v1825_v0 = vld [vmem:[%s2475_s3 + $0x94] sm:$0xf0]  ;;  %v1628_v2 = vld [vmem:[%s2475_s3 + $0x18] sm:$0xf0]  ;;  %v1824_v3 = vld [vmem:[%s2475_s3 + $0x94] sm:$0xf]  ;;  %v1627_v5 = vor.u32 %v1809_v61, %v1626_v60 }
 0x134   : > { %v1692_v4 = vld [vmem:[%s2475_s3 + $0x98] sm:$0xf0]  ;;  %v1691_v6 = vor.u32 %v1825_v0, %v1690_v62  ;;  %v1631_v7 = vor.u32 %v1808_v1, %v1628_v2  ;;  %v1618_v8 = vld [vmem:[%s2475_s3] sm:$0xf]  ;;  %v1807_v9 = vld [vmem:[%s2475_s3 + $0x4] sm:$0xf0] }
 0x135   : > { %1062 = vmatpush.bf16.msrb.mxu3 %v1711_v51  ;;  %v1682_v10 = vld [vmem:[%s2475_s3 + $0x80] sm:$0xf]  ;;  %v1695_v11 = vor.u32 %v1824_v3, %v1692_v4  ;;  %v1823_v12 = vld [vmem:[%s2475_s3 + $0x84] sm:$0xf0]  ;;  %v1806_v13 = vld [vmem:[%s2475_s3 + $0x4] sm:$0xf]  ;;  %v1619_v17 = vor.u32 %v1807_v9, %v1618_v8 }
 0x136   : > { %1006 = vmatpush.bf16.msrb.mxu0 %v1635_v57  ;;  %v1620_v14 = vld [vmem:[%s2475_s3 + $0x8] sm:$0xf0]  ;;  %v1822_v15 = vld [vmem:[%s2475_s3 + $0x84] sm:$0xf]  ;;  %v1683_v18 = vor.u32 %v1823_v12, %v1682_v10  ;;  %v1093_v25 = vld [vmem:[%s2476_s4] sm:$0x3] }
 0x137   : > { %1025 = vmatpush.bf16.msrb.mxu1 %v1699_v58  ;;  %1044 = vmatpush.bf16.msrb.mxu2 %v1639_v59  ;;  %v1684_v16 = vld [vmem:[%s2475_s3 + $0x88] sm:$0xf0]  ;;  %v1623_v19 = vor.u32 %v1806_v13, %v1620_v14  ;;  %v1077_v24 = vld [vmem:[#allocation3] sm:$0xff]  ;;  %v2440_v31 = vperm.slane %v1093_v25, 1  ;;  %v1079_v33 = vld [vmem:[#allocation3 + $0x10] sm:$0xff] }
 0x138   : > { %v1687_v20 = vor.u32 %v1822_v15, %v1684_v16  ;;  %v1078_v28 = vld [vmem:[#allocation3 + $0x8] sm:$0xff]  ;;  %v1080_v46 = vld [vmem:[#allocation3 + $0x18] sm:$0xff]  ;;  %v1081_v53 = vld [vmem:[#allocation3 + $0x20] sm:$0xff] }
 0x139   : > { %1063 = vmatpush.bf16.msrb.mxu3 %v1703_v63  ;;  %v1082_v4 = vld [vmem:[#allocation3 + $0x28] sm:$0xff]  ;;  %v1083_v12 = vld [vmem:[#allocation3 + $0x30] sm:$0xff] }
 0x13a   : > { %1007 = vmatpush.bf16.msrb.mxu0 %v1627_v5 }
 0x13b   : > { %1026 = vmatpush.bf16.msrb.mxu1 %v1691_v6  ;;  %1045 = vmatpush.bf16.msrb.mxu2 %v1631_v7 }
 0x13d   : > { %1064 = vmatpush.bf16.msrb.mxu3 %v1695_v11 }
 0x13e   : > { %1008 = vmatpush.bf16.msrb.mxu0 %v1619_v17 }
 0x13f   : > { %1027 = vmatpush.bf16.msrb.mxu1 %v1683_v18  ;;  %1046 = vmatpush.bf16.msrb.mxu2 %v1623_v19 }
 0x141   : > { %1065 = vmatpush.bf16.msrb.mxu3 %v1687_v20  ;;  %1009 = vmatmul.bf16.vlgmr.msrb.gmra.mxu0 %v2145_v36 }
 0x142   : > { %1028 = vmatmul.bf16.vlgmr.msrb.gmra.mxu1 %v2147_v37  ;;  %1047 = vmatmul.bf16.vlgmr.msrb.gmra.mxu2 %v2145_v36  ;;  %v2437_v36 = vperm.slane %v1093_v25, 0 }
 0x144   : > { %1066 = vmatmul.bf16.vlgmr.msrb.gmra.mxu3 %v2147_v37 }
 0x151   : > { %1014 = vmatmul.bf16.gmra.mxu0 %v2153_v42 }
 0x152   : > { %1033 = vmatmul.bf16.gmra.mxu1 %v2155_v43  ;;  %1052 = vmatmul.bf16.gmra.mxu2 %v2153_v42 }
 0x154   : > { %1071 = vmatmul.bf16.gmra.mxu3 %v2155_v43 }
 0x1be   : > { %v1010_v21 = vpop.f32.mrf.mxu0 }
 0x1bf   : > { %v1029_v22 = vpop.f32.mrf.mxu1 }
 0x1c0   : > { %v1030_v23 = vadd.f32 %v1029_v22, %v1010_v21 }
 0x1c2   : > { %v1085_v26 = vadd.f32 %v1077_v24, %v1030_v23 }
 0x1c4   : > { %v1099_v30 = vadd.f32 %v2437_v36, %v1085_v26  ;;  %v1084_v26 = vld [vmem:[#allocation3 + $0x38] sm:$0xff] }
 0x1c5   : > { %v1048_v37 = vpop.f32.mrf.mxu2 }
 0x1c6   : > { %v1012_v29 = vpop.f32.mrf.mxu0  ;;  %v1107_v35 = vmul.f32 0.2, %v1099_v30 }
 0x1c7   : > { %v1067_v27 = vpop.f32.mrf.mxu3  ;;  %v1031_v43 = vpop.f32.mrf.mxu1 }
 0x1c8   : > { %v1068_v42 = vadd.f32 %v1067_v27, %v1048_v37  ;;  %v1032_v32 = vadd.f32 %v1031_v43, %v1012_v29  ;;  %v1115_v48 = vmax.f32 %v1099_v30, %v1107_v35 }
 0x1ca   : > { %v1086_v34 = vadd.f32 %v1078_v28, %v1068_v42  ;;  %v1087_v39 = vadd.f32 %v1079_v33, %v1032_v32 }
 0x1cc   : > { %v1100_v38 = vadd.f32 %v2440_v31, %v1086_v34  ;;  %v1101_v50 = vadd.f32 %v2437_v36, %v1087_v39 }
 0x1cd   : > { %v1050_v44 = vpop.f32.mrf.mxu2 }
 0x1ce   : > { %v1108_v40 = vmul.f32 0.2, %v1100_v38  ;;  %v1015_v47 = vpop.f32.mrf.mxu0  ;;  %v1109_v58 = vmul.f32 0.2, %v1101_v50 }
 0x1cf   : > { %v1069_v45 = vpop.f32.mrf.mxu3  ;;  %v1034_v52 = vpop.f32.mrf.mxu1 }
 0x1d0   : > { %v1116_v49 = vmax.f32 %v1100_v38, %v1108_v40  ;;  %v1070_v51 = vadd.f32 %v1069_v45, %v1050_v44  ;;  %v1035_v54 = vadd.f32 %v1034_v52, %v1015_v47  ;;  %v1117_v6 = vmax.f32 %v1101_v50, %v1109_v58 }
 0x1d2   : > { %v2444_v55 = vpack.c.bf16 %v1116_v49, %v1115_v48  ;;  %v1088_v56 = vadd.f32 %v1080_v46, %v1070_v51  ;;  %v1089_v57 = vadd.f32 %v1081_v53, %v1035_v54 }
 0x1d4   : > { %1127 = vst [vmem:[%s2138_s22] sm:$0xff] %v2444_v55  ;;  %v1102_v59 = vadd.f32 %v2440_v31, %v1088_v56  ;;  %v1189_v60 = vunpack.c.l.bf16 %v2444_v55  ;;  %v1190_v61 = vunpack.c.h.bf16 %v2444_v55  ;;  %v1103_v2 = vadd.f32 %v2437_v36, %v1089_v57 }
 0x1d5   : > { %v1053_v63 = vpop.f32.mrf.mxu2 }
 0x1d6   : > { %v1110_v62 = vmul.f32 0.2, %v1102_v59  ;;  %v1197_v0 = vmul.f32 %v1189_v60, %v1189_v60  ;;  %v1198_v1 = vmul.f32 %v1190_v61, %v1190_v61  ;;  %v1017_v5 = vpop.f32.mrf.mxu0  ;;  %v1111_v15 = vmul.f32 0.2, %v1103_v2 }
 0x1d7   : > { %v1072_v3 = vpop.f32.mrf.mxu3  ;;  %v1036_v9 = vpop.f32.mrf.mxu1  ;;  %v1136_v60 = vunpack.c.h.b16 %v2444_v55 }
 0x1d8   : > { %v1118_v7 = vmax.f32 %v1102_v59, %v1110_v62  ;;  %v1073_v8 = vadd.f32 %v1072_v3, %v1053_v63  ;;  %v1205_v10 = vadd.f32 %v1198_v1, %v1197_v0  ;;  %v1037_v11 = vadd.f32 %v1036_v9, %v1017_v5 }
 0x1d9   : > { %v1119_v24 = vmax.f32 %v1103_v2, %v1111_v15  ;;  %v1135_v59 = vunpack.c.l.b16 %v2444_v55  ;;  %v1226_v1 = vand.u32 127, %v795_v41 }
 0x1da   : > { %v1124_v13 = vpack.c.bf16 %v1118_v7, %v1117_v6  ;;  %v1090_v14 = vadd.f32 %v1082_v4, %v1073_v8  ;;  %1206 = vadd.xlane.f32.xlu0 %v1205_v10  ;;  %v1091_v17 = vadd.f32 %v1083_v12, %v1037_v11 }
 0x1db   : > { %v1228_v2 = vadd.s32 4294967288, %v1226_v1  ;;  %v1232_v4 = vadd.s32 4294967280, %v1226_v1  ;;  %v1236_v5 = vadd.s32 4294967272, %v1226_v1 }
 0x1dc   : > { %1128 = vst [vmem:[%s2138_s22 + $0x8] sm:$0xff] %v1124_v13  ;;  %v1104_v16 = vadd.f32 %v2440_v31, %v1090_v14  ;;  %v1191_v18 = vunpack.c.l.bf16 %v1124_v13  ;;  %v1192_v19 = vunpack.c.h.bf16 %v1124_v13  ;;  %v1105_v27 = vadd.f32 %v2437_v36, %v1091_v17 }
 0x1dd   : > { %v1055_v21 = vpop.f32.mrf.mxu2  ;;  %v1137_v57 = vunpack.c.l.b16 %v1124_v13  ;;  %v1138_v58 = vunpack.c.h.b16 %v1124_v13 }
 0x1de   : > { %v1112_v20 = vmul.f32 0.2, %v1104_v16  ;;  %v1199_v22 = vmul.f32 %v1191_v18, %v1191_v18  ;;  %v1200_v23 = vmul.f32 %v1192_v19, %v1192_v19  ;;  %v1113_v43 = vmul.f32 0.2, %v1105_v27 }
 0x1df   : > { %v1074_v25 = vpop.f32.mrf.mxu3  ;;  %v1143_v61 = vpack.c.b16 %v1137_v57, %v1135_v59  ;;  %v1144_v62 = vpack.c.b16 %v1138_v58, %v1136_v60 }
 0x1e0   : > { %v1120_v37 = vmax.f32 %v1104_v16, %v1112_v20  ;;  %v1075_v28 = vadd.f32 %v1074_v25, %v1055_v21  ;;  %v1208_v29 = vadd.f32 %v1200_v23, %v1199_v22  ;;  %v1121_v40 = vmax.f32 %v1105_v27, %v1113_v43 }
 0x1e2   : > { %v1125_v30 = vpack.c.bf16 %v1120_v37, %v1119_v24  ;;  %v1092_v42 = vadd.f32 %v1084_v26, %v1075_v28  ;;  %1209 = vadd.xlane.f32.xlu0 %v1208_v29 }
 0x1e4   : > { %1129 = vst [vmem:[%s2138_s22 + $0x10] sm:$0xff] %v1125_v30  ;;  %v1106_v32 = vadd.f32 %v2440_v31, %v1092_v42  ;;  %v1193_v33 = vunpack.c.l.bf16 %v1125_v30  ;;  %v1194_v34 = vunpack.c.h.bf16 %v1125_v30  ;;  %v1139_v36 = vunpack.c.l.b16 %v1125_v30 }
 0x1e5   : > { %v1140_v47 = vunpack.c.h.b16 %v1125_v30 }
 0x1e6   : > { %v1114_v35 = vmul.f32 0.2, %v1106_v32  ;;  %v1201_v38 = vmul.f32 %v1193_v33, %v1193_v33  ;;  %v1202_v39 = vmul.f32 %v1194_v34, %v1194_v34 }
 0x1e8   : > { %v1122_v44 = vmax.f32 %v1106_v32, %v1114_v35  ;;  %v1211_v45 = vadd.f32 %v1202_v39, %v1201_v38 }
 0x1ea   : > { %v1126_v46 = vpack.c.bf16 %v1122_v44, %v1121_v40  ;;  %1212 = vadd.xlane.f32.xlu1 %v1211_v45 }
 0x1ec   : > { %1130 = vst [vmem:[%s2138_s22 + $0x18] sm:$0xff] %v1126_v46  ;;  %v1141_v48 = vunpack.c.l.b16 %v1126_v46  ;;  %v1142_v49 = vunpack.c.h.b16 %v1126_v46  ;;  %v1195_v50 = vunpack.c.l.bf16 %v1126_v46  ;;  %v1196_v51 = vunpack.c.h.bf16 %v1126_v46 }
 0x1ee   : > { %v1145_v52 = vpack.c.b16 %v1141_v48, %v1139_v36  ;;  %v1146_v53 = vpack.c.b16 %v1142_v49, %v1140_v47  ;;  %v1203_v31 = vmul.f32 %v1195_v50, %v1195_v50  ;;  %v1204_v54 = vmul.f32 %v1196_v51, %v1196_v51 }
 0x1f0   : > { %1157 = vmatpush.bf16.xpose.msra.mxu0 %v1145_v52  ;;  %1838 = vmatpush.bf16.xpose.msra.mxu2 %v1145_v52  ;;  %v1214_v56 = vadd.f32 %v1204_v54, %v1203_v31 }
 0x1f1   : > { %1176 = vmatpush.bf16.xpose.msra.mxu1 %v1146_v53  ;;  %1840 = vmatpush.bf16.xpose.msra.mxu3 %v1146_v53 }
 0x1f2   : > { %1215 = vadd.xlane.f32.xlu1 %v1214_v56 }
 0x1f8   : > { %1158 = vmatpush.bf16.xpose.msra.mxu0 %v1143_v61  ;;  %1839 = vmatpush.bf16.xpose.msra.mxu2 %v1143_v61 }
 0x1f9   : > { %1177 = vmatpush.bf16.xpose.msra.mxu1 %v1144_v62  ;;  %1841 = vmatpush.bf16.xpose.msra.mxu3 %v1144_v62 }
 0x1ff   : > { %1159 = vmatmul.bf16.vlgmr.msra.gmra.mxu0 %v1143_v61  ;;  %1164 = vmatmul.bf16.vlgmr.msra.gmra.mxu2 %v1145_v52 }
 0x200   : > { %1178 = vmatmul.bf16.vlgmr.msra.gmra.mxu1 %v1144_v62  ;;  %1183 = vmatmul.bf16.vlgmr.msra.gmra.mxu3 %v1146_v53 }
 0x24d   : > { %v1207_v63 = vpop.xlane.xlu0 %1206 }
 0x24e   : > { %v1227_v9 = vperm.slane %v1207_v63, %v1226_v1 }
 0x255   : > { %v1210_v3 = vpop.xlane.xlu0 %1209 }
 0x256   : > { %v1229_v55 = vperm.slane %v1210_v3, %v1228_v2 }
 0x258   : > { %v1231_v13 = vsel %vm1230_vm1, %v1229_v55, %v1227_v9 }
 0x25d   : > { %v1213_v0 = vpop.xlane.xlu1 %1212 }
 0x25e   : > { %v1233_v7 = vperm.slane %v1213_v0, %v1232_v4 }
 0x260   : > { %v1235_v14 = vsel %vm1234_vm2, %v1233_v7, %v1231_v13 }
 0x265   : > { %v1216_v6 = vpop.xlane.xlu1 %1215 }
 0x266   : > { %v1237_v10 = vperm.slane %v1216_v6, %v1236_v5 }
 0x268   : > { %v1239_v15 = vsel %vm1238_vm3, %v1237_v10, %v1235_v14 }
 0x27c   : > { %v1160_v8 = vpop.f32.mrf.mxu0 }
 0x27d   : > { %v1179_v11 = vpop.f32.mrf.mxu1 }
 0x27e   : > { %v1180_v12 = vadd.f32 %v1179_v11, %v1160_v8 }
 0x280   : > { %v1217_v41 = vmul.f32 2.0, %v1180_v12 }
 0x282   : > { %v1253_v16 = vsub.f32 %v1217_v41, %v1239_v15  ;;  %v1165_v17 = vpop.f32.mrf.mxu2 }
 0x283   : > { %v1184_v18 = vpop.f32.mrf.mxu3 }
 0x284   : > { %1258 = vst.msk [vmem:[%s2143_s0] sm:$0xff] %vm1257_vm4, %v1253_v16  ;;  %v1185_v19 = vadd.f32 %v1184_v18, %v1165_v17  ;;  %v1162_v20 = vpop.f32.mrf.mxu0 }
 0x285   : > { %v1181_v21 = vpop.f32.mrf.mxu1 }
 0x286   : > { %v1219_v22 = vmul.f32 2.0, %v1185_v19  ;;  %v1182_v23 = vadd.f32 %v1181_v21, %v1162_v20 }
 0x288   : > { %v1255_v24 = vsub.f32 %v1219_v22, %v1239_v15  ;;  %v1218_v25 = vmul.f32 2.0, %v1182_v23 }
 0x28a   : > { %1260 = vst.msk [vmem:[%s2143_s0 + $0x10] sm:$0xff] %vm1257_vm4, %v1255_v24  ;;  %v1254_v26 = vsub.f32 %v1218_v25, %v1239_v15  ;;  %v1167_v37 = vpop.f32.mrf.mxu2 }
 0x28b   : > { %v1186_v27 = vpop.f32.mrf.mxu3 }
 0x28c   : > { %1259 = vst.msk [vmem:[%s2143_s0 + $0x8] sm:$0xff] %vm1257_vm4, %v1254_v26  ;;  %v1187_v28 = vadd.f32 %v1186_v27, %v1167_v37 }
 0x28e   : > { %v1220_v29 = vmul.f32 2.0, %v1187_v28 }
 0x290   : > { %v1256_v30 = vsub.f32 %v1220_v29, %v1239_v15 }
 0x292   : > { %1261 = vst.msk [vmem:[%s2143_s0 + $0x18] sm:$0xff] %vm1257_vm4, %v1256_v30 }
 0x293 PF: > { %s25_s25 = sadd.s32 1, %s1883_s25  }
 0x294   : > { %p22_p5 = scmp.ge.s32.totalorder %s25_s25, 4  }
 0x296   :  { %24 = sbr.rel (!%p22_p5) target bundleno = 8 (0x8), region = 117 }

// kernel: dgcnn_forward.9
= control target key start
LH: loop header
LB: loop body
LE: loop exit
PB: predicated region body
PF: predicated region fallthrough
CT: control target
= control target key end

     0   :  { %s2883_s24 = smov [#allocation5]   ;;  %s3929_s0 = inlined_call_operand.vmem [shape: s32[1280], index: 0, kind: input, shape index: {}]   ;;  %s3930_s1 = inlined_call_operand.vmem [shape: bf16[2,32,256], index: 1, kind: input, shape index: {}]   ;;  %s3931_s2 = inlined_call_operand.vmem [shape: bf16[256,512], index: 2, kind: input, shape index: {}]   ;;  %s3932_s3 = inlined_call_operand.vmem [shape: bf16[256,512], index: 3, kind: input, shape index: {}]   ;;  %s3933_s4 = inlined_call_operand.vmem [shape: f32[1,512], index: 4, kind: input, shape index: {}]   ;;  %s3934_s5 = inlined_call_operand.vmem [shape: bf16[2,32,512], index: 5, kind: output, shape index: {0}]   ;;  %s3935_s6 = inlined_call_operand.vmem [shape: f32[2,32,32], index: 6, kind: output, shape index: {1}]  }
   0x1   :  { %3936 = sst [smem:[#allocation7_spill]] %s3930_s1  ;;  %s13_s23 = sshll.u32 %s3929_s0, 4  ;;  %s14_s23 = int_to_ptr.vmem [resolvable:$true] %s13_s23 }
   0x2   :  { %3937 = sst [smem:[#allocation8_spill]] %s3931_s2 }
   0x3   :  { %16 = dma.vmem_to_smem %s14_s23, 160, %s2883_s24, [#allocation4] }
   0x4   :  { %2873 = dma.done.wait [#allocation4], 160 }
   0x5   :  { %2874 = vsyncadd [#allocation4], 4294967136 }
   0x6   :  { %19 = sfence }
   0x7   :  { %s2922_s25 = smov 0  }
   0x8 LB: > { %s2928_s26 = sadd.s32 4294967295, %s2877_s25   ;;  %p2100_p0 = scmp.ge.s32.totalorder %s2877_s25, 1  ;;  %s2877_s25 = sphi %s2922_s25, %s25_s25  }
   0x9   : > { %p199_p1 = scmp.lt.s32.totalorder %s2877_s25, 3 }
   0xb   : > { %p200_p2 = pnand %p2100_p0, %p199_p1 }
   0xc   : > { %s3938_s2 = sld [smem:[#allocation8_spill]] (!%p200_p2)  ;;  %p232_p3 = scmp.lt.s32.totalorder (!%p200_p2), %s2928_s26, 1 }
   0xd   : > { %203 = sbr.rel (%p200_p2) target bundleno = 740 (0x2e4), region = 36  ;;  %s3939_s1 = sld [smem:[#allocation7_spill]] (!%p200_p2) }
   0xe   : > { %s3365_s8 = smov (!%p200_p2), 0  }
  0x12   : > { %v2237_v0 = vld [vmem:[%s3938_s2 + $0xe0] sm:$0xf]  ;;  %v2717_v1 = vld [vmem:[%s3938_s2 + $0xec] sm:$0xf0]  ;;  %v2715_v5 = vld [vmem:[%s3938_s2 + $0xe4] sm:$0xf] }
  0x13   : > { %v2365_v2 = vld [vmem:[%s3938_s2 + $0x1e0] sm:$0xf]  ;;  %v2238_v3 = vor.u32 %v2717_v1, %v2237_v0  ;;  %v2749_v4 = vld [vmem:[%s3938_s2 + $0x1ec] sm:$0xf0]  ;;  %v2239_v6 = vld [vmem:[%s3938_s2 + $0xf0] sm:$0xf0] }
  0x14   : > { %v2366_v7 = vor.u32 %v2749_v4, %v2365_v2  ;;  %v2242_v8 = vor.u32 %v2715_v5, %v2239_v6  ;;  %v2747_v9 = vld [vmem:[%s3938_s2 + $0x1e4] sm:$0xf]  ;;  %v2367_v10 = vld [vmem:[%s3938_s2 + $0x1f0] sm:$0xf0]  ;;  %v2221_v11 = vld [vmem:[%s3938_s2 + $0xc0] sm:$0xf] }
  0x15   : > { %656 = vmatpush.bf16.msra.mxu0 %v2238_v3  ;;  %v2370_v12 = vor.u32 %v2747_v9, %v2367_v10  ;;  %v2713_v13 = vld [vmem:[%s3938_s2 + $0xcc] sm:$0xf0]  ;;  %v2349_v14 = vld [vmem:[%s3938_s2 + $0x1c0] sm:$0xf]  ;;  %v2711_v18 = vld [vmem:[%s3938_s2 + $0xc4] sm:$0xf] }
  0x16   : > { %v2745_v15 = vld [vmem:[%s3938_s2 + $0x1cc] sm:$0xf0]  ;;  %675 = vmatpush.bf16.msra.mxu1 %v2366_v7  ;;  %694 = vmatpush.bf16.msra.mxu2 %v2242_v8  ;;  %v2222_v16 = vor.u32 %v2713_v13, %v2221_v11  ;;  %v2223_v19 = vld [vmem:[%s3938_s2 + $0xd0] sm:$0xf0]  ;;  %v2743_v20 = vld [vmem:[%s3938_s2 + $0x1c4] sm:$0xf] }
  0x17   : > { %v2350_v17 = vor.u32 %v2745_v15, %v2349_v14  ;;  %713 = vmatpush.bf16.msra.mxu3 %v2370_v12  ;;  %v2226_v21 = vor.u32 %v2711_v18, %v2223_v19  ;;  %v2351_v22 = vld [vmem:[%s3938_s2 + $0x1d0] sm:$0xf0]  ;;  %v2205_v23 = vld [vmem:[%s3938_s2 + $0xa0] sm:$0xf]  ;;  %v2709_v24 = vld [vmem:[%s3938_s2 + $0xac] sm:$0xf0] }
  0x18   : > { %v2354_v25 = vor.u32 %v2743_v20, %v2351_v22  ;;  %v2333_v26 = vld [vmem:[%s3938_s2 + $0x1a0] sm:$0xf]  ;;  %v2741_v27 = vld [vmem:[%s3938_s2 + $0x1ac] sm:$0xf0]  ;;  %v2707_v28 = vld [vmem:[%s3938_s2 + $0xa4] sm:$0xf]  ;;  %v2206_v29 = vor.u32 %v2709_v24, %v2205_v23 }
  0x19   : > { %657 = vmatpush.bf16.msra.mxu0 %v2222_v16  ;;  %v2207_v30 = vld [vmem:[%s3938_s2 + $0xb0] sm:$0xf0]  ;;  %v2739_v31 = vld [vmem:[%s3938_s2 + $0x1a4] sm:$0xf]  ;;  %v2334_v33 = vor.u32 %v2741_v27, %v2333_v26  ;;  %v2189_v35 = vld [vmem:[%s3938_s2 + $0x80] sm:$0xf] }
  0x1a   : > { %v2335_v32 = vld [vmem:[%s3938_s2 + $0x1b0] sm:$0xf0]  ;;  %676 = vmatpush.bf16.msra.mxu1 %v2350_v17  ;;  %695 = vmatpush.bf16.msra.mxu2 %v2226_v21  ;;  %v2210_v34 = vor.u32 %v2707_v28, %v2207_v30  ;;  %v2705_v36 = vld [vmem:[%s3938_s2 + $0x8c] sm:$0xf0]  ;;  %v2317_v37 = vld [vmem:[%s3938_s2 + $0x180] sm:$0xf] }
  0x1b   : > { %714 = vmatpush.bf16.msra.mxu3 %v2354_v25  ;;  %v2338_v38 = vor.u32 %v2739_v31, %v2335_v32  ;;  %v2737_v39 = vld [vmem:[%s3938_s2 + $0x18c] sm:$0xf0]  ;;  %v2703_v40 = vld [vmem:[%s3938_s2 + $0x84] sm:$0xf]  ;;  %v2191_v41 = vld [vmem:[%s3938_s2 + $0x90] sm:$0xf0]  ;;  %v2190_v44 = vor.u32 %v2705_v36, %v2189_v35 }
  0x1c   : > { %v2735_v42 = vld [vmem:[%s3938_s2 + $0x184] sm:$0xf]  ;;  %v2319_v43 = vld [vmem:[%s3938_s2 + $0x190] sm:$0xf0]  ;;  %v2318_v45 = vor.u32 %v2737_v39, %v2317_v37  ;;  %v2194_v46 = vor.u32 %v2703_v40, %v2191_v41  ;;  %v2173_v47 = vld [vmem:[%s3938_s2 + $0x60] sm:$0xf] }
  0x1d   : > { %658 = vmatpush.bf16.msra.mxu0 %v2206_v29  ;;  %v2701_v48 = vld [vmem:[%s3938_s2 + $0x6c] sm:$0xf0]  ;;  %v2301_v49 = vld [vmem:[%s3938_s2 + $0x160] sm:$0xf]  ;;  %v2322_v50 = vor.u32 %v2735_v42, %v2319_v43  ;;  %v2699_v52 = vld [vmem:[%s3938_s2 + $0x64] sm:$0xf] }
  0x1e   : > { %677 = vmatpush.bf16.msra.mxu1 %v2334_v33  ;;  %696 = vmatpush.bf16.msra.mxu2 %v2210_v34  ;;  %v2733_v51 = vld [vmem:[%s3938_s2 + $0x16c] sm:$0xf0]  ;;  %v2175_v53 = vld [vmem:[%s3938_s2 + $0x70] sm:$0xf0]  ;;  %v2731_v54 = vld [vmem:[%s3938_s2 + $0x164] sm:$0xf]  ;;  %v2174_v56 = vor.u32 %v2701_v48, %v2173_v47 }
  0x1f   : > { %715 = vmatpush.bf16.msra.mxu3 %v2338_v38  ;;  %v2303_v55 = vld [vmem:[%s3938_s2 + $0x170] sm:$0xf0]  ;;  %v2302_v57 = vor.u32 %v2733_v51, %v2301_v49  ;;  %v2178_v58 = vor.u32 %v2699_v52, %v2175_v53  ;;  %v2157_v59 = vld [vmem:[%s3938_s2 + $0x40] sm:$0xf]  ;;  %v2697_v60 = vld [vmem:[%s3938_s2 + $0x4c] sm:$0xf0] }
  0x20   : > { %v2285_v61 = vld [vmem:[%s3938_s2 + $0x140] sm:$0xf]  ;;  %v2306_v62 = vor.u32 %v2731_v54, %v2303_v55  ;;  %v2729_v63 = vld [vmem:[%s3938_s2 + $0x14c] sm:$0xf0]  ;;  %v2695_v0 = vld [vmem:[%s3938_s2 + $0x44] sm:$0xf]  ;;  %v2158_v4 = vor.u32 %v2697_v60, %v2157_v59 }
  0x21   : > { %659 = vmatpush.bf16.msra.mxu0 %v2190_v44  ;;  %v2159_v1 = vld [vmem:[%s3938_s2 + $0x50] sm:$0xf0]  ;;  %v2727_v2 = vld [vmem:[%s3938_s2 + $0x144] sm:$0xf]  ;;  %v2141_v5 = vld [vmem:[%s3938_s2 + $0x20] sm:$0xf]  ;;  %v2286_v6 = vor.u32 %v2729_v63, %v2285_v61 }
  0x22   : > { %678 = vmatpush.bf16.msra.mxu1 %v2318_v45  ;;  %697 = vmatpush.bf16.msra.mxu2 %v2194_v46  ;;  %v2287_v3 = vld [vmem:[%s3938_s2 + $0x150] sm:$0xf0]  ;;  %v2162_v7 = vor.u32 %v2695_v0, %v2159_v1  ;;  %v2693_v8 = vld [vmem:[%s3938_s2 + $0x2c] sm:$0xf0]  ;;  %v2269_v9 = vld [vmem:[%s3938_s2 + $0x120] sm:$0xf] }
  0x23   : > { %716 = vmatpush.bf16.msra.mxu3 %v2322_v50  ;;  %v2725_v10 = vld [vmem:[%s3938_s2 + $0x12c] sm:$0xf0]  ;;  %v2290_v11 = vor.u32 %v2727_v2, %v2287_v3  ;;  %v2691_v12 = vld [vmem:[%s3938_s2 + $0x24] sm:$0xf]  ;;  %v2143_v13 = vld [vmem:[%s3938_s2 + $0x30] sm:$0xf0]  ;;  %v2142_v17 = vor.u32 %v2693_v8, %v2141_v5 }
  0x24   : > { %v2723_v14 = vld [vmem:[%s3938_s2 + $0x124] sm:$0xf]  ;;  %v2271_v15 = vld [vmem:[%s3938_s2 + $0x130] sm:$0xf0]  ;;  %v2125_v16 = vld [vmem:[%s3938_s2] sm:$0xf]  ;;  %v2270_v20 = vor.u32 %v2725_v10, %v2269_v9  ;;  %v2146_v21 = vor.u32 %v2691_v12, %v2143_v13 }
  0x25   : > { %660 = vmatpush.bf16.msra.mxu0 %v2174_v56  ;;  %v2689_v18 = vld [vmem:[%s3938_s2 + $0xc] sm:$0xf0]  ;;  %v2253_v19 = vld [vmem:[%s3938_s2 + $0x100] sm:$0xf]  ;;  %s233_s29 = scalar_select %p232_p3, %s2928_s26, 1  ;;  %v2274_v25 = vor.u32 %v2723_v14, %v2271_v15 }
  0x26   : > { %679 = vmatpush.bf16.msra.mxu1 %v2302_v57  ;;  %698 = vmatpush.bf16.msra.mxu2 %v2178_v58  ;;  %v2721_v22 = vld [vmem:[%s3938_s2 + $0x10c] sm:$0xf0]  ;;  %v2687_v23 = vld [vmem:[%s3938_s2 + $0x4] sm:$0xf]  ;;  %v2127_v24 = vld [vmem:[%s3938_s2 + $0x10] sm:$0xf0]  ;;  %v2126_v31 = vor.u32 %v2689_v18, %v2125_v16 }
  0x27   : > { %717 = vmatpush.bf16.msra.mxu3 %v2306_v62  ;;  %v2719_v26 = vld [vmem:[%s3938_s2 + $0x104] sm:$0xf]  ;;  %v2255_v27 = vld [vmem:[%s3938_s2 + $0x110] sm:$0xf0]  ;;  %s2680_s16 = sshll.u32 %s233_s29, 5  ;;  %s2681_s17 = sshll.u32 %s233_s29, 6  ;;  %v2254_v35 = vor.u32 %v2721_v22, %v2253_v19  ;;  %v2130_v36 = vor.u32 %v2687_v23, %v2127_v24 }
  0x28   : > { %s3129_s20 = scalar_lea.vmem %s3939_s1, %s2680_s16  ;;  %s3134_s23 = scalar_lea.vmem %s3934_s5, %s2681_s17  ;;  %v2716_v28 = vld [vmem:[%s3938_s2 + $0xec] sm:$0xf]  ;;  %v2247_v29 = vld [vmem:[%s3938_s2 + $0xf8] sm:$0xf0]  ;;  %v2258_v39 = vor.u32 %v2719_v26, %v2255_v27  ;;  %v2245_v41 = vld [vmem:[%s3938_s2 + $0xe8] sm:$0xf] }
  0x29   : > { %661 = vmatpush.bf16.msra.mxu0 %v2158_v4  ;;  %v2748_v30 = vld [vmem:[%s3938_s2 + $0x1ec] sm:$0xf]  ;;  %s3148_s9 = scalar_lea.vmem %s3935_s6, %s2680_s16  ;;  %v2109_v32 = vld [vmem:[%s3129_s20] sm:$0xf]  ;;  %v2684_v33 = vld [vmem:[%s3129_s20 + $0x4] sm:$0xf0]  ;;  %v2250_v40 = vor.u32 %v2716_v28, %v2247_v29 }
  0x2a   : > { %680 = vmatpush.bf16.msra.mxu1 %v2286_v6  ;;  %699 = vmatpush.bf16.msra.mxu2 %v2162_v7  ;;  %v2375_v34 = vld [vmem:[%s3938_s2 + $0x1f8] sm:$0xf0]  ;;  %v2683_v37 = vld [vmem:[%s3129_s20 + $0x4] sm:$0xf]  ;;  %v2111_v38 = vld [vmem:[%s3129_s20 + $0x8] sm:$0xf0]  ;;  %v3166_v44 = vor.u32 %v2684_v33, %v2109_v32 }
  0x2b   : > { %718 = vmatpush.bf16.msra.mxu3 %v2290_v11  ;;  %v2718_v42 = vld [vmem:[%s3938_s2 + $0xf4] sm:$0xf0]  ;;  %v2373_v43 = vld [vmem:[%s3938_s2 + $0x1e8] sm:$0xf]  ;;  %v2378_v45 = vor.u32 %v2748_v30, %v2375_v34  ;;  %v2712_v47 = vld [vmem:[%s3938_s2 + $0xcc] sm:$0xf]  ;;  %v3177_v49 = vor.u32 %v2683_v37, %v2111_v38 }
  0x2c   : > { %v2750_v46 = vld [vmem:[%s3938_s2 + $0x1f4] sm:$0xf0]  ;;  %v2231_v48 = vld [vmem:[%s3938_s2 + $0xd8] sm:$0xf0]  ;;  %v2744_v50 = vld [vmem:[%s3938_s2 + $0x1cc] sm:$0xf]  ;;  %v2246_v52 = vor.u32 %v2718_v42, %v2245_v41 }
  0x2d   : > { %662 = vmatpush.bf16.msra.mxu0 %v2142_v17  ;;  %v2359_v51 = vld [vmem:[%s3938_s2 + $0x1d8] sm:$0xf0]  ;;  %v2374_v53 = vor.u32 %v2750_v46, %v2373_v43  ;;  %v2234_v54 = vor.u32 %v2712_v47, %v2231_v48  ;;  %v2229_v55 = vld [vmem:[%s3938_s2 + $0xc8] sm:$0xf]  ;;  %v2714_v56 = vld [vmem:[%s3938_s2 + $0xd4] sm:$0xf0] }
  0x2e   : > { %681 = vmatpush.bf16.msra.mxu1 %v2270_v20  ;;  %700 = vmatpush.bf16.msra.mxu2 %v2146_v21  ;;  %v2357_v57 = vld [vmem:[%s3938_s2 + $0x1c8] sm:$0xf]  ;;  %v2362_v58 = vor.u32 %v2744_v50, %v2359_v51  ;;  %v2746_v59 = vld [vmem:[%s3938_s2 + $0x1d4] sm:$0xf0]  ;;  %v2708_v60 = vld [vmem:[%s3938_s2 + $0xac] sm:$0xf]  ;;  %v2230_v0 = vor.u32 %v2714_v56, %v2229_v55 }
  0x2f   : > { %719 = vmatpush.bf16.msra.mxu3 %v2274_v25  ;;  %v2215_v61 = vld [vmem:[%s3938_s2 + $0xb8] sm:$0xf0]  ;;  %v2740_v62 = vld [vmem:[%s3938_s2 + $0x1ac] sm:$0xf]  ;;  %v2358_v1 = vor.u32 %v2746_v59, %v2357_v57  ;;  %v2213_v3 = vld [vmem:[%s3938_s2 + $0xa8] sm:$0xf] }
  0x30   : > { %v2343_v63 = vld [vmem:[%s3938_s2 + $0x1b8] sm:$0xf0]  ;;  %v2218_v2 = vor.u32 %v2708_v60, %v2215_v61  ;;  %v2710_v4 = vld [vmem:[%s3938_s2 + $0xb4] sm:$0xf0]  ;;  %v2341_v5 = vld [vmem:[%s3938_s2 + $0x1a8] sm:$0xf] }
  0x31   : > { %663 = vmatpush.bf16.msra.mxu0 %v2126_v31  ;;  %v2346_v6 = vor.u32 %v2740_v62, %v2343_v63  ;;  %v2742_v7 = vld [vmem:[%s3938_s2 + $0x1b4] sm:$0xf0]  ;;  %v2704_v8 = vld [vmem:[%s3938_s2 + $0x8c] sm:$0xf]  ;;  %v2199_v9 = vld [vmem:[%s3938_s2 + $0x98] sm:$0xf0]  ;;  %v2214_v12 = vor.u32 %v2710_v4, %v2213_v3 }
  0x32   : > { %682 = vmatpush.bf16.msra.mxu1 %v2254_v35  ;;  %701 = vmatpush.bf16.msra.mxu2 %v2130_v36  ;;  %v2736_v10 = vld [vmem:[%s3938_s2 + $0x18c] sm:$0xf]  ;;  %v2327_v11 = vld [vmem:[%s3938_s2 + $0x198] sm:$0xf0]  ;;  %v2197_v13 = vld [vmem:[%s3938_s2 + $0x88] sm:$0xf]  ;;  %v2342_v14 = vor.u32 %v2742_v7, %v2341_v5  ;;  %v2202_v15 = vor.u32 %v2704_v8, %v2199_v9 }
  0x33   : > { %720 = vmatpush.bf16.msra.mxu3 %v2258_v39  ;;  %v2706_v16 = vld [vmem:[%s3938_s2 + $0x94] sm:$0xf0]  ;;  %v2325_v17 = vld [vmem:[%s3938_s2 + $0x188] sm:$0xf]  ;;  %v2330_v19 = vor.u32 %v2736_v10, %v2327_v11  ;;  %v2117_v20 = vld [vmem:[%s3129_s20 + $0x10] sm:$0xf] }
  0x34   : > { %664 = vmatmul.bf16.vlgmr.msra.gmra.mxu0 %v3166_v44  ;;  %v2738_v18 = vld [vmem:[%s3938_s2 + $0x194] sm:$0xf0]  ;;  %v2700_v21 = vld [vmem:[%s3938_s2 + $0x6c] sm:$0xf]  ;;  %v2183_v22 = vld [vmem:[%s3938_s2 + $0x78] sm:$0xf0]  ;;  %v2198_v26 = vor.u32 %v2706_v16, %v2197_v13 }
  0x35   : > { %683 = vmatmul.bf16.vlgmr.msra.gmra.mxu1 %v3177_v49  ;;  %702 = vmatmul.bf16.vlgmr.msra.gmra.mxu2 %v3166_v44  ;;  %v2686_v23 = vld [vmem:[%s3129_s20 + $0x14] sm:$0xf0]  ;;  %v2732_v24 = vld [vmem:[%s3938_s2 + $0x16c] sm:$0xf]  ;;  %v2311_v25 = vld [vmem:[%s3938_s2 + $0x178] sm:$0xf0]  ;;  %v2326_v29 = vor.u32 %v2738_v18, %v2325_v17  ;;  %v2186_v30 = vor.u32 %v2700_v21, %v2183_v22 }
  0x36   : > { %770 = vmatpush.bf16.msrb.mxu2 %v2250_v40  ;;  %721 = vmatmul.bf16.vlgmr.msra.gmra.mxu3 %v3177_v49  ;;  %v2685_v27 = vld [vmem:[%s3129_s20 + $0x14] sm:$0xf]  ;;  %v2119_v28 = vld [vmem:[%s3129_s20 + $0x18] sm:$0xf0]  ;;  %v2181_v31 = vld [vmem:[%s3938_s2 + $0x68] sm:$0xf]  ;;  %v3274_v34 = vor.u32 %v2686_v23, %v2117_v20  ;;  %v2314_v35 = vor.u32 %v2732_v24, %v2311_v25 }
  0x37   : > { %789 = vmatpush.bf16.msrb.mxu3 %v2378_v45  ;;  %732 = vmatpush.bf16.msrb.mxu0 %v2246_v52  ;;  %v2702_v32 = vld [vmem:[%s3938_s2 + $0x74] sm:$0xf0]  ;;  %v2309_v33 = vld [vmem:[%s3938_s2 + $0x168] sm:$0xf]  ;;  %v2696_v37 = vld [vmem:[%s3938_s2 + $0x4c] sm:$0xf]  ;;  %v3285_v39 = vor.u32 %v2685_v27, %v2119_v28 }
  0x38   : > { %751 = vmatpush.bf16.msrb.mxu1 %v2374_v53  ;;  %v2734_v36 = vld [vmem:[%s3938_s2 + $0x174] sm:$0xf0]  ;;  %v2167_v38 = vld [vmem:[%s3938_s2 + $0x58] sm:$0xf0]  ;;  %v2728_v40 = vld [vmem:[%s3938_s2 + $0x14c] sm:$0xf]  ;;  %v2182_v42 = vor.u32 %v2702_v32, %v2181_v31 }
  0x39   : > { %v2295_v41 = vld [vmem:[%s3938_s2 + $0x158] sm:$0xf0]  ;;  %v2310_v43 = vor.u32 %v2734_v36, %v2309_v33  ;;  %v2170_v45 = vor.u32 %v2696_v37, %v2167_v38  ;;  %v2165_v46 = vld [vmem:[%s3938_s2 + $0x48] sm:$0xf]  ;;  %v2698_v47 = vld [vmem:[%s3938_s2 + $0x54] sm:$0xf0] }
  0x3a   : > { %771 = vmatpush.bf16.msrb.mxu2 %v2234_v54  ;;  %v2293_v48 = vld [vmem:[%s3938_s2 + $0x148] sm:$0xf]  ;;  %v2298_v50 = vor.u32 %v2728_v40, %v2295_v41  ;;  %v2730_v51 = vld [vmem:[%s3938_s2 + $0x154] sm:$0xf0]  ;;  %v2692_v52 = vld [vmem:[%s3938_s2 + $0x2c] sm:$0xf]  ;;  %v2166_v56 = vor.u32 %v2698_v47, %v2165_v46 }
  0x3b   : > { %790 = vmatpush.bf16.msrb.mxu3 %v2362_v58  ;;  %733 = vmatpush.bf16.msrb.mxu0 %v2230_v0  ;;  %v2151_v53 = vld [vmem:[%s3938_s2 + $0x38] sm:$0xf0]  ;;  %v2724_v54 = vld [vmem:[%s3938_s2 + $0x12c] sm:$0xf]  ;;  %v2294_v57 = vor.u32 %v2730_v51, %v2293_v48  ;;  %v2149_v59 = vld [vmem:[%s3938_s2 + $0x28] sm:$0xf] }
  0x3c   : > { %752 = vmatpush.bf16.msrb.mxu1 %v2358_v1  ;;  %v2279_v55 = vld [vmem:[%s3938_s2 + $0x138] sm:$0xf0]  ;;  %v2154_v58 = vor.u32 %v2692_v52, %v2151_v53  ;;  %v2694_v60 = vld [vmem:[%s3938_s2 + $0x34] sm:$0xf0]  ;;  %v2277_v61 = vld [vmem:[%s3938_s2 + $0x128] sm:$0xf] }
  0x3d   : > { %v2282_v62 = vor.u32 %v2724_v54, %v2279_v55  ;;  %v2726_v63 = vld [vmem:[%s3938_s2 + $0x134] sm:$0xf0]  ;;  %v2688_v0 = vld [vmem:[%s3938_s2 + $0xc] sm:$0xf]  ;;  %v2135_v1 = vld [vmem:[%s3938_s2 + $0x18] sm:$0xf0]  ;;  %v2150_v4 = vor.u32 %v2694_v60, %v2149_v59 }
  0x3e   : > { %772 = vmatpush.bf16.msrb.mxu2 %v2218_v2  ;;  %v2720_v2 = vld [vmem:[%s3938_s2 + $0x10c] sm:$0xf]  ;;  %v2263_v3 = vld [vmem:[%s3938_s2 + $0x118] sm:$0xf0]  ;;  %v2278_v5 = vor.u32 %v2726_v63, %v2277_v61  ;;  %v2133_v7 = vld [vmem:[%s3938_s2 + $0x8] sm:$0xf] }
  0x3f   : > { %791 = vmatpush.bf16.msrb.mxu3 %v2346_v6  ;;  %734 = vmatpush.bf16.msrb.mxu0 %v2214_v12  ;;  %v2138_v6 = vor.u32 %v2688_v0, %v2135_v1  ;;  %v2690_v8 = vld [vmem:[%s3938_s2 + $0x14] sm:$0xf0]  ;;  %v2266_v9 = vor.u32 %v2720_v2, %v2263_v3  ;;  %v2261_v10 = vld [vmem:[%s3938_s2 + $0x108] sm:$0xf] }
  0x40   : > { %753 = vmatpush.bf16.msrb.mxu1 %v2342_v14  ;;  %v2722_v11 = vld [vmem:[%s3938_s2 + $0x114] sm:$0xf0]  ;;  %v2134_v12 = vor.u32 %v2690_v8, %v2133_v7 }
  0x41   : > { %v2262_v13 = vor.u32 %v2722_v11, %v2261_v10 }
  0x42   : > { %773 = vmatpush.bf16.msrb.mxu2 %v2202_v15 }
  0x43   : > { %792 = vmatpush.bf16.msrb.mxu3 %v2330_v19  ;;  %735 = vmatpush.bf16.msrb.mxu0 %v2198_v26 }
  0x44   : > { %754 = vmatpush.bf16.msrb.mxu1 %v2326_v29  ;;  %669 = vmatmul.bf16.gmra.mxu0 %v3274_v34 }
  0x45   : > { %688 = vmatmul.bf16.gmra.mxu1 %v3285_v39  ;;  %707 = vmatmul.bf16.gmra.mxu2 %v3274_v34 }
  0x46   : > { %774 = vmatpush.bf16.msrb.mxu2 %v2186_v30  ;;  %726 = vmatmul.bf16.gmra.mxu3 %v3285_v39 }
  0x47   : > { %793 = vmatpush.bf16.msrb.mxu3 %v2314_v35  ;;  %736 = vmatpush.bf16.msrb.mxu0 %v2182_v42 }
  0x48   : > { %755 = vmatpush.bf16.msrb.mxu1 %v2310_v43 }
  0x4a   : > { %775 = vmatpush.bf16.msrb.mxu2 %v2170_v45 }
  0x4b   : > { %794 = vmatpush.bf16.msrb.mxu3 %v2298_v50  ;;  %737 = vmatpush.bf16.msrb.mxu0 %v2166_v56 }
  0x4c   : > { %756 = vmatpush.bf16.msrb.mxu1 %v2294_v57 }
  0x4e   : > { %776 = vmatpush.bf16.msrb.mxu2 %v2154_v58 }
  0x4f   : > { %795 = vmatpush.bf16.msrb.mxu3 %v2282_v62  ;;  %738 = vmatpush.bf16.msrb.mxu0 %v2150_v4 }
  0x50   : > { %757 = vmatpush.bf16.msrb.mxu1 %v2278_v5 }
  0x52   : > { %777 = vmatpush.bf16.msrb.mxu2 %v2138_v6 }
  0x53   : > { %796 = vmatpush.bf16.msrb.mxu3 %v2266_v9  ;;  %739 = vmatpush.bf16.msrb.mxu0 %v2134_v12 }
  0x54   : > { %758 = vmatpush.bf16.msrb.mxu1 %v2262_v13 }
  0x55   : > { %778 = vmatmul.bf16.vlgmr.msrb.gmra.mxu2 %v3166_v44 }
  0x56   : > { %740 = vmatmul.bf16.vlgmr.msrb.gmra.mxu0 %v3166_v44  ;;  %797 = vmatmul.bf16.vlgmr.msrb.gmra.mxu3 %v3177_v49 }
  0x57   : > { %759 = vmatmul.bf16.vlgmr.msrb.gmra.mxu1 %v3177_v49 }
  0x65   : > { %783 = vmatmul.bf16.gmra.mxu2 %v3274_v34 }
  0x66   : > { %745 = vmatmul.bf16.gmra.mxu0 %v3274_v34  ;;  %802 = vmatmul.bf16.gmra.mxu3 %v3285_v39 }
  0x67   : > { %764 = vmatmul.bf16.gmra.mxu1 %v3285_v39 }
  0xb1   : > { %v665_v14 = vpop.f32.mrf.mxu0 }
  0xb2   : > { %v684_v15 = vpop.f32.mrf.mxu1 }
  0xb3   : > { %v685_v16 = vadd.f32 %v684_v15, %v665_v14 }
  0xb5   : > { %808 = vst [vmem:[#allocation2] sm:$0xff] %v685_v16 }
  0xb8   : > { %v703_v17 = vpop.f32.mrf.mxu2 }
  0xb9   : > { %v722_v18 = vpop.f32.mrf.mxu3  ;;  %v667_v19 = vpop.f32.mrf.mxu0 }
  0xba   : > { %v723_v20 = vadd.f32 %v722_v18, %v703_v17  ;;  %v686_v21 = vpop.f32.mrf.mxu1 }
  0xbb   : > { %v687_v22 = vadd.f32 %v686_v21, %v667_v19 }
  0xbc   : > { %809 = vst [vmem:[#allocation2 + $0x8] sm:$0xff] %v723_v20 }
  0xbd   : > { %812 = vst [vmem:[#allocation2 + $0x20] sm:$0xff] %v687_v22 }
  0xc0   : > { %v705_v23 = vpop.f32.mrf.mxu2 }
  0xc1   : > { %v724_v24 = vpop.f32.mrf.mxu3  ;;  %v670_v25 = vpop.f32.mrf.mxu0 }
  0xc2   : > { %v725_v26 = vadd.f32 %v724_v24, %v705_v23  ;;  %v689_v27 = vpop.f32.mrf.mxu1 }
  0xc3   : > { %v690_v28 = vadd.f32 %v689_v27, %v670_v25 }
  0xc4   : > { %813 = vst [vmem:[#allocation2 + $0x28] sm:$0xff] %v725_v26 }
  0xc5   : > { %816 = vst [vmem:[#allocation2 + $0x40] sm:$0xff] %v690_v28 }
  0xc8   : > { %v708_v29 = vpop.f32.mrf.mxu2 }
  0xc9   : > { %v727_v30 = vpop.f32.mrf.mxu3  ;;  %v672_v31 = vpop.f32.mrf.mxu0 }
  0xca   : > { %v728_v32 = vadd.f32 %v727_v30, %v708_v29  ;;  %v691_v33 = vpop.f32.mrf.mxu1 }
  0xcb   : > { %v692_v35 = vadd.f32 %v691_v33, %v672_v31 }
  0xcc   : > { %817 = vst [vmem:[#allocation2 + $0x48] sm:$0xff] %v728_v32 }
  0xcd   : > { %820 = vst [vmem:[#allocation2 + $0x60] sm:$0xff] %v692_v35 }
  0xd0   : > { %v710_v36 = vpop.f32.mrf.mxu2 }
  0xd1   : > { %v729_v37 = vpop.f32.mrf.mxu3 }
  0xd2   : > { %v730_v38 = vadd.f32 %v729_v37, %v710_v36 }
  0xd3   : > { %v741_v40 = vpop.f32.mrf.mxu0 }
  0xd4   : > { %v760_v41 = vpop.f32.mrf.mxu1  ;;  %821 = vst [vmem:[#allocation2 + $0x68] sm:$0xff] %v730_v38 }
  0xd5   : > { %v761_v42 = vadd.f32 %v760_v41, %v741_v40 }
  0xd7   : > { %810 = vst [vmem:[#allocation2 + $0x10] sm:$0xff] %v761_v42 }
  0xd8   : > { %v779_v43 = vpop.f32.mrf.mxu2 }
  0xd9   : > { %v798_v45 = vpop.f32.mrf.mxu3 }
  0xda   : > { %v799_v46 = vadd.f32 %v798_v45, %v779_v43 }
  0xdb   : > { %v743_v47 = vpop.f32.mrf.mxu0 }
  0xdc   : > { %v762_v48 = vpop.f32.mrf.mxu1  ;;  %811 = vst [vmem:[#allocation2 + $0x18] sm:$0xff] %v799_v46 }
  0xdd   : > { %v763_v50 = vadd.f32 %v762_v48, %v743_v47 }
  0xdf   : > { %814 = vst [vmem:[#allocation2 + $0x30] sm:$0xff] %v763_v50 }
  0xe0   : > { %v781_v51 = vpop.f32.mrf.mxu2 }
  0xe1   : > { %v800_v52 = vpop.f32.mrf.mxu3 }
  0xe2   : > { %v801_v53 = vadd.f32 %v800_v52, %v781_v51 }
  0xe3   : > { %v746_v54 = vpop.f32.mrf.mxu0 }
  0xe4   : > { %v765_v55 = vpop.f32.mrf.mxu1  ;;  %815 = vst [vmem:[#allocation2 + $0x38] sm:$0xff] %v801_v53 }
  0xe5   : > { %v766_v56 = vadd.f32 %v765_v55, %v746_v54 }
  0xe7   : > { %818 = vst [vmem:[#allocation2 + $0x50] sm:$0xff] %v766_v56 }
  0xe8   : > { %v784_v57 = vpop.f32.mrf.mxu2 }
  0xe9   : > { %v803_v58 = vpop.f32.mrf.mxu3 }
  0xea   : > { %v804_v59 = vadd.f32 %v803_v58, %v784_v57 }
  0xeb   : > { %v748_v60 = vpop.f32.mrf.mxu0 }
  0xec   : > { %v767_v61 = vpop.f32.mrf.mxu1  ;;  %819 = vst [vmem:[#allocation2 + $0x58] sm:$0xff] %v804_v59 }
  0xed   : > { %v768_v62 = vadd.f32 %v767_v61, %v748_v60 }
  0xef   : > { %822 = vst [vmem:[#allocation2 + $0x70] sm:$0xff] %v768_v62 }
  0xf0   : > { %v786_v63 = vpop.f32.mrf.mxu2 }
  0xf1   : > { %v805_v0 = vpop.f32.mrf.mxu3 }
  0xf2   : > { %v806_v1 = vadd.f32 %v805_v0, %v786_v63 }
  0xf4   : > { %823 = vst [vmem:[#allocation2 + $0x78] sm:$0xff] %v806_v1 }
  0xf5 LB: >> { %s2379_s10 = sshll.u32 %s2928_s26, 5  ;;  %v1071_v38 = vlaneseq  ;;  %s2881_s8 = sphi %s3365_s8, %s829_s8  }
  0xf6   : >> { %s831_s11 = sadd.s32 %s2881_s8, %s2379_s10 }
  0xf7   : >> { %s3372_s12 = smul.u32 20, %s831_s11  ;;  %vm1073_vm0 = vcmp.lt.s32.totalorder %v1071_v38, 512 }
  0xf9   : >> { %s833_s13 = sld [smem:[#allocation5 + %s3372_s12]]  ;;  %s843_s14 = sadd.s32 1, %s3372_s12 }
  0xfa   : >> { %s844_s15 = sld [smem:[#allocation5 + %s843_s14]]  ;;  %s855_s16 = sadd.s32 2, %s3372_s12 }
  0xfb   : >> { %s856_s17 = sld [smem:[#allocation5 + %s855_s16]]  ;;  %s867_s18 = sadd.s32 3, %s3372_s12 }
  0xfc   : >> { %s3378_s19 = sld [smem:[#allocation5 + %s867_s18]]  ;;  %s879_s21 = sadd.s32 4, %s3372_s12 }
  0xfd   : >> { %s3381_s22 = sld [smem:[#allocation5 + %s879_s21]]  ;;  %s891_s20 = sadd.s32 5, %s3372_s12 }
  0xfe   : >> { %s3384_s24 = sld [smem:[#allocation5 + %s891_s20]] }
  0xff   : >> { %s834_s27 = sshra.s32 %s833_s13, 3  ;;  %s837_s28 = sand.u32 7, %s833_s13 }
 0x100   : >> { %s2751_s29 = sshll.u32 %s834_s27, 5  ;;  %s845_s30 = sshra.s32 %s844_s15, 3 }
 0x101   : >> { %s840_s7 = sadd.s32 %s2751_s29, %s837_s28  ;;  %s848_s10 = sand.u32 7, %s844_s15 }
 0x102   : >> { %s2752_s11 = sshll.u32 %s845_s30, 5  ;;  %s841_s14 = scalar_lea.vmem [#allocation2], %s840_s7 }
 0x103   : >> { %v842_v2 = vld [vmem:[%s841_s14] ss:$8 sm:$0xf]  ;;  %s851_s16 = sadd.s32 %s2752_s11, %s848_s10  ;;  %s857_s18 = sshra.s32 %s856_s17, 3 }
 0x104   : >> { %s860_s21 = sand.u32 7, %s856_s17  ;;  %s852_s1 = scalar_lea.vmem [#allocation2], %s851_s16 }
 0x105   : >> { %v853_v3 = vld [vmem:[%s852_s1] ss:$8 sm:$0xf]  ;;  %s2753_s20 = sshll.u32 %s857_s18, 5  ;;  %s869_s0 = sshra.s32 %s3378_s19, 3 }
 0x106   : >> { %v854_v4 = vmax.f32 %v842_v2, %v853_v3  ;;  %s863_s13 = sadd.s32 %s2753_s20, %s860_s21  ;;  %s872_s27 = sand.u32 7, %s3378_s19 }
 0x107   : >> { %s2754_s2 = sshll.u32 %s869_s0, 5  ;;  %s864_s28 = scalar_lea.vmem [#allocation2], %s863_s13 }
 0x108   : >> { %v865_v5 = vld [vmem:[%s864_s28] ss:$8 sm:$0xf]  ;;  %s875_s15 = sadd.s32 %s2754_s2, %s872_s27  ;;  %s881_s29 = sshra.s32 %s3381_s22, 3 }
 0x109   : >> { %v866_v6 = vmax.f32 %v854_v4, %v865_v5  ;;  %s884_s30 = sand.u32 7, %s3381_s22  ;;  %s876_s17 = scalar_lea.vmem [#allocation2], %s875_s15 }
 0x10a   : >> { %v877_v7 = vld [vmem:[%s876_s17] ss:$8 sm:$0xf]  ;;  %s2755_s1 = sshll.u32 %s881_s29, 5  ;;  %s893_s7 = sshra.s32 %s3384_s24, 3 }
 0x10b   : >> { %s887_s10 = sadd.s32 %s2755_s1, %s884_s30  ;;  %s896_s11 = sand.u32 7, %s3384_s24  ;;  %v878_v8 = vmax.f32 %v866_v6, %v877_v7 }
 0x10c   : >> { %s2756_s19 = sshll.u32 %s893_s7, 5  ;;  %s888_s0 = scalar_lea.vmem [#allocation2], %s887_s10 }
 0x10d   : >> { %v889_v9 = vld [vmem:[%s888_s0] ss:$8 sm:$0xf]  ;;  %s899_s14 = sadd.s32 %s2756_s19, %s896_s11  ;;  %s3940_s2 = sadd.s32 6, %s3372_s12 }
 0x10e   : >> { %s904_s16 = sld [smem:[#allocation5 + %s3940_s2]]  ;;  %s915_s18 = sadd.s32 7, %s3372_s12  ;;  %v890_v10 = vmax.f32 %v878_v8, %v889_v9 }
 0x10f   : >> { %s916_s21 = sld [smem:[#allocation5 + %s915_s18]]  ;;  %s927_s20 = sadd.s32 8, %s3372_s12 }
 0x110   : >> { %s928_s22 = sld [smem:[#allocation5 + %s927_s20]]  ;;  %s939_s13 = sadd.s32 9, %s3372_s12 }
 0x111   : >> { %s900_s27 = scalar_lea.vmem [#allocation2], %s899_s14  ;;  %s3398_s28 = sld [smem:[#allocation5 + %s939_s13]] }
 0x112   : >> { %v901_v11 = vld [vmem:[%s900_s27] ss:$8 sm:$0xf]  ;;  %s951_s24 = sadd.s32 10, %s3372_s12  ;;  %s963_s29 = sadd.s32 11, %s3372_s12 }
 0x113   : >> { %s3401_s15 = sld [smem:[#allocation5 + %s951_s24]]  ;;  %v902_v12 = vmax.f32 %v890_v10, %v901_v11 }
 0x114   : >> { %s905_s30 = sshra.s32 %s904_s16, 3  ;;  %s908_s17 = sand.u32 7, %s904_s16 }
 0x115   : >> { %s2757_s1 = sshll.u32 %s905_s30, 5  ;;  %s3404_s7 = sld [smem:[#allocation5 + %s963_s29]] }
 0x116   : >> { %s911_s10 = sadd.s32 %s2757_s1, %s908_s17  ;;  %s917_s11 = sshra.s32 %s916_s21, 3 }
 0x117   : >> { %s920_s19 = sand.u32 7, %s916_s21  ;;  %s912_s0 = scalar_lea.vmem [#allocation2], %s911_s10 }
 0x118   : >> { %v913_v13 = vld [vmem:[%s912_s0] ss:$8 sm:$0xf]  ;;  %s2758_s14 = sshll.u32 %s917_s11, 5  ;;  %s929_s2 = sshra.s32 %s928_s22, 3 }
 0x119   : >> { %v914_v14 = vmax.f32 %v902_v12, %v913_v13  ;;  %s923_s18 = sadd.s32 %s2758_s14, %s920_s19  ;;  %s932_s20 = sand.u32 7, %s928_s22 }
 0x11a   : >> { %s2759_s13 = sshll.u32 %s929_s2, 5  ;;  %s924_s16 = scalar_lea.vmem [#allocation2], %s923_s18 }
 0x11b   : >> { %v925_v15 = vld [vmem:[%s924_s16] ss:$8 sm:$0xf]  ;;  %s935_s27 = sadd.s32 %s2759_s13, %s932_s20  ;;  %s941_s24 = sshra.s32 %s3398_s28, 3 }
 0x11c   : >> { %v926_v16 = vmax.f32 %v914_v14, %v925_v15  ;;  %s944_s29 = sand.u32 7, %s3398_s28  ;;  %s936_s21 = scalar_lea.vmem [#allocation2], %s935_s27 }
 0x11d   : >> { %v937_v17 = vld [vmem:[%s936_s21] ss:$8 sm:$0xf]  ;;  %s2760_s30 = sshll.u32 %s941_s24, 5  ;;  %s953_s17 = sshra.s32 %s3401_s15, 3 }
 0x11e   : >> { %v938_v18 = vmax.f32 %v926_v16, %v937_v17  ;;  %s947_s1 = sadd.s32 %s2760_s30, %s944_s29  ;;  %s956_s10 = sand.u32 7, %s3401_s15 }
 0x11f   : >> { %s2761_s22 = sshll.u32 %s953_s17, 5  ;;  %s948_s11 = scalar_lea.vmem [#allocation2], %s947_s1 }
 0x120   : >> { %v949_v19 = vld [vmem:[%s948_s11] ss:$8 sm:$0xf]  ;;  %s959_s19 = sadd.s32 %s2761_s22, %s956_s10  ;;  %s965_s0 = sshra.s32 %s3404_s7, 3 }
 0x121   : >> { %s968_s14 = sand.u32 7, %s3404_s7  ;;  %v950_v20 = vmax.f32 %v938_v18, %v949_v19  ;;  %s2762_s28 = sshll.u32 %s965_s0, 5 }
 0x122   : >> { %s975_s2 = sadd.s32 12, %s3372_s12  ;;  %s960_s18 = scalar_lea.vmem [#allocation2], %s959_s19 }
 0x123   : >> { %v961_v21 = vld [vmem:[%s960_s18] ss:$8 sm:$0xf]  ;;  %s971_s20 = sadd.s32 %s2762_s28, %s968_s14  ;;  %s976_s13 = sld [smem:[#allocation5 + %s975_s2]] }
 0x124   : >> { %s987_s16 = sadd.s32 13, %s3372_s12  ;;  %s999_s15 = sadd.s32 14, %s3372_s12  ;;  %v962_v22 = vmax.f32 %v950_v20, %v961_v21 }
 0x125   : >> { %s988_s27 = sld [smem:[#allocation5 + %s987_s16]]  ;;  %s1011_s29 = sadd.s32 15, %s3372_s12 }
 0x126   : >> { %s1000_s24 = sld [smem:[#allocation5 + %s999_s15]]  ;;  %s972_s21 = scalar_lea.vmem [#allocation2], %s971_s20 }
 0x127   : >> { %v973_v23 = vld [vmem:[%s972_s21] ss:$8 sm:$0xf]  ;;  %s3416_s30 = sld [smem:[#allocation5 + %s1011_s29]]  ;;  %s1023_s7 = sadd.s32 16, %s3372_s12 }
 0x128   : >> { %s3419_s17 = sld [smem:[#allocation5 + %s1023_s7]]  ;;  %s1035_s1 = sadd.s32 17, %s3372_s12  ;;  %v974_v24 = vmax.f32 %v962_v22, %v973_v23 }
 0x129   : >> { %s977_s10 = sshra.s32 %s976_s13, 3  ;;  %s980_s22 = sand.u32 7, %s976_s13 }
 0x12a   : >> { %s2763_s11 = sshll.u32 %s977_s10, 5  ;;  %s3422_s19 = sld [smem:[#allocation5 + %s1035_s1]] }
 0x12b   : >> { %s983_s0 = sadd.s32 %s2763_s11, %s980_s22  ;;  %s989_s14 = sshra.s32 %s988_s27, 3 }
 0x12c   : >> { %s992_s28 = sand.u32 7, %s988_s27  ;;  %s984_s2 = scalar_lea.vmem [#allocation2], %s983_s0 }
 0x12d   : >> { %v985_v25 = vld [vmem:[%s984_s2] ss:$8 sm:$0xf]  ;;  %s2764_s18 = sshll.u32 %s989_s14, 5  ;;  %s1001_s20 = sshra.s32 %s1000_s24, 3 }
 0x12e   : >> { %v986_v26 = vmax.f32 %v974_v24, %v985_v25  ;;  %s995_s16 = sadd.s32 %s2764_s18, %s992_s28  ;;  %s1004_s15 = sand.u32 7, %s1000_s24 }
 0x12f   : >> { %s2765_s29 = sshll.u32 %s1001_s20, 5  ;;  %s996_s13 = scalar_lea.vmem [#allocation2], %s995_s16 }
 0x130   : >> { %v997_v27 = vld [vmem:[%s996_s13] ss:$8 sm:$0xf]  ;;  %s1007_s21 = sadd.s32 %s2765_s29, %s1004_s15  ;;  %s1013_s7 = sshra.s32 %s3416_s30, 3 }
 0x131   : >> { %v998_v28 = vmax.f32 %v986_v26, %v997_v27  ;;  %s1016_s1 = sand.u32 7, %s3416_s30  ;;  %s1008_s27 = scalar_lea.vmem [#allocation2], %s1007_s21 }
 0x132   : >> { %v1009_v29 = vld [vmem:[%s1008_s27] ss:$8 sm:$0xf]  ;;  %s2766_s10 = sshll.u32 %s1013_s7, 5  ;;  %s1025_s22 = sshra.s32 %s3419_s17, 3 }
 0x133   : >> { %v1010_v30 = vmax.f32 %v998_v28, %v1009_v29  ;;  %s1019_s11 = sadd.s32 %s2766_s10, %s1016_s1  ;;  %s1028_s0 = sand.u32 7, %s3419_s17 }
 0x134   : >> { %s2767_s14 = sshll.u32 %s1025_s22, 5  ;;  %s1020_s24 = scalar_lea.vmem [#allocation2], %s1019_s11 }
 0x135   : >> { %v1021_v31 = vld [vmem:[%s1020_s24] ss:$8 sm:$0xf]  ;;  %s1031_s28 = sadd.s32 %s2767_s14, %s1028_s0  ;;  %s1037_s2 = sshra.s32 %s3422_s19, 3 }
 0x136   : >> { %s1040_s18 = sand.u32 7, %s3422_s19  ;;  %v1022_v32 = vmax.f32 %v1010_v30, %v1021_v31  ;;  %s2768_s20 = sshll.u32 %s1037_s2, 5 }
 0x137   : >> { %s1047_s30 = sadd.s32 18, %s3372_s12  ;;  %s1032_s16 = scalar_lea.vmem [#allocation2], %s1031_s28 }
 0x138   : >> { %v1033_v33 = vld [vmem:[%s1032_s16] ss:$8 sm:$0xf]  ;;  %s1043_s15 = sadd.s32 %s2768_s20, %s1040_s18  ;;  %s1048_s29 = sld [smem:[#allocation5 + %s1047_s30]] }
 0x139   : >> { %s1059_s13 = sadd.s32 19, %s3372_s12  ;;  %v1034_v35 = vmax.f32 %v1022_v32, %v1033_v33  ;;  %s1044_s7 = scalar_lea.vmem [#allocation2], %s1043_s15 }
 0x13a   : >> { %s1060_s21 = sld [smem:[#allocation5 + %s1059_s13]]  ;;  %v1045_v36 = vld [vmem:[%s1044_s7] ss:$8 sm:$0xf]  ;;  %s1075_s17 = sshra.s32 %s2881_s8, 3 }
 0x13b   : >> { %s1078_s1 = sand.u32 7, %s2881_s8  ;;  %v1046_v37 = vmax.f32 %v1034_v35, %v1045_v36  ;;  %s2771_s11 = sshll.u32 %s1075_s17, 5 }
 0x13c   : >> { %s1081_s2 = sadd.s32 %s2771_s11, %s1078_s1  ;;  %s829_s8 = sadd.s32 1, %s2881_s8  }
 0x13d   : >> { %s1082_s20 = scalar_lea.vmem [#allocation3], %s1081_s2  ;;  %p826_p4 = scmp.ge.s32.totalorder %s829_s8, 32  }
 0x13e   : >> { %s1049_s27 = sshra.s32 %s1048_s29, 3  ;;  %s1052_s10 = sand.u32 7, %s1048_s29  ;;  %v2536_v45 = vld [vmem:[%s3932_s3 + $0xe0] sm:$0xf] (%p826_p4)  ;;  %v2802_v46 = vld [vmem:[%s3932_s3 + $0xec] sm:$0xf0] (%p826_p4) }
 0x13f   : >> { %s2769_s22 = sshll.u32 %s1049_s27, 5  ;;  %v2664_v47 = vld [vmem:[%s3932_s3 + $0x1e0] sm:$0xf] (%p826_p4)  ;;  %v2537_v48 = vor.u32 (%p826_p4), %v2802_v46, %v2536_v45  ;;  %v2834_v50 = vld [vmem:[%s3932_s3 + $0x1ec] sm:$0xf0] (%p826_p4)  ;;  %vm1908_vm1 = vcmask (%p826_p4), 130112  }
 0x140   : >> { %s1055_s19 = sadd.s32 %s2769_s22, %s1052_s10  ;;  %s1061_s0 = sshra.s32 %s1060_s21, 3  ;;  %v2800_v51 = vld [vmem:[%s3932_s3 + $0xe4] sm:$0xf] (%p826_p4)  ;;  %v2538_v52 = vld [vmem:[%s3932_s3 + $0xf0] sm:$0xf0] (%p826_p4)  ;;  %v2665_v53 = vor.u32 (%p826_p4), %v2834_v50, %v2664_v47  ;;  %vm1912_vm2 = vcmask (%p826_p4), 195712  }
 0x141   : >> { %s1064_s14 = sand.u32 7, %s1060_s21  ;;  %s1056_s24 = scalar_lea.vmem [#allocation2], %s1055_s19  ;;  %v2541_v54 = vor.u32 (%p826_p4), %v2800_v51, %v2538_v52  ;;  %v2832_v55 = vld [vmem:[%s3932_s3 + $0x1e4] sm:$0xf] (%p826_p4)  ;;  %v2666_v56 = vld [vmem:[%s3932_s3 + $0x1f0] sm:$0xf0] (%p826_p4)  ;;  %1469 = vmatpush.bf16.msra.mxu0 (%p826_p4), %v2537_v48 }
 0x142   : >> { %v1057_v40 = vld [vmem:[%s1056_s24] ss:$8 sm:$0xf]  ;;  %s2770_s28 = sshll.u32 %s1061_s0, 5  ;;  %v2669_v58 = vor.u32 (%p826_p4), %v2832_v55, %v2666_v56  ;;  %1488 = vmatpush.bf16.msra.mxu1 (%p826_p4), %v2665_v53  ;;  %v2796_v0 = vld [vmem:[%s3932_s3 + $0xc4] sm:$0xf] (%p826_p4) }
 0x143   : >> { %v1058_v41 = vmax.f32 %v1046_v37, %v1057_v40  ;;  %s1067_s12 = sadd.s32 %s2770_s28, %s1064_s14  ;;  %v2520_v57 = vld [vmem:[%s3932_s3 + $0xc0] sm:$0xf] (%p826_p4)  ;;  %v2798_v59 = vld [vmem:[%s3932_s3 + $0xcc] sm:$0xf0] (%p826_p4)  ;;  %1507 = vmatpush.bf16.msra.mxu2 (%p826_p4), %v2541_v54  ;;  %v2522_v1 = vld [vmem:[%s3932_s3 + $0xd0] sm:$0xf0] (%p826_p4) }
 0x144   : >> { %s1068_s18 = scalar_lea.vmem [#allocation2], %s1067_s12  ;;  %828 = sbr.rel (!%p826_p4) target bundleno = 245 (0xf5), region = 106  ;;  %v2648_v60 = vld [vmem:[%s3932_s3 + $0x1c0] sm:$0xf] (%p826_p4)  ;;  %v2830_v61 = vld [vmem:[%s3932_s3 + $0x1cc] sm:$0xf0] (%p826_p4)  ;;  %v2521_v62 = vor.u32 (%p826_p4), %v2798_v59, %v2520_v57  ;;  %1526 = vmatpush.bf16.msra.mxu3 (%p826_p4), %v2669_v58  ;;  %v2525_v3 = vor.u32 (%p826_p4), %v2796_v0, %v2522_v1 }
 0x145   : >> { %v1069_v42 = vld [vmem:[%s1068_s18] ss:$8 sm:$0xf]  ;;  %v2649_v63 = vor.u32 (%p826_p4), %v2830_v61, %v2648_v60  ;;  %v2828_v2 = vld [vmem:[%s3932_s3 + $0x1c4] sm:$0xf] (%p826_p4)  ;;  %vm1916_vm3 = vcmask (%p826_p4), 261312  }
 0x146   : >> { %v1070_v43 = vmax.f32 %v1058_v41, %v1069_v42  ;;  %v2650_v4 = vld [vmem:[%s3932_s3 + $0x1d0] sm:$0xf0] (%p826_p4)  ;;  %v2504_v5 = vld [vmem:[%s3932_s3 + $0xa0] sm:$0xf] (%p826_p4)  ;;  %v2794_v6 = vld [vmem:[%s3932_s3 + $0xac] sm:$0xf0] (%p826_p4)  ;;  %1470 = vmatpush.bf16.msra.mxu0 (%p826_p4), %v2521_v62 }
 0x147   : > { %v2653_v7 = vor.u32 (%p826_p4), %v2828_v2, %v2650_v4  ;;  %v2632_v8 = vld [vmem:[%s3932_s3 + $0x1a0] sm:$0xf] (%p826_p4)  ;;  %v2826_v9 = vld [vmem:[%s3932_s3 + $0x1ac] sm:$0xf0] (%p826_p4)  ;;  %v2792_v10 = vld [vmem:[%s3932_s3 + $0xa4] sm:$0xf] (%p826_p4)  ;;  %v2505_v11 = vor.u32 (%p826_p4), %v2794_v6, %v2504_v5  ;;  %1489 = vmatpush.bf16.msra.mxu1 (%p826_p4), %v2649_v63  ;;  %1508 = vmatpush.bf16.msra.mxu2 (%p826_p4), %v2525_v3 }
 0x148   : >> { %1083 = vst.msk [vmem:[%s1082_s20] ss:$8 sm:$0xf] %vm1073_vm0, %v1070_v43  ;;  %v2506_v12 = vld [vmem:[%s3932_s3 + $0xb0] sm:$0xf0] (%p826_p4)  ;;  %v2633_v15 = vor.u32 (%p826_p4), %v2826_v9, %v2632_v8  ;;  %vm1935_vm4 = vcmask (%p826_p4), 261120  }
 0x149   : > { %v2824_v13 = vld [vmem:[%s3932_s3 + $0x1a4] sm:$0xf]  ;;  %v2634_v14 = vld [vmem:[%s3932_s3 + $0x1b0] sm:$0xf0]  ;;  %v2509_v16 = vor.u32 %v2792_v10, %v2506_v12  ;;  %v2488_v17 = vld [vmem:[%s3932_s3 + $0x80] sm:$0xf]  ;;  %1527 = vmatpush.bf16.msra.mxu3 %v2653_v7 }
 0x14a   : > { %v2790_v18 = vld [vmem:[%s3932_s3 + $0x8c] sm:$0xf0]  ;;  %v2616_v19 = vld [vmem:[%s3932_s3 + $0x180] sm:$0xf]  ;;  %v2637_v20 = vor.u32 %v2824_v13, %v2634_v14  ;;  %v2788_v22 = vld [vmem:[%s3932_s3 + $0x84] sm:$0xf]  ;;  %1471 = vmatpush.bf16.msra.mxu0 %v2505_v11 }
 0x14b   : > { %v2822_v21 = vld [vmem:[%s3932_s3 + $0x18c] sm:$0xf0]  ;;  %v2490_v23 = vld [vmem:[%s3932_s3 + $0x90] sm:$0xf0]  ;;  %v2820_v24 = vld [vmem:[%s3932_s3 + $0x184] sm:$0xf]  ;;  %v2489_v26 = vor.u32 %v2790_v18, %v2488_v17  ;;  %1490 = vmatpush.bf16.msra.mxu1 %v2633_v15  ;;  %1509 = vmatpush.bf16.msra.mxu2 %v2509_v16 }
 0x14c   : > { %v2618_v25 = vld [vmem:[%s3932_s3 + $0x190] sm:$0xf0]  ;;  %v2617_v27 = vor.u32 %v2822_v21, %v2616_v19  ;;  %v2493_v28 = vor.u32 %v2788_v22, %v2490_v23  ;;  %v2472_v29 = vld [vmem:[%s3932_s3 + $0x60] sm:$0xf]  ;;  %v2786_v30 = vld [vmem:[%s3932_s3 + $0x6c] sm:$0xf0] }
 0x14d   : > { %v2600_v31 = vld [vmem:[%s3932_s3 + $0x160] sm:$0xf]  ;;  %1528 = vmatpush.bf16.msra.mxu3 %v2637_v20  ;;  %v2621_v32 = vor.u32 %v2820_v24, %v2618_v25  ;;  %v2818_v33 = vld [vmem:[%s3932_s3 + $0x16c] sm:$0xf0]  ;;  %v2784_v35 = vld [vmem:[%s3932_s3 + $0x64] sm:$0xf]  ;;  %v2473_v41 = vor.u32 %v2786_v30, %v2472_v29 }
 0x14e   : > { %v2474_v36 = vld [vmem:[%s3932_s3 + $0x70] sm:$0xf0]  ;;  %v2816_v37 = vld [vmem:[%s3932_s3 + $0x164] sm:$0xf]  ;;  %1472 = vmatpush.bf16.msra.mxu0 %v2489_v26  ;;  %v2601_v42 = vor.u32 %v2818_v33, %v2600_v31  ;;  %v2456_v45 = vld [vmem:[%s3932_s3 + $0x40] sm:$0xf] }
 0x14f   : > { %v2602_v40 = vld [vmem:[%s3932_s3 + $0x170] sm:$0xf0]  ;;  %1491 = vmatpush.bf16.msra.mxu1 %v2617_v27  ;;  %1510 = vmatpush.bf16.msra.mxu2 %v2493_v28  ;;  %v2477_v43 = vor.u32 %v2784_v35, %v2474_v36  ;;  %v2782_v46 = vld [vmem:[%s3932_s3 + $0x4c] sm:$0xf0]  ;;  %v2584_v47 = vld [vmem:[%s3932_s3 + $0x140] sm:$0xf] }
 0x150   : > { %v2605_v48 = vor.u32 %v2816_v37, %v2602_v40  ;;  %v2814_v50 = vld [vmem:[%s3932_s3 + $0x14c] sm:$0xf0]  ;;  %v2780_v51 = vld [vmem:[%s3932_s3 + $0x44] sm:$0xf]  ;;  %v2458_v52 = vld [vmem:[%s3932_s3 + $0x50] sm:$0xf0]  ;;  %v2457_v55 = vor.u32 %v2782_v46, %v2456_v45 }
 0x151   : > { %1529 = vmatpush.bf16.msra.mxu3 %v2621_v32  ;;  %v2812_v53 = vld [vmem:[%s3932_s3 + $0x144] sm:$0xf]  ;;  %v2586_v54 = vld [vmem:[%s3932_s3 + $0x150] sm:$0xf0]  ;;  %v2585_v56 = vor.u32 %v2814_v50, %v2584_v47  ;;  %v2461_v57 = vor.u32 %v2780_v51, %v2458_v52  ;;  %v2440_v58 = vld [vmem:[%s3932_s3 + $0x20] sm:$0xf] }
 0x152   : > { %1473 = vmatpush.bf16.msra.mxu0 %v2473_v41  ;;  %v2778_v59 = vld [vmem:[%s3932_s3 + $0x2c] sm:$0xf0]  ;;  %v2568_v60 = vld [vmem:[%s3932_s3 + $0x120] sm:$0xf]  ;;  %v2589_v61 = vor.u32 %v2812_v53, %v2586_v54  ;;  %v2776_v63 = vld [vmem:[%s3932_s3 + $0x24] sm:$0xf] }
 0x153   : > { %1492 = vmatpush.bf16.msra.mxu1 %v2601_v42  ;;  %1511 = vmatpush.bf16.msra.mxu2 %v2477_v43  ;;  %v2810_v62 = vld [vmem:[%s3932_s3 + $0x12c] sm:$0xf0]  ;;  %v2442_v0 = vld [vmem:[%s3932_s3 + $0x30] sm:$0xf0]  ;;  %v2808_v1 = vld [vmem:[%s3932_s3 + $0x124] sm:$0xf]  ;;  %v2441_v3 = vor.u32 %v2778_v59, %v2440_v58 }
 0x154   : > { %v2570_v2 = vld [vmem:[%s3932_s3 + $0x130] sm:$0xf0]  ;;  %v2424_v4 = vld [vmem:[%s3932_s3] sm:$0xf]  ;;  %v2569_v5 = vor.u32 %v2810_v62, %v2568_v60  ;;  %v2445_v6 = vor.u32 %v2776_v63, %v2442_v0  ;;  %v2774_v7 = vld [vmem:[%s3932_s3 + $0xc] sm:$0xf0] }
 0x155   : > { %1530 = vmatpush.bf16.msra.mxu3 %v2605_v48  ;;  %v2552_v8 = vld [vmem:[%s3932_s3 + $0x100] sm:$0xf]  ;;  %v2806_v9 = vld [vmem:[%s3932_s3 + $0x10c] sm:$0xf0]  ;;  %v2573_v10 = vor.u32 %v2808_v1, %v2570_v2  ;;  %v2772_v11 = vld [vmem:[%s3932_s3 + $0x4] sm:$0xf]  ;;  %v2425_v17 = vor.u32 %v2774_v7, %v2424_v4 }
 0x156   : > { %1474 = vmatpush.bf16.msra.mxu0 %v2457_v55  ;;  %v2426_v12 = vld [vmem:[%s3932_s3 + $0x10] sm:$0xf0]  ;;  %v2804_v13 = vld [vmem:[%s3932_s3 + $0x104] sm:$0xf]  ;;  %v2544_v15 = vld [vmem:[%s3932_s3 + $0xe8] sm:$0xf]  ;;  %v2553_v20 = vor.u32 %v2806_v9, %v2552_v8 }
 0x157   : > { %1493 = vmatpush.bf16.msra.mxu1 %v2585_v56  ;;  %1512 = vmatpush.bf16.msra.mxu2 %v2461_v57  ;;  %v2554_v14 = vld [vmem:[%s3932_s3 + $0x110] sm:$0xf0]  ;;  %v2803_v16 = vld [vmem:[%s3932_s3 + $0xf4] sm:$0xf0]  ;;  %v2672_v18 = vld [vmem:[%s3932_s3 + $0x1e8] sm:$0xf]  ;;  %v2429_v21 = vor.u32 %v2772_v11, %v2426_v12 }
 0x158   : > { %v2835_v19 = vld [vmem:[%s3932_s3 + $0x1f4] sm:$0xf0]  ;;  %v2557_v22 = vor.u32 %v2804_v13, %v2554_v14  ;;  %v2545_v23 = vor.u32 %v2803_v16, %v2544_v15  ;;  %v2801_v24 = vld [vmem:[%s3932_s3 + $0xec] sm:$0xf]  ;;  %v2546_v25 = vld [vmem:[%s3932_s3 + $0xf8] sm:$0xf0] }
 0x159   : > { %1531 = vmatpush.bf16.msra.mxu3 %v2589_v61  ;;  %v2833_v26 = vld [vmem:[%s3932_s3 + $0x1ec] sm:$0xf]  ;;  %v2673_v27 = vor.u32 %v2835_v19, %v2672_v18  ;;  %v2674_v28 = vld [vmem:[%s3932_s3 + $0x1f8] sm:$0xf0]  ;;  %v2528_v29 = vld [vmem:[%s3932_s3 + $0xc8] sm:$0xf]  ;;  %v2549_v33 = vor.u32 %v2801_v24, %v2546_v25 }
 0x15a   : > { %1475 = vmatpush.bf16.msra.mxu0 %v2441_v3  ;;  %v2799_v30 = vld [vmem:[%s3932_s3 + $0xd4] sm:$0xf0]  ;;  %v2656_v31 = vld [vmem:[%s3932_s3 + $0x1c8] sm:$0xf]  ;;  %v2677_v35 = vor.u32 %v2833_v26, %v2674_v28  ;;  %v2797_v37 = vld [vmem:[%s3932_s3 + $0xcc] sm:$0xf] }
 0x15b   : > { %1494 = vmatpush.bf16.msra.mxu1 %v2569_v5  ;;  %1513 = vmatpush.bf16.msra.mxu2 %v2445_v6  ;;  %v2831_v32 = vld [vmem:[%s3932_s3 + $0x1d4] sm:$0xf0]  ;;  %v2529_v36 = vor.u32 %v2799_v30, %v2528_v29  ;;  %v2530_v40 = vld [vmem:[%s3932_s3 + $0xd8] sm:$0xf0]  ;;  %v2829_v41 = vld [vmem:[%s3932_s3 + $0x1cc] sm:$0xf] }
 0x15c   : > { %v2657_v42 = vor.u32 %v2831_v32, %v2656_v31  ;;  %v2658_v43 = vld [vmem:[%s3932_s3 + $0x1d8] sm:$0xf0]  ;;  %v2512_v45 = vld [vmem:[%s3932_s3 + $0xa8] sm:$0xf]  ;;  %v2795_v46 = vld [vmem:[%s3932_s3 + $0xb4] sm:$0xf0]  ;;  %v2533_v50 = vor.u32 %v2797_v37, %v2530_v40 }
 0x15d   : > { %1532 = vmatpush.bf16.msra.mxu3 %v2573_v10  ;;  %v2640_v47 = vld [vmem:[%s3932_s3 + $0x1a8] sm:$0xf]  ;;  %v2827_v48 = vld [vmem:[%s3932_s3 + $0x1b4] sm:$0xf0]  ;;  %v2661_v51 = vor.u32 %v2829_v41, %v2658_v43  ;;  %v2513_v52 = vor.u32 %v2795_v46, %v2512_v45  ;;  %v2793_v53 = vld [vmem:[%s3932_s3 + $0xac] sm:$0xf] }
 0x15e   : > { %1476 = vmatpush.bf16.msra.mxu0 %v2425_v17  ;;  %v2514_v54 = vld [vmem:[%s3932_s3 + $0xb8] sm:$0xf0]  ;;  %v2825_v55 = vld [vmem:[%s3932_s3 + $0x1ac] sm:$0xf]  ;;  %v2641_v56 = vor.u32 %v2827_v48, %v2640_v47  ;;  %v2496_v58 = vld [vmem:[%s3932_s3 + $0x88] sm:$0xf] }
 0x15f   : > { %1495 = vmatpush.bf16.msra.mxu1 %v2553_v20  ;;  %1514 = vmatpush.bf16.msra.mxu2 %v2429_v21  ;;  %v2642_v57 = vld [vmem:[%s3932_s3 + $0x1b8] sm:$0xf0]  ;;  %v2791_v59 = vld [vmem:[%s3932_s3 + $0x94] sm:$0xf0]  ;;  %v2624_v60 = vld [vmem:[%s3932_s3 + $0x188] sm:$0xf]  ;;  %v2517_v62 = vor.u32 %v2793_v53, %v2514_v54 }
 0x160   : > { %v2823_v61 = vld [vmem:[%s3932_s3 + $0x194] sm:$0xf0]  ;;  %v2645_v63 = vor.u32 %v2825_v55, %v2642_v57  ;;  %v2497_v0 = vor.u32 %v2791_v59, %v2496_v58  ;;  %v2789_v1 = vld [vmem:[%s3932_s3 + $0x8c] sm:$0xf]  ;;  %v2498_v2 = vld [vmem:[%s3932_s3 + $0x98] sm:$0xf0] }
 0x161   : > { %1533 = vmatpush.bf16.msra.mxu3 %v2557_v22  ;;  %1477 = vmatmul.bf16.vlgmr.msra.gmra.mxu0 %v3166_v44  ;;  %v2821_v3 = vld [vmem:[%s3932_s3 + $0x18c] sm:$0xf]  ;;  %v2625_v4 = vor.u32 %v2823_v61, %v2624_v60  ;;  %v2626_v5 = vld [vmem:[%s3932_s3 + $0x198] sm:$0xf0]  ;;  %v2480_v6 = vld [vmem:[%s3932_s3 + $0x68] sm:$0xf]  ;;  %v2501_v10 = vor.u32 %v2789_v1, %v2498_v2 }
 0x162   : > { %1545 = vmatpush.bf16.msrb.mxu0 %v2545_v23  ;;  %1496 = vmatmul.bf16.vlgmr.msra.gmra.mxu1 %v3177_v49  ;;  %v2787_v7 = vld [vmem:[%s3932_s3 + $0x74] sm:$0xf0]  ;;  %v2608_v8 = vld [vmem:[%s3932_s3 + $0x168] sm:$0xf]  ;;  %v2629_v11 = vor.u32 %v2821_v3, %v2626_v5  ;;  %v2785_v13 = vld [vmem:[%s3932_s3 + $0x6c] sm:$0xf] }
 0x163   : > { %1564 = vmatpush.bf16.msrb.mxu1 %v2673_v27  ;;  %1515 = vmatmul.bf16.vlgmr.msra.gmra.mxu2 %v3166_v44  ;;  %v2819_v9 = vld [vmem:[%s3932_s3 + $0x174] sm:$0xf0]  ;;  %v2481_v12 = vor.u32 %v2787_v7, %v2480_v6  ;;  %v2482_v14 = vld [vmem:[%s3932_s3 + $0x78] sm:$0xf0]  ;;  %v2817_v15 = vld [vmem:[%s3932_s3 + $0x16c] sm:$0xf] }
 0x164   : > { %1534 = vmatmul.bf16.vlgmr.msra.gmra.mxu3 %v3177_v49  ;;  %1583 = vmatpush.bf16.msrb.mxu2 %v2549_v33  ;;  %v2609_v16 = vor.u32 %v2819_v9, %v2608_v8  ;;  %v2610_v17 = vld [vmem:[%s3932_s3 + $0x178] sm:$0xf0]  ;;  %v2464_v18 = vld [vmem:[%s3932_s3 + $0x48] sm:$0xf]  ;;  %v2783_v19 = vld [vmem:[%s3932_s3 + $0x54] sm:$0xf0]  ;;  %v2485_v22 = vor.u32 %v2785_v13, %v2482_v14 }
 0x165   : > { %1602 = vmatpush.bf16.msrb.mxu3 %v2677_v35  ;;  %v2592_v20 = vld [vmem:[%s3932_s3 + $0x148] sm:$0xf]  ;;  %v2815_v21 = vld [vmem:[%s3932_s3 + $0x154] sm:$0xf0]  ;;  %v2613_v23 = vor.u32 %v2817_v15, %v2610_v17  ;;  %v2465_v24 = vor.u32 %v2783_v19, %v2464_v18  ;;  %v2781_v25 = vld [vmem:[%s3932_s3 + $0x4c] sm:$0xf] }
 0x166   : > { %1546 = vmatpush.bf16.msrb.mxu0 %v2529_v36  ;;  %v2466_v26 = vld [vmem:[%s3932_s3 + $0x58] sm:$0xf0]  ;;  %v2813_v27 = vld [vmem:[%s3932_s3 + $0x14c] sm:$0xf]  ;;  %v2593_v28 = vor.u32 %v2815_v21, %v2592_v20  ;;  %v2448_v30 = vld [vmem:[%s3932_s3 + $0x28] sm:$0xf] }
 0x167   : > { %1565 = vmatpush.bf16.msrb.mxu1 %v2657_v42  ;;  %v2594_v29 = vld [vmem:[%s3932_s3 + $0x158] sm:$0xf0]  ;;  %v2779_v31 = vld [vmem:[%s3932_s3 + $0x34] sm:$0xf0]  ;;  %v2576_v32 = vld [vmem:[%s3932_s3 + $0x128] sm:$0xf]  ;;  %v2469_v35 = vor.u32 %v2781_v25, %v2466_v26 }
 0x168   : > { %1584 = vmatpush.bf16.msrb.mxu2 %v2533_v50  ;;  %v2811_v33 = vld [vmem:[%s3932_s3 + $0x134] sm:$0xf0]  ;;  %v2597_v36 = vor.u32 %v2813_v27, %v2594_v29  ;;  %v2449_v37 = vor.u32 %v2779_v31, %v2448_v30  ;;  %v2777_v40 = vld [vmem:[%s3932_s3 + $0x2c] sm:$0xf]  ;;  %v2450_v41 = vld [vmem:[%s3932_s3 + $0x38] sm:$0xf0] }
 0x169   : > { %1603 = vmatpush.bf16.msrb.mxu3 %v2661_v51  ;;  %v2809_v42 = vld [vmem:[%s3932_s3 + $0x12c] sm:$0xf]  ;;  %v2577_v43 = vor.u32 %v2811_v33, %v2576_v32  ;;  %v2578_v45 = vld [vmem:[%s3932_s3 + $0x138] sm:$0xf0]  ;;  %v2432_v46 = vld [vmem:[%s3932_s3 + $0x8] sm:$0xf]  ;;  %v2453_v51 = vor.u32 %v2777_v40, %v2450_v41 }
 0x16a   : > { %1547 = vmatpush.bf16.msrb.mxu0 %v2513_v52  ;;  %v2775_v47 = vld [vmem:[%s3932_s3 + $0x14] sm:$0xf0]  ;;  %v2560_v48 = vld [vmem:[%s3932_s3 + $0x108] sm:$0xf]  ;;  %v2581_v52 = vor.u32 %v2809_v42, %v2578_v45  ;;  %v2773_v54 = vld [vmem:[%s3932_s3 + $0xc] sm:$0xf] }
 0x16b   : > { %1566 = vmatpush.bf16.msrb.mxu1 %v2641_v56  ;;  %v2807_v50 = vld [vmem:[%s3932_s3 + $0x114] sm:$0xf0]  ;;  %v2433_v53 = vor.u32 %v2775_v47, %v2432_v46  ;;  %v2434_v55 = vld [vmem:[%s3932_s3 + $0x18] sm:$0xf0]  ;;  %v2805_v57 = vld [vmem:[%s3932_s3 + $0x10c] sm:$0xf] }
 0x16c   : > { %1585 = vmatpush.bf16.msrb.mxu2 %v2517_v62  ;;  %v2561_v56 = vor.u32 %v2807_v50, %v2560_v48  ;;  %v2562_v58 = vld [vmem:[%s3932_s3 + $0x118] sm:$0xf0]  ;;  %v2437_v59 = vor.u32 %v2773_v54, %v2434_v55  ;;  %v3841_v1 = vld [vmem:[%s3933_s4] sm:$0xf]  ;;  %v1626_v17 = vld [vmem:[#allocation3 + $0x28] sm:$0xff] }
 0x16d   : > { %1604 = vmatpush.bf16.msrb.mxu3 %v2645_v63  ;;  %v2565_v60 = vor.u32 %v2805_v57, %v2562_v58  ;;  %v1625_v9 = vld [vmem:[#allocation3 + $0x20] sm:$0xff] }
 0x16e   : > { %1548 = vmatpush.bf16.msrb.mxu0 %v2497_v0  ;;  %v1621_v0 = vld [vmem:[#allocation3] sm:$0xff] }
 0x16f   : > { %1567 = vmatpush.bf16.msrb.mxu1 %v2625_v4  ;;  %v1622_v4 = vld [vmem:[#allocation3 + $0x8] sm:$0xff]  ;;  %v1629_v25 = vld [vmem:[#allocation3 + $0x40] sm:$0xff] }
 0x170   : > { %1586 = vmatpush.bf16.msrb.mxu2 %v2501_v10  ;;  %v1633_v46 = vld [vmem:[#allocation3 + $0x60] sm:$0xff] }
 0x171   : > { %1605 = vmatpush.bf16.msrb.mxu3 %v2629_v11  ;;  %1482 = vmatmul.bf16.gmra.mxu0 %v3274_v34 }
 0x172   : > { %1549 = vmatpush.bf16.msrb.mxu0 %v2481_v12  ;;  %1501 = vmatmul.bf16.gmra.mxu1 %v3285_v39 }
 0x173   : > { %1568 = vmatpush.bf16.msrb.mxu1 %v2609_v16  ;;  %1520 = vmatmul.bf16.gmra.mxu2 %v3274_v34 }
 0x174   : > { %1539 = vmatmul.bf16.gmra.mxu3 %v3285_v39  ;;  %1587 = vmatpush.bf16.msrb.mxu2 %v2485_v22 }
 0x175   : > { %1606 = vmatpush.bf16.msrb.mxu3 %v2613_v23 }
 0x176   : > { %1550 = vmatpush.bf16.msrb.mxu0 %v2465_v24 }
 0x177   : > { %1569 = vmatpush.bf16.msrb.mxu1 %v2593_v28 }
 0x178   : > { %1588 = vmatpush.bf16.msrb.mxu2 %v2469_v35  ;;  %v1630_v35 = vld [vmem:[#allocation3 + $0x48] sm:$0xff] }
 0x179   : > { %1607 = vmatpush.bf16.msrb.mxu3 %v2597_v36 }
 0x17a   : > { %1551 = vmatpush.bf16.msrb.mxu0 %v2449_v37 }
 0x17b   : > { %1570 = vmatpush.bf16.msrb.mxu1 %v2577_v43 }
 0x17c   : > { %1589 = vmatpush.bf16.msrb.mxu2 %v2453_v51 }
 0x17d   : > { %1608 = vmatpush.bf16.msrb.mxu3 %v2581_v52 }
 0x17e   : > { %1552 = vmatpush.bf16.msrb.mxu0 %v2433_v53 }
 0x17f   : > { %1571 = vmatpush.bf16.msrb.mxu1 %v2561_v56  ;;  %v1634_v56 = vld [vmem:[#allocation3 + $0x68] sm:$0xff] }
 0x180   : > { %1590 = vmatpush.bf16.msrb.mxu2 %v2437_v59 }
 0x181   : > { %1609 = vmatpush.bf16.msrb.mxu3 %v2565_v60  ;;  %1553 = vmatmul.bf16.vlgmr.msrb.gmra.mxu0 %v3166_v44 }
 0x182   : > { %1572 = vmatmul.bf16.vlgmr.msrb.gmra.mxu1 %v3177_v49 }
 0x183   : > { %1591 = vmatmul.bf16.vlgmr.msrb.gmra.mxu2 %v3166_v44 }
 0x184   : > { %1610 = vmatmul.bf16.vlgmr.msrb.gmra.mxu3 %v3177_v49  ;;  %v1655_v49 = vperm.slane %v3841_v1, 0 }
 0x191   : > { %1558 = vmatmul.bf16.gmra.mxu0 %v3274_v34 }
 0x192   : > { %1577 = vmatmul.bf16.gmra.mxu1 %v3285_v39 }
 0x193   : > { %1596 = vmatmul.bf16.gmra.mxu2 %v3274_v34 }
 0x194   : > { %1615 = vmatmul.bf16.gmra.mxu3 %v3285_v39  ;;  %v1656_v39 = vperm.slane %v3841_v1, 1 }
 0x1de   : > { %v1478_v61 = vpop.f32.mrf.mxu0 }
 0x1df   : > { %v1497_v62 = vpop.f32.mrf.mxu1 }
 0x1e0   : > { %v1498_v63 = vadd.f32 %v1497_v62, %v1478_v61 }
 0x1e2   : > { %v1637_v44 = vadd.f32 %v1621_v0, %v1498_v63  ;;  %v1623_v0 = vld [vmem:[#allocation3 + $0x10] sm:$0xff] }
 0x1e4   : > { %v1663_v6 = vadd.f32 %v1655_v49, %v1637_v44 }
 0x1e6   : > { %v1516_v2 = vpop.f32.mrf.mxu2  ;;  %v1480_v5 = vpop.f32.mrf.mxu0  ;;  %v1679_v11 = vmul.f32 0.2, %v1663_v6 }
 0x1e7   : > { %v1535_v3 = vpop.f32.mrf.mxu3  ;;  %v1499_v7 = vpop.f32.mrf.mxu1 }
 0x1e8   : > { %v1536_v34 = vadd.f32 %v1535_v3, %v1516_v2  ;;  %v1500_v8 = vadd.f32 %v1499_v7, %v1480_v5  ;;  %v1695_v19 = vmax.f32 %v1663_v6, %v1679_v11  ;;  %v3858_v6 = vperm.slane %v3841_v1, 2 }
 0x1ea   : > { %v1638_v10 = vadd.f32 %v1622_v4, %v1536_v34  ;;  %v1641_v13 = vadd.f32 %v1625_v9, %v1500_v8  ;;  %v3861_v9 = vperm.slane %v3841_v1, 3 }
 0x1ec   : > { %v1664_v12 = vadd.f32 %v1656_v39, %v1638_v10  ;;  %v1667_v21 = vadd.f32 %v1655_v49, %v1641_v13 }
 0x1ee   : > { %v1680_v14 = vmul.f32 0.2, %v1664_v12  ;;  %v1518_v15 = vpop.f32.mrf.mxu2  ;;  %v1483_v18 = vpop.f32.mrf.mxu0  ;;  %v1683_v28 = vmul.f32 0.2, %v1667_v21 }
 0x1ef   : > { %v1537_v16 = vpop.f32.mrf.mxu3  ;;  %v1502_v23 = vpop.f32.mrf.mxu1 }
 0x1f0   : > { %v1696_v20 = vmax.f32 %v1664_v12, %v1680_v14  ;;  %v1538_v22 = vadd.f32 %v1537_v16, %v1518_v15  ;;  %v1503_v24 = vadd.f32 %v1502_v23, %v1483_v18  ;;  %v1699_v37 = vmax.f32 %v1667_v21, %v1683_v28 }
 0x1f2   : > { %v3845_v26 = vpack.c.bf16 %v1696_v20, %v1695_v19  ;;  %v1642_v27 = vadd.f32 %v1626_v17, %v1538_v22  ;;  %v1645_v30 = vadd.f32 %v1629_v25, %v1503_v24 }
 0x1f4   : > { %1719 = vst [vmem:[%s3134_s23] sm:$0xff] %v3845_v26  ;;  %v1668_v29 = vadd.f32 %v1656_v39, %v1642_v27  ;;  %v1671_v41 = vadd.f32 %v1655_v49, %v1645_v30  ;;  %v1843_v25 = vunpack.c.l.bf16 %v3845_v26  ;;  %v1844_v27 = vunpack.c.h.bf16 %v3845_v26 }
 0x1f6   : > { %v1684_v31 = vmul.f32 0.2, %v1668_v29  ;;  %v1521_v32 = vpop.f32.mrf.mxu2  ;;  %v1485_v36 = vpop.f32.mrf.mxu0  ;;  %v1687_v50 = vmul.f32 0.2, %v1671_v41 }
 0x1f7   : > { %v1540_v33 = vpop.f32.mrf.mxu3  ;;  %v1504_v43 = vpop.f32.mrf.mxu1 }
 0x1f8   : > { %v1700_v40 = vmax.f32 %v1668_v29, %v1684_v31  ;;  %v1541_v42 = vadd.f32 %v1540_v33, %v1521_v32  ;;  %v1505_v45 = vadd.f32 %v1504_v43, %v1485_v36  ;;  %v1703_v58 = vmax.f32 %v1671_v41, %v1687_v50  ;;  %v1631_v43 = vld [vmem:[#allocation3 + $0x50] sm:$0xff] }
 0x1fa   : > { %v3849_v47 = vpack.c.bf16 %v1700_v40, %v1699_v37  ;;  %v1646_v48 = vadd.f32 %v1630_v35, %v1541_v42  ;;  %v1649_v52 = vadd.f32 %v1633_v46, %v1505_v45  ;;  %v1628_v35 = vld [vmem:[#allocation3 + $0x38] sm:$0xff]  ;;  %v1859_v46 = vmul.f32 %v1843_v25, %v1843_v25 }
 0x1fc   : > { %1721 = vst [vmem:[%s3134_s23 + $0x10] sm:$0xff] %v3849_v47  ;;  %v1672_v51 = vadd.f32 %v1656_v39, %v1646_v48  ;;  %v1675_v60 = vadd.f32 %v1655_v49, %v1649_v52  ;;  %v1624_v49 = vld [vmem:[#allocation3 + $0x18] sm:$0xff]  ;;  %v1860_v48 = vmul.f32 %v1844_v27, %v1844_v27  ;;  %v1739_v52 = vunpack.c.l.b16 %v3849_v47 }
 0x1fe   : > { %v1688_v53 = vmul.f32 0.2, %v1672_v51  ;;  %v1523_v54 = vpop.f32.mrf.mxu2  ;;  %v1554_v57 = vpop.f32.mrf.mxu0  ;;  %v1691_v3 = vmul.f32 0.2, %v1675_v60 }
 0x1ff   : > { %v1542_v55 = vpop.f32.mrf.mxu3  ;;  %v1573_v62 = vpop.f32.mrf.mxu1 }
 0x200   : > { %v1704_v59 = vmax.f32 %v1672_v51, %v1688_v53  ;;  %v1543_v61 = vadd.f32 %v1542_v55, %v1523_v54  ;;  %v1574_v63 = vadd.f32 %v1573_v62, %v1554_v57  ;;  %v1707_v11 = vmax.f32 %v1675_v60, %v1691_v3 }
 0x201   : > { %v1740_v53 = vunpack.c.h.b16 %v3849_v47  ;;  %v1847_v62 = vunpack.c.l.bf16 %v3849_v47 }
 0x202   : > { %v3853_v44 = vpack.c.bf16 %v1704_v59, %v1703_v58  ;;  %v1650_v2 = vadd.f32 %v1634_v56, %v1543_v61  ;;  %v1639_v5 = vadd.f32 %v1623_v0, %v1574_v63  ;;  %v1735_v56 = vunpack.c.l.b16 %v3845_v26 }
 0x203   : > { %v1736_v58 = vunpack.c.h.b16 %v3845_v26  ;;  %v1875_v61 = vadd.f32 %v1860_v48, %v1859_v46  ;;  %v1848_v63 = vunpack.c.h.bf16 %v3849_v47 }
 0x204   : > { %1723 = vst [vmem:[%s3134_s23 + $0x20] sm:$0xff] %v3853_v44  ;;  %v1676_v4 = vadd.f32 %v1656_v39, %v1650_v2  ;;  %v1665_v13 = vadd.f32 %v3858_v6, %v1639_v5  ;;  %v1627_v39 = vld [vmem:[#allocation3 + $0x30] sm:$0xff]  ;;  %v1743_v20 = vunpack.c.l.b16 %v3853_v44  ;;  %v1744_v21 = vunpack.c.h.b16 %v3853_v44 }
 0x205   : > { %v1751_v3 = vpack.c.b16 %v1739_v52, %v1735_v56  ;;  %v1851_v25 = vunpack.c.l.bf16 %v3853_v44  ;;  %v1852_v27 = vunpack.c.h.bf16 %v3853_v44 }
 0x206   : > { %v1692_v34 = vmul.f32 0.2, %v1676_v4  ;;  %v1592_v7 = vpop.f32.mrf.mxu2  ;;  %v1556_v10 = vpop.f32.mrf.mxu0  ;;  %v1681_v1 = vmul.f32 0.2, %v1665_v13 }
 0x207   : > { %v1611_v8 = vpop.f32.mrf.mxu3  ;;  %v1575_v15 = vpop.f32.mrf.mxu1  ;;  %v1867_v46 = vmul.f32 %v1851_v25, %v1851_v25  ;;  %v1868_v48 = vmul.f32 %v1852_v27, %v1852_v27 }
 0x208   : > { %v1708_v12 = vmax.f32 %v1676_v4, %v1692_v34  ;;  %v1612_v14 = vadd.f32 %v1611_v8, %v1592_v7  ;;  %v1576_v16 = vadd.f32 %v1575_v15, %v1556_v10  ;;  %v1697_v37 = vmax.f32 %v1665_v13, %v1681_v1 }
 0x209   : > { %v1752_v4 = vpack.c.b16 %v1740_v53, %v1736_v58  ;;  %v1885_v56 = vadd.f32 %v1868_v48, %v1867_v46 }
 0x20a   : > { %v3864_v17 = vpack.c.bf16 %v1708_v12, %v1707_v11  ;;  %v1640_v18 = vadd.f32 %v1624_v49, %v1612_v14  ;;  %v1643_v19 = vadd.f32 %v1627_v39, %v1576_v16  ;;  %v1632_v49 = vld [vmem:[#allocation3 + $0x58] sm:$0xff]  ;;  %v1635_v14 = vld [vmem:[#allocation3 + $0x70] sm:$0xff]  ;;  %v1863_v39 = vmul.f32 %v1847_v62, %v1847_v62 }
 0x20c   : > { %1725 = vst [vmem:[%s3134_s23 + $0x30] sm:$0xff] %v3864_v17  ;;  %v1666_v22 = vadd.f32 %v3861_v9, %v1640_v18  ;;  %v1747_v23 = vunpack.c.l.b16 %v3864_v17  ;;  %v1748_v24 = vunpack.c.h.b16 %v3864_v17  ;;  %v1669_v32 = vadd.f32 %v3858_v6, %v1643_v19 }
 0x20e   : > { %v1682_v28 = vmul.f32 0.2, %v1666_v22  ;;  %v1594_v29 = vpop.f32.mrf.mxu2  ;;  %v3875_v30 = vpack.c.b16 %v1747_v23, %v1743_v20  ;;  %v3877_v31 = vpack.c.b16 %v1748_v24, %v1744_v21  ;;  %v1559_v36 = vpop.f32.mrf.mxu0  ;;  %v1685_v54 = vmul.f32 0.2, %v1669_v32 }
 0x20f   : > { %v1613_v33 = vpop.f32.mrf.mxu3  ;;  %v1578_v42 = vpop.f32.mrf.mxu1  ;;  %v1864_v20 = vmul.f32 %v1848_v63, %v1848_v63 }
 0x210   : > { %v1698_v40 = vmax.f32 %v1666_v22, %v1682_v28  ;;  %v1614_v41 = vadd.f32 %v1613_v33, %v1594_v29  ;;  %1773 = vmatpush.bf16.xpose.msra.mxu0 %v3875_v30  ;;  %1792 = vmatpush.bf16.xpose.msra.mxu1 %v3877_v31  ;;  %v1579_v45 = vadd.f32 %v1578_v42, %v1559_v36 }
 0x211   : > { %v1701_v34 = vmax.f32 %v1669_v32, %v1685_v54  ;;  %v1880_v33 = vadd.f32 %v1864_v20, %v1863_v39 }
 0x212   : > { %v3882_v50 = vpack.c.bf16 %v1698_v40, %v1697_v37  ;;  %v1644_v51 = vadd.f32 %v1628_v35, %v1614_v41  ;;  %v1647_v55 = vadd.f32 %v1631_v43, %v1579_v45  ;;  %v1636_v40 = vld [vmem:[#allocation3 + $0x78] sm:$0xff] }
 0x214   : > { %1720 = vst [vmem:[%s3134_s23 + $0x8] sm:$0xff] %v3882_v50  ;;  %v1670_v57 = vadd.f32 %v3861_v9, %v1644_v51  ;;  %v1845_v59 = vunpack.c.l.bf16 %v3882_v50  ;;  %v1846_v60 = vunpack.c.h.bf16 %v3882_v50  ;;  %v1673_v7 = vadd.f32 %v3858_v6, %v1647_v55 }
 0x216   : > { %v1686_v0 = vmul.f32 0.2, %v1670_v57  ;;  %v1597_v2 = vpop.f32.mrf.mxu2  ;;  %v1861_v5 = vmul.f32 %v1845_v59, %v1845_v59  ;;  %v1561_v26 = vpop.f32.mrf.mxu0  ;;  %v1862_v10 = vmul.f32 %v1846_v60, %v1846_v60  ;;  %v1689_v21 = vmul.f32 0.2, %v1673_v7 }
 0x217   : > { %v1616_v8 = vpop.f32.mrf.mxu3  ;;  %v1580_v13 = vpop.f32.mrf.mxu1  ;;  %v1855_v59 = vunpack.c.l.bf16 %v3864_v17  ;;  %v1856_v60 = vunpack.c.h.bf16 %v3864_v17 }
 0x218   : > { %v1702_v11 = vmax.f32 %v1670_v57, %v1686_v0  ;;  %v1617_v12 = vadd.f32 %v1616_v8, %v1597_v2  ;;  %1774 = vmatpush.bf16.xpose.msra.mxu0 %v1751_v3  ;;  %1793 = vmatpush.bf16.xpose.msra.mxu1 %v1752_v4  ;;  %v1876_v47 = vadd.f32 %v1875_v61, %v1861_v5 }
 0x219   : > { %v1581_v15 = vadd.f32 %v1580_v13, %v1561_v26  ;;  %v1705_v35 = vmax.f32 %v1673_v7, %v1689_v21  ;;  %v1872_v5 = vmul.f32 %v1856_v60, %v1856_v60 }
 0x21a   : > { %v3896_v16 = vpack.c.bf16 %v1702_v11, %v1701_v34  ;;  %v1648_v18 = vadd.f32 %v1632_v49, %v1617_v12  ;;  %v1877_v19 = vadd.f32 %v1876_v47, %v1862_v10 }
 0x21b   : > { %v1651_v1 = vadd.f32 %v1635_v14, %v1581_v15 }
 0x21c   : > { %1722 = vst [vmem:[%s3134_s23 + $0x18] sm:$0xff] %v3896_v16  ;;  %v1674_v22 = vadd.f32 %v3861_v9, %v1648_v18  ;;  %1878 = vadd.xlane.f32.xlu0 %v1877_v19  ;;  %v1849_v23 = vunpack.c.l.bf16 %v3896_v16  ;;  %v1850_v24 = vunpack.c.h.bf16 %v3896_v16  ;;  %v1741_v15 = vunpack.c.l.b16 %v3896_v16 }
 0x21d   : > { %v1677_v36 = vadd.f32 %v3858_v6, %v1651_v1  ;;  %v1742_v39 = vunpack.c.h.b16 %v3896_v16  ;;  %v1737_v18 = vunpack.c.l.b16 %v3882_v50  ;;  %v1738_v19 = vunpack.c.h.b16 %v3882_v50 }
 0x21e   : > { %v1690_v28 = vmul.f32 0.2, %v1674_v22  ;;  %v1599_v29 = vpop.f32.mrf.mxu2  ;;  %v1865_v32 = vmul.f32 %v1849_v23, %v1849_v23  ;;  %v1866_v43 = vmul.f32 %v1850_v24, %v1850_v24  ;;  %v1904_v23 = vand.u32 127, %v1071_v38 }
 0x21f   : > { %v1618_v37 = vpop.f32.mrf.mxu3  ;;  %1775 = vmatmul.bf16.vlgmr.msra.gmra.mxu0 %v1751_v3  ;;  %1794 = vmatmul.bf16.vlgmr.msra.gmra.mxu1 %v1752_v4  ;;  %v1693_v53 = vmul.f32 0.2, %v1677_v36  ;;  %v1871_v4 = vmul.f32 %v1855_v59, %v1855_v59  ;;  %v1753_v20 = vpack.c.b16 %v1741_v15, %v1737_v18  ;;  %v1754_v21 = vpack.c.b16 %v1742_v39, %v1738_v19 }
 0x220   : > { %v1706_v41 = vmax.f32 %v1674_v22, %v1690_v28  ;;  %v1619_v42 = vadd.f32 %v1618_v37, %v1599_v29  ;;  %v1881_v45 = vadd.f32 %v1880_v33, %v1865_v32  ;;  %v1906_v16 = vadd.s32 4294967288, %v1904_v23 }
 0x221   : > { %v1709_v61 = vmax.f32 %v1677_v36, %v1693_v53  ;;  %v1890_v17 = vadd.f32 %v1872_v5, %v1871_v4  ;;  %v1910_v25 = vadd.s32 4294967280, %v1904_v23  ;;  %v1914_v28 = vadd.s32 4294967272, %v1904_v23 }
 0x222   : > { %v1716_v51 = vpack.c.bf16 %v1706_v41, %v1705_v35  ;;  %v1652_v44 = vadd.f32 %v1636_v40, %v1619_v42  ;;  %v1882_v52 = vadd.f32 %v1881_v45, %v1866_v43 }
 0x224   : > { %1724 = vst [vmem:[%s3134_s23 + $0x28] sm:$0xff] %v1716_v51  ;;  %v1678_v54 = vadd.f32 %v3861_v9, %v1652_v44  ;;  %1883 = vadd.xlane.f32.xlu0 %v1882_v52  ;;  %v1853_v55 = vunpack.c.l.bf16 %v1716_v51  ;;  %v1854_v6 = vunpack.c.h.bf16 %v1716_v51  ;;  %v1745_v9 = vunpack.c.l.b16 %v1716_v51 }
 0x225   : > { %v1746_v34 = vunpack.c.h.b16 %v1716_v51 }
 0x226   : > { %v1694_v57 = vmul.f32 0.2, %v1678_v54  ;;  %v1869_v58 = vmul.f32 %v1853_v55, %v1853_v55  ;;  %v1870_v63 = vmul.f32 %v1854_v6, %v1854_v6 }
 0x228   : > { %v1710_v62 = vmax.f32 %v1678_v54, %v1694_v57  ;;  %v1886_v0 = vadd.f32 %v1885_v56, %v1869_v58 }
 0x22a   : > { %v1718_v2 = vpack.c.bf16 %v1710_v62, %v1709_v61  ;;  %v1887_v3 = vadd.f32 %v1886_v0, %v1870_v63 }
 0x22c   : > { %1726 = vst [vmem:[%s3134_s23 + $0x38] sm:$0xff] %v1718_v2  ;;  %1888 = vadd.xlane.f32.xlu1 %v1887_v3  ;;  %v1749_v7 = vunpack.c.l.b16 %v1718_v2  ;;  %v1750_v8 = vunpack.c.h.b16 %v1718_v2  ;;  %v1857_v49 = vunpack.c.l.bf16 %v1718_v2  ;;  %v1858_v26 = vunpack.c.h.bf16 %v1718_v2 }
 0x22e   : > { %v1757_v10 = vpack.c.b16 %v1749_v7, %v1745_v9  ;;  %v1758_v11 = vpack.c.b16 %v1750_v8, %v1746_v34  ;;  %v1873_v12 = vmul.f32 %v1857_v49, %v1857_v49  ;;  %v1874_v13 = vmul.f32 %v1858_v26, %v1858_v26 }
 0x22f   : > { %1780 = vmatmul.bf16.gmra.mxu0 %v3875_v30  ;;  %1799 = vmatmul.bf16.gmra.mxu1 %v3877_v31 }
 0x230   : > { %1811 = vmatpush.bf16.xpose.msra.mxu2 %v1757_v10  ;;  %1830 = vmatpush.bf16.xpose.msra.mxu3 %v1758_v11  ;;  %v1891_v14 = vadd.f32 %v1890_v17, %v1873_v12 }
 0x232   : > { %v1892_v47 = vadd.f32 %v1891_v14, %v1874_v13 }
 0x234   : > { %1893 = vadd.xlane.f32.xlu1 %v1892_v47 }
 0x238   : > { %1812 = vmatpush.bf16.xpose.msra.mxu2 %v1753_v20  ;;  %1831 = vmatpush.bf16.xpose.msra.mxu3 %v1754_v21 }
 0x23f   : > { %1813 = vmatmul.bf16.vlgmr.msra.gmra.mxu2 %v1753_v20  ;;  %1832 = vmatmul.bf16.vlgmr.msra.gmra.mxu3 %v1754_v21 }
 0x24f   : > { %1818 = vmatmul.bf16.gmra.mxu2 %v1757_v10  ;;  %1837 = vmatmul.bf16.gmra.mxu3 %v1758_v11 }
 0x28f   : > { %v1879_v30 = vpop.xlane.xlu0 %1878 }
 0x290   : > { %v1905_v41 = vperm.slane %v1879_v30, %v1904_v23 }
 0x297   : > { %v1884_v24 = vpop.xlane.xlu0 %1883 }
 0x298   : > { %v1907_v33 = vperm.slane %v1884_v24, %v1906_v16 }
 0x29a   : > { %v1909_v43 = vsel %vm1908_vm1, %v1907_v33, %v1905_v41 }
 0x29c   : > { %v1776_v31 = vpop.f32.mrf.mxu0  ;;  %v1795_v1 = vpop.f32.mrf.mxu1 }
 0x29d   : > { %v1796_v50 = vadd.f32 %v1795_v1, %v1776_v31 }
 0x29f   : > { %v1889_v22 = vpop.xlane.xlu1 %1888 }
 0x2a0   : > { %v1911_v37 = vperm.slane %v1889_v22, %v1910_v25 }
 0x2a2   : > { %v1913_v45 = vsel %vm1912_vm2, %v1911_v37, %v1909_v43 }
 0x2a4   : > { %v1778_v27 = vpop.f32.mrf.mxu0  ;;  %v1797_v29 = vpop.f32.mrf.mxu1 }
 0x2a5   : > { %v1798_v51 = vadd.f32 %v1797_v29, %v1778_v27 }
 0x2a7   : > { %v1894_v32 = vpop.xlane.xlu1 %1893 }
 0x2a8   : > { %v1915_v42 = vperm.slane %v1894_v32, %v1914_v28 }
 0x2aa   : > { %v1917_v48 = vsel %vm1916_vm3, %v1915_v42, %v1913_v45 }
 0x2ac   : > { %v1781_v55 = vpop.f32.mrf.mxu0  ;;  %v1800_v6 = vpop.f32.mrf.mxu1 }
 0x2ad   : > { %v1801_v58 = vadd.f32 %v1800_v6, %v1781_v55 }
 0x2b4   : > { %v1783_v0 = vpop.f32.mrf.mxu0  ;;  %v1802_v2 = vpop.f32.mrf.mxu1 }
 0x2b5   : > { %v1803_v4 = vadd.f32 %v1802_v2, %v1783_v0 }
 0x2c2   : > { %v1814_v35 = vpop.f32.mrf.mxu2  ;;  %v1833_v36 = vpop.f32.mrf.mxu3 }
 0x2c3   : > { %v1815_v40 = vadd.f32 %v1814_v35, %v1796_v50 }
 0x2c5   : > { %v1834_v38 = vadd.f32 %v1833_v36, %v1815_v40 }
 0x2c7   : > { %v1895_v46 = vmul.f32 2.0, %v1834_v38 }
 0x2c9   : > { %v1931_v44 = vsub.f32 %v1895_v46, %v1917_v48 }
 0x2ca   : > { %v1816_v52 = vpop.f32.mrf.mxu2  ;;  %v1835_v53 = vpop.f32.mrf.mxu3 }
 0x2cb   : > { %1936 = vst.msk [vmem:[%s3148_s9] sm:$0xff] %vm1935_vm4, %v1931_v44  ;;  %v1817_v54 = vadd.f32 %v1816_v52, %v1798_v51 }
 0x2cd   : > { %v1836_v56 = vadd.f32 %v1835_v53, %v1817_v54 }
 0x2cf   : > { %v1896_v57 = vmul.f32 2.0, %v1836_v56 }
 0x2d1   : > { %v1932_v59 = vsub.f32 %v1896_v57, %v1917_v48 }
 0x2d2   : > { %v1819_v60 = vpop.f32.mrf.mxu2  ;;  %v1838_v61 = vpop.f32.mrf.mxu3 }
 0x2d3   : > { %1937 = vst.msk [vmem:[%s3148_s9 + $0x8] sm:$0xff] %vm1935_vm4, %v1932_v59  ;;  %v1820_v62 = vadd.f32 %v1819_v60, %v1801_v58 }
 0x2d5   : > { %v1839_v63 = vadd.f32 %v1838_v61, %v1820_v62 }
 0x2d7   : > { %v1897_v3 = vmul.f32 2.0, %v1839_v63 }
 0x2d9   : > { %v1933_v5 = vsub.f32 %v1897_v3, %v1917_v48 }
 0x2da   : > { %v1821_v9 = vpop.f32.mrf.mxu2  ;;  %v1840_v7 = vpop.f32.mrf.mxu3 }
 0x2db   : > { %1938 = vst.msk [vmem:[%s3148_s9 + $0x10] sm:$0xff] %vm1935_vm4, %v1933_v5  ;;  %v1822_v34 = vadd.f32 %v1821_v9, %v1803_v4 }
 0x2dd   : > { %v1841_v8 = vadd.f32 %v1840_v7, %v1822_v34 }
 0x2df   : > { %v1898_v49 = vmul.f32 2.0, %v1841_v8 }
 0x2e1   : > { %v1934_v26 = vsub.f32 %v1898_v49, %v1917_v48 }
 0x2e3   : > { %1939 = vst.msk [vmem:[%s3148_s9 + $0x18] sm:$0xff] %vm1935_vm4, %v1934_v26 }
 0x2e4 PF: > { %s25_s25 = sadd.s32 1, %s2877_s25  }
 0x2e5   : > { %p22_p5 = scmp.ge.s32.totalorder %s25_s25, 4  }
 0x2e7   :  { %24 = sbr.rel (!%p22_p5) target bundleno = 8 (0x8), region = 117 }

// kernel: dgcnn_forward.10
= control target key start
LH: loop header
LB: loop body
LE: loop exit
PB: predicated region body
PF: predicated region fallthrough
CT: control target
= control target key end

     0   :  { %s4349_s21 = smov [#allocation5]   ;;  %s6147_s0 = inlined_call_operand.vmem [shape: s32[1280], index: 0, kind: input, shape index: {}]   ;;  %s6148_s1 = inlined_call_operand.vmem [shape: bf16[2,32,512], index: 1, kind: input, shape index: {}]   ;;  %s6149_s2 = inlined_call_operand.vmem [shape: bf16[512,512], index: 2, kind: input, shape index: {}]   ;;  %s6150_s3 = inlined_call_operand.vmem [shape: bf16[512,512], index: 3, kind: input, shape index: {}]   ;;  %s6151_s4 = inlined_call_operand.vmem [shape: f32[1,512], index: 4, kind: input, shape index: {}]   ;;  %s6152_s5 = inlined_call_operand.vmem [shape: bf16[2,32,512], index: 5, kind: output, shape index: {}]  }
   0x1   :  { %s11_s20 = sshll.u32 %s6147_s0, 4  ;;  %s12_s20 = int_to_ptr.vmem [resolvable:$true] %s11_s20 }
   0x2   :  { %14 = dma.vmem_to_smem %s12_s20, 160, %s4349_s21, [#allocation4] }
   0x3   :  { %4339 = dma.done.wait [#allocation4], 160 }
   0x4   :  { %4340 = vsyncadd [#allocation4], 4294967136 }
   0x5   :  { %17 = sfence }
   0x6   :  { %s4383_s22 = smov 0  }
   0x7 LB: > { %s4389_s23 = sadd.s32 4294967295, %s4343_s22   ;;  %p2909_p0 = scmp.ge.s32.totalorder %s4343_s22, 1  ;;  %s4343_s22 = sphi %s4383_s22, %s23_s22  }
   0x8   : > { %p171_p1 = scmp.lt.s32.totalorder %s4343_s22, 3 }
   0xa   : > { %p172_p2 = pnand %p2909_p0, %p171_p1 }
   0xb   : > { %p197_p3 = scmp.lt.s32.totalorder (!%p172_p2), %s4389_s23, 1  ;;  %s5237_s8 = smov (!%p172_p2), 0  }
   0xc   : > { %175 = sbr.rel (%p172_p2) target bundleno = 690 (0x2b2), region = 36 }
  0x11   : > { %v3060_v0 = vld [vmem:[%s6149_s2 + $0xe0] sm:$0xf]  ;;  %v4055_v1 = vld [vmem:[%s6149_s2 + $0xec] sm:$0xf0]  ;;  %s198_s0 = scalar_select %p197_p3, %s4389_s23, 1 }
  0x12   : > { %v3188_v2 = vld [vmem:[%s6149_s2 + $0x1e0] sm:$0xf]  ;;  %v3061_v3 = vor.u32 %v4055_v1, %v3060_v0  ;;  %v4087_v4 = vld [vmem:[%s6149_s2 + $0x1ec] sm:$0xf0] }
  0x13   : > { %v3316_v5 = vld [vmem:[%s6149_s2 + $0x2e0] sm:$0xf]  ;;  %v4119_v6 = vld [vmem:[%s6149_s2 + $0x2ec] sm:$0xf0]  ;;  %v3189_v7 = vor.u32 %v4087_v4, %v3188_v2  ;;  %s4015_s7 = sshll.u32 %s198_s0, 6 }
  0x14   : > { %v3317_v8 = vor.u32 %v4119_v6, %v3316_v5  ;;  %v3444_v9 = vld [vmem:[%s6149_s2 + $0x3e0] sm:$0xf]  ;;  %v4151_v10 = vld [vmem:[%s6149_s2 + $0x3ec] sm:$0xf0]  ;;  %1023 = vmatpush.bf16.msra.mxu0 %v3061_v3  ;;  %s4593_s12 = scalar_lea.vmem %s6148_s1, %s4015_s7  ;;  %s4598_s15 = scalar_lea.vmem %s6152_s5, %s4015_s7 }
  0x15   : > { %v3044_v11 = vld [vmem:[%s6149_s2 + $0xc0] sm:$0xf]  ;;  %v3445_v12 = vor.u32 %v4151_v10, %v3444_v9  ;;  %v4051_v13 = vld [vmem:[%s6149_s2 + $0xcc] sm:$0xf0]  ;;  %1042 = vmatpush.bf16.msra.mxu1 %v3189_v7 }
  0x16   : > { %v3172_v14 = vld [vmem:[%s6149_s2 + $0x1c0] sm:$0xf]  ;;  %v4083_v15 = vld [vmem:[%s6149_s2 + $0x1cc] sm:$0xf0]  ;;  %1061 = vmatpush.bf16.msra.mxu2 %v3317_v8  ;;  %v3045_v16 = vor.u32 %v4051_v13, %v3044_v11 }
  0x17   : > { %v3173_v17 = vor.u32 %v4083_v15, %v3172_v14  ;;  %v3300_v18 = vld [vmem:[%s6149_s2 + $0x2c0] sm:$0xf]  ;;  %v4115_v19 = vld [vmem:[%s6149_s2 + $0x2cc] sm:$0xf0]  ;;  %1080 = vmatpush.bf16.msra.mxu3 %v3445_v12 }
  0x18   : > { %v3428_v20 = vld [vmem:[%s6149_s2 + $0x3c0] sm:$0xf]  ;;  %v3301_v21 = vor.u32 %v4115_v19, %v3300_v18  ;;  %v4147_v22 = vld [vmem:[%s6149_s2 + $0x3cc] sm:$0xf0]  ;;  %1024 = vmatpush.bf16.msra.mxu0 %v3045_v16 }
  0x19   : > { %v3028_v23 = vld [vmem:[%s6149_s2 + $0xa0] sm:$0xf]  ;;  %v4047_v24 = vld [vmem:[%s6149_s2 + $0xac] sm:$0xf0]  ;;  %v3429_v25 = vor.u32 %v4147_v22, %v3428_v20  ;;  %1043 = vmatpush.bf16.msra.mxu1 %v3173_v17 }
  0x1a   : > { %v3156_v26 = vld [vmem:[%s6149_s2 + $0x1a0] sm:$0xf]  ;;  %v4079_v27 = vld [vmem:[%s6149_s2 + $0x1ac] sm:$0xf0]  ;;  %v3029_v29 = vor.u32 %v4047_v24, %v3028_v23  ;;  %1062 = vmatpush.bf16.msra.mxu2 %v3301_v21 }
  0x1b   : > { %v3284_v28 = vld [vmem:[%s6149_s2 + $0x2a0] sm:$0xf]  ;;  %v4111_v30 = vld [vmem:[%s6149_s2 + $0x2ac] sm:$0xf0]  ;;  %v3157_v33 = vor.u32 %v4079_v27, %v3156_v26  ;;  %1081 = vmatpush.bf16.msra.mxu3 %v3429_v25 }
  0x1c   : > { %v3412_v31 = vld [vmem:[%s6149_s2 + $0x3a0] sm:$0xf]  ;;  %v4143_v32 = vld [vmem:[%s6149_s2 + $0x3ac] sm:$0xf0]  ;;  %v3285_v34 = vor.u32 %v4111_v30, %v3284_v28  ;;  %1025 = vmatpush.bf16.msra.mxu0 %v3029_v29  ;;  %v4117_v28 = vld [vmem:[%s6149_s2 + $0x2e4] sm:$0xf] }
  0x1d   : > { %v3012_v35 = vld [vmem:[%s6149_s2 + $0x80] sm:$0xf]  ;;  %v4043_v36 = vld [vmem:[%s6149_s2 + $0x8c] sm:$0xf0]  ;;  %v3413_v38 = vor.u32 %v4143_v32, %v3412_v31  ;;  %1044 = vmatpush.bf16.msra.mxu1 %v3157_v33  ;;  %v3318_v29 = vld [vmem:[%s6149_s2 + $0x2f0] sm:$0xf0] }
  0x1e   : > { %v3140_v37 = vld [vmem:[%s6149_s2 + $0x180] sm:$0xf]  ;;  %v4075_v39 = vld [vmem:[%s6149_s2 + $0x18c] sm:$0xf0]  ;;  %v3013_v44 = vor.u32 %v4043_v36, %v3012_v35  ;;  %1063 = vmatpush.bf16.msra.mxu2 %v3285_v34  ;;  %v4085_v30 = vld [vmem:[%s6149_s2 + $0x1e4] sm:$0xf] }
  0x1f   : > { %v3268_v40 = vld [vmem:[%s6149_s2 + $0x280] sm:$0xf]  ;;  %v4107_v41 = vld [vmem:[%s6149_s2 + $0x28c] sm:$0xf0]  ;;  %v3141_v45 = vor.u32 %v4075_v39, %v3140_v37  ;;  %1082 = vmatpush.bf16.msra.mxu3 %v3413_v38  ;;  %v3190_v31 = vld [vmem:[%s6149_s2 + $0x1f0] sm:$0xf0] }
  0x20   : > { %v3396_v42 = vld [vmem:[%s6149_s2 + $0x380] sm:$0xf]  ;;  %v4139_v43 = vld [vmem:[%s6149_s2 + $0x38c] sm:$0xf0]  ;;  %v3269_v46 = vor.u32 %v4107_v41, %v3268_v40  ;;  %1026 = vmatpush.bf16.msra.mxu0 %v3013_v44  ;;  %v4017_v35 = vld [vmem:[%s4593_s12 + $0x4] sm:$0xf] }
  0x21   : > { %v2996_v47 = vld [vmem:[%s6149_s2 + $0x60] sm:$0xf]  ;;  %v4039_v48 = vld [vmem:[%s6149_s2 + $0x6c] sm:$0xf0]  ;;  %v3397_v50 = vor.u32 %v4139_v43, %v3396_v42  ;;  %1045 = vmatpush.bf16.msra.mxu1 %v3141_v45  ;;  %v4053_v36 = vld [vmem:[%s6149_s2 + $0xe4] sm:$0xf] }
  0x22   : > { %v3124_v49 = vld [vmem:[%s6149_s2 + $0x160] sm:$0xf]  ;;  %v4071_v51 = vld [vmem:[%s6149_s2 + $0x16c] sm:$0xf0]  ;;  %v2997_v56 = vor.u32 %v4039_v48, %v2996_v47  ;;  %1064 = vmatpush.bf16.msra.mxu2 %v3269_v46  ;;  %v3062_v37 = vld [vmem:[%s6149_s2 + $0xf0] sm:$0xf0]  ;;  %v3321_v46 = vor.u32 %v4117_v28, %v3318_v29 }
  0x23   : > { %v3252_v52 = vld [vmem:[%s6149_s2 + $0x260] sm:$0xf]  ;;  %v4103_v53 = vld [vmem:[%s6149_s2 + $0x26c] sm:$0xf0]  ;;  %v3125_v57 = vor.u32 %v4071_v51, %v3124_v49  ;;  %1083 = vmatpush.bf16.msra.mxu3 %v3397_v50  ;;  %v2918_v40 = vld [vmem:[%s4593_s12 + $0x10] sm:$0xf0]  ;;  %v3193_v49 = vor.u32 %v4085_v30, %v3190_v31 }
  0x24   : > { %v3380_v54 = vld [vmem:[%s6149_s2 + $0x360] sm:$0xf]  ;;  %v4135_v55 = vld [vmem:[%s6149_s2 + $0x36c] sm:$0xf0]  ;;  %v3253_v58 = vor.u32 %v4103_v53, %v3252_v52  ;;  %1027 = vmatpush.bf16.msra.mxu0 %v2997_v56  ;;  %v2924_v41 = vld [vmem:[%s4593_s12 + $0x8] sm:$0xf]  ;;  %v4637_v53 = vor.u32 %v4017_v35, %v2918_v40 }
  0x25   : > { %v2980_v59 = vld [vmem:[%s6149_s2 + $0x40] sm:$0xf]  ;;  %v4035_v60 = vld [vmem:[%s6149_s2 + $0x4c] sm:$0xf0]  ;;  %v3381_v62 = vor.u32 %v4135_v55, %v3380_v54  ;;  %1046 = vmatpush.bf16.msra.mxu1 %v3125_v57  ;;  %v4020_v42 = vld [vmem:[%s4593_s12 + $0x14] sm:$0xf0] }
  0x26   : > { %v3108_v61 = vld [vmem:[%s6149_s2 + $0x140] sm:$0xf]  ;;  %v4067_v63 = vld [vmem:[%s6149_s2 + $0x14c] sm:$0xf0]  ;;  %v2981_v4 = vor.u32 %v4035_v60, %v2980_v59  ;;  %1065 = vmatpush.bf16.msra.mxu2 %v3253_v58  ;;  %v4018_v44 = vld [vmem:[%s4593_s12 + $0xc] sm:$0xf]  ;;  %v4639_v54 = vor.u32 %v4020_v42, %v2924_v41  ;;  %v3065_v58 = vor.u32 %v4053_v36, %v3062_v37 }
  0x27   : > { %v3236_v0 = vld [vmem:[%s6149_s2 + $0x240] sm:$0xf]  ;;  %v4099_v1 = vld [vmem:[%s6149_s2 + $0x24c] sm:$0xf0]  ;;  %v3109_v7 = vor.u32 %v4067_v63, %v3108_v61  ;;  %1084 = vmatpush.bf16.msra.mxu3 %v3381_v62  ;;  %v2926_v45 = vld [vmem:[%s4593_s12 + $0x18] sm:$0xf0] }
  0x28   : > { %v3364_v2 = vld [vmem:[%s6149_s2 + $0x340] sm:$0xf]  ;;  %v4131_v3 = vld [vmem:[%s6149_s2 + $0x34c] sm:$0xf0]  ;;  %v3237_v8 = vor.u32 %v4099_v1, %v3236_v0  ;;  %1028 = vmatpush.bf16.msra.mxu0 %v2981_v4  ;;  %v4149_v47 = vld [vmem:[%s6149_s2 + $0x3e4] sm:$0xf]  ;;  %v4647_v57 = vor.u32 %v4018_v44, %v2926_v45 }
  0x29   : > { %v2964_v5 = vld [vmem:[%s6149_s2 + $0x20] sm:$0xf]  ;;  %v4031_v6 = vld [vmem:[%s6149_s2 + $0x2c] sm:$0xf0]  ;;  %v3365_v12 = vor.u32 %v4131_v3, %v3364_v2  ;;  %1047 = vmatpush.bf16.msra.mxu1 %v3109_v7  ;;  %v3446_v50 = vld [vmem:[%s6149_s2 + $0x3f0] sm:$0xf0] }
  0x2a   : > { %v3092_v9 = vld [vmem:[%s6149_s2 + $0x120] sm:$0xf]  ;;  %v4063_v10 = vld [vmem:[%s6149_s2 + $0x12c] sm:$0xf0]  ;;  %v2965_v18 = vor.u32 %v4031_v6, %v2964_v5  ;;  %1066 = vmatpush.bf16.msra.mxu2 %v3237_v8  ;;  %v4113_v51 = vld [vmem:[%s6149_s2 + $0x2c4] sm:$0xf]  ;;  %v3449_v59 = vor.u32 %v4149_v47, %v3446_v50 }
  0x2b   : > { %v3220_v11 = vld [vmem:[%s6149_s2 + $0x220] sm:$0xf]  ;;  %v4095_v13 = vld [vmem:[%s6149_s2 + $0x22c] sm:$0xf0]  ;;  %v3093_v21 = vor.u32 %v4063_v10, %v3092_v9  ;;  %1085 = vmatpush.bf16.msra.mxu3 %v3365_v12  ;;  %v3302_v52 = vld [vmem:[%s6149_s2 + $0x2d0] sm:$0xf0] }
  0x2c   : > { %v3348_v14 = vld [vmem:[%s6149_s2 + $0x320] sm:$0xf]  ;;  %v4127_v15 = vld [vmem:[%s6149_s2 + $0x32c] sm:$0xf0]  ;;  %v3221_v22 = vor.u32 %v4095_v13, %v3220_v11  ;;  %1029 = vmatpush.bf16.msra.mxu0 %v2965_v18  ;;  %v4081_v55 = vld [vmem:[%s6149_s2 + $0x1c4] sm:$0xf]  ;;  %v3305_v60 = vor.u32 %v4113_v51, %v3302_v52 }
  0x2d   : > { %v2948_v16 = vld [vmem:[%s6149_s2] sm:$0xf]  ;;  %v4027_v17 = vld [vmem:[%s6149_s2 + $0xc] sm:$0xf0]  ;;  %v3349_v26 = vor.u32 %v4127_v15, %v3348_v14  ;;  %1048 = vmatpush.bf16.msra.mxu1 %v3093_v21  ;;  %v3174_v56 = vld [vmem:[%s6149_s2 + $0x1d0] sm:$0xf0] }
  0x2e   : > { %v3076_v19 = vld [vmem:[%s6149_s2 + $0x100] sm:$0xf]  ;;  %v4059_v20 = vld [vmem:[%s6149_s2 + $0x10c] sm:$0xf0]  ;;  %v2949_v32 = vor.u32 %v4027_v17, %v2948_v16  ;;  %1067 = vmatpush.bf16.msra.mxu2 %v3221_v22  ;;  %v4049_v61 = vld [vmem:[%s6149_s2 + $0xc4] sm:$0xf]  ;;  %v3177_v0 = vor.u32 %v4081_v55, %v3174_v56 }
  0x2f   : > { %v3204_v23 = vld [vmem:[%s6149_s2 + $0x200] sm:$0xf]  ;;  %v4091_v24 = vld [vmem:[%s6149_s2 + $0x20c] sm:$0xf0]  ;;  %v3077_v38 = vor.u32 %v4059_v20, %v3076_v19  ;;  %1086 = vmatpush.bf16.msra.mxu3 %v3349_v26  ;;  %v3046_v62 = vld [vmem:[%s6149_s2 + $0xd0] sm:$0xf0] }
  0x30   : > { %v3332_v25 = vld [vmem:[%s6149_s2 + $0x300] sm:$0xf]  ;;  %v4123_v27 = vld [vmem:[%s6149_s2 + $0x30c] sm:$0xf0]  ;;  %v3205_v39 = vor.u32 %v4091_v24, %v3204_v23  ;;  %1030 = vmatpush.bf16.msra.mxu0 %v2949_v32  ;;  %v4145_v63 = vld [vmem:[%s6149_s2 + $0x3c4] sm:$0xf]  ;;  %v3049_v6 = vor.u32 %v4049_v61, %v3046_v62 }
  0x31   : > { %v2916_v33 = vld [vmem:[%s4593_s12] sm:$0xf]  ;;  %v4019_v34 = vld [vmem:[%s4593_s12 + $0xc] sm:$0xf0]  ;;  %v3333_v43 = vor.u32 %v4123_v27, %v3332_v25  ;;  %1049 = vmatpush.bf16.msra.mxu1 %v3077_v38  ;;  %v3430_v1 = vld [vmem:[%s6149_s2 + $0x3d0] sm:$0xf0] }
  0x32   : > { %v4626_v48 = vor.u32 %v4019_v34, %v2916_v33  ;;  %1068 = vmatpush.bf16.msra.mxu2 %v3205_v39  ;;  %v4109_v2 = vld [vmem:[%s6149_s2 + $0x2a4] sm:$0xf]  ;;  %v3286_v3 = vld [vmem:[%s6149_s2 + $0x2b0] sm:$0xf0]  ;;  %v3433_v7 = vor.u32 %v4145_v63, %v3430_v1  ;;  %v2932_v25 = vld [vmem:[%s4593_s12 + $0x20] sm:$0xf] }
  0x33   : > { %1087 = vmatpush.bf16.msra.mxu3 %v3333_v43  ;;  %v4077_v4 = vld [vmem:[%s6149_s2 + $0x1a4] sm:$0xf]  ;;  %v3158_v5 = vld [vmem:[%s6149_s2 + $0x1b0] sm:$0xf0]  ;;  %v3289_v8 = vor.u32 %v4109_v2, %v3286_v3  ;;  %v4023_v26 = vld [vmem:[%s4593_s12 + $0x2c] sm:$0xf0] }
  0x34   : > { %1031 = vmatmul.bf16.vlgmr.msra.gmra.mxu0 %v4626_v48  ;;  %1050 = vmatmul.bf16.vlgmr.msra.gmra.mxu1 %v4637_v53  ;;  %v4045_v9 = vld [vmem:[%s6149_s2 + $0xa4] sm:$0xf]  ;;  %v3030_v10 = vld [vmem:[%s6149_s2 + $0xb0] sm:$0xf0]  ;;  %v3161_v12 = vor.u32 %v4077_v4, %v3158_v5  ;;  %v2940_v32 = vld [vmem:[%s4593_s12 + $0x28] sm:$0xf]  ;;  %v4742_v44 = vor.u32 %v4023_v26, %v2932_v25 }
  0x35   : > { %1118 = vmatpush.bf16.msrb.mxu1 %v3193_v49  ;;  %1069 = vmatmul.bf16.vlgmr.msra.gmra.mxu2 %v4639_v54  ;;  %v4141_v11 = vld [vmem:[%s6149_s2 + $0x3a4] sm:$0xf]  ;;  %v3414_v13 = vld [vmem:[%s6149_s2 + $0x3b0] sm:$0xf0]  ;;  %v3033_v18 = vor.u32 %v4045_v9, %v3030_v10  ;;  %v4024_v36 = vld [vmem:[%s4593_s12 + $0x34] sm:$0xf0] }
  0x36   : > { %1137 = vmatpush.bf16.msrb.mxu2 %v3321_v46  ;;  %1088 = vmatmul.bf16.vlgmr.msra.gmra.mxu3 %v4647_v57  ;;  %v4105_v14 = vld [vmem:[%s6149_s2 + $0x284] sm:$0xf]  ;;  %v3270_v15 = vld [vmem:[%s6149_s2 + $0x290] sm:$0xf0]  ;;  %v3417_v22 = vor.u32 %v4141_v11, %v3414_v13  ;;  %v4022_v37 = vld [vmem:[%s4593_s12 + $0x2c] sm:$0xf]  ;;  %v4755_v51 = vor.u32 %v4024_v36, %v2940_v32 }
  0x37   : > { %1099 = vmatpush.bf16.msrb.mxu0 %v3065_v58  ;;  %1156 = vmatpush.bf16.msrb.mxu3 %v3449_v59  ;;  %v4073_v16 = vld [vmem:[%s6149_s2 + $0x184] sm:$0xf]  ;;  %v3142_v17 = vld [vmem:[%s6149_s2 + $0x190] sm:$0xf0]  ;;  %v3273_v23 = vor.u32 %v4105_v14, %v3270_v15  ;;  %v2942_v38 = vld [vmem:[%s4593_s12 + $0x38] sm:$0xf0] }
  0x38   : > { %v4041_v19 = vld [vmem:[%s6149_s2 + $0x84] sm:$0xf]  ;;  %v3014_v20 = vld [vmem:[%s6149_s2 + $0x90] sm:$0xf0]  ;;  %v3145_v27 = vor.u32 %v4073_v16, %v3142_v17  ;;  %v4763_v56 = vor.u32 %v4022_v37, %v2942_v38  ;;  %v4056_v32 = vld [vmem:[%s6149_s2 + $0xf4] sm:$0xf0] }
  0x39   : > { %1119 = vmatpush.bf16.msrb.mxu1 %v3177_v0  ;;  %v4137_v21 = vld [vmem:[%s6149_s2 + $0x384] sm:$0xf]  ;;  %v3398_v24 = vld [vmem:[%s6149_s2 + $0x390] sm:$0xf0]  ;;  %v3017_v35 = vor.u32 %v4041_v19, %v3014_v20  ;;  %v4120_v19 = vld [vmem:[%s6149_s2 + $0x2f4] sm:$0xf0] }
  0x3a   : > { %1138 = vmatpush.bf16.msrb.mxu2 %v3305_v60  ;;  %v4021_v28 = vld [vmem:[%s4593_s12 + $0x24] sm:$0xf]  ;;  %v2934_v29 = vld [vmem:[%s4593_s12 + $0x30] sm:$0xf0]  ;;  %v3401_v39 = vor.u32 %v4137_v21, %v3398_v24  ;;  %v3308_v36 = vld [vmem:[%s6149_s2 + $0x2c8] sm:$0xf] }
  0x3b   : > { %1100 = vmatpush.bf16.msrb.mxu0 %v3049_v6  ;;  %1157 = vmatpush.bf16.msrb.mxu3 %v3433_v7  ;;  %v4101_v30 = vld [vmem:[%s6149_s2 + $0x264] sm:$0xf]  ;;  %v3254_v31 = vld [vmem:[%s6149_s2 + $0x270] sm:$0xf0]  ;;  %v4753_v50 = vor.u32 %v4021_v28, %v2934_v29  ;;  %v4116_v37 = vld [vmem:[%s6149_s2 + $0x2d4] sm:$0xf0] }
  0x3c   : > { %v4069_v33 = vld [vmem:[%s6149_s2 + $0x164] sm:$0xf]  ;;  %v3126_v34 = vld [vmem:[%s6149_s2 + $0x170] sm:$0xf0]  ;;  %v3257_v40 = vor.u32 %v4101_v30, %v3254_v31  ;;  %v3068_v31 = vld [vmem:[%s6149_s2 + $0xe8] sm:$0xf] }
  0x3d   : > { %1120 = vmatpush.bf16.msrb.mxu1 %v3161_v12  ;;  %v4037_v41 = vld [vmem:[%s6149_s2 + $0x64] sm:$0xf]  ;;  %v2998_v42 = vld [vmem:[%s6149_s2 + $0x70] sm:$0xf0]  ;;  %v3129_v45 = vor.u32 %v4069_v33, %v3126_v34  ;;  %v3452_v33 = vld [vmem:[%s6149_s2 + $0x3e8] sm:$0xf] }
  0x3e   : > { %1139 = vmatpush.bf16.msrb.mxu2 %v3289_v8  ;;  %v4133_v43 = vld [vmem:[%s6149_s2 + $0x364] sm:$0xf]  ;;  %v3382_v46 = vld [vmem:[%s6149_s2 + $0x370] sm:$0xf0]  ;;  %v3001_v58 = vor.u32 %v4037_v41, %v2998_v42  ;;  %v3052_v41 = vld [vmem:[%s6149_s2 + $0xc8] sm:$0xf] }
  0x3f   : > { %1101 = vmatpush.bf16.msrb.mxu0 %v3033_v18  ;;  %1158 = vmatpush.bf16.msrb.mxu3 %v3417_v22  ;;  %v4097_v47 = vld [vmem:[%s6149_s2 + $0x244] sm:$0xf]  ;;  %v3238_v49 = vld [vmem:[%s6149_s2 + $0x250] sm:$0xf0]  ;;  %v3385_v59 = vor.u32 %v4133_v43, %v3382_v46  ;;  %v3324_v18 = vld [vmem:[%s6149_s2 + $0x2e8] sm:$0xf] }
  0x40   : > { %v4065_v52 = vld [vmem:[%s6149_s2 + $0x144] sm:$0xf]  ;;  %v3110_v55 = vld [vmem:[%s6149_s2 + $0x150] sm:$0xf0]  ;;  %v3241_v60 = vor.u32 %v4097_v47, %v3238_v49  ;;  %v3196_v22 = vld [vmem:[%s6149_s2 + $0x1e8] sm:$0xf]  ;;  %v3325_v30 = vor.u32 %v4120_v19, %v3324_v18 }
  0x41   : > { %1121 = vmatpush.bf16.msrb.mxu1 %v3145_v27  ;;  %v4033_v61 = vld [vmem:[%s6149_s2 + $0x44] sm:$0xf]  ;;  %v2982_v62 = vld [vmem:[%s6149_s2 + $0x50] sm:$0xf0]  ;;  %v3113_v0 = vor.u32 %v4065_v52, %v3110_v55  ;;  %v4052_v42 = vld [vmem:[%s6149_s2 + $0xd4] sm:$0xf0] }
  0x42   : > { %1140 = vmatpush.bf16.msrb.mxu2 %v3273_v23  ;;  %v4129_v63 = vld [vmem:[%s6149_s2 + $0x344] sm:$0xf]  ;;  %v3366_v1 = vld [vmem:[%s6149_s2 + $0x350] sm:$0xf0]  ;;  %v2985_v6 = vor.u32 %v4033_v61, %v2982_v62  ;;  %v4088_v23 = vld [vmem:[%s6149_s2 + $0x1f4] sm:$0xf0] }
  0x43   : > { %1102 = vmatpush.bf16.msrb.mxu0 %v3017_v35  ;;  %1159 = vmatpush.bf16.msrb.mxu3 %v3401_v39  ;;  %v4093_v2 = vld [vmem:[%s6149_s2 + $0x224] sm:$0xf]  ;;  %v3222_v3 = vld [vmem:[%s6149_s2 + $0x230] sm:$0xf0]  ;;  %v3369_v8 = vor.u32 %v4129_v63, %v3366_v1  ;;  %v3197_v34 = vor.u32 %v4088_v23, %v3196_v22  ;;  %v4152_v35 = vld [vmem:[%s6149_s2 + $0x3f4] sm:$0xf0] }
  0x44   : > { %1036 = vmatmul.bf16.gmra.mxu0 %v4742_v44  ;;  %1055 = vmatmul.bf16.gmra.mxu1 %v4753_v50  ;;  %v4061_v4 = vld [vmem:[%s6149_s2 + $0x124] sm:$0xf]  ;;  %v3094_v5 = vld [vmem:[%s6149_s2 + $0x130] sm:$0xf0]  ;;  %v3225_v9 = vor.u32 %v4093_v2, %v3222_v3  ;;  %v3453_v43 = vor.u32 %v4152_v35, %v3452_v33  ;;  %v3180_v46 = vld [vmem:[%s6149_s2 + $0x1c8] sm:$0xf] }
  0x45   : > { %1122 = vmatpush.bf16.msrb.mxu1 %v3129_v45  ;;  %1074 = vmatmul.bf16.gmra.mxu2 %v4755_v51  ;;  %v4029_v7 = vld [vmem:[%s6149_s2 + $0x24] sm:$0xf]  ;;  %v2966_v10 = vld [vmem:[%s6149_s2 + $0x30] sm:$0xf0]  ;;  %v3097_v13 = vor.u32 %v4061_v4, %v3094_v5  ;;  %v3309_v45 = vor.u32 %v4116_v37, %v3308_v36  ;;  %v4084_v47 = vld [vmem:[%s6149_s2 + $0x1d4] sm:$0xf0] }
  0x46   : > { %1141 = vmatpush.bf16.msrb.mxu2 %v3257_v40  ;;  %1093 = vmatmul.bf16.gmra.mxu3 %v4763_v56  ;;  %v4125_v11 = vld [vmem:[%s6149_s2 + $0x324] sm:$0xf]  ;;  %v3350_v12 = vld [vmem:[%s6149_s2 + $0x330] sm:$0xf0]  ;;  %v2969_v20 = vor.u32 %v4029_v7, %v2966_v10  ;;  %v3069_v40 = vor.u32 %v4056_v32, %v3068_v31  ;;  %v3436_v49 = vld [vmem:[%s6149_s2 + $0x3c8] sm:$0xf] }
  0x47   : > { %1103 = vmatpush.bf16.msrb.mxu0 %v3001_v58  ;;  %1160 = vmatpush.bf16.msrb.mxu3 %v3385_v59  ;;  %v4089_v14 = vld [vmem:[%s6149_s2 + $0x204] sm:$0xf]  ;;  %v3206_v15 = vld [vmem:[%s6149_s2 + $0x210] sm:$0xf0]  ;;  %v3353_v24 = vor.u32 %v4125_v11, %v3350_v12  ;;  %v4148_v52 = vld [vmem:[%s6149_s2 + $0x3d4] sm:$0xf0]  ;;  %v3053_v59 = vor.u32 %v4052_v42, %v3052_v41 }
  0x48   : > { %v4057_v16 = vld [vmem:[%s6149_s2 + $0x104] sm:$0xf]  ;;  %v3078_v17 = vld [vmem:[%s6149_s2 + $0x110] sm:$0xf0]  ;;  %v3209_v25 = vor.u32 %v4089_v14, %v3206_v15  ;;  %v3292_v55 = vld [vmem:[%s6149_s2 + $0x2a8] sm:$0xf]  ;;  %v3437_v63 = vor.u32 %v4148_v52, %v3436_v49 }
  0x49   : > { %1123 = vmatpush.bf16.msrb.mxu1 %v3113_v0  ;;  %v4025_v21 = vld [vmem:[%s6149_s2 + $0x4] sm:$0xf]  ;;  %v2950_v26 = vld [vmem:[%s6149_s2 + $0x10] sm:$0xf0]  ;;  %v3081_v29 = vor.u32 %v4057_v16, %v3078_v17  ;;  %v4112_v58 = vld [vmem:[%s6149_s2 + $0x2b4] sm:$0xf0] }
  0x4a   : > { %1142 = vmatpush.bf16.msrb.mxu2 %v3241_v60  ;;  %v4121_v27 = vld [vmem:[%s6149_s2 + $0x304] sm:$0xf]  ;;  %v3334_v28 = vld [vmem:[%s6149_s2 + $0x310] sm:$0xf0]  ;;  %v2953_v38 = vor.u32 %v4025_v21, %v2950_v26  ;;  %v3181_v60 = vor.u32 %v4084_v47, %v3180_v46  ;;  %v3036_v61 = vld [vmem:[%s6149_s2 + $0xa8] sm:$0xf]  ;;  %v3293_v0 = vor.u32 %v4112_v58, %v3292_v55 }
  0x4b   : > { %1104 = vmatpush.bf16.msrb.mxu0 %v2985_v6  ;;  %1161 = vmatpush.bf16.msrb.mxu3 %v3369_v8  ;;  %v3337_v39 = vor.u32 %v4121_v27, %v3334_v28  ;;  %v4048_v62 = vld [vmem:[%s6149_s2 + $0xb4] sm:$0xf0]  ;;  %v3164_v1 = vld [vmem:[%s6149_s2 + $0x1a8] sm:$0xf] }
  0x4c   : > { %v4080_v2 = vld [vmem:[%s6149_s2 + $0x1b4] sm:$0xf0]  ;;  %v3420_v3 = vld [vmem:[%s6149_s2 + $0x3a8] sm:$0xf]  ;;  %v3037_v7 = vor.u32 %v4048_v62, %v3036_v61 }
  0x4d   : > { %1124 = vmatpush.bf16.msrb.mxu1 %v3097_v13  ;;  %v4144_v4 = vld [vmem:[%s6149_s2 + $0x3b4] sm:$0xf0]  ;;  %v3276_v5 = vld [vmem:[%s6149_s2 + $0x288] sm:$0xf]  ;;  %v3165_v8 = vor.u32 %v4080_v2, %v3164_v1 }
  0x4e   : > { %1143 = vmatpush.bf16.msrb.mxu2 %v3225_v9  ;;  %v4108_v6 = vld [vmem:[%s6149_s2 + $0x294] sm:$0xf0]  ;;  %v3020_v9 = vld [vmem:[%s6149_s2 + $0x88] sm:$0xf]  ;;  %v3421_v11 = vor.u32 %v4144_v4, %v3420_v3 }
  0x4f   : > { %1105 = vmatpush.bf16.msrb.mxu0 %v2969_v20  ;;  %1162 = vmatpush.bf16.msrb.mxu3 %v3353_v24  ;;  %v4044_v10 = vld [vmem:[%s6149_s2 + $0x94] sm:$0xf0]  ;;  %v3277_v12 = vor.u32 %v4108_v6, %v3276_v5  ;;  %v3148_v13 = vld [vmem:[%s6149_s2 + $0x188] sm:$0xf] }
  0x50   : > { %v4076_v14 = vld [vmem:[%s6149_s2 + $0x194] sm:$0xf0]  ;;  %v3404_v15 = vld [vmem:[%s6149_s2 + $0x388] sm:$0xf]  ;;  %v3021_v19 = vor.u32 %v4044_v10, %v3020_v9 }
  0x51   : > { %1125 = vmatpush.bf16.msrb.mxu1 %v3081_v29  ;;  %v4140_v16 = vld [vmem:[%s6149_s2 + $0x394] sm:$0xf0]  ;;  %v3260_v17 = vld [vmem:[%s6149_s2 + $0x268] sm:$0xf]  ;;  %v3149_v20 = vor.u32 %v4076_v14, %v3148_v13  ;;  %v3070_v13 = vld [vmem:[%s6149_s2 + $0xf8] sm:$0xf0] }
  0x52   : > { %1144 = vmatpush.bf16.msrb.mxu2 %v3209_v25  ;;  %v4104_v18 = vld [vmem:[%s6149_s2 + $0x274] sm:$0xf0]  ;;  %v3004_v21 = vld [vmem:[%s6149_s2 + $0x68] sm:$0xf]  ;;  %v3405_v23 = vor.u32 %v4140_v16, %v3404_v15  ;;  %v4086_v14 = vld [vmem:[%s6149_s2 + $0x1ec] sm:$0xf] }
  0x53   : > { %1106 = vmatpush.bf16.msrb.mxu0 %v2953_v38  ;;  %1163 = vmatpush.bf16.msrb.mxu3 %v3337_v39  ;;  %v4040_v22 = vld [vmem:[%s6149_s2 + $0x74] sm:$0xf0]  ;;  %v3261_v24 = vor.u32 %v4104_v18, %v3260_v17  ;;  %v3132_v25 = vld [vmem:[%s6149_s2 + $0x168] sm:$0xf]  ;;  %v3198_v15 = vld [vmem:[%s6149_s2 + $0x1f8] sm:$0xf0] }
  0x54   : > { %1126 = vmatmul.bf16.vlgmr.msrb.gmra.mxu1 %v4637_v53  ;;  %v4072_v26 = vld [vmem:[%s6149_s2 + $0x174] sm:$0xf0]  ;;  %v3388_v27 = vld [vmem:[%s6149_s2 + $0x368] sm:$0xf]  ;;  %v3005_v31 = vor.u32 %v4040_v22, %v3004_v21  ;;  %v4150_v16 = vld [vmem:[%s6149_s2 + $0x3ec] sm:$0xf] }
  0x55   : > { %1194 = vmatpush.bf16.msra.mxu1 %v3197_v34  ;;  %1145 = vmatmul.bf16.vlgmr.msrb.gmra.mxu2 %v4639_v54  ;;  %v4136_v28 = vld [vmem:[%s6149_s2 + $0x374] sm:$0xf0]  ;;  %v3244_v29 = vld [vmem:[%s6149_s2 + $0x248] sm:$0xf]  ;;  %v3133_v32 = vor.u32 %v4072_v26, %v3132_v25  ;;  %v3454_v17 = vld [vmem:[%s6149_s2 + $0x3f8] sm:$0xf0] }
  0x56   : > { %1213 = vmatpush.bf16.msra.mxu2 %v3325_v30  ;;  %1107 = vmatmul.bf16.vlgmr.msrb.gmra.mxu0 %v4626_v48  ;;  %v4100_v30 = vld [vmem:[%s6149_s2 + $0x254] sm:$0xf0]  ;;  %v2988_v33 = vld [vmem:[%s6149_s2 + $0x48] sm:$0xf]  ;;  %v3389_v35 = vor.u32 %v4136_v28, %v3388_v27  ;;  %v3310_v21 = vld [vmem:[%s6149_s2 + $0x2d8] sm:$0xf0]  ;;  %v3457_v25 = vor.u32 %v4150_v16, %v3454_v17 }
  0x57   : > { %1175 = vmatpush.bf16.msra.mxu0 %v3069_v40  ;;  %1232 = vmatpush.bf16.msra.mxu3 %v3453_v43  ;;  %v4036_v34 = vld [vmem:[%s6149_s2 + $0x54] sm:$0xf0]  ;;  %v3245_v36 = vor.u32 %v4100_v30, %v3244_v29  ;;  %v3116_v37 = vld [vmem:[%s6149_s2 + $0x148] sm:$0xf]  ;;  %v4050_v26 = vld [vmem:[%s6149_s2 + $0xcc] sm:$0xf] }
  0x58   : > { %1164 = vmatmul.bf16.vlgmr.msrb.gmra.mxu3 %v4647_v57  ;;  %v4068_v38 = vld [vmem:[%s6149_s2 + $0x154] sm:$0xf0]  ;;  %v3372_v39 = vld [vmem:[%s6149_s2 + $0x348] sm:$0xf]  ;;  %v2989_v43 = vor.u32 %v4036_v34, %v2988_v33  ;;  %v3054_v27 = vld [vmem:[%s6149_s2 + $0xd8] sm:$0xf0] }
  0x59   : > { %1195 = vmatpush.bf16.msra.mxu1 %v3181_v60  ;;  %v4132_v40 = vld [vmem:[%s6149_s2 + $0x354] sm:$0xf0]  ;;  %v3228_v41 = vld [vmem:[%s6149_s2 + $0x228] sm:$0xf]  ;;  %v4082_v29 = vld [vmem:[%s6149_s2 + $0x1cc] sm:$0xf] }
  0x5a   : > { %1214 = vmatpush.bf16.msra.mxu2 %v3309_v45  ;;  %v4096_v42 = vld [vmem:[%s6149_s2 + $0x234] sm:$0xf0]  ;;  %v3117_v45 = vor.u32 %v4068_v38, %v3116_v37  ;;  %v2972_v46 = vld [vmem:[%s6149_s2 + $0x28] sm:$0xf]  ;;  %v3373_v49 = vor.u32 %v4132_v40, %v3372_v39  ;;  %v3182_v30 = vld [vmem:[%s6149_s2 + $0x1d8] sm:$0xf0] }
  0x5b   : > { %1176 = vmatpush.bf16.msra.mxu0 %v3053_v59  ;;  %1233 = vmatpush.bf16.msra.mxu3 %v3437_v63  ;;  %v4032_v47 = vld [vmem:[%s6149_s2 + $0x34] sm:$0xf0]  ;;  %v3229_v52 = vor.u32 %v4096_v42, %v3228_v41  ;;  %v3100_v55 = vld [vmem:[%s6149_s2 + $0x128] sm:$0xf]  ;;  %v4118_v63 = vld [vmem:[%s6149_s2 + $0x2ec] sm:$0xf]  ;;  %v3185_v38 = vor.u32 %v4082_v29, %v3182_v30 }
  0x5c   : > { %v4064_v58 = vld [vmem:[%s6149_s2 + $0x134] sm:$0xf0]  ;;  %v3356_v59 = vld [vmem:[%s6149_s2 + $0x328] sm:$0xf]  ;;  %v2973_v1 = vor.u32 %v4032_v47, %v2972_v46  ;;  %v3438_v33 = vld [vmem:[%s6149_s2 + $0x3d8] sm:$0xf0] }
  0x5d   : > { %1196 = vmatpush.bf16.msra.mxu1 %v3165_v8  ;;  %v4128_v60 = vld [vmem:[%s6149_s2 + $0x334] sm:$0xf0]  ;;  %v3212_v61 = vld [vmem:[%s6149_s2 + $0x208] sm:$0xf]  ;;  %v3101_v2 = vor.u32 %v4064_v58, %v3100_v55  ;;  %v4110_v34 = vld [vmem:[%s6149_s2 + $0x2ac] sm:$0xf] }
  0x5e   : > { %1215 = vmatpush.bf16.msra.mxu2 %v3293_v0  ;;  %v4092_v62 = vld [vmem:[%s6149_s2 + $0x214] sm:$0xf0]  ;;  %v3326_v0 = vld [vmem:[%s6149_s2 + $0x2f8] sm:$0xf0]  ;;  %v2956_v3 = vld [vmem:[%s6149_s2 + $0x8] sm:$0xf]  ;;  %v3357_v6 = vor.u32 %v4128_v60, %v3356_v59 }
  0x5f   : > { %1177 = vmatpush.bf16.msra.mxu0 %v3037_v7  ;;  %1234 = vmatpush.bf16.msra.mxu3 %v3421_v11  ;;  %v4028_v4 = vld [vmem:[%s6149_s2 + $0x14] sm:$0xf0]  ;;  %v3084_v5 = vld [vmem:[%s6149_s2 + $0x108] sm:$0xf]  ;;  %v3213_v7 = vor.u32 %v4092_v62, %v3212_v61  ;;  %v3329_v11 = vor.u32 %v4118_v63, %v3326_v0  ;;  %v3038_v37 = vld [vmem:[%s6149_s2 + $0xb8] sm:$0xf0] }
  0x60   : > { %v4060_v8 = vld [vmem:[%s6149_s2 + $0x114] sm:$0xf0]  ;;  %v3340_v9 = vld [vmem:[%s6149_s2 + $0x308] sm:$0xf]  ;;  %v2957_v18 = vor.u32 %v4028_v4, %v2956_v3  ;;  %v4078_v40 = vld [vmem:[%s6149_s2 + $0x1ac] sm:$0xf] }
  0x61   : > { %1197 = vmatpush.bf16.msra.mxu1 %v3149_v20  ;;  %v4124_v10 = vld [vmem:[%s6149_s2 + $0x314] sm:$0xf0]  ;;  %v4114_v20 = vld [vmem:[%s6149_s2 + $0x2cc] sm:$0xf]  ;;  %v3166_v41 = vld [vmem:[%s6149_s2 + $0x1b8] sm:$0xf0] }
  0x62   : > { %1216 = vmatpush.bf16.msra.mxu2 %v3277_v12  ;;  %v4054_v12 = vld [vmem:[%s6149_s2 + $0xec] sm:$0xf]  ;;  %v3341_v22 = vor.u32 %v4124_v10, %v3340_v9  ;;  %v3313_v28 = vor.u32 %v4114_v20, %v3310_v21  ;;  %v3422_v46 = vld [vmem:[%s6149_s2 + $0x3b8] sm:$0xf0]  ;;  %v3169_v58 = vor.u32 %v4078_v40, %v3166_v41 }
  0x63   : > { %1178 = vmatpush.bf16.msra.mxu0 %v3021_v19  ;;  %1235 = vmatpush.bf16.msra.mxu3 %v3405_v23  ;;  %v3085_v19 = vor.u32 %v4060_v8, %v3084_v5  ;;  %v3073_v23 = vor.u32 %v4054_v12, %v3070_v13  ;;  %v4106_v47 = vld [vmem:[%s6149_s2 + $0x28c] sm:$0xf]  ;;  %v3022_v55 = vld [vmem:[%s6149_s2 + $0x98] sm:$0xf0] }
  0x64   : > { %1131 = vmatmul.bf16.gmra.mxu1 %v4753_v50  ;;  %v4074_v60 = vld [vmem:[%s6149_s2 + $0x18c] sm:$0xf]  ;;  %v3150_v61 = vld [vmem:[%s6149_s2 + $0x198] sm:$0xf0] }
  0x65   : > { %1198 = vmatpush.bf16.msra.mxu1 %v3133_v32  ;;  %1150 = vmatmul.bf16.gmra.mxu2 %v4755_v51  ;;  %v4146_v32 = vld [vmem:[%s6149_s2 + $0x3cc] sm:$0xf]  ;;  %v3262_v3 = vld [vmem:[%s6149_s2 + $0x278] sm:$0xf0] }
  0x66   : > { %1217 = vmatpush.bf16.msra.mxu2 %v3261_v24  ;;  %1112 = vmatmul.bf16.gmra.mxu0 %v4742_v44  ;;  %v3201_v24 = vor.u32 %v4086_v14, %v3198_v15  ;;  %v3441_v39 = vor.u32 %v4146_v32, %v3438_v33  ;;  %v4138_v0 = vld [vmem:[%s6149_s2 + $0x38c] sm:$0xf]  ;;  %v3006_v5 = vld [vmem:[%s6149_s2 + $0x78] sm:$0xf0] }
  0x67   : > { %1179 = vmatpush.bf16.msra.mxu0 %v3005_v31  ;;  %1236 = vmatpush.bf16.msra.mxu3 %v3389_v35  ;;  %v3057_v31 = vor.u32 %v4050_v26, %v3054_v27  ;;  %v3294_v35 = vld [vmem:[%s6149_s2 + $0x2b8] sm:$0xf0]  ;;  %v4038_v4 = vld [vmem:[%s6149_s2 + $0x6c] sm:$0xf] }
  0x68   : > { %1169 = vmatmul.bf16.gmra.mxu3 %v4763_v56  ;;  %v3297_v42 = vor.u32 %v4110_v34, %v3294_v35  ;;  %v4070_v8 = vld [vmem:[%s6149_s2 + $0x16c] sm:$0xf]  ;;  %v3134_v9 = vld [vmem:[%s6149_s2 + $0x178] sm:$0xf0] }
  0x69   : > { %1199 = vmatpush.bf16.msra.mxu1 %v3117_v45  ;;  %v4142_v45 = vld [vmem:[%s6149_s2 + $0x3ac] sm:$0xf]  ;;  %v3390_v13 = vld [vmem:[%s6149_s2 + $0x378] sm:$0xf0] }
  0x6a   : > { %1218 = vmatpush.bf16.msra.mxu2 %v3245_v36  ;;  %v4046_v36 = vld [vmem:[%s6149_s2 + $0xac] sm:$0xf]  ;;  %v3425_v59 = vor.u32 %v4142_v45, %v3422_v46  ;;  %v3246_v15 = vld [vmem:[%s6149_s2 + $0x258] sm:$0xf0] }
  0x6b   : > { %1180 = vmatpush.bf16.msra.mxu0 %v2989_v43  ;;  %1237 = vmatpush.bf16.msra.mxu3 %v3373_v49  ;;  %v3041_v43 = vor.u32 %v4046_v36, %v3038_v37  ;;  %v3278_v49 = vld [vmem:[%s6149_s2 + $0x298] sm:$0xf0]  ;;  %v4134_v12 = vld [vmem:[%s6149_s2 + $0x36c] sm:$0xf] }
  0x6c   : > { %v3281_v62 = vor.u32 %v4106_v47, %v3278_v49  ;;  %v4098_v14 = vld [vmem:[%s6149_s2 + $0x24c] sm:$0xf]  ;;  %v2990_v17 = vld [vmem:[%s6149_s2 + $0x58] sm:$0xf0] }
  0x6d   : > { %1200 = vmatpush.bf16.msra.mxu1 %v3101_v2  ;;  %v4102_v2 = vld [vmem:[%s6149_s2 + $0x26c] sm:$0xf]  ;;  %v3118_v21 = vld [vmem:[%s6149_s2 + $0x158] sm:$0xf0] }
  0x6e   : > { %1219 = vmatpush.bf16.msra.mxu2 %v3229_v52  ;;  %v4042_v52 = vld [vmem:[%s6149_s2 + $0x8c] sm:$0xf]  ;;  %v3265_v10 = vor.u32 %v4102_v2, %v3262_v3  ;;  %v3230_v27 = vld [vmem:[%s6149_s2 + $0x238] sm:$0xf0] }
  0x6f   : > { %1181 = vmatpush.bf16.msra.mxu0 %v2973_v1  ;;  %1238 = vmatpush.bf16.msra.mxu3 %v3357_v6  ;;  %v3025_v63 = vor.u32 %v4042_v52, %v3022_v55  ;;  %v3406_v1 = vld [vmem:[%s6149_s2 + $0x398] sm:$0xf0]  ;;  %v3153_v6 = vor.u32 %v4074_v60, %v3150_v61  ;;  %v4034_v16 = vld [vmem:[%s6149_s2 + $0x4c] sm:$0xf] }
  0x70   : > { %v4066_v20 = vld [vmem:[%s6149_s2 + $0x14c] sm:$0xf]  ;;  %v2974_v29 = vld [vmem:[%s6149_s2 + $0x38] sm:$0xf0] }
  0x71   : > { %1201 = vmatpush.bf16.msra.mxu1 %v3085_v19  ;;  %v3393_v19 = vor.u32 %v4134_v12, %v3390_v13  ;;  %v4094_v26 = vld [vmem:[%s6149_s2 + $0x22c] sm:$0xf]  ;;  %v3121_v30 = vor.u32 %v4066_v20, %v3118_v21  ;;  %v3102_v33 = vld [vmem:[%s6149_s2 + $0x138] sm:$0xf0] }
  0x72   : > { %1220 = vmatpush.bf16.msra.mxu2 %v3213_v7  ;;  %v3409_v7 = vor.u32 %v4138_v0, %v3406_v1  ;;  %v4062_v32 = vld [vmem:[%s6149_s2 + $0x12c] sm:$0xf]  ;;  %v3233_v34 = vor.u32 %v4094_v26, %v3230_v27  ;;  %v3358_v37 = vld [vmem:[%s6149_s2 + $0x338] sm:$0xf0] }
  0x73   : > { %1182 = vmatpush.bf16.msra.mxu0 %v2957_v18  ;;  %1239 = vmatpush.bf16.msra.mxu3 %v3341_v22  ;;  %v3137_v18 = vor.u32 %v4070_v8, %v3134_v9  ;;  %v3249_v22 = vor.u32 %v4098_v14, %v3246_v15  ;;  %v4126_v36 = vld [vmem:[%s6149_s2 + $0x32c] sm:$0xf]  ;;  %v2958_v41 = vld [vmem:[%s6149_s2 + $0x18] sm:$0xf0] }
  0x74   : > { %1202 = vmatmul.bf16.vlgmr.msra.gmra.mxu1 %v4637_v53  ;;  %v4026_v40 = vld [vmem:[%s6149_s2 + $0xc] sm:$0xf]  ;;  %v3086_v49 = vld [vmem:[%s6149_s2 + $0x118] sm:$0xf0] }
  0x75   : > { %1270 = vmatpush.bf16.msrb.mxu1 %v3201_v24  ;;  %1221 = vmatmul.bf16.vlgmr.msra.gmra.mxu2 %v4639_v54  ;;  %v4130_v24 = vld [vmem:[%s6149_s2 + $0x34c] sm:$0xf]  ;;  %v2961_v47 = vor.u32 %v4026_v40, %v2958_v41  ;;  %v3342_v55 = vld [vmem:[%s6149_s2 + $0x318] sm:$0xf0] }
  0x76   : > { %1289 = vmatpush.bf16.msrb.mxu2 %v3329_v11  ;;  %1183 = vmatmul.bf16.vlgmr.msra.gmra.mxu0 %v4626_v48  ;;  %v3009_v11 = vor.u32 %v4038_v4, %v3006_v5  ;;  %v4058_v45 = vld [vmem:[%s6149_s2 + $0x10c] sm:$0xf] }
  0x77   : > { %1251 = vmatpush.bf16.msrb.mxu0 %v3073_v23  ;;  %1308 = vmatpush.bf16.msrb.mxu3 %v3457_v25  ;;  %v2993_v23 = vor.u32 %v4034_v16, %v2990_v17  ;;  %v3374_v25 = vld [vmem:[%s6149_s2 + $0x358] sm:$0xf0]  ;;  %v4122_v52 = vld [vmem:[%s6149_s2 + $0x30c] sm:$0xf] }
  0x78   : > { %1240 = vmatmul.bf16.vlgmr.msra.gmra.mxu3 %v4647_v57 }
  0x79   : > { %1271 = vmatpush.bf16.msrb.mxu1 %v3185_v38  ;;  %v4090_v38 = vld [vmem:[%s6149_s2 + $0x20c] sm:$0xf] }
  0x7a   : > { %1290 = vmatpush.bf16.msrb.mxu2 %v3313_v28  ;;  %v4030_v28 = vld [vmem:[%s6149_s2 + $0x2c] sm:$0xf] }
  0x7b   : > { %1252 = vmatpush.bf16.msrb.mxu0 %v3057_v31  ;;  %1309 = vmatpush.bf16.msrb.mxu3 %v3441_v39  ;;  %v3377_v31 = vor.u32 %v4130_v24, %v3374_v25  ;;  %v2977_v35 = vor.u32 %v4030_v28, %v2974_v29  ;;  %v3214_v39 = vld [vmem:[%s6149_s2 + $0x218] sm:$0xf0] }
  0x7c   : > { %v3217_v46 = vor.u32 %v4090_v38, %v3214_v39 }
  0x7d   : > { %1272 = vmatpush.bf16.msrb.mxu1 %v3169_v58  ;;  %v3089_v58 = vor.u32 %v4058_v45, %v3086_v49 }
  0x7e   : > { %1291 = vmatpush.bf16.msrb.mxu2 %v3297_v42  ;;  %v3105_v42 = vor.u32 %v4062_v32, %v3102_v33 }
  0x7f   : > { %1253 = vmatpush.bf16.msrb.mxu0 %v3041_v43  ;;  %1310 = vmatpush.bf16.msrb.mxu3 %v3425_v59  ;;  %v3361_v43 = vor.u32 %v4126_v36, %v3358_v37  ;;  %v3345_v59 = vor.u32 %v4122_v52, %v3342_v55 }
  0x81   : > { %1273 = vmatpush.bf16.msrb.mxu1 %v3153_v6 }
  0x82   : > { %1292 = vmatpush.bf16.msrb.mxu2 %v3281_v62 }
  0x83   : > { %1254 = vmatpush.bf16.msrb.mxu0 %v3025_v63  ;;  %1311 = vmatpush.bf16.msrb.mxu3 %v3409_v7 }
  0x84   : > { %1207 = vmatmul.bf16.gmra.mxu1 %v4753_v50 }
  0x85   : > { %1274 = vmatpush.bf16.msrb.mxu1 %v3137_v18  ;;  %1226 = vmatmul.bf16.gmra.mxu2 %v4755_v51 }
  0x86   : > { %1293 = vmatpush.bf16.msrb.mxu2 %v3265_v10  ;;  %1188 = vmatmul.bf16.gmra.mxu0 %v4742_v44 }
  0x87   : > { %1255 = vmatpush.bf16.msrb.mxu0 %v3009_v11  ;;  %1312 = vmatpush.bf16.msrb.mxu3 %v3393_v19 }
  0x88   : > { %1245 = vmatmul.bf16.gmra.mxu3 %v4763_v56 }
  0x89   : > { %1275 = vmatpush.bf16.msrb.mxu1 %v3121_v30 }
  0x8a   : > { %1294 = vmatpush.bf16.msrb.mxu2 %v3249_v22 }
  0x8b   : > { %1256 = vmatpush.bf16.msrb.mxu0 %v2993_v23  ;;  %1313 = vmatpush.bf16.msrb.mxu3 %v3377_v31 }
  0x8d   : > { %1276 = vmatpush.bf16.msrb.mxu1 %v3105_v42 }
  0x8e   : > { %1295 = vmatpush.bf16.msrb.mxu2 %v3233_v34 }
  0x8f   : > { %1257 = vmatpush.bf16.msrb.mxu0 %v2977_v35  ;;  %1314 = vmatpush.bf16.msrb.mxu3 %v3361_v43 }
  0x91   : > { %1277 = vmatpush.bf16.msrb.mxu1 %v3089_v58 }
  0x92   : > { %1296 = vmatpush.bf16.msrb.mxu2 %v3217_v46 }
  0x93   : > { %1258 = vmatpush.bf16.msrb.mxu0 %v2961_v47  ;;  %1315 = vmatpush.bf16.msrb.mxu3 %v3345_v59 }
  0x94   : > { %1278 = vmatmul.bf16.vlgmr.msrb.gmra.mxu1 %v4637_v53 }
  0x95   : > { %1297 = vmatmul.bf16.vlgmr.msrb.gmra.mxu2 %v4639_v54 }
  0x96   : > { %1259 = vmatmul.bf16.vlgmr.msrb.gmra.mxu0 %v4626_v48 }
  0x98   : > { %1316 = vmatmul.bf16.vlgmr.msrb.gmra.mxu3 %v4647_v57 }
  0xa4   : > { %1283 = vmatmul.bf16.gmra.mxu1 %v4753_v50 }
  0xa5   : > { %1302 = vmatmul.bf16.gmra.mxu2 %v4755_v51 }
  0xa6   : > { %1264 = vmatmul.bf16.gmra.mxu0 %v4742_v44 }
  0xa8   : > { %1321 = vmatmul.bf16.gmra.mxu3 %v4763_v56 }
  0xb1   : > { %v1032_v60 = vpop.f32.mrf.mxu0  ;;  %v1051_v61 = vpop.f32.mrf.mxu1 }
  0xb2   : > { %v1052_v62 = vadd.f32 %v1051_v61, %v1032_v60 }
  0xb8   : > { %v1070_v63 = vpop.f32.mrf.mxu2 }
  0xb9   : > { %v1071_v0 = vadd.f32 %v1070_v63, %v1052_v62  ;;  %v1089_v1 = vpop.f32.mrf.mxu3  ;;  %v1034_v2 = vpop.f32.mrf.mxu0 }
  0xba   : > { %v1053_v3 = vpop.f32.mrf.mxu1 }
  0xbb   : > { %v1090_v4 = vadd.f32 %v1089_v1, %v1071_v0  ;;  %v1054_v5 = vadd.f32 %v1053_v3, %v1034_v2 }
  0xbd   : > { %1327 = vst [vmem:[#allocation2] sm:$0xff] %v1090_v4 }
  0xc0   : > { %v1072_v6 = vpop.f32.mrf.mxu2 }
  0xc1   : > { %v1073_v7 = vadd.f32 %v1072_v6, %v1054_v5  ;;  %v1091_v8 = vpop.f32.mrf.mxu3  ;;  %v1037_v9 = vpop.f32.mrf.mxu0 }
  0xc2   : > { %v1056_v10 = vpop.f32.mrf.mxu1 }
  0xc3   : > { %v1092_v11 = vadd.f32 %v1091_v8, %v1073_v7  ;;  %v1057_v12 = vadd.f32 %v1056_v10, %v1037_v9 }
  0xc5   : > { %1331 = vst [vmem:[#allocation2 + $0x20] sm:$0xff] %v1092_v11 }
  0xc8   : > { %v1075_v13 = vpop.f32.mrf.mxu2 }
  0xc9   : > { %v1076_v14 = vadd.f32 %v1075_v13, %v1057_v12  ;;  %v1094_v15 = vpop.f32.mrf.mxu3  ;;  %v1039_v16 = vpop.f32.mrf.mxu0 }
  0xca   : > { %v1058_v17 = vpop.f32.mrf.mxu1 }
  0xcb   : > { %v1095_v18 = vadd.f32 %v1094_v15, %v1076_v14  ;;  %v1059_v19 = vadd.f32 %v1058_v17, %v1039_v16 }
  0xcd   : > { %1335 = vst [vmem:[#allocation2 + $0x40] sm:$0xff] %v1095_v18 }
  0xd0   : > { %v1077_v20 = vpop.f32.mrf.mxu2 }
  0xd1   : > { %v1078_v21 = vadd.f32 %v1077_v20, %v1059_v19  ;;  %v1096_v22 = vpop.f32.mrf.mxu3 }
  0xd2   : > { %v1127_v24 = vpop.f32.mrf.mxu1 }
  0xd3   : > { %v1108_v23 = vpop.f32.mrf.mxu0  ;;  %v1097_v25 = vadd.f32 %v1096_v22, %v1078_v21 }
  0xd4   : > { %v1128_v26 = vadd.f32 %v1127_v24, %v1108_v23 }
  0xd5   : > { %1339 = vst [vmem:[#allocation2 + $0x60] sm:$0xff] %v1097_v25 }
  0xd8   : > { %v1146_v27 = vpop.f32.mrf.mxu2 }
  0xd9   : > { %v1147_v29 = vadd.f32 %v1146_v27, %v1128_v26 }
  0xda   : > { %v1129_v31 = vpop.f32.mrf.mxu1 }
  0xdb   : > { %v1165_v28 = vpop.f32.mrf.mxu3  ;;  %v1110_v30 = vpop.f32.mrf.mxu0 }
  0xdc   : > { %v1166_v32 = vadd.f32 %v1165_v28, %v1147_v29  ;;  %v1130_v33 = vadd.f32 %v1129_v31, %v1110_v30 }
  0xde   : > { %1328 = vst [vmem:[#allocation2 + $0x8] sm:$0xff] %v1166_v32 }
  0xe0   : > { %v1148_v34 = vpop.f32.mrf.mxu2 }
  0xe1   : > { %v1149_v36 = vadd.f32 %v1148_v34, %v1130_v33 }
  0xe2   : > { %v1132_v38 = vpop.f32.mrf.mxu1 }
  0xe3   : > { %v1167_v35 = vpop.f32.mrf.mxu3  ;;  %v1113_v37 = vpop.f32.mrf.mxu0 }
  0xe4   : > { %v1168_v39 = vadd.f32 %v1167_v35, %v1149_v36  ;;  %v1133_v40 = vadd.f32 %v1132_v38, %v1113_v37 }
  0xe6   : > { %1332 = vst [vmem:[#allocation2 + $0x28] sm:$0xff] %v1168_v39 }
  0xe8   : > { %v1151_v41 = vpop.f32.mrf.mxu2 }
  0xe9   : > { %v1152_v43 = vadd.f32 %v1151_v41, %v1133_v40 }
  0xea   : > { %v1134_v46 = vpop.f32.mrf.mxu1 }
  0xeb   : > { %v1170_v42 = vpop.f32.mrf.mxu3  ;;  %v1115_v45 = vpop.f32.mrf.mxu0 }
  0xec   : > { %v1171_v47 = vadd.f32 %v1170_v42, %v1152_v43  ;;  %v1135_v49 = vadd.f32 %v1134_v46, %v1115_v45 }
  0xee   : > { %1336 = vst [vmem:[#allocation2 + $0x48] sm:$0xff] %v1171_v47 }
  0xf0   : > { %v1153_v52 = vpop.f32.mrf.mxu2 }
  0xf1   : > { %v1154_v58 = vadd.f32 %v1153_v52, %v1135_v49 }
  0xf2   : > { %v1203_v60 = vpop.f32.mrf.mxu1 }
  0xf3   : > { %v1172_v55 = vpop.f32.mrf.mxu3  ;;  %v1184_v59 = vpop.f32.mrf.mxu0 }
  0xf4   : > { %v1173_v61 = vadd.f32 %v1172_v55, %v1154_v58  ;;  %v1204_v62 = vadd.f32 %v1203_v60, %v1184_v59 }
  0xf6   : > { %1340 = vst [vmem:[#allocation2 + $0x68] sm:$0xff] %v1173_v61 }
  0xf8   : > { %v1222_v63 = vpop.f32.mrf.mxu2 }
  0xf9   : > { %v1223_v1 = vadd.f32 %v1222_v63, %v1204_v62 }
  0xfa   : > { %v1205_v3 = vpop.f32.mrf.mxu1 }
  0xfb   : > { %v1241_v0 = vpop.f32.mrf.mxu3  ;;  %v1186_v2 = vpop.f32.mrf.mxu0 }
  0xfc   : > { %v1242_v4 = vadd.f32 %v1241_v0, %v1223_v1  ;;  %v1206_v5 = vadd.f32 %v1205_v3, %v1186_v2 }
  0xfe   : > { %1329 = vst [vmem:[#allocation2 + $0x10] sm:$0xff] %v1242_v4 }
 0x100   : > { %v1224_v6 = vpop.f32.mrf.mxu2 }
 0x101   : > { %v1225_v8 = vadd.f32 %v1224_v6, %v1206_v5 }
 0x102   : > { %v1208_v10 = vpop.f32.mrf.mxu1 }
 0x103   : > { %v1243_v7 = vpop.f32.mrf.mxu3  ;;  %v1189_v9 = vpop.f32.mrf.mxu0 }
 0x104   : > { %v1244_v11 = vadd.f32 %v1243_v7, %v1225_v8  ;;  %v1209_v12 = vadd.f32 %v1208_v10, %v1189_v9 }
 0x106   : > { %1333 = vst [vmem:[#allocation2 + $0x30] sm:$0xff] %v1244_v11 }
 0x108   : > { %v1227_v13 = vpop.f32.mrf.mxu2 }
 0x109   : > { %v1228_v15 = vadd.f32 %v1227_v13, %v1209_v12 }
 0x10a   : > { %v1210_v17 = vpop.f32.mrf.mxu1 }
 0x10b   : > { %v1246_v14 = vpop.f32.mrf.mxu3  ;;  %v1191_v16 = vpop.f32.mrf.mxu0 }
 0x10c   : > { %v1247_v18 = vadd.f32 %v1246_v14, %v1228_v15  ;;  %v1211_v19 = vadd.f32 %v1210_v17, %v1191_v16 }
 0x10e   : > { %1337 = vst [vmem:[#allocation2 + $0x50] sm:$0xff] %v1247_v18 }
 0x110   : > { %v1229_v20 = vpop.f32.mrf.mxu2 }
 0x111   : > { %v1230_v22 = vadd.f32 %v1229_v20, %v1211_v19 }
 0x112   : > { %v1279_v24 = vpop.f32.mrf.mxu1 }
 0x113   : > { %v1248_v21 = vpop.f32.mrf.mxu3  ;;  %v1260_v23 = vpop.f32.mrf.mxu0 }
 0x114   : > { %v1249_v25 = vadd.f32 %v1248_v21, %v1230_v22  ;;  %v1280_v26 = vadd.f32 %v1279_v24, %v1260_v23 }
 0x116   : > { %1341 = vst [vmem:[#allocation2 + $0x70] sm:$0xff] %v1249_v25 }
 0x118   : > { %v1298_v27 = vpop.f32.mrf.mxu2 }
 0x119   : > { %v1299_v29 = vadd.f32 %v1298_v27, %v1280_v26 }
 0x11a   : > { %v1281_v31 = vpop.f32.mrf.mxu1 }
 0x11b   : > { %v1317_v28 = vpop.f32.mrf.mxu3  ;;  %v1262_v30 = vpop.f32.mrf.mxu0 }
 0x11c   : > { %v1318_v32 = vadd.f32 %v1317_v28, %v1299_v29  ;;  %v1282_v33 = vadd.f32 %v1281_v31, %v1262_v30 }
 0x11e   : > { %1330 = vst [vmem:[#allocation2 + $0x18] sm:$0xff] %v1318_v32 }
 0x120   : > { %v1300_v34 = vpop.f32.mrf.mxu2 }
 0x121   : > { %v1301_v36 = vadd.f32 %v1300_v34, %v1282_v33 }
 0x122   : > { %v1284_v38 = vpop.f32.mrf.mxu1 }
 0x123   : > { %v1319_v35 = vpop.f32.mrf.mxu3  ;;  %v1265_v37 = vpop.f32.mrf.mxu0 }
 0x124   : > { %v1320_v39 = vadd.f32 %v1319_v35, %v1301_v36  ;;  %v1285_v40 = vadd.f32 %v1284_v38, %v1265_v37 }
 0x126   : > { %1334 = vst [vmem:[#allocation2 + $0x38] sm:$0xff] %v1320_v39 }
 0x128   : > { %v1303_v41 = vpop.f32.mrf.mxu2 }
 0x129   : > { %v1304_v43 = vadd.f32 %v1303_v41, %v1285_v40 }
 0x12a   : > { %v1286_v47 = vpop.f32.mrf.mxu1 }
 0x12b   : > { %v1322_v42 = vpop.f32.mrf.mxu3  ;;  %v1267_v46 = vpop.f32.mrf.mxu0 }
 0x12c   : > { %v1323_v45 = vadd.f32 %v1322_v42, %v1304_v43  ;;  %v1287_v49 = vadd.f32 %v1286_v47, %v1267_v46 }
 0x12e   : > { %1338 = vst [vmem:[#allocation2 + $0x58] sm:$0xff] %v1323_v45 }
 0x130   : > { %v1305_v52 = vpop.f32.mrf.mxu2 }
 0x131   : > { %v1306_v55 = vadd.f32 %v1305_v52, %v1287_v49 }
 0x133   : > { %v1324_v58 = vpop.f32.mrf.mxu3 }
 0x134   : > { %v1325_v59 = vadd.f32 %v1324_v58, %v1306_v55 }
 0x136   : > { %1342 = vst [vmem:[#allocation2 + $0x78] sm:$0xff] %v1325_v59 }
 0x137 LB: >> { %s3458_s9 = sshll.u32 %s4389_s23, 5  ;;  %v1590_v31 = vlaneseq  ;;  %s4347_s8 = sphi %s5237_s8, %s1348_s8  }
 0x138   : >> { %s1350_s10 = sadd.s32 %s4347_s8, %s3458_s9 }
 0x139   : >> { %s5244_s11 = smul.u32 20, %s1350_s10  ;;  %vm1592_vm0 = vcmp.lt.s32.totalorder %v1590_v31, 512 }
 0x13b   : >> { %s1352_s13 = sld [smem:[#allocation5 + %s5244_s11]]  ;;  %s1362_s14 = sadd.s32 1, %s5244_s11 }
 0x13c   : >> { %s1363_s16 = sld [smem:[#allocation5 + %s1362_s14]]  ;;  %s1374_s17 = sadd.s32 2, %s5244_s11 }
 0x13d   : >> { %s1375_s18 = sld [smem:[#allocation5 + %s1374_s17]]  ;;  %s1386_s19 = sadd.s32 3, %s5244_s11 }
 0x13e   : >> { %s5250_s20 = sld [smem:[#allocation5 + %s1386_s19]]  ;;  %s1398_s21 = sadd.s32 4, %s5244_s11 }
 0x13f   : >> { %s5253_s0 = sld [smem:[#allocation5 + %s1398_s21]]  ;;  %s1410_s24 = sadd.s32 5, %s5244_s11 }
 0x140   : >> { %s5256_s25 = sld [smem:[#allocation5 + %s1410_s24]] }
 0x141   : >> { %s1353_s12 = sshra.s32 %s1352_s13, 3  ;;  %s1356_s27 = sand.u32 7, %s1352_s13 }
 0x142   : >> { %s4153_s28 = sshll.u32 %s1353_s12, 5  ;;  %s1364_s29 = sshra.s32 %s1363_s16, 3 }
 0x143   : >> { %s1359_s30 = sadd.s32 %s4153_s28, %s1356_s27  ;;  %s1367_s6 = sand.u32 7, %s1363_s16 }
 0x144   : >> { %s4154_s7 = sshll.u32 %s1364_s29, 5  ;;  %s1360_s9 = scalar_lea.vmem [#allocation2], %s1359_s30 }
 0x145   : >> { %v1361_v60 = vld [vmem:[%s1360_s9] ss:$8 sm:$0xf]  ;;  %s1370_s10 = sadd.s32 %s4154_s7, %s1367_s6  ;;  %s1376_s14 = sshra.s32 %s1375_s18, 3 }
 0x146   : >> { %s1379_s17 = sand.u32 7, %s1375_s18  ;;  %s1371_s19 = scalar_lea.vmem [#allocation2], %s1370_s10 }
 0x147   : >> { %v1372_v61 = vld [vmem:[%s1371_s19] ss:$8 sm:$0xf]  ;;  %s4155_s21 = sshll.u32 %s1376_s14, 5  ;;  %s1388_s24 = sshra.s32 %s5250_s20, 3 }
 0x148   : >> { %v1373_v62 = vmax.f32 %v1361_v60, %v1372_v61  ;;  %s1382_s13 = sadd.s32 %s4155_s21, %s1379_s17  ;;  %s1391_s12 = sand.u32 7, %s5250_s20 }
 0x149   : >> { %s4156_s26 = sshll.u32 %s1388_s24, 5  ;;  %s1383_s27 = scalar_lea.vmem [#allocation2], %s1382_s13 }
 0x14a   : >> { %v1384_v63 = vld [vmem:[%s1383_s27] ss:$8 sm:$0xf]  ;;  %s1394_s16 = sadd.s32 %s4156_s26, %s1391_s12  ;;  %s1400_s28 = sshra.s32 %s5253_s0, 3 }
 0x14b   : >> { %v1385_v0 = vmax.f32 %v1373_v62, %v1384_v63  ;;  %s1403_s29 = sand.u32 7, %s5253_s0  ;;  %s1395_s18 = scalar_lea.vmem [#allocation2], %s1394_s16 }
 0x14c   : >> { %v1396_v1 = vld [vmem:[%s1395_s18] ss:$8 sm:$0xf]  ;;  %s4157_s30 = sshll.u32 %s1400_s28, 5  ;;  %s1412_s6 = sshra.s32 %s5256_s25, 3 }
 0x14d   : >> { %s1406_s7 = sadd.s32 %s4157_s30, %s1403_s29  ;;  %s1415_s9 = sand.u32 7, %s5256_s25  ;;  %v1397_v2 = vmax.f32 %v1385_v0, %v1396_v1 }
 0x14e   : >> { %s4158_s20 = sshll.u32 %s1412_s6, 5  ;;  %s1407_s10 = scalar_lea.vmem [#allocation2], %s1406_s7 }
 0x14f   : >> { %v1408_v3 = vld [vmem:[%s1407_s10] ss:$8 sm:$0xf]  ;;  %s1418_s14 = sadd.s32 %s4158_s20, %s1415_s9  ;;  %s6153_s26 = sadd.s32 6, %s5244_s11 }
 0x150   : >> { %s1423_s17 = sld [smem:[#allocation5 + %s6153_s26]]  ;;  %s1434_s19 = sadd.s32 7, %s5244_s11  ;;  %v1409_v4 = vmax.f32 %v1397_v2, %v1408_v3 }
 0x151   : >> { %s1435_s21 = sld [smem:[#allocation5 + %s1434_s19]]  ;;  %s1446_s24 = sadd.s32 8, %s5244_s11 }
 0x152   : >> { %s1447_s0 = sld [smem:[#allocation5 + %s1446_s24]]  ;;  %s1458_s13 = sadd.s32 9, %s5244_s11 }
 0x153   : >> { %s1419_s12 = scalar_lea.vmem [#allocation2], %s1418_s14  ;;  %s5270_s27 = sld [smem:[#allocation5 + %s1458_s13]] }
 0x154   : >> { %v1420_v5 = vld [vmem:[%s1419_s12] ss:$8 sm:$0xf]  ;;  %s1470_s25 = sadd.s32 10, %s5244_s11  ;;  %s1482_s28 = sadd.s32 11, %s5244_s11 }
 0x155   : >> { %s5273_s16 = sld [smem:[#allocation5 + %s1470_s25]]  ;;  %v1421_v6 = vmax.f32 %v1409_v4, %v1420_v5 }
 0x156   : >> { %s1424_s29 = sshra.s32 %s1423_s17, 3  ;;  %s1427_s18 = sand.u32 7, %s1423_s17 }
 0x157   : >> { %s4159_s30 = sshll.u32 %s1424_s29, 5  ;;  %s5276_s6 = sld [smem:[#allocation5 + %s1482_s28]] }
 0x158   : >> { %s1430_s7 = sadd.s32 %s4159_s30, %s1427_s18  ;;  %s1436_s9 = sshra.s32 %s1435_s21, 3 }
 0x159   : >> { %s1439_s20 = sand.u32 7, %s1435_s21  ;;  %s1431_s10 = scalar_lea.vmem [#allocation2], %s1430_s7 }
 0x15a   : >> { %v1432_v7 = vld [vmem:[%s1431_s10] ss:$8 sm:$0xf]  ;;  %s4160_s14 = sshll.u32 %s1436_s9, 5  ;;  %s1448_s26 = sshra.s32 %s1447_s0, 3 }
 0x15b   : >> { %v1433_v8 = vmax.f32 %v1421_v6, %v1432_v7  ;;  %s1442_s19 = sadd.s32 %s4160_s14, %s1439_s20  ;;  %s1451_s24 = sand.u32 7, %s1447_s0 }
 0x15c   : >> { %s4161_s13 = sshll.u32 %s1448_s26, 5  ;;  %s1443_s17 = scalar_lea.vmem [#allocation2], %s1442_s19 }
 0x15d   : >> { %v1444_v9 = vld [vmem:[%s1443_s17] ss:$8 sm:$0xf]  ;;  %s1454_s12 = sadd.s32 %s4161_s13, %s1451_s24  ;;  %s1460_s25 = sshra.s32 %s5270_s27, 3 }
 0x15e   : >> { %v1445_v10 = vmax.f32 %v1433_v8, %v1444_v9  ;;  %s1463_s28 = sand.u32 7, %s5270_s27  ;;  %s1455_s21 = scalar_lea.vmem [#allocation2], %s1454_s12 }
 0x15f   : >> { %v1456_v11 = vld [vmem:[%s1455_s21] ss:$8 sm:$0xf]  ;;  %s4162_s29 = sshll.u32 %s1460_s25, 5  ;;  %s1472_s18 = sshra.s32 %s5273_s16, 3 }
 0x160   : >> { %v1457_v12 = vmax.f32 %v1445_v10, %v1456_v11  ;;  %s1466_s30 = sadd.s32 %s4162_s29, %s1463_s28  ;;  %s1475_s7 = sand.u32 7, %s5273_s16 }
 0x161   : >> { %s4163_s0 = sshll.u32 %s1472_s18, 5  ;;  %s1467_s9 = scalar_lea.vmem [#allocation2], %s1466_s30 }
 0x162   : >> { %v1468_v13 = vld [vmem:[%s1467_s9] ss:$8 sm:$0xf]  ;;  %s1478_s20 = sadd.s32 %s4163_s0, %s1475_s7  ;;  %s1484_s10 = sshra.s32 %s5276_s6, 3 }
 0x163   : >> { %s1487_s14 = sand.u32 7, %s5276_s6  ;;  %v1469_v14 = vmax.f32 %v1457_v12, %v1468_v13  ;;  %s4164_s27 = sshll.u32 %s1484_s10, 5 }
 0x164   : >> { %s1494_s26 = sadd.s32 12, %s5244_s11  ;;  %s1479_s19 = scalar_lea.vmem [#allocation2], %s1478_s20 }
 0x165   : >> { %v1480_v15 = vld [vmem:[%s1479_s19] ss:$8 sm:$0xf]  ;;  %s1490_s24 = sadd.s32 %s4164_s27, %s1487_s14  ;;  %s1495_s13 = sld [smem:[#allocation5 + %s1494_s26]] }
 0x166   : >> { %s1506_s17 = sadd.s32 13, %s5244_s11  ;;  %s1518_s16 = sadd.s32 14, %s5244_s11  ;;  %v1481_v16 = vmax.f32 %v1469_v14, %v1480_v15 }
 0x167   : >> { %s1507_s12 = sld [smem:[#allocation5 + %s1506_s17]]  ;;  %s1530_s28 = sadd.s32 15, %s5244_s11 }
 0x168   : >> { %s1519_s25 = sld [smem:[#allocation5 + %s1518_s16]]  ;;  %s1491_s21 = scalar_lea.vmem [#allocation2], %s1490_s24 }
 0x169   : >> { %v1492_v17 = vld [vmem:[%s1491_s21] ss:$8 sm:$0xf]  ;;  %s5288_s29 = sld [smem:[#allocation5 + %s1530_s28]]  ;;  %s1542_s6 = sadd.s32 16, %s5244_s11 }
 0x16a   : >> { %s5291_s18 = sld [smem:[#allocation5 + %s1542_s6]]  ;;  %s1554_s30 = sadd.s32 17, %s5244_s11  ;;  %v1493_v18 = vmax.f32 %v1481_v16, %v1492_v17 }
 0x16b   : >> { %s1496_s7 = sshra.s32 %s1495_s13, 3  ;;  %s1499_s0 = sand.u32 7, %s1495_s13 }
 0x16c   : >> { %s4165_s9 = sshll.u32 %s1496_s7, 5  ;;  %s5294_s20 = sld [smem:[#allocation5 + %s1554_s30]] }
 0x16d   : >> { %s1502_s10 = sadd.s32 %s4165_s9, %s1499_s0  ;;  %s1508_s14 = sshra.s32 %s1507_s12, 3 }
 0x16e   : >> { %s1511_s27 = sand.u32 7, %s1507_s12  ;;  %s1503_s26 = scalar_lea.vmem [#allocation2], %s1502_s10 }
 0x16f   : >> { %v1504_v19 = vld [vmem:[%s1503_s26] ss:$8 sm:$0xf]  ;;  %s4166_s19 = sshll.u32 %s1508_s14, 5  ;;  %s1520_s24 = sshra.s32 %s1519_s25, 3 }
 0x170   : >> { %v1505_v20 = vmax.f32 %v1493_v18, %v1504_v19  ;;  %s1514_s17 = sadd.s32 %s4166_s19, %s1511_s27  ;;  %s1523_s16 = sand.u32 7, %s1519_s25 }
 0x171   : >> { %s4167_s28 = sshll.u32 %s1520_s24, 5  ;;  %s1515_s13 = scalar_lea.vmem [#allocation2], %s1514_s17 }
 0x172   : >> { %v1516_v21 = vld [vmem:[%s1515_s13] ss:$8 sm:$0xf]  ;;  %s1526_s21 = sadd.s32 %s4167_s28, %s1523_s16  ;;  %s1532_s6 = sshra.s32 %s5288_s29, 3 }
 0x173   : >> { %v1517_v22 = vmax.f32 %v1505_v20, %v1516_v21  ;;  %s1535_s30 = sand.u32 7, %s5288_s29  ;;  %s1527_s12 = scalar_lea.vmem [#allocation2], %s1526_s21 }
 0x174   : >> { %v1528_v23 = vld [vmem:[%s1527_s12] ss:$8 sm:$0xf]  ;;  %s4168_s7 = sshll.u32 %s1532_s6, 5  ;;  %s1544_s0 = sshra.s32 %s5291_s18, 3 }
 0x175   : >> { %v1529_v24 = vmax.f32 %v1517_v22, %v1528_v23  ;;  %s1538_s9 = sadd.s32 %s4168_s7, %s1535_s30  ;;  %s1547_s10 = sand.u32 7, %s5291_s18 }
 0x176   : >> { %s4169_s14 = sshll.u32 %s1544_s0, 5  ;;  %s1539_s25 = scalar_lea.vmem [#allocation2], %s1538_s9 }
 0x177   : >> { %v1540_v25 = vld [vmem:[%s1539_s25] ss:$8 sm:$0xf]  ;;  %s1550_s27 = sadd.s32 %s4169_s14, %s1547_s10  ;;  %s1556_s26 = sshra.s32 %s5294_s20, 3 }
 0x178   : >> { %s1559_s19 = sand.u32 7, %s5294_s20  ;;  %v1541_v26 = vmax.f32 %v1529_v24, %v1540_v25  ;;  %s4170_s24 = sshll.u32 %s1556_s26, 5 }
 0x179   : >> { %s1566_s29 = sadd.s32 18, %s5244_s11  ;;  %s1551_s17 = scalar_lea.vmem [#allocation2], %s1550_s27 }
 0x17a   : >> { %v1552_v27 = vld [vmem:[%s1551_s17] ss:$8 sm:$0xf]  ;;  %s1562_s16 = sadd.s32 %s4170_s24, %s1559_s19  ;;  %s1567_s28 = sld [smem:[#allocation5 + %s1566_s29]] }
 0x17b   : >> { %s1578_s13 = sadd.s32 19, %s5244_s11  ;;  %v1553_v28 = vmax.f32 %v1541_v26, %v1552_v27  ;;  %s1563_s6 = scalar_lea.vmem [#allocation2], %s1562_s16 }
 0x17c   : >> { %s1579_s21 = sld [smem:[#allocation5 + %s1578_s13]]  ;;  %v1564_v29 = vld [vmem:[%s1563_s6] ss:$8 sm:$0xf]  ;;  %s1594_s18 = sshra.s32 %s4347_s8, 3 }
 0x17d   : >> { %s1597_s30 = sand.u32 7, %s4347_s8  ;;  %v1565_v30 = vmax.f32 %v1553_v28, %v1564_v29  ;;  %s4173_s9 = sshll.u32 %s1594_s18, 5 }
 0x17e   : >> { %s1600_s26 = sadd.s32 %s4173_s9, %s1597_s30  ;;  %s1348_s8 = sadd.s32 1, %s4347_s8  }
 0x17f   : >> { %s1601_s24 = scalar_lea.vmem [#allocation3], %s1600_s26  ;;  %p1345_p4 = scmp.ge.s32.totalorder %s1348_s8, 32  }
 0x180   : >> { %s1568_s12 = sshra.s32 %s1567_s28, 3  ;;  %s1571_s7 = sand.u32 7, %s1567_s28  ;;  %v3615_v36 = vld [vmem:[%s6150_s3 + $0xe0] sm:$0xf] (%p1345_p4)  ;;  %v4204_v37 = vld [vmem:[%s6150_s3 + $0xec] sm:$0xf0] (%p1345_p4) }
 0x181   : >> { %s4171_s0 = sshll.u32 %s1568_s12, 5  ;;  %v3743_v38 = vld [vmem:[%s6150_s3 + $0x1e0] sm:$0xf] (%p1345_p4)  ;;  %v3616_v39 = vor.u32 (%p1345_p4), %v4204_v37, %v3615_v36  ;;  %v4236_v40 = vld [vmem:[%s6150_s3 + $0x1ec] sm:$0xf0] (%p1345_p4) }
 0x182   : >> { %s1574_s20 = sadd.s32 %s4171_s0, %s1571_s7  ;;  %s1580_s10 = sshra.s32 %s1579_s21, 3  ;;  %v3871_v41 = vld [vmem:[%s6150_s3 + $0x2e0] sm:$0xf] (%p1345_p4)  ;;  %v4268_v42 = vld [vmem:[%s6150_s3 + $0x2ec] sm:$0xf0] (%p1345_p4)  ;;  %v3744_v43 = vor.u32 (%p1345_p4), %v4236_v40, %v3743_v38 }
 0x183   : >> { %s1583_s14 = sand.u32 7, %s1579_s21  ;;  %s1575_s25 = scalar_lea.vmem [#allocation2], %s1574_s20  ;;  %v3872_v45 = vor.u32 (%p1345_p4), %v4268_v42, %v3871_v41  ;;  %v3999_v46 = vld [vmem:[%s6150_s3 + $0x3e0] sm:$0xf] (%p1345_p4)  ;;  %v4300_v47 = vld [vmem:[%s6150_s3 + $0x3ec] sm:$0xf0] (%p1345_p4)  ;;  %2372 = vmatpush.bf16.msra.mxu0 (%p1345_p4), %v3616_v39 }
 0x184   : >> { %v1576_v32 = vld [vmem:[%s1575_s25] ss:$8 sm:$0xf]  ;;  %s4172_s27 = sshll.u32 %s1580_s10, 5  ;;  %v4000_v52 = vor.u32 (%p1345_p4), %v4300_v47, %v3999_v46  ;;  %2391 = vmatpush.bf16.msra.mxu1 (%p1345_p4), %v3744_v43 }
 0x185   : >> { %v1577_v33 = vmax.f32 %v1565_v30, %v1576_v32  ;;  %s1586_s11 = sadd.s32 %s4172_s27, %s1583_s14  ;;  %v3599_v49 = vld [vmem:[%s6150_s3 + $0xc0] sm:$0xf] (%p1345_p4)  ;;  %v4200_v55 = vld [vmem:[%s6150_s3 + $0xcc] sm:$0xf0] (%p1345_p4)  ;;  %2410 = vmatpush.bf16.msra.mxu2 (%p1345_p4), %v3872_v45 }
 0x186   : >> { %s1587_s19 = scalar_lea.vmem [#allocation2], %s1586_s11  ;;  %1347 = sbr.rel (!%p1345_p4) target bundleno = 311 (0x137), region = 94  ;;  %v3727_v58 = vld [vmem:[%s6150_s3 + $0x1c0] sm:$0xf] (%p1345_p4)  ;;  %v4232_v59 = vld [vmem:[%s6150_s3 + $0x1cc] sm:$0xf0] (%p1345_p4)  ;;  %v3600_v60 = vor.u32 (%p1345_p4), %v4200_v55, %v3599_v49  ;;  %2429 = vmatpush.bf16.msra.mxu3 (%p1345_p4), %v4000_v52 }
 0x187   : >> { %v1588_v34 = vld [vmem:[%s1587_s19] ss:$8 sm:$0xf]  ;;  %v3728_v61 = vor.u32 (%p1345_p4), %v4232_v59, %v3727_v58 }
 0x188   : >> { %v1589_v35 = vmax.f32 %v1577_v33, %v1588_v34  ;;  %v3855_v62 = vld [vmem:[%s6150_s3 + $0x2c0] sm:$0xf] (%p1345_p4)  ;;  %v4264_v63 = vld [vmem:[%s6150_s3 + $0x2cc] sm:$0xf0] (%p1345_p4)  ;;  %2373 = vmatpush.bf16.msra.mxu0 (%p1345_p4), %v3600_v60 }
 0x189   : > { %v3983_v0 = vld [vmem:[%s6150_s3 + $0x3c0] sm:$0xf] (%p1345_p4)  ;;  %v3856_v1 = vor.u32 (%p1345_p4), %v4264_v63, %v3855_v62  ;;  %v4296_v2 = vld [vmem:[%s6150_s3 + $0x3cc] sm:$0xf0] (%p1345_p4)  ;;  %2392 = vmatpush.bf16.msra.mxu1 (%p1345_p4), %v3728_v61 }
 0x18a   : >> { %1602 = vst.msk [vmem:[%s1601_s24] ss:$8 sm:$0xf] %vm1592_vm0, %v1589_v35  ;;  %v3583_v3 = vld [vmem:[%s6150_s3 + $0xa0] sm:$0xf] (%p1345_p4)  ;;  %v3984_v5 = vor.u32 (%p1345_p4), %v4296_v2, %v3983_v0 }
 0x18b   : > { %v4196_v4 = vld [vmem:[%s6150_s3 + $0xac] sm:$0xf0]  ;;  %v3711_v6 = vld [vmem:[%s6150_s3 + $0x1a0] sm:$0xf]  ;;  %2411 = vmatpush.bf16.msra.mxu2 %v3856_v1 }
 0x18c   : > { %v4228_v7 = vld [vmem:[%s6150_s3 + $0x1ac] sm:$0xf0]  ;;  %v3839_v8 = vld [vmem:[%s6150_s3 + $0x2a0] sm:$0xf]  ;;  %v3584_v9 = vor.u32 %v4196_v4, %v3583_v3  ;;  %2430 = vmatpush.bf16.msra.mxu3 %v3984_v5 }
 0x18d   : > { %v4260_v10 = vld [vmem:[%s6150_s3 + $0x2ac] sm:$0xf0]  ;;  %v3967_v11 = vld [vmem:[%s6150_s3 + $0x3a0] sm:$0xf]  ;;  %v3712_v13 = vor.u32 %v4228_v7, %v3711_v6 }
 0x18e   : > { %v4292_v12 = vld [vmem:[%s6150_s3 + $0x3ac] sm:$0xf0]  ;;  %v3840_v14 = vor.u32 %v4260_v10, %v3839_v8  ;;  %v3567_v15 = vld [vmem:[%s6150_s3 + $0x80] sm:$0xf]  ;;  %2374 = vmatpush.bf16.msra.mxu0 %v3584_v9 }
 0x18f   : > { %v4192_v16 = vld [vmem:[%s6150_s3 + $0x8c] sm:$0xf0]  ;;  %v3695_v17 = vld [vmem:[%s6150_s3 + $0x180] sm:$0xf]  ;;  %v3968_v18 = vor.u32 %v4292_v12, %v3967_v11  ;;  %2393 = vmatpush.bf16.msra.mxu1 %v3712_v13 }
 0x190   : > { %v4224_v19 = vld [vmem:[%s6150_s3 + $0x18c] sm:$0xf0]  ;;  %v3823_v20 = vld [vmem:[%s6150_s3 + $0x280] sm:$0xf]  ;;  %v3568_v24 = vor.u32 %v4192_v16, %v3567_v15  ;;  %2412 = vmatpush.bf16.msra.mxu2 %v3840_v14  ;;  %v4266_v16 = vld [vmem:[%s6150_s3 + $0x2e4] sm:$0xf] }
 0x191   : > { %v4256_v21 = vld [vmem:[%s6150_s3 + $0x28c] sm:$0xf0]  ;;  %v3951_v22 = vld [vmem:[%s6150_s3 + $0x380] sm:$0xf]  ;;  %v3696_v25 = vor.u32 %v4224_v19, %v3695_v17  ;;  %2431 = vmatpush.bf16.msra.mxu3 %v3968_v18  ;;  %v3873_v17 = vld [vmem:[%s6150_s3 + $0x2f0] sm:$0xf0] }
 0x192   : > { %v4288_v23 = vld [vmem:[%s6150_s3 + $0x38c] sm:$0xf0]  ;;  %v3824_v26 = vor.u32 %v4256_v21, %v3823_v20  ;;  %v3551_v27 = vld [vmem:[%s6150_s3 + $0x60] sm:$0xf]  ;;  %2375 = vmatpush.bf16.msra.mxu0 %v3568_v24  ;;  %v4234_v19 = vld [vmem:[%s6150_s3 + $0x1e4] sm:$0xf]  ;;  %v3876_v24 = vor.u32 %v4266_v16, %v3873_v17 }
 0x193   : > { %v4188_v28 = vld [vmem:[%s6150_s3 + $0x6c] sm:$0xf0]  ;;  %v3679_v29 = vld [vmem:[%s6150_s3 + $0x160] sm:$0xf]  ;;  %v3952_v30 = vor.u32 %v4288_v23, %v3951_v22  ;;  %2394 = vmatpush.bf16.msra.mxu1 %v3696_v25  ;;  %v3745_v20 = vld [vmem:[%s6150_s3 + $0x1f0] sm:$0xf0] }
 0x194   : > { %v4220_v31 = vld [vmem:[%s6150_s3 + $0x16c] sm:$0xf0]  ;;  %v3807_v32 = vld [vmem:[%s6150_s3 + $0x260] sm:$0xf]  ;;  %v3552_v36 = vor.u32 %v4188_v28, %v3551_v27  ;;  %2413 = vmatpush.bf16.msra.mxu2 %v3824_v26  ;;  %v4202_v25 = vld [vmem:[%s6150_s3 + $0xe4] sm:$0xf]  ;;  %v3748_v28 = vor.u32 %v4234_v19, %v3745_v20 }
 0x195   : > { %v4252_v33 = vld [vmem:[%s6150_s3 + $0x26c] sm:$0xf0]  ;;  %v3935_v34 = vld [vmem:[%s6150_s3 + $0x360] sm:$0xf]  ;;  %v3680_v37 = vor.u32 %v4220_v31, %v3679_v29  ;;  %2432 = vmatpush.bf16.msra.mxu3 %v3952_v30  ;;  %v3617_v26 = vld [vmem:[%s6150_s3 + $0xf0] sm:$0xf0] }
 0x196   : > { %v4284_v35 = vld [vmem:[%s6150_s3 + $0x36c] sm:$0xf0]  ;;  %v3808_v38 = vor.u32 %v4252_v33, %v3807_v32  ;;  %v3535_v39 = vld [vmem:[%s6150_s3 + $0x40] sm:$0xf]  ;;  %2376 = vmatpush.bf16.msra.mxu0 %v3552_v36  ;;  %v4298_v27 = vld [vmem:[%s6150_s3 + $0x3e4] sm:$0xf] }
 0x197   : > { %v4184_v40 = vld [vmem:[%s6150_s3 + $0x4c] sm:$0xf0]  ;;  %v3663_v41 = vld [vmem:[%s6150_s3 + $0x140] sm:$0xf]  ;;  %v3936_v42 = vor.u32 %v4284_v35, %v3935_v34  ;;  %2395 = vmatpush.bf16.msra.mxu1 %v3680_v37  ;;  %v4001_v29 = vld [vmem:[%s6150_s3 + $0x3f0] sm:$0xf0]  ;;  %v3620_v34 = vor.u32 %v4202_v25, %v3617_v26 }
 0x198   : > { %v4216_v43 = vld [vmem:[%s6150_s3 + $0x14c] sm:$0xf0]  ;;  %v3791_v45 = vld [vmem:[%s6150_s3 + $0x240] sm:$0xf]  ;;  %v3536_v52 = vor.u32 %v4184_v40, %v3535_v39  ;;  %2414 = vmatpush.bf16.msra.mxu2 %v3808_v38  ;;  %v4262_v30 = vld [vmem:[%s6150_s3 + $0x2c4] sm:$0xf]  ;;  %v4004_v35 = vor.u32 %v4298_v27, %v4001_v29 }
 0x199   : > { %v4248_v46 = vld [vmem:[%s6150_s3 + $0x24c] sm:$0xf0]  ;;  %v3919_v47 = vld [vmem:[%s6150_s3 + $0x340] sm:$0xf]  ;;  %v3664_v55 = vor.u32 %v4216_v43, %v3663_v41  ;;  %2433 = vmatpush.bf16.msra.mxu3 %v3936_v42  ;;  %v3857_v31 = vld [vmem:[%s6150_s3 + $0x2d0] sm:$0xf0] }
 0x19a   : > { %v4280_v49 = vld [vmem:[%s6150_s3 + $0x34c] sm:$0xf0]  ;;  %v3792_v58 = vor.u32 %v4248_v46, %v3791_v45  ;;  %v3519_v59 = vld [vmem:[%s6150_s3 + $0x20] sm:$0xf]  ;;  %2377 = vmatpush.bf16.msra.mxu0 %v3536_v52  ;;  %v4230_v32 = vld [vmem:[%s6150_s3 + $0x1c4] sm:$0xf]  ;;  %v3860_v36 = vor.u32 %v4262_v30, %v3857_v31 }
 0x19b   : > { %v4180_v60 = vld [vmem:[%s6150_s3 + $0x2c] sm:$0xf0]  ;;  %v3647_v61 = vld [vmem:[%s6150_s3 + $0x120] sm:$0xf]  ;;  %v3920_v62 = vor.u32 %v4280_v49, %v3919_v47  ;;  %2396 = vmatpush.bf16.msra.mxu1 %v3664_v55  ;;  %v3729_v33 = vld [vmem:[%s6150_s3 + $0x1d0] sm:$0xf0] }
 0x19c   : > { %v4212_v63 = vld [vmem:[%s6150_s3 + $0x12c] sm:$0xf0]  ;;  %v3775_v0 = vld [vmem:[%s6150_s3 + $0x220] sm:$0xf]  ;;  %v3520_v4 = vor.u32 %v4180_v60, %v3519_v59  ;;  %2415 = vmatpush.bf16.msra.mxu2 %v3792_v58  ;;  %v4198_v37 = vld [vmem:[%s6150_s3 + $0xc4] sm:$0xf]  ;;  %v3732_v40 = vor.u32 %v4230_v32, %v3729_v33 }
 0x19d   : > { %v4244_v1 = vld [vmem:[%s6150_s3 + $0x22c] sm:$0xf0]  ;;  %v3903_v2 = vld [vmem:[%s6150_s3 + $0x320] sm:$0xf]  ;;  %v3648_v6 = vor.u32 %v4212_v63, %v3647_v61  ;;  %2434 = vmatpush.bf16.msra.mxu3 %v3920_v62  ;;  %v3601_v38 = vld [vmem:[%s6150_s3 + $0xd0] sm:$0xf0] }
 0x19e   : > { %v4276_v3 = vld [vmem:[%s6150_s3 + $0x32c] sm:$0xf0]  ;;  %v3503_v5 = vld [vmem:[%s6150_s3] sm:$0xf]  ;;  %v3776_v7 = vor.u32 %v4244_v1, %v3775_v0  ;;  %2378 = vmatpush.bf16.msra.mxu0 %v3520_v4  ;;  %v4294_v39 = vld [vmem:[%s6150_s3 + $0x3c4] sm:$0xf]  ;;  %v3604_v47 = vor.u32 %v4198_v37, %v3601_v38 }
 0x19f   : > { %v4176_v8 = vld [vmem:[%s6150_s3 + $0xc] sm:$0xf0]  ;;  %v3631_v9 = vld [vmem:[%s6150_s3 + $0x100] sm:$0xf]  ;;  %v3904_v11 = vor.u32 %v4276_v3, %v3903_v2  ;;  %2397 = vmatpush.bf16.msra.mxu1 %v3648_v6  ;;  %v3985_v41 = vld [vmem:[%s6150_s3 + $0x3d0] sm:$0xf0] }
 0x1a0   : > { %v4208_v10 = vld [vmem:[%s6150_s3 + $0x10c] sm:$0xf0]  ;;  %v3759_v12 = vld [vmem:[%s6150_s3 + $0x200] sm:$0xf]  ;;  %v3504_v18 = vor.u32 %v4176_v8, %v3503_v5  ;;  %2416 = vmatpush.bf16.msra.mxu2 %v3776_v7  ;;  %v4258_v42 = vld [vmem:[%s6150_s3 + $0x2a4] sm:$0xf]  ;;  %v3988_v49 = vor.u32 %v4294_v39, %v3985_v41 }
 0x1a1   : > { %v4240_v13 = vld [vmem:[%s6150_s3 + $0x20c] sm:$0xf0]  ;;  %v3887_v14 = vld [vmem:[%s6150_s3 + $0x300] sm:$0xf]  ;;  %v3632_v21 = vor.u32 %v4208_v10, %v3631_v9  ;;  %2435 = vmatpush.bf16.msra.mxu3 %v3904_v11  ;;  %v3841_v43 = vld [vmem:[%s6150_s3 + $0x2b0] sm:$0xf0] }
 0x1a2   : > { %v4272_v15 = vld [vmem:[%s6150_s3 + $0x30c] sm:$0xf0]  ;;  %v3760_v22 = vor.u32 %v4240_v13, %v3759_v12  ;;  %2379 = vmatpush.bf16.msra.mxu0 %v3504_v18  ;;  %v4226_v45 = vld [vmem:[%s6150_s3 + $0x1a4] sm:$0xf]  ;;  %v3713_v46 = vld [vmem:[%s6150_s3 + $0x1b0] sm:$0xf0]  ;;  %v3844_v52 = vor.u32 %v4258_v42, %v3841_v43 }
 0x1a3   : > { %v3888_v23 = vor.u32 %v4272_v15, %v3887_v14  ;;  %2398 = vmatpush.bf16.msra.mxu1 %v3632_v21  ;;  %v4194_v55 = vld [vmem:[%s6150_s3 + $0xa4] sm:$0xf]  ;;  %v3585_v58 = vld [vmem:[%s6150_s3 + $0xb0] sm:$0xf0]  ;;  %v3716_v60 = vor.u32 %v4226_v45, %v3713_v46 }
 0x1a4   : > { %2417 = vmatpush.bf16.msra.mxu2 %v3760_v22  ;;  %v4290_v59 = vld [vmem:[%s6150_s3 + $0x3a4] sm:$0xf]  ;;  %v3969_v61 = vld [vmem:[%s6150_s3 + $0x3b0] sm:$0xf0]  ;;  %v3588_v2 = vor.u32 %v4194_v55, %v3585_v58  ;;  %v3879_v58 = vld [vmem:[%s6150_s3 + $0x2e8] sm:$0xf] }
 0x1a5   : > { %2436 = vmatpush.bf16.msra.mxu3 %v3888_v23  ;;  %2380 = vmatmul.bf16.vlgmr.msra.gmra.mxu0 %v4626_v48  ;;  %v4254_v62 = vld [vmem:[%s6150_s3 + $0x284] sm:$0xf]  ;;  %v3825_v63 = vld [vmem:[%s6150_s3 + $0x290] sm:$0xf0]  ;;  %v3972_v3 = vor.u32 %v4290_v59, %v3969_v61  ;;  %v4269_v59 = vld [vmem:[%s6150_s3 + $0x2f4] sm:$0xf0] }
 0x1a6   : > { %2399 = vmatmul.bf16.vlgmr.msra.gmra.mxu1 %v4637_v53  ;;  %2448 = vmatpush.bf16.msrb.mxu0 %v3620_v34  ;;  %v4222_v0 = vld [vmem:[%s6150_s3 + $0x184] sm:$0xf]  ;;  %v3697_v1 = vld [vmem:[%s6150_s3 + $0x190] sm:$0xf0]  ;;  %v3828_v4 = vor.u32 %v4254_v62, %v3825_v63  ;;  %v3751_v62 = vld [vmem:[%s6150_s3 + $0x1e8] sm:$0xf] }
 0x1a7   : > { %2467 = vmatpush.bf16.msrb.mxu1 %v3748_v28  ;;  %2418 = vmatmul.bf16.vlgmr.msra.gmra.mxu2 %v4639_v54  ;;  %v4190_v5 = vld [vmem:[%s6150_s3 + $0x84] sm:$0xf]  ;;  %v3569_v6 = vld [vmem:[%s6150_s3 + $0x90] sm:$0xf0]  ;;  %v3700_v8 = vor.u32 %v4222_v0, %v3697_v1  ;;  %v4237_v63 = vld [vmem:[%s6150_s3 + $0x1f4] sm:$0xf0] }
 0x1a8   : > { %2486 = vmatpush.bf16.msrb.mxu2 %v3876_v24  ;;  %2437 = vmatmul.bf16.vlgmr.msra.gmra.mxu3 %v4647_v57  ;;  %v4286_v7 = vld [vmem:[%s6150_s3 + $0x384] sm:$0xf]  ;;  %v3953_v9 = vld [vmem:[%s6150_s3 + $0x390] sm:$0xf0]  ;;  %v3572_v14 = vor.u32 %v4190_v5, %v3569_v6  ;;  %v3880_v6 = vor.u32 %v4269_v59, %v3879_v58  ;;  %v4253_v58 = vld [vmem:[%s6150_s3 + $0x274] sm:$0xf0] }
 0x1a9   : > { %2505 = vmatpush.bf16.msrb.mxu3 %v4004_v35  ;;  %v4250_v10 = vld [vmem:[%s6150_s3 + $0x264] sm:$0xf]  ;;  %v3809_v11 = vld [vmem:[%s6150_s3 + $0x270] sm:$0xf0]  ;;  %v3956_v15 = vor.u32 %v4286_v7, %v3953_v9  ;;  %v3623_v7 = vld [vmem:[%s6150_s3 + $0xe8] sm:$0xf] }
 0x1aa   : > { %2449 = vmatpush.bf16.msrb.mxu0 %v3604_v47  ;;  %v4218_v12 = vld [vmem:[%s6150_s3 + $0x164] sm:$0xf]  ;;  %v3681_v13 = vld [vmem:[%s6150_s3 + $0x170] sm:$0xf0]  ;;  %v3812_v16 = vor.u32 %v4250_v10, %v3809_v11  ;;  %v4007_v9 = vld [vmem:[%s6150_s3 + $0x3e8] sm:$0xf]  ;;  %v3752_v10 = vor.u32 %v4237_v63, %v3751_v62 }
 0x1ab   : > { %2468 = vmatpush.bf16.msrb.mxu1 %v3732_v40  ;;  %v4186_v17 = vld [vmem:[%s6150_s3 + $0x64] sm:$0xf]  ;;  %v3553_v18 = vld [vmem:[%s6150_s3 + $0x70] sm:$0xf0]  ;;  %v3684_v20 = vor.u32 %v4218_v12, %v3681_v13  ;;  %v4301_v11 = vld [vmem:[%s6150_s3 + $0x3f4] sm:$0xf0] }
 0x1ac   : > { %2487 = vmatpush.bf16.msrb.mxu2 %v3860_v36  ;;  %v4282_v19 = vld [vmem:[%s6150_s3 + $0x364] sm:$0xf]  ;;  %v3937_v21 = vld [vmem:[%s6150_s3 + $0x370] sm:$0xf0]  ;;  %v3556_v26 = vor.u32 %v4186_v17, %v3553_v18  ;;  %v3863_v12 = vld [vmem:[%s6150_s3 + $0x2c8] sm:$0xf] }
 0x1ad   : > { %2506 = vmatpush.bf16.msrb.mxu3 %v3988_v49  ;;  %v4246_v22 = vld [vmem:[%s6150_s3 + $0x244] sm:$0xf]  ;;  %v3793_v23 = vld [vmem:[%s6150_s3 + $0x250] sm:$0xf0]  ;;  %v3940_v27 = vor.u32 %v4282_v19, %v3937_v21  ;;  %v4265_v13 = vld [vmem:[%s6150_s3 + $0x2d4] sm:$0xf0]  ;;  %v4008_v19 = vor.u32 %v4301_v11, %v4007_v9 }
 0x1ae   : > { %2450 = vmatpush.bf16.msrb.mxu0 %v3588_v2  ;;  %v4214_v24 = vld [vmem:[%s6150_s3 + $0x144] sm:$0xf]  ;;  %v3665_v25 = vld [vmem:[%s6150_s3 + $0x150] sm:$0xf0]  ;;  %v3796_v28 = vor.u32 %v4246_v22, %v3793_v23  ;;  %v3607_v17 = vld [vmem:[%s6150_s3 + $0xc8] sm:$0xf] }
 0x1af   : > { %2469 = vmatpush.bf16.msrb.mxu1 %v3716_v60  ;;  %v4182_v29 = vld [vmem:[%s6150_s3 + $0x44] sm:$0xf]  ;;  %v3537_v30 = vld [vmem:[%s6150_s3 + $0x50] sm:$0xf0]  ;;  %v3668_v32 = vor.u32 %v4214_v24, %v3665_v25  ;;  %v4201_v18 = vld [vmem:[%s6150_s3 + $0xd4] sm:$0xf0] }
 0x1b0   : > { %2488 = vmatpush.bf16.msrb.mxu2 %v3844_v52  ;;  %v4278_v31 = vld [vmem:[%s6150_s3 + $0x344] sm:$0xf]  ;;  %v3921_v33 = vld [vmem:[%s6150_s3 + $0x350] sm:$0xf0]  ;;  %v3540_v38 = vor.u32 %v4182_v29, %v3537_v30  ;;  %v3735_v21 = vld [vmem:[%s6150_s3 + $0x1c8] sm:$0xf] }
 0x1b1   : > { %2507 = vmatpush.bf16.msrb.mxu3 %v3972_v3  ;;  %v4242_v34 = vld [vmem:[%s6150_s3 + $0x224] sm:$0xf]  ;;  %v3777_v35 = vld [vmem:[%s6150_s3 + $0x230] sm:$0xf0]  ;;  %v3924_v40 = vor.u32 %v4278_v31, %v3921_v33  ;;  %v4233_v22 = vld [vmem:[%s6150_s3 + $0x1d4] sm:$0xf0] }
 0x1b2   : > { %2451 = vmatpush.bf16.msrb.mxu0 %v3572_v14  ;;  %v4210_v36 = vld [vmem:[%s6150_s3 + $0x124] sm:$0xf]  ;;  %v3649_v37 = vld [vmem:[%s6150_s3 + $0x130] sm:$0xf0]  ;;  %v3780_v41 = vor.u32 %v4242_v34, %v3777_v35  ;;  %v3991_v23 = vld [vmem:[%s6150_s3 + $0x3c8] sm:$0xf] }
 0x1b3   : > { %2470 = vmatpush.bf16.msrb.mxu1 %v3700_v8  ;;  %v4178_v39 = vld [vmem:[%s6150_s3 + $0x24] sm:$0xf]  ;;  %v3521_v42 = vld [vmem:[%s6150_s3 + $0x30] sm:$0xf0]  ;;  %v3652_v46 = vor.u32 %v4210_v36, %v3649_v37  ;;  %v4205_v8 = vld [vmem:[%s6150_s3 + $0xf4] sm:$0xf0] }
 0x1b4   : > { %2489 = vmatpush.bf16.msrb.mxu2 %v3828_v4  ;;  %v4274_v43 = vld [vmem:[%s6150_s3 + $0x324] sm:$0xf]  ;;  %v3905_v45 = vld [vmem:[%s6150_s3 + $0x330] sm:$0xf0]  ;;  %v3524_v60 = vor.u32 %v4178_v39, %v3521_v42  ;;  %v4297_v24 = vld [vmem:[%s6150_s3 + $0x3d4] sm:$0xf0] }
 0x1b5   : > { %2508 = vmatpush.bf16.msrb.mxu3 %v3956_v15  ;;  %2385 = vmatmul.bf16.gmra.mxu0 %v4742_v44  ;;  %v4238_v47 = vld [vmem:[%s6150_s3 + $0x204] sm:$0xf]  ;;  %v3761_v49 = vld [vmem:[%s6150_s3 + $0x210] sm:$0xf0]  ;;  %v3908_v0 = vor.u32 %v4274_v43, %v3905_v45  ;;  %v3847_v25 = vld [vmem:[%s6150_s3 + $0x2a8] sm:$0xf]  ;;  %v3992_v31 = vor.u32 %v4297_v24, %v3991_v23 }
 0x1b6   : > { %2404 = vmatmul.bf16.gmra.mxu1 %v4753_v50  ;;  %2452 = vmatpush.bf16.msrb.mxu0 %v3556_v26  ;;  %v4206_v52 = vld [vmem:[%s6150_s3 + $0x104] sm:$0xf]  ;;  %v3633_v55 = vld [vmem:[%s6150_s3 + $0x110] sm:$0xf0]  ;;  %v3764_v1 = vor.u32 %v4238_v47, %v3761_v49  ;;  %v4261_v26 = vld [vmem:[%s6150_s3 + $0x2b4] sm:$0xf0] }
 0x1b7   : > { %2471 = vmatpush.bf16.msrb.mxu1 %v3684_v20  ;;  %2423 = vmatmul.bf16.gmra.mxu2 %v4755_v51  ;;  %v4174_v61 = vld [vmem:[%s6150_s3 + $0x4] sm:$0xf]  ;;  %v3505_v2 = vld [vmem:[%s6150_s3 + $0x10] sm:$0xf0]  ;;  %v3636_v5 = vor.u32 %v4206_v52, %v3633_v55  ;;  %v3864_v20 = vor.u32 %v4265_v13, %v3863_v12  ;;  %v3591_v29 = vld [vmem:[%s6150_s3 + $0xa8] sm:$0xf] }
 0x1b8   : > { %2490 = vmatpush.bf16.msrb.mxu2 %v3812_v16  ;;  %2442 = vmatmul.bf16.gmra.mxu3 %v4763_v56  ;;  %v4270_v3 = vld [vmem:[%s6150_s3 + $0x304] sm:$0xf]  ;;  %v3889_v4 = vld [vmem:[%s6150_s3 + $0x310] sm:$0xf0]  ;;  %v3508_v14 = vor.u32 %v4174_v61, %v3505_v2  ;;  %v3624_v16 = vor.u32 %v4205_v8, %v3623_v7  ;;  %v4197_v30 = vld [vmem:[%s6150_s3 + $0xb4] sm:$0xf0] }
 0x1b9   : > { %2509 = vmatpush.bf16.msrb.mxu3 %v3940_v27  ;;  %v3892_v15 = vor.u32 %v4270_v3, %v3889_v4  ;;  %v3608_v27 = vor.u32 %v4201_v18, %v3607_v17  ;;  %v3719_v33 = vld [vmem:[%s6150_s3 + $0x1a8] sm:$0xf]  ;;  %v4229_v34 = vld [vmem:[%s6150_s3 + $0x1b4] sm:$0xf0]  ;;  %v3592_v39 = vor.u32 %v4197_v30, %v3591_v29 }
 0x1ba   : > { %2453 = vmatpush.bf16.msrb.mxu0 %v3540_v38  ;;  %v3975_v35 = vld [vmem:[%s6150_s3 + $0x3a8] sm:$0xf]  ;;  %v4293_v36 = vld [vmem:[%s6150_s3 + $0x3b4] sm:$0xf0] }
 0x1bb   : > { %2472 = vmatpush.bf16.msrb.mxu1 %v3668_v32  ;;  %v3848_v32 = vor.u32 %v4261_v26, %v3847_v25  ;;  %v3831_v37 = vld [vmem:[%s6150_s3 + $0x288] sm:$0xf]  ;;  %v4257_v38 = vld [vmem:[%s6150_s3 + $0x294] sm:$0xf0]  ;;  %v3976_v43 = vor.u32 %v4293_v36, %v3975_v35 }
 0x1bc   : > { %2491 = vmatpush.bf16.msrb.mxu2 %v3796_v28  ;;  %v3736_v28 = vor.u32 %v4233_v22, %v3735_v21  ;;  %v4193_v42 = vld [vmem:[%s6150_s3 + $0x94] sm:$0xf0]  ;;  %v3832_v45 = vor.u32 %v4257_v38, %v3831_v37  ;;  %v3959_v49 = vld [vmem:[%s6150_s3 + $0x388] sm:$0xf] }
 0x1bd   : > { %2510 = vmatpush.bf16.msrb.mxu3 %v3924_v40  ;;  %v3720_v40 = vor.u32 %v4229_v34, %v3719_v33  ;;  %v4225_v47 = vld [vmem:[%s6150_s3 + $0x194] sm:$0xf0]  ;;  %v3815_v55 = vld [vmem:[%s6150_s3 + $0x268] sm:$0xf] }
 0x1be   : > { %2454 = vmatpush.bf16.msrb.mxu0 %v3524_v60  ;;  %v4289_v52 = vld [vmem:[%s6150_s3 + $0x394] sm:$0xf0]  ;;  %v3559_v61 = vld [vmem:[%s6150_s3 + $0x68] sm:$0xf] }
 0x1bf   : > { %2473 = vmatpush.bf16.msrb.mxu1 %v3652_v46  ;;  %v3703_v46 = vld [vmem:[%s6150_s3 + $0x188] sm:$0xf]  ;;  %v4189_v62 = vld [vmem:[%s6150_s3 + $0x74] sm:$0xf0]  ;;  %v3960_v63 = vor.u32 %v4289_v52, %v3959_v49  ;;  %v3753_v49 = vld [vmem:[%s6150_s3 + $0x1f8] sm:$0xf0] }
 0x1c0   : > { %2492 = vmatpush.bf16.msrb.mxu2 %v3780_v41  ;;  %v3575_v41 = vld [vmem:[%s6150_s3 + $0x88] sm:$0xf]  ;;  %v3704_v60 = vor.u32 %v4225_v47, %v3703_v46  ;;  %v4221_v2 = vld [vmem:[%s6150_s3 + $0x174] sm:$0xf0]  ;;  %v3560_v7 = vor.u32 %v4189_v62, %v3559_v61  ;;  %v3625_v46 = vld [vmem:[%s6150_s3 + $0xf8] sm:$0xf0] }
 0x1c1   : > { %2511 = vmatpush.bf16.msrb.mxu3 %v3908_v0  ;;  %v3576_v59 = vor.u32 %v4193_v42, %v3575_v41  ;;  %v3816_v0 = vor.u32 %v4253_v58, %v3815_v55  ;;  %v3943_v3 = vld [vmem:[%s6150_s3 + $0x368] sm:$0xf]  ;;  %v4285_v4 = vld [vmem:[%s6150_s3 + $0x374] sm:$0xf0]  ;;  %v4235_v47 = vld [vmem:[%s6150_s3 + $0x1ec] sm:$0xf] }
 0x1c2   : > { %2455 = vmatpush.bf16.msrb.mxu0 %v3508_v14  ;;  %v3543_v9 = vld [vmem:[%s6150_s3 + $0x48] sm:$0xf]  ;;  %v3944_v11 = vor.u32 %v4285_v4, %v3943_v3  ;;  %v4217_v14 = vld [vmem:[%s6150_s3 + $0x154] sm:$0xf0]  ;;  %v4299_v52 = vld [vmem:[%s6150_s3 + $0x3ec] sm:$0xf] }
 0x1c3   : > { %2474 = vmatpush.bf16.msrb.mxu1 %v3636_v5  ;;  %v3799_v5 = vld [vmem:[%s6150_s3 + $0x248] sm:$0xf]  ;;  %v4245_v18 = vld [vmem:[%s6150_s3 + $0x234] sm:$0xf0]  ;;  %v4009_v55 = vld [vmem:[%s6150_s3 + $0x3f8] sm:$0xf0] }
 0x1c4   : > { %2493 = vmatpush.bf16.msrb.mxu2 %v3764_v1  ;;  %v3687_v1 = vld [vmem:[%s6150_s3 + $0x168] sm:$0xf]  ;;  %v4181_v22 = vld [vmem:[%s6150_s3 + $0x34] sm:$0xf0]  ;;  %v3865_v61 = vld [vmem:[%s6150_s3 + $0x2d8] sm:$0xf0] }
 0x1c5   : > { %2512 = vmatpush.bf16.msrb.mxu3 %v3892_v15  ;;  %2456 = vmatmul.bf16.vlgmr.msrb.gmra.mxu0 %v4626_v48  ;;  %v3688_v8 = vor.u32 %v4221_v2, %v3687_v1  ;;  %v3671_v13 = vld [vmem:[%s6150_s3 + $0x148] sm:$0xf]  ;;  %v4213_v26 = vld [vmem:[%s6150_s3 + $0x134] sm:$0xf0]  ;;  %v4012_v1 = vor.u32 %v4299_v52, %v4009_v55  ;;  %v4199_v2 = vld [vmem:[%s6150_s3 + $0xcc] sm:$0xf] }
 0x1c6   : > { %2524 = vmatpush.bf16.msra.mxu0 %v3624_v16  ;;  %2475 = vmatmul.bf16.vlgmr.msrb.gmra.mxu1 %v4637_v53  ;;  %v3927_v15 = vld [vmem:[%s6150_s3 + $0x348] sm:$0xf]  ;;  %v4281_v16 = vld [vmem:[%s6150_s3 + $0x354] sm:$0xf0]  ;;  %v3609_v3 = vld [vmem:[%s6150_s3 + $0xd8] sm:$0xf0] }
 0x1c7   : > { %2543 = vmatpush.bf16.msra.mxu1 %v3752_v10  ;;  %2494 = vmatmul.bf16.vlgmr.msrb.gmra.mxu2 %v4639_v54  ;;  %v4185_v10 = vld [vmem:[%s6150_s3 + $0x54] sm:$0xf0]  ;;  %v3783_v17 = vld [vmem:[%s6150_s3 + $0x228] sm:$0xf]  ;;  %v3928_v23 = vor.u32 %v4281_v16, %v3927_v15  ;;  %v4227_v16 = vld [vmem:[%s6150_s3 + $0x1ac] sm:$0xf] }
 0x1c8   : > { %2562 = vmatpush.bf16.msra.mxu2 %v3880_v6  ;;  %2513 = vmatmul.bf16.vlgmr.msrb.gmra.mxu3 %v4647_v57  ;;  %v4249_v6 = vld [vmem:[%s6150_s3 + $0x254] sm:$0xf0]  ;;  %v3527_v21 = vld [vmem:[%s6150_s3 + $0x28] sm:$0xf]  ;;  %v3784_v24 = vor.u32 %v4245_v18, %v3783_v17  ;;  %v3721_v17 = vld [vmem:[%s6150_s3 + $0x1b8] sm:$0xf0] }
 0x1c9   : > { %2581 = vmatpush.bf16.msra.mxu3 %v4008_v19  ;;  %v3800_v12 = vor.u32 %v4249_v6, %v3799_v5  ;;  %v3544_v19 = vor.u32 %v4185_v10, %v3543_v9  ;;  %v3655_v25 = vld [vmem:[%s6150_s3 + $0x128] sm:$0xf]  ;;  %v4241_v30 = vld [vmem:[%s6150_s3 + $0x214] sm:$0xf0]  ;;  %v3528_v33 = vor.u32 %v4181_v22, %v3527_v21  ;;  %v4231_v5 = vld [vmem:[%s6150_s3 + $0x1cc] sm:$0xf] }
 0x1ca   : > { %2525 = vmatpush.bf16.msra.mxu0 %v3608_v27  ;;  %v3911_v27 = vld [vmem:[%s6150_s3 + $0x328] sm:$0xf]  ;;  %v3656_v34 = vor.u32 %v4213_v26, %v3655_v25  ;;  %v4177_v36 = vld [vmem:[%s6150_s3 + $0x14] sm:$0xf0]  ;;  %v3737_v6 = vld [vmem:[%s6150_s3 + $0x1d8] sm:$0xf0]  ;;  %v3724_v26 = vor.u32 %v4227_v16, %v3721_v17 }
 0x1cb   : > { %2544 = vmatpush.bf16.msra.mxu1 %v3736_v28  ;;  %v4277_v28 = vld [vmem:[%s6150_s3 + $0x334] sm:$0xf0]  ;;  %v3767_v29 = vld [vmem:[%s6150_s3 + $0x208] sm:$0xf]  ;;  %v3993_v9 = vld [vmem:[%s6150_s3 + $0x3d8] sm:$0xf0] }
 0x1cc   : > { %2563 = vmatpush.bf16.msra.mxu2 %v3864_v20  ;;  %v3672_v20 = vor.u32 %v4217_v14, %v3671_v13  ;;  %v3511_v35 = vld [vmem:[%s6150_s3 + $0x8] sm:$0xf]  ;;  %v3912_v38 = vor.u32 %v4277_v28, %v3911_v27  ;;  %v4273_v42 = vld [vmem:[%s6150_s3 + $0x314] sm:$0xf0]  ;;  %v4259_v10 = vld [vmem:[%s6150_s3 + $0x2ac] sm:$0xf]  ;;  %v3740_v14 = vor.u32 %v4231_v5, %v3737_v6 }
 0x1cd   : > { %2582 = vmatpush.bf16.msra.mxu3 %v3992_v31  ;;  %v4267_v31 = vld [vmem:[%s6150_s3 + $0x2ec] sm:$0xf]  ;;  %v3639_v37 = vld [vmem:[%s6150_s3 + $0x108] sm:$0xf]  ;;  %v3512_v58 = vor.u32 %v4177_v36, %v3511_v35  ;;  %v3593_v13 = vld [vmem:[%s6150_s3 + $0xb8] sm:$0xf0] }
 0x1ce   : > { %2526 = vmatpush.bf16.msra.mxu0 %v3592_v39  ;;  %v3768_v39 = vor.u32 %v4241_v30, %v3767_v29  ;;  %v3895_v41 = vld [vmem:[%s6150_s3 + $0x308] sm:$0xf]  ;;  %v3977_v21 = vld [vmem:[%s6150_s3 + $0x3b8] sm:$0xf0]  ;;  %v4255_v22 = vld [vmem:[%s6150_s3 + $0x28c] sm:$0xf] }
 0x1cf   : > { %2545 = vmatpush.bf16.msra.mxu1 %v3720_v40  ;;  %v4209_v40 = vld [vmem:[%s6150_s3 + $0x114] sm:$0xf0]  ;;  %v3896_v62 = vor.u32 %v4273_v42, %v3895_v41  ;;  %v3577_v25 = vld [vmem:[%s6150_s3 + $0x98] sm:$0xf0]  ;;  %v4223_v28 = vld [vmem:[%s6150_s3 + $0x18c] sm:$0xf] }
 0x1d0   : > { %2564 = vmatpush.bf16.msra.mxu2 %v3848_v32  ;;  %v3881_v32 = vld [vmem:[%s6150_s3 + $0x2f8] sm:$0xf0]  ;;  %v4187_v36 = vld [vmem:[%s6150_s3 + $0x6c] sm:$0xf] }
 0x1d1   : > { %2583 = vmatpush.bf16.msra.mxu3 %v3976_v43  ;;  %v3884_v43 = vor.u32 %v4267_v31, %v3881_v32  ;;  %v3705_v29 = vld [vmem:[%s6150_s3 + $0x198] sm:$0xf0]  ;;  %v4287_v32 = vld [vmem:[%s6150_s3 + $0x38c] sm:$0xf] }
 0x1d2   : > { %2527 = vmatpush.bf16.msra.mxu0 %v3576_v59  ;;  %v3640_v59 = vor.u32 %v4209_v40, %v3639_v37  ;;  %v3817_v35 = vld [vmem:[%s6150_s3 + $0x278] sm:$0xf0]  ;;  %v4219_v40 = vld [vmem:[%s6150_s3 + $0x16c] sm:$0xf] }
 0x1d3   : > { %2546 = vmatpush.bf16.msra.mxu1 %v3704_v60  ;;  %v4263_v60 = vld [vmem:[%s6150_s3 + $0x2cc] sm:$0xf]  ;;  %v3561_v37 = vld [vmem:[%s6150_s3 + $0x78] sm:$0xf0] }
 0x1d4   : > { %2565 = vmatpush.bf16.msra.mxu2 %v3832_v45  ;;  %v4203_v45 = vld [vmem:[%s6150_s3 + $0xec] sm:$0xf]  ;;  %v3868_v4 = vor.u32 %v4263_v60, %v3865_v61  ;;  %v3689_v41 = vld [vmem:[%s6150_s3 + $0x178] sm:$0xf0] }
 0x1d5   : > { %2584 = vmatpush.bf16.msra.mxu3 %v3960_v63  ;;  %2461 = vmatmul.bf16.gmra.mxu0 %v4742_v44  ;;  %v3628_v63 = vor.u32 %v4203_v45, %v3625_v46  ;;  %v4283_v45 = vld [vmem:[%s6150_s3 + $0x36c] sm:$0xf]  ;;  %v3945_v46 = vld [vmem:[%s6150_s3 + $0x378] sm:$0xf0] }
 0x1d6   : > { %2528 = vmatpush.bf16.msra.mxu0 %v3560_v7  ;;  %2480 = vmatmul.bf16.gmra.mxu1 %v4753_v50  ;;  %v3612_v7 = vor.u32 %v4199_v2, %v3609_v3  ;;  %v4183_v52 = vld [vmem:[%s6150_s3 + $0x4c] sm:$0xf]  ;;  %v3545_v55 = vld [vmem:[%s6150_s3 + $0x58] sm:$0xf0] }
 0x1d7   : > { %2547 = vmatpush.bf16.msra.mxu1 %v3688_v8  ;;  %2499 = vmatmul.bf16.gmra.mxu2 %v4755_v51  ;;  %v4295_v8 = vld [vmem:[%s6150_s3 + $0x3cc] sm:$0xf]  ;;  %v3673_v61 = vld [vmem:[%s6150_s3 + $0x158] sm:$0xf0] }
 0x1d8   : > { %2566 = vmatpush.bf16.msra.mxu2 %v3816_v0  ;;  %2518 = vmatmul.bf16.gmra.mxu3 %v4763_v56  ;;  %v3756_v0 = vor.u32 %v4235_v47, %v3753_v49  ;;  %v3996_v15 = vor.u32 %v4295_v8, %v3993_v9  ;;  %v4247_v47 = vld [vmem:[%s6150_s3 + $0x24c] sm:$0xf]  ;;  %v3801_v49 = vld [vmem:[%s6150_s3 + $0x258] sm:$0xf0] }
 0x1d9   : > { %2585 = vmatpush.bf16.msra.mxu3 %v3944_v11  ;;  %v3849_v11 = vld [vmem:[%s6150_s3 + $0x2b8] sm:$0xf0]  ;;  %v4215_v60 = vld [vmem:[%s6150_s3 + $0x14c] sm:$0xf] }
 0x1da   : > { %2529 = vmatpush.bf16.msra.mxu0 %v3544_v19  ;;  %v3852_v18 = vor.u32 %v4259_v10, %v3849_v11  ;;  %v4243_v2 = vld [vmem:[%s6150_s3 + $0x22c] sm:$0xf]  ;;  %v3785_v3 = vld [vmem:[%s6150_s3 + $0x238] sm:$0xf0]  ;;  %v3676_v6 = vor.u32 %v4215_v60, %v3673_v61 }
 0x1db   : > { %2548 = vmatpush.bf16.msra.mxu1 %v3672_v20  ;;  %v4291_v20 = vld [vmem:[%s6150_s3 + $0x3ac] sm:$0xf]  ;;  %v3529_v5 = vld [vmem:[%s6150_s3 + $0x38] sm:$0xf0]  ;;  %v3788_v10 = vor.u32 %v4243_v2, %v3785_v3 }
 0x1dc   : > { %2567 = vmatpush.bf16.msra.mxu2 %v3800_v12  ;;  %v4195_v12 = vld [vmem:[%s6150_s3 + $0xac] sm:$0xf]  ;;  %v3980_v27 = vor.u32 %v4291_v20, %v3977_v21  ;;  %v3657_v9 = vld [vmem:[%s6150_s3 + $0x138] sm:$0xf0] }
 0x1dd   : > { %2586 = vmatpush.bf16.msra.mxu3 %v3928_v23  ;;  %v3596_v19 = vor.u32 %v4195_v12, %v3593_v13  ;;  %v3833_v23 = vld [vmem:[%s6150_s3 + $0x298] sm:$0xf0]  ;;  %v4211_v8 = vld [vmem:[%s6150_s3 + $0x12c] sm:$0xf] }
 0x1de   : > { %2530 = vmatpush.bf16.msra.mxu0 %v3528_v33  ;;  %v3836_v30 = vor.u32 %v4255_v22, %v3833_v23  ;;  %v3961_v33 = vld [vmem:[%s6150_s3 + $0x398] sm:$0xf0]  ;;  %v4275_v12 = vld [vmem:[%s6150_s3 + $0x32c] sm:$0xf] }
 0x1df   : > { %2549 = vmatpush.bf16.msra.mxu1 %v3656_v34  ;;  %v4251_v34 = vld [vmem:[%s6150_s3 + $0x26c] sm:$0xf]  ;;  %v3913_v13 = vld [vmem:[%s6150_s3 + $0x338] sm:$0xf0] }
 0x1e0   : > { %2568 = vmatpush.bf16.msra.mxu2 %v3784_v24  ;;  %v4191_v24 = vld [vmem:[%s6150_s3 + $0x8c] sm:$0xf]  ;;  %v3820_v42 = vor.u32 %v4251_v34, %v3817_v35  ;;  %v3513_v17 = vld [vmem:[%s6150_s3 + $0x18] sm:$0xf0] }
 0x1e1   : > { %2587 = vmatpush.bf16.msra.mxu3 %v3912_v38  ;;  %v3580_v31 = vor.u32 %v4191_v24, %v3577_v25  ;;  %v3708_v38 = vor.u32 %v4223_v28, %v3705_v29  ;;  %v4175_v16 = vld [vmem:[%s6150_s3 + $0xc] sm:$0xf]  ;;  %v3641_v23 = vld [vmem:[%s6150_s3 + $0x118] sm:$0xf0] }
 0x1e2   : > { %2531 = vmatpush.bf16.msra.mxu0 %v3512_v58  ;;  %v3692_v58 = vor.u32 %v4219_v40, %v3689_v41  ;;  %v4207_v20 = vld [vmem:[%s6150_s3 + $0x10c] sm:$0xf]  ;;  %v3516_v22 = vor.u32 %v4175_v16, %v3513_v17  ;;  %v3897_v25 = vld [vmem:[%s6150_s3 + $0x318] sm:$0xf0]  ;;  %v2676_v41 = vld [vmem:[#allocation3] sm:$0xff] }
 0x1e3   : > { %2550 = vmatpush.bf16.msra.mxu1 %v3640_v59  ;;  %v3948_v59 = vor.u32 %v4283_v45, %v3945_v46  ;;  %v4271_v24 = vld [vmem:[%s6150_s3 + $0x30c] sm:$0xf] }
 0x1e4   : > { %2569 = vmatpush.bf16.msra.mxu2 %v3768_v39  ;;  %v3964_v39 = vor.u32 %v4287_v32, %v3961_v33  ;;  %v2681_v17 = vld [vmem:[#allocation3 + $0x28] sm:$0xff] }
 0x1e5   : > { %2588 = vmatpush.bf16.msra.mxu3 %v3896_v62  ;;  %2532 = vmatmul.bf16.vlgmr.msra.gmra.mxu0 %v4626_v48  ;;  %v3804_v62 = vor.u32 %v4247_v47, %v3801_v49 }
 0x1e6   : > { %2600 = vmatpush.bf16.msrb.mxu0 %v3628_v63  ;;  %2551 = vmatmul.bf16.vlgmr.msra.gmra.mxu1 %v4637_v53  ;;  %v3548_v63 = vor.u32 %v4183_v52, %v3545_v55 }
 0x1e7   : > { %2619 = vmatpush.bf16.msrb.mxu1 %v3756_v0  ;;  %2570 = vmatmul.bf16.vlgmr.msra.gmra.mxu2 %v4639_v54  ;;  %v4279_v0 = vld [vmem:[%s6150_s3 + $0x34c] sm:$0xf] }
 0x1e8   : > { %2638 = vmatpush.bf16.msrb.mxu2 %v3884_v43  ;;  %2589 = vmatmul.bf16.vlgmr.msra.gmra.mxu3 %v4647_v57  ;;  %v3564_v43 = vor.u32 %v4187_v36, %v3561_v37 }
 0x1e9   : > { %2657 = vmatpush.bf16.msrb.mxu3 %v4012_v1  ;;  %v3929_v1 = vld [vmem:[%s6150_s3 + $0x358] sm:$0xf0] }
 0x1ea   : > { %2601 = vmatpush.bf16.msrb.mxu0 %v3612_v7  ;;  %v3932_v7 = vor.u32 %v4279_v0, %v3929_v1  ;;  %v2680_v0 = vld [vmem:[#allocation3 + $0x20] sm:$0xff] }
 0x1eb   : > { %2620 = vmatpush.bf16.msrb.mxu1 %v3740_v14  ;;  %v4239_v14 = vld [vmem:[%s6150_s3 + $0x20c] sm:$0xf] }
 0x1ec   : > { %2639 = vmatpush.bf16.msrb.mxu2 %v3868_v4  ;;  %v4179_v4 = vld [vmem:[%s6150_s3 + $0x2c] sm:$0xf] }
 0x1ed   : > { %2658 = vmatpush.bf16.msrb.mxu3 %v3996_v15  ;;  %v3532_v11 = vor.u32 %v4179_v4, %v3529_v5  ;;  %v3769_v15 = vld [vmem:[%s6150_s3 + $0x218] sm:$0xf0] }
 0x1ee   : > { %2602 = vmatpush.bf16.msrb.mxu0 %v3596_v19  ;;  %v3916_v19 = vor.u32 %v4275_v12, %v3913_v13  ;;  %v3772_v21 = vor.u32 %v4239_v14, %v3769_v15 }
 0x1ef   : > { %2621 = vmatpush.bf16.msrb.mxu1 %v3724_v26  ;;  %v3644_v26 = vor.u32 %v4207_v20, %v3641_v23 }
 0x1f0   : > { %2640 = vmatpush.bf16.msrb.mxu2 %v3852_v18  ;;  %v3660_v18 = vor.u32 %v4211_v8, %v3657_v9 }
 0x1f1   : > { %2659 = vmatpush.bf16.msrb.mxu3 %v3980_v27  ;;  %v3900_v27 = vor.u32 %v4271_v24, %v3897_v25 }
 0x1f2   : > { %2603 = vmatpush.bf16.msrb.mxu0 %v3580_v31 }
 0x1f3   : > { %2622 = vmatpush.bf16.msrb.mxu1 %v3708_v38 }
 0x1f4   : > { %2641 = vmatpush.bf16.msrb.mxu2 %v3836_v30 }
 0x1f5   : > { %2660 = vmatpush.bf16.msrb.mxu3 %v3964_v39  ;;  %2537 = vmatmul.bf16.gmra.mxu0 %v4742_v44 }
 0x1f6   : > { %2604 = vmatpush.bf16.msrb.mxu0 %v3564_v43  ;;  %2556 = vmatmul.bf16.gmra.mxu1 %v4753_v50 }
 0x1f7   : > { %2623 = vmatpush.bf16.msrb.mxu1 %v3692_v58  ;;  %2575 = vmatmul.bf16.gmra.mxu2 %v4755_v51 }
 0x1f8   : > { %2642 = vmatpush.bf16.msrb.mxu2 %v3820_v42  ;;  %2594 = vmatmul.bf16.gmra.mxu3 %v4763_v56  ;;  %v6112_v42 = vld [vmem:[%s6151_s4] sm:$0xf] }
 0x1f9   : > { %2661 = vmatpush.bf16.msrb.mxu3 %v3948_v59  ;;  %v6115_v49 = vperm.slane %v6112_v42, 0  ;;  %v6119_v3 = vperm.slane %v6112_v42, 1 }
 0x1fa   : > { %2605 = vmatpush.bf16.msrb.mxu0 %v3548_v63 }
 0x1fb   : > { %2624 = vmatpush.bf16.msrb.mxu1 %v3676_v6 }
 0x1fc   : > { %2643 = vmatpush.bf16.msrb.mxu2 %v3804_v62  ;;  %v2677_v62 = vld [vmem:[#allocation3 + $0x8] sm:$0xff] }
 0x1fd   : > { %2662 = vmatpush.bf16.msrb.mxu3 %v3932_v7 }
 0x1fe   : > { %2606 = vmatpush.bf16.msrb.mxu0 %v3532_v11 }
 0x1ff   : > { %2625 = vmatpush.bf16.msrb.mxu1 %v3660_v18 }
 0x200   : > { %2644 = vmatpush.bf16.msrb.mxu2 %v3788_v10 }
 0x201   : > { %2663 = vmatpush.bf16.msrb.mxu3 %v3916_v19 }
 0x202   : > { %2607 = vmatpush.bf16.msrb.mxu0 %v3516_v22  ;;  %v2684_v22 = vld [vmem:[#allocation3 + $0x40] sm:$0xff] }
 0x203   : > { %2626 = vmatpush.bf16.msrb.mxu1 %v3644_v26 }
 0x204   : > { %2645 = vmatpush.bf16.msrb.mxu2 %v3772_v21 }
 0x205   : > { %2664 = vmatpush.bf16.msrb.mxu3 %v3900_v27  ;;  %2608 = vmatmul.bf16.vlgmr.msrb.gmra.mxu0 %v4626_v48 }
 0x206   : > { %2627 = vmatmul.bf16.vlgmr.msrb.gmra.mxu1 %v4637_v53 }
 0x207   : > { %2646 = vmatmul.bf16.vlgmr.msrb.gmra.mxu2 %v4639_v54 }
 0x208   : > { %2665 = vmatmul.bf16.vlgmr.msrb.gmra.mxu3 %v4647_v57 }
 0x215   : > { %2613 = vmatmul.bf16.gmra.mxu0 %v4742_v44 }
 0x216   : > { %2632 = vmatmul.bf16.gmra.mxu1 %v4753_v50 }
 0x217   : > { %2651 = vmatmul.bf16.gmra.mxu2 %v4755_v51 }
 0x218   : > { %2670 = vmatmul.bf16.gmra.mxu3 %v4763_v56 }
 0x222   : > { %v2381_v28 = vpop.f32.mrf.mxu0 }
 0x223   : > { %v2400_v29 = vpop.f32.mrf.mxu1 }
 0x224   : > { %v2401_v37 = vadd.f32 %v2400_v29, %v2381_v28 }
 0x22a   : > { %v2419_v30 = vpop.f32.mrf.mxu2  ;;  %v2383_v32 = vpop.f32.mrf.mxu0 }
 0x22b   : > { %v2438_v31 = vpop.f32.mrf.mxu3  ;;  %v2402_v48 = vpop.f32.mrf.mxu1  ;;  %v2420_v50 = vadd.f32 %v2419_v30, %v2401_v37 }
 0x22c   : > { %v2403_v43 = vadd.f32 %v2402_v48, %v2383_v32 }
 0x22d   : > { %v2439_v40 = vadd.f32 %v2438_v31, %v2420_v50  ;;  %v2688_v50 = vld [vmem:[#allocation3 + $0x60] sm:$0xff] }
 0x22f   : > { %v2692_v47 = vadd.f32 %v2676_v41, %v2439_v40 }
 0x231   : > { %v2718_v63 = vadd.f32 %v6115_v49, %v2692_v47 }
 0x232   : > { %v2421_v33 = vpop.f32.mrf.mxu2  ;;  %v2386_v34 = vpop.f32.mrf.mxu0 }
 0x233   : > { %v2440_v53 = vpop.f32.mrf.mxu3  ;;  %v2405_v54 = vpop.f32.mrf.mxu1  ;;  %v2422_v46 = vadd.f32 %v2421_v33, %v2403_v43  ;;  %v2734_v6 = vmul.f32 0.2, %v2718_v63 }
 0x234   : > { %v2406_v1 = vadd.f32 %v2405_v54, %v2386_v34 }
 0x235   : > { %v2441_v61 = vadd.f32 %v2440_v53, %v2422_v46  ;;  %v2750_v18 = vmax.f32 %v2718_v63, %v2734_v6 }
 0x237   : > { %v2696_v5 = vadd.f32 %v2680_v0, %v2441_v61 }
 0x239   : > { %v2722_v16 = vadd.f32 %v6115_v49, %v2696_v5 }
 0x23a   : > { %v2424_v35 = vpop.f32.mrf.mxu2  ;;  %v2388_v36 = vpop.f32.mrf.mxu0 }
 0x23b   : > { %v2443_v57 = vpop.f32.mrf.mxu3  ;;  %v2407_v44 = vpop.f32.mrf.mxu1  ;;  %v2425_v7 = vadd.f32 %v2424_v35, %v2406_v1  ;;  %v2738_v27 = vmul.f32 0.2, %v2722_v16  ;;  %v2685_v35 = vld [vmem:[#allocation3 + $0x48] sm:$0xff] }
 0x23c   : > { %v2408_v23 = vadd.f32 %v2407_v44, %v2388_v36 }
 0x23d   : > { %v2444_v19 = vadd.f32 %v2443_v57, %v2425_v7  ;;  %v2754_v54 = vmax.f32 %v2722_v16, %v2738_v27 }
 0x23f   : > { %v2700_v28 = vadd.f32 %v2684_v22, %v2444_v19 }
 0x241   : > { %v2726_v57 = vadd.f32 %v6115_v49, %v2700_v28 }
 0x242   : > { %v2426_v38 = vpop.f32.mrf.mxu2  ;;  %v2457_v39 = vpop.f32.mrf.mxu0 }
 0x243   : > { %v2445_v51 = vpop.f32.mrf.mxu3  ;;  %v2476_v56 = vpop.f32.mrf.mxu1  ;;  %v2427_v29 = vadd.f32 %v2426_v38, %v2408_v23 }
 0x244   : > { %v2477_v45 = vadd.f32 %v2476_v56, %v2457_v39  ;;  %v2742_v56 = vmul.f32 0.2, %v2726_v57 }
 0x245   : > { %v2446_v36 = vadd.f32 %v2445_v51, %v2427_v29 }
 0x246   : > { %v2758_v51 = vmax.f32 %v2726_v57, %v2742_v56  ;;  %v2682_v57 = vld [vmem:[#allocation3 + $0x30] sm:$0xff] }
 0x247   : > { %v2704_v40 = vadd.f32 %v2688_v50, %v2446_v36 }
 0x24a   : > { %v2495_v52 = vpop.f32.mrf.mxu2  ;;  %v2459_v59 = vpop.f32.mrf.mxu0 }
 0x24b   : > { %v2514_v55 = vpop.f32.mrf.mxu3  ;;  %v2496_v58 = vadd.f32 %v2495_v52, %v2477_v45  ;;  %v2478_v60 = vpop.f32.mrf.mxu1 }
 0x24c   : > { %v2479_v9 = vadd.f32 %v2478_v60, %v2459_v59  ;;  %v2689_v59 = vld [vmem:[#allocation3 + $0x68] sm:$0xff]  ;;  %v2730_v60 = vadd.f32 %v6115_v49, %v2704_v40 }
 0x24d   : > { %v2515_v2 = vadd.f32 %v2514_v55, %v2496_v58 }
 0x24e   : > { %v2746_v1 = vmul.f32 0.2, %v2730_v60 }
 0x24f   : > { %v2693_v4 = vadd.f32 %v2677_v62, %v2515_v2 }
 0x251   : > { %v2719_v8 = vadd.f32 %v6119_v3, %v2693_v4 }
 0x252   : > { %v2497_v10 = vpop.f32.mrf.mxu2  ;;  %v2462_v14 = vpop.f32.mrf.mxu0 }
 0x253   : > { %v2516_v11 = vpop.f32.mrf.mxu3  ;;  %v2735_v12 = vmul.f32 0.2, %v2719_v8  ;;  %v2498_v13 = vadd.f32 %v2497_v10, %v2479_v9  ;;  %v2481_v15 = vpop.f32.mrf.mxu1  ;;  %v2762_v9 = vmax.f32 %v2730_v60, %v2746_v1 }
 0x254   : > { %v2482_v26 = vadd.f32 %v2481_v15, %v2462_v14 }
 0x255   : > { %v2751_v20 = vmax.f32 %v2719_v8, %v2735_v12  ;;  %v2517_v21 = vadd.f32 %v2516_v11, %v2498_v13 }
 0x257   : > { %v2766_v24 = vpack.c.bf16 %v2751_v20, %v2750_v18  ;;  %v2697_v25 = vadd.f32 %v2681_v17, %v2517_v21 }
 0x259   : > { %2774 = vst [vmem:[%s4598_s15] sm:$0xff] %v2766_v24  ;;  %v2723_v30 = vadd.f32 %v6119_v3, %v2697_v25  ;;  %v2678_v25 = vld [vmem:[#allocation3 + $0x10] sm:$0xff] }
 0x25a   : > { %v2500_v31 = vpop.f32.mrf.mxu2  ;;  %v2464_v53 = vpop.f32.mrf.mxu0 }
 0x25b   : > { %v2519_v32 = vpop.f32.mrf.mxu3  ;;  %v2739_v48 = vmul.f32 0.2, %v2723_v30  ;;  %v2501_v33 = vadd.f32 %v2500_v31, %v2482_v26  ;;  %v2483_v34 = vpop.f32.mrf.mxu1 }
 0x25c   : > { %v2484_v43 = vadd.f32 %v2483_v34, %v2464_v53 }
 0x25d   : > { %v2755_v44 = vmax.f32 %v2723_v30, %v2739_v48  ;;  %v2520_v37 = vadd.f32 %v2519_v32, %v2501_v33  ;;  %v6133_v30 = vperm.slane %v6112_v42, 2 }
 0x25f   : > { %v2768_v39 = vpack.c.bf16 %v2755_v44, %v2754_v54  ;;  %v2701_v38 = vadd.f32 %v2685_v35, %v2520_v37  ;;  %v2679_v54 = vld [vmem:[#allocation3 + $0x18] sm:$0xff]  ;;  %v2713_v37 = vperm.slane %v6112_v42, 3 }
 0x261   : > { %2776 = vst [vmem:[%s4598_s15 + $0x10] sm:$0xff] %v2768_v39  ;;  %v2727_v41 = vadd.f32 %v6119_v3, %v2701_v38 }
 0x262   : > { %v2502_v45 = vpop.f32.mrf.mxu2  ;;  %v2533_v55 = vpop.f32.mrf.mxu0 }
 0x263   : > { %v2521_v46 = vpop.f32.mrf.mxu3  ;;  %v2743_v47 = vmul.f32 0.2, %v2727_v41  ;;  %v2503_v52 = vadd.f32 %v2502_v45, %v2484_v43  ;;  %v2552_v58 = vpop.f32.mrf.mxu1 }
 0x264   : > { %v2553_v19 = vadd.f32 %v2552_v58, %v2533_v55  ;;  %v2683_v55 = vld [vmem:[#allocation3 + $0x38] sm:$0xff] }
 0x265   : > { %v2759_v61 = vmax.f32 %v2727_v41, %v2743_v47  ;;  %v2522_v62 = vadd.f32 %v2521_v46, %v2503_v52 }
 0x267   : > { %v2770_v63 = vpack.c.bf16 %v2759_v61, %v2758_v51  ;;  %v2705_v0 = vadd.f32 %v2689_v59, %v2522_v62  ;;  %v2686_v62 = vld [vmem:[#allocation3 + $0x50] sm:$0xff] }
 0x269   : > { %2778 = vst [vmem:[%s4598_s15 + $0x20] sm:$0xff] %v2770_v63  ;;  %v2731_v2 = vadd.f32 %v6119_v3, %v2705_v0 }
 0x26a   : > { %v2571_v4 = vpop.f32.mrf.mxu2  ;;  %v2535_v7 = vpop.f32.mrf.mxu0 }
 0x26b   : > { %v2590_v5 = vpop.f32.mrf.mxu3  ;;  %v2747_v6 = vmul.f32 0.2, %v2731_v2  ;;  %v2554_v8 = vpop.f32.mrf.mxu1  ;;  %v2572_v20 = vadd.f32 %v2571_v4, %v2553_v19 }
 0x26c   : > { %v2555_v26 = vadd.f32 %v2554_v8, %v2535_v7 }
 0x26d   : > { %v2763_v10 = vmax.f32 %v2731_v2, %v2747_v6  ;;  %v2591_v24 = vadd.f32 %v2590_v5, %v2572_v20 }
 0x26f   : > { %v2772_v11 = vpack.c.bf16 %v2763_v10, %v2762_v9  ;;  %v2694_v29 = vadd.f32 %v2678_v25, %v2591_v24 }
 0x271   : > { %2780 = vst [vmem:[%s4598_s15 + $0x30] sm:$0xff] %v2772_v11  ;;  %v2720_v35 = vadd.f32 %v6133_v30, %v2694_v29 }
 0x272   : > { %v2573_v12 = vpop.f32.mrf.mxu2  ;;  %v2538_v13 = vpop.f32.mrf.mxu0 }
 0x273   : > { %v2592_v49 = vpop.f32.mrf.mxu3  ;;  %v2557_v14 = vpop.f32.mrf.mxu1  ;;  %v2574_v28 = vadd.f32 %v2573_v12, %v2555_v26  ;;  %v2736_v38 = vmul.f32 0.2, %v2720_v35 }
 0x274   : > { %v2558_v36 = vadd.f32 %v2557_v14, %v2538_v13 }
 0x275   : > { %v2593_v34 = vadd.f32 %v2592_v49, %v2574_v28  ;;  %v2752_v51 = vmax.f32 %v2720_v35, %v2736_v38  ;;  %v2687_v49 = vld [vmem:[#allocation3 + $0x58] sm:$0xff] }
 0x277   : > { %v2698_v39 = vadd.f32 %v2682_v57, %v2593_v34 }
 0x279   : > { %v2724_v52 = vadd.f32 %v6133_v30, %v2698_v39 }
 0x27a   : > { %v2576_v15 = vpop.f32.mrf.mxu2  ;;  %v2540_v17 = vpop.f32.mrf.mxu0 }
 0x27b   : > { %v2595_v16 = vpop.f32.mrf.mxu3  ;;  %v2559_v18 = vpop.f32.mrf.mxu1  ;;  %v2577_v56 = vadd.f32 %v2576_v15, %v2558_v36  ;;  %v2740_v4 = vmul.f32 0.2, %v2724_v52 }
 0x27c   : > { %v2560_v63 = vadd.f32 %v2559_v18, %v2540_v17  ;;  %v2690_v17 = vld [vmem:[#allocation3 + $0x70] sm:$0xff] }
 0x27d   : > { %v2596_v60 = vadd.f32 %v2595_v16, %v2577_v56  ;;  %v2756_v12 = vmax.f32 %v2724_v52, %v2740_v4 }
 0x27f   : > { %v2702_v5 = vadd.f32 %v2686_v62, %v2596_v60 }
 0x281   : > { %v2728_v13 = vadd.f32 %v6133_v30, %v2702_v5 }
 0x282   : > { %v2578_v3 = vpop.f32.mrf.mxu2  ;;  %v2609_v22 = vpop.f32.mrf.mxu0 }
 0x283   : > { %v2597_v21 = vpop.f32.mrf.mxu3  ;;  %v2628_v23 = vpop.f32.mrf.mxu1  ;;  %v2579_v6 = vadd.f32 %v2578_v3, %v2560_v63  ;;  %v2744_v3 = vmul.f32 0.2, %v2728_v13 }
 0x284   : > { %v2629_v27 = vadd.f32 %v2628_v23, %v2609_v22 }
 0x285   : > { %v2598_v14 = vadd.f32 %v2597_v21, %v2579_v6  ;;  %v2760_v21 = vmax.f32 %v2728_v13, %v2744_v3 }
 0x287   : > { %v2706_v23 = vadd.f32 %v2690_v17, %v2598_v14 }
 0x28a   : > { %v2647_v31 = vpop.f32.mrf.mxu2  ;;  %v2611_v33 = vpop.f32.mrf.mxu0 }
 0x28b   : > { %v2666_v32 = vpop.f32.mrf.mxu3  ;;  %v2648_v48 = vadd.f32 %v2647_v31, %v2629_v27  ;;  %v2630_v53 = vpop.f32.mrf.mxu1  ;;  %v2691_v31 = vld [vmem:[#allocation3 + $0x78] sm:$0xff] }
 0x28c   : > { %v2631_v41 = vadd.f32 %v2630_v53, %v2611_v33 }
 0x28d   : > { %v2667_v44 = vadd.f32 %v2666_v32, %v2648_v48  ;;  %v2732_v32 = vadd.f32 %v6133_v30, %v2706_v23 }
 0x28f   : > { %v2695_v50 = vadd.f32 %v2679_v54, %v2667_v44  ;;  %v2748_v54 = vmul.f32 0.2, %v2732_v32 }
 0x291   : > { %v2721_v40 = vadd.f32 %v2713_v37, %v2695_v50  ;;  %v2764_v36 = vmax.f32 %v2732_v32, %v2748_v54 }
 0x292   : > { %v2649_v43 = vpop.f32.mrf.mxu2  ;;  %v2614_v58 = vpop.f32.mrf.mxu0 }
 0x293   : > { %v2668_v45 = vpop.f32.mrf.mxu3  ;;  %v2737_v46 = vmul.f32 0.2, %v2721_v40  ;;  %v2650_v47 = vadd.f32 %v2649_v43, %v2631_v41  ;;  %v2633_v59 = vpop.f32.mrf.mxu1 }
 0x294   : > { %v2634_v2 = vadd.f32 %v2633_v59, %v2614_v58 }
 0x295   : > { %v2753_v61 = vmax.f32 %v2721_v40, %v2737_v46  ;;  %v2669_v42 = vadd.f32 %v2668_v45, %v2650_v47 }
 0x297   : > { %v2767_v0 = vpack.c.bf16 %v2753_v61, %v2752_v51  ;;  %v2699_v1 = vadd.f32 %v2683_v55, %v2669_v42 }
 0x299   : > { %2775 = vst [vmem:[%s4598_s15 + $0x8] sm:$0xff] %v2767_v0  ;;  %v2725_v7 = vadd.f32 %v2713_v37, %v2699_v1 }
 0x29a   : > { %v2652_v8 = vpop.f32.mrf.mxu2  ;;  %v2616_v18 = vpop.f32.mrf.mxu0 }
 0x29b   : > { %v2671_v9 = vpop.f32.mrf.mxu3  ;;  %v2741_v10 = vmul.f32 0.2, %v2725_v7  ;;  %v2653_v11 = vadd.f32 %v2652_v8, %v2634_v2  ;;  %v2635_v19 = vpop.f32.mrf.mxu1 }
 0x29c   : > { %v2636_v25 = vadd.f32 %v2635_v19, %v2616_v18 }
 0x29d   : > { %v2757_v15 = vmax.f32 %v2725_v7, %v2741_v10  ;;  %v2672_v16 = vadd.f32 %v2671_v9, %v2653_v11 }
 0x29f   : > { %v2769_v20 = vpack.c.bf16 %v2757_v15, %v2756_v12  ;;  %v2703_v22 = vadd.f32 %v2687_v49, %v2672_v16 }
 0x2a1   : > { %2777 = vst [vmem:[%s4598_s15 + $0x18] sm:$0xff] %v2769_v20  ;;  %v2729_v24 = vadd.f32 %v2713_v37, %v2703_v22 }
 0x2a2   : > { %v2654_v26 = vpop.f32.mrf.mxu2 }
 0x2a3   : > { %v2745_v27 = vmul.f32 0.2, %v2729_v24  ;;  %v2655_v28 = vadd.f32 %v2654_v26, %v2636_v25  ;;  %v2673_v29 = vpop.f32.mrf.mxu3 }
 0x2a5   : > { %v2761_v48 = vmax.f32 %v2729_v24, %v2745_v27  ;;  %v2674_v33 = vadd.f32 %v2673_v29, %v2655_v28 }
 0x2a7   : > { %v2771_v53 = vpack.c.bf16 %v2761_v48, %v2760_v21  ;;  %v2707_v34 = vadd.f32 %v2691_v31, %v2674_v33 }
 0x2a9   : > { %2779 = vst [vmem:[%s4598_s15 + $0x28] sm:$0xff] %v2771_v53  ;;  %v2733_v35 = vadd.f32 %v2713_v37, %v2707_v34 }
 0x2ab   : > { %v2749_v57 = vmul.f32 0.2, %v2733_v35 }
 0x2ad   : > { %v2765_v44 = vmax.f32 %v2733_v35, %v2749_v57 }
 0x2af   : > { %v2773_v50 = vpack.c.bf16 %v2765_v44, %v2764_v36 }
 0x2b1   : > { %2781 = vst [vmem:[%s4598_s15 + $0x38] sm:$0xff] %v2773_v50 }
 0x2b2 PF: > { %s23_s22 = sadd.s32 1, %s4343_s22  }
 0x2b3   : > { %p20_p5 = scmp.ge.s32.totalorder %s23_s22, 4  }
 0x2b5   :  { %22 = sbr.rel (!%p20_p5) target bundleno = 7 (0x7), region = 105 }

// kernel: dgcnn_forward.11
= control target key start
LH: loop header
LB: loop body
LE: loop exit
PB: predicated region body
PF: predicated region fallthrough
CT: control target
= control target key end

     0   :  { %s3980_s0 = inlined_call_operand.vmem [shape: bf16[2,32,256], index: 0, kind: input, shape index: {}]   ;;  %s3981_s1 = inlined_call_operand.vmem [shape: bf16[2,32,256], index: 1, kind: input, shape index: {}]   ;;  %s3982_s2 = inlined_call_operand.vmem [shape: bf16[2,32,512], index: 2, kind: input, shape index: {}]   ;;  %s3983_s3 = inlined_call_operand.vmem [shape: bf16[2,32,512], index: 3, kind: input, shape index: {}]   ;;  %s3984_s4 = inlined_call_operand.vmem [shape: bf16[256,64], index: 4, kind: input, shape index: {}]   ;;  %s3985_s5 = inlined_call_operand.vmem [shape: bf16[256,64], index: 5, kind: input, shape index: {}]   ;;  %s3986_s6 = inlined_call_operand.vmem [shape: bf16[512,64], index: 6, kind: input, shape index: {}]   ;;  %s3987_s7 = inlined_call_operand.vmem [shape: bf16[512,64], index: 7, kind: input, shape index: {}]   ;;  %s3988_s8 = inlined_call_operand.vmem [shape: f32[1,64], index: 8, kind: input, shape index: {}]   ;;  %s3989_s9 = inlined_call_operand.vmem [shape: bf16[64,256], index: 9, kind: input, shape index: {}]   ;;  %s3990_s10 = inlined_call_operand.vmem [shape: bf16[64,256], index: 10, kind: input, shape index: {}]   ;;  %s3991_s11 = inlined_call_operand.vmem [shape: f32[1,256], index: 11, kind: input, shape index: {}]   ;;  %s3992_s12 = inlined_call_operand.vmem [shape: bf16[256,128], index: 12, kind: input, shape index: {}]   ;;  %s3993_s13 = inlined_call_operand.vmem [shape: f32[1,128], index: 13, kind: input, shape index: {}]   ;;  %s3994_s14 = inlined_call_operand.vmem [shape: bf16[128,8], index: 14, kind: input, shape index: {}]   ;;  %s3995_s15 = inlined_call_operand.vmem [shape: f32[1,8], index: 15, kind: input, shape index: {}]   ;;  %s3996_s16 = inlined_call_operand.hbm [shape: f32[2,1,8], index: 16, kind: output, shape index: {}]  }
   0x1   :  { %4005 = sst [smem:[#allocation12_spill]] %s3980_s0 }
   0x2   :  { %4006 = sst [smem:[#allocation13_spill]] %s3981_s1 }
   0x3   :  { %21 = vsyncpa [#allocation3], 0 }
   0x4   :  { %23 = vsyncpa [#allocation3 + $0x1], 0  ;;  %s3306_s21 = smov 0   ;;  %s3308_s22 = smov 0  }
   0x5   :  { %s3310_s23 = smov 0   ;;  %s3312_s24 = smov 0  }
   0x6 LB: > { %4007 = sst [smem:[#allocation5_spill]] %s3206_s21  ;;  %s3327_s25 = sadd.s32 4294967295, %s3218_s24   ;;  %s3218_s24 = sphi %s3312_s24, %s4022_s24   ;;  %s3214_s23 = sphi %s3310_s23, %s4024_s23   ;;  %s3210_s22 = sphi %s3308_s22, %s4026_s22   ;;  %s3206_s21 = sphi %s3306_s21, %s4025_s21  }
   0x7   : > { %4008 = sst [smem:[#allocation6_spill]] %s3214_s23  ;;  %s2291_s26 = sadd.s32 4294967294, %s3218_s24  }
   0x8   : > { %4009 = sst [smem:[#allocation7_spill]] %s3218_s24  ;;  %s3331_s27 = sadd.s32 1, %s3218_s24  }
   0x9   : > { %4010 = sst [smem:[#allocation8_spill]] %s3331_s27  ;;  %s392_s28 = sadd.s32 1, %s3214_s23 }
   0xa   : > { %s389_s29 = ssub.s32 %s3218_s24, %s3331_s27  ;;  %p402_p0 = scmp.ne.s32.totalorder %s3214_s23, %s3210_s22 }
   0xb   : > { %p390_p1 = scmp.eq.s32.totalorder %s389_s29, 0  ;;  %p403_p2 = scmp.eq.s32.totalorder %s3327_s25, 1 }
   0xc   : > { %p408_p3 = scmp.ne.s32.totalorder %s3210_s22, %s3206_s21  ;;  %p409_p4 = scmp.eq.s32.totalorder %s2291_s26, 1 }
   0xd   : > { %s3342_s30 = scalar_select %p390_p1, %s3214_s23, %s392_s28  }
   0xe   : > { %p3344_p5 = por %p403_p2, %p402_p0  ;;  %p3348_p6 = por %p409_p4, %p408_p3 }
   0xf   : > { %4011 = sst [smem:[#allocation9_spill]] %s3342_s30  ;;  %p2294_p7 = scmp.ge.s32.totalorder %s3218_s24, 1 }
  0x10   : > { %s4012_s0 = scalar_select %p3344_p5, 1, 0 }
  0x11   : > { %s4014_s17 = scalar_select %p3348_p6, 1, 0 }
  0x12   : > { %4013 = sst [smem:[#allocation10_spill]] %s4012_s0  ;;  %p495_p8 = scmp.lt.s32.totalorder %s3218_s24, 3 }
  0x13   : > { %4015 = sst [smem:[#allocation11_spill]] %s4014_s17 }
  0x14   : > { %p496_p9 = pnand %p2294_p7, %p495_p8 }
  0x15   : > { %p559_p10 = scmp.lt.s32.totalorder (!%p496_p9), %s3327_s25, 1  ;;  %s4016_s1 = sld [smem:[#allocation13_spill]] (!%p496_p9) }
  0x16   : > { %499 = sbr.rel (%p496_p9) target bundleno = 744 (0x2e8), region = 84  ;;  %s4017_s26 = sld [smem:[#allocation12_spill]] (!%p496_p9) }
  0x17   : > { %s557_s0 = sand.u32 (!%p496_p9), 1, %s3210_s22   ;;  %s2196_s20 = scalar_lea.hbm (!%p496_p9), %s3996_s16, %s3327_s25 }
  0x18   : > { %s2200_s23 = sshll.u32 (!%p496_p9), %s2196_s20, 4  ;;  %s2201_s23 = int_to_ptr.hbm [resolvable:$true] %s2200_s23 }
  0x19   : > { %s3170_s21 = sshra.s32 (!%p496_p9), %s2201_s23, 4  ;;  %s3171_s21 = int_to_ptr.hbm [resolvable:$true] %s3170_s21 }
  0x1a   : > { %s3172_s19 = scalar_lea.hbm (!%p496_p9), %s3171_s21, 1  ;;  %p3177_p0 = scmp.lt.s32.totalorder (!%p496_p9), %s3171_s21, %s3996_s16 }
  0x1b   : > { %v2984_v0 = vld [vmem:[%s3985_s5 + $0x38] sm:$0xff]  ;;  %v2983_v4 = vld [vmem:[%s3985_s5 + $0x30] sm:$0xff]  ;;  %v2982_v8 = vld [vmem:[%s3985_s5 + $0x28] sm:$0xff]  ;;  %s3416_s18 = scalar_select %p559_p10, %s3327_s25, 1  ;;  %vm1744_vm0 = vcmask 523264   ;;  %vm2185_vm2 = vcmask 57344  }
  0x1c   : > { %v2992_v1 = vld [vmem:[%s3985_s5 + $0x78] sm:$0xff]  ;;  %768 = vmatpush.bf16.msra.mxu0 %v2984_v0  ;;  %v2991_v5 = vld [vmem:[%s3985_s5 + $0x70] sm:$0xff]  ;;  %v2990_v9 = vld [vmem:[%s3985_s5 + $0x68] sm:$0xff]  ;;  %p3173_p11 = scmp.ne.s32.totalorder %s3171_s21, %s3172_s19 }
  0x1d   : > { %v2964_v2 = vld [vmem:[%s3984_s4 + $0x38] sm:$0xff]  ;;  %787 = vmatpush.bf16.msra.mxu1 %v2992_v1  ;;  %v2963_v6 = vld [vmem:[%s3984_s4 + $0x30] sm:$0xff]  ;;  %v2962_v10 = vld [vmem:[%s3984_s4 + $0x28] sm:$0xff]  ;;  %s2949_s17 = sshll.u32 %s3416_s18, 5  ;;  %s2951_s30 = sshll.u32 %s3416_s18, 6 }
  0x1e   : > { %v2972_v3 = vld [vmem:[%s3984_s4 + $0x78] sm:$0xff]  ;;  %922 = vmatpush.bf16.msra.mxu2 %v2964_v2  ;;  %v2971_v7 = vld [vmem:[%s3984_s4 + $0x70] sm:$0xff]  ;;  %v2970_v11 = vld [vmem:[%s3984_s4 + $0x68] sm:$0xff]  ;;  %s3440_s29 = scalar_lea.vmem %s4016_s1, %s2949_s17  ;;  %s3451_s24 = scalar_lea.vmem %s4017_s26, %s2949_s17 }
  0x1f   : > { %941 = vmatpush.bf16.msra.mxu3 %v2972_v3  ;;  %v2981_v12 = vld [vmem:[%s3985_s5 + $0x20] sm:$0xff]  ;;  %v2980_v16 = vld [vmem:[%s3985_s5 + $0x18] sm:$0xff]  ;;  %v2979_v20 = vld [vmem:[%s3985_s5 + $0x10] sm:$0xff]  ;;  %s3565_s27 = scalar_lea.vmem %s3982_s2, %s2951_s30  ;;  %s3693_s17 = scalar_lea.vmem %s3983_s3, %s2951_s30 }
  0x20   : > { %769 = vmatpush.bf16.msra.mxu0 %v2983_v4  ;;  %v2989_v13 = vld [vmem:[%s3985_s5 + $0x60] sm:$0xff]  ;;  %v2988_v17 = vld [vmem:[%s3985_s5 + $0x58] sm:$0xff]  ;;  %v2987_v21 = vld [vmem:[%s3985_s5 + $0x50] sm:$0xff]  ;;  %s558_s26 = scalar_lea.vmem [#allocation2], %s557_s0  ;;  %p3174_p12 = pnand %p3173_p11, %p3344_p5 }
  0x21   : > { %788 = vmatpush.bf16.msra.mxu1 %v2991_v5  ;;  %v2961_v14 = vld [vmem:[%s3984_s4 + $0x20] sm:$0xff]  ;;  %v2960_v18 = vld [vmem:[%s3984_s4 + $0x18] sm:$0xff]  ;;  %v2959_v22 = vld [vmem:[%s3984_s4 + $0x10] sm:$0xff]  ;;  %s2198_s28 = sshll.u32 %s558_s26, 4  ;;  %s2199_s28 = int_to_ptr.vmem [resolvable:$true] %s2198_s28 }
  0x22   : > { %923 = vmatpush.bf16.msra.mxu2 %v2963_v6  ;;  %v2969_v15 = vld [vmem:[%s3984_s4 + $0x60] sm:$0xff]  ;;  %v2968_v19 = vld [vmem:[%s3984_s4 + $0x58] sm:$0xff]  ;;  %v2967_v23 = vld [vmem:[%s3984_s4 + $0x50] sm:$0xff]  ;;  %p3175_p13 = pneg %p3174_p12 }
  0x23   : > { %942 = vmatpush.bf16.msra.mxu3 %v2971_v7  ;;  %v2978_v24 = vld [vmem:[%s3985_s5 + $0x8] sm:$0xff]  ;;  %v2977_v28 = vld [vmem:[%s3985_s5] sm:$0xff]  ;;  %v3024_v40 = vld [vmem:[%s3986_s6 + $0xb8] sm:$0xff] }
  0x24   : > { %770 = vmatpush.bf16.msra.mxu0 %v2982_v8  ;;  %v2986_v25 = vld [vmem:[%s3985_s5 + $0x48] sm:$0xff]  ;;  %v2985_v29 = vld [vmem:[%s3985_s5 + $0x40] sm:$0xff]  ;;  %v3008_v41 = vld [vmem:[%s3986_s6 + $0x38] sm:$0xff] }
  0x25   : > { %789 = vmatpush.bf16.msra.mxu1 %v2990_v9  ;;  %v2958_v26 = vld [vmem:[%s3984_s4 + $0x8] sm:$0xff]  ;;  %v2957_v30 = vld [vmem:[%s3984_s4] sm:$0xff]  ;;  %v3016_v46 = vld [vmem:[%s3986_s6 + $0x78] sm:$0xff] }
  0x26   : > { %924 = vmatpush.bf16.msra.mxu2 %v2962_v10  ;;  %v2966_v27 = vld [vmem:[%s3984_s4 + $0x48] sm:$0xff]  ;;  %v2965_v31 = vld [vmem:[%s3984_s4 + $0x40] sm:$0xff]  ;;  %v3032_v47 = vld [vmem:[%s3986_s6 + $0xf8] sm:$0xff] }
  0x27   : > { %943 = vmatpush.bf16.msra.mxu3 %v2970_v11  ;;  %v2305_v32 = vld [vmem:[%s3440_s29] sm:$0xf]  ;;  %v2974_v33 = vld [vmem:[%s3440_s29 + $0x4] sm:$0xf0]  ;;  %v2973_v34 = vld [vmem:[%s3440_s29 + $0x4] sm:$0xf] }
  0x28   : > { %771 = vmatpush.bf16.msra.mxu0 %v2981_v12  ;;  %v2307_v35 = vld [vmem:[%s3440_s29 + $0x8] sm:$0xf0]  ;;  %v2385_v36 = vld [vmem:[%s3451_s24] sm:$0xf]  ;;  %v2954_v37 = vld [vmem:[%s3451_s24 + $0x4] sm:$0xf0]  ;;  %v2306_v42 = vor.u32 %v2974_v33, %v2305_v32 }
  0x29   : > { %790 = vmatpush.bf16.msra.mxu1 %v2989_v13  ;;  %v2953_v38 = vld [vmem:[%s3451_s24 + $0x4] sm:$0xf]  ;;  %v2387_v39 = vld [vmem:[%s3451_s24 + $0x8] sm:$0xf0]  ;;  %v2310_v43 = vor.u32 %v2973_v34, %v2307_v35  ;;  %v2386_v44 = vor.u32 %v2954_v37, %v2385_v36  ;;  %v3023_v48 = vld [vmem:[%s3986_s6 + $0xb0] sm:$0xff] }
  0x2a   : > { %925 = vmatpush.bf16.msra.mxu2 %v2961_v14  ;;  %v2390_v45 = vor.u32 %v2953_v38, %v2387_v39  ;;  %v3007_v49 = vld [vmem:[%s3986_s6 + $0x30] sm:$0xff]  ;;  %v3022_v52 = vld [vmem:[%s3986_s6 + $0xa8] sm:$0xff]  ;;  %v3021_v56 = vld [vmem:[%s3986_s6 + $0xa0] sm:$0xff] }
  0x2b   : > { %944 = vmatpush.bf16.msra.mxu3 %v2969_v15  ;;  %v3015_v50 = vld [vmem:[%s3986_s6 + $0x70] sm:$0xff]  ;;  %v3006_v53 = vld [vmem:[%s3986_s6 + $0x28] sm:$0xff]  ;;  %v3005_v57 = vld [vmem:[%s3986_s6 + $0x20] sm:$0xff] }
  0x2c   : > { %772 = vmatpush.bf16.msra.mxu0 %v2980_v16  ;;  %v3031_v51 = vld [vmem:[%s3986_s6 + $0xf0] sm:$0xff]  ;;  %v3014_v54 = vld [vmem:[%s3986_s6 + $0x68] sm:$0xff]  ;;  %v3013_v58 = vld [vmem:[%s3986_s6 + $0x60] sm:$0xff] }
  0x2d   : > { %791 = vmatpush.bf16.msra.mxu1 %v2988_v17  ;;  %v3030_v55 = vld [vmem:[%s3986_s6 + $0xe8] sm:$0xff]  ;;  %v3029_v59 = vld [vmem:[%s3986_s6 + $0xe0] sm:$0xff]  ;;  %v2313_v60 = vld [vmem:[%s3440_s29 + $0x10] sm:$0xf] }
  0x2e   : > { %926 = vmatpush.bf16.msra.mxu2 %v2960_v18  ;;  %v2976_v61 = vld [vmem:[%s3440_s29 + $0x14] sm:$0xf0]  ;;  %v2975_v62 = vld [vmem:[%s3440_s29 + $0x14] sm:$0xf]  ;;  %v2315_v63 = vld [vmem:[%s3440_s29 + $0x18] sm:$0xf0] }
  0x2f   : > { %945 = vmatpush.bf16.msra.mxu3 %v2968_v19  ;;  %v2393_v0 = vld [vmem:[%s3451_s24 + $0x10] sm:$0xf]  ;;  %v2956_v1 = vld [vmem:[%s3451_s24 + $0x14] sm:$0xf0]  ;;  %v2955_v2 = vld [vmem:[%s3451_s24 + $0x14] sm:$0xf]  ;;  %v2314_v6 = vor.u32 %v2976_v61, %v2313_v60  ;;  %v2318_v7 = vor.u32 %v2975_v62, %v2315_v63 }
  0x30   : > { %773 = vmatpush.bf16.msra.mxu0 %v2979_v20  ;;  %v2395_v3 = vld [vmem:[%s3451_s24 + $0x18] sm:$0xf0]  ;;  %v2394_v8 = vor.u32 %v2956_v1, %v2393_v0  ;;  %v3019_v12 = vld [vmem:[%s3986_s6 + $0x90] sm:$0xff]  ;;  %v3018_v16 = vld [vmem:[%s3986_s6 + $0x88] sm:$0xff] }
  0x31   : > { %792 = vmatpush.bf16.msra.mxu1 %v2987_v21  ;;  %v3020_v4 = vld [vmem:[%s3986_s6 + $0x98] sm:$0xff]  ;;  %v2398_v9 = vor.u32 %v2955_v2, %v2395_v3  ;;  %v3003_v13 = vld [vmem:[%s3986_s6 + $0x10] sm:$0xff]  ;;  %v3002_v17 = vld [vmem:[%s3986_s6 + $0x8] sm:$0xff] }
  0x32   : > { %927 = vmatpush.bf16.msra.mxu2 %v2959_v22  ;;  %v3004_v5 = vld [vmem:[%s3986_s6 + $0x18] sm:$0xff]  ;;  %v3011_v14 = vld [vmem:[%s3986_s6 + $0x50] sm:$0xff]  ;;  %v3010_v18 = vld [vmem:[%s3986_s6 + $0x48] sm:$0xff] }
  0x33   : > { %946 = vmatpush.bf16.msra.mxu3 %v2967_v23  ;;  %v3012_v10 = vld [vmem:[%s3986_s6 + $0x58] sm:$0xff]  ;;  %v3027_v15 = vld [vmem:[%s3986_s6 + $0xd0] sm:$0xff]  ;;  %v3026_v19 = vld [vmem:[%s3986_s6 + $0xc8] sm:$0xff] }
  0x34   : > { %774 = vmatpush.bf16.msra.mxu0 %v2978_v24  ;;  %v3028_v11 = vld [vmem:[%s3986_s6 + $0xd8] sm:$0xff]  ;;  %v3017_v20 = vld [vmem:[%s3986_s6 + $0x80] sm:$0xff]  ;;  %v2994_v32 = vld [vmem:[%s3565_s27 + $0xc] sm:$0xf] }
  0x35   : > { %793 = vmatpush.bf16.msra.mxu1 %v2986_v25  ;;  %v3001_v21 = vld [vmem:[%s3986_s6] sm:$0xff]  ;;  %v3064_v25 = vld [vmem:[%s3987_s7 + $0xb8] sm:$0xff]  ;;  %v3063_v37 = vld [vmem:[%s3987_s7 + $0xb0] sm:$0xff] }
  0x36   : > { %928 = vmatpush.bf16.msra.mxu2 %v2958_v26  ;;  %v3009_v22 = vld [vmem:[%s3986_s6 + $0x40] sm:$0xff]  ;;  %v3048_v26 = vld [vmem:[%s3987_s7 + $0x38] sm:$0xff]  ;;  %v3059_v1 = vld [vmem:[%s3987_s7 + $0x90] sm:$0xff] }
  0x37   : > { %947 = vmatpush.bf16.msra.mxu3 %v2966_v27  ;;  %v3025_v23 = vld [vmem:[%s3986_s6 + $0xc0] sm:$0xff]  ;;  %v2995_v27 = vld [vmem:[%s3565_s27 + $0xc] sm:$0xf0]  ;;  %v2475_v33 = vld [vmem:[%s3565_s27 + $0x18] sm:$0xf0] }
  0x38   : > { %775 = vmatpush.bf16.msra.mxu0 %v2977_v28  ;;  %v2465_v24 = vld [vmem:[%s3565_s27] sm:$0xf]  ;;  %v2993_v28 = vld [vmem:[%s3565_s27 + $0x4] sm:$0xf]  ;;  %v3056_v34 = vld [vmem:[%s3987_s7 + $0x78] sm:$0xff] }
  0x39   : > { %794 = vmatpush.bf16.msra.mxu1 %v2985_v29  ;;  %v2467_v29 = vld [vmem:[%s3565_s27 + $0x10] sm:$0xf0]  ;;  %v3072_v35 = vld [vmem:[%s3987_s7 + $0xf8] sm:$0xff]  ;;  %v2466_v36 = vor.u32 %v2995_v27, %v2465_v24 }
  0x3a   : > { %929 = vmatpush.bf16.msra.mxu2 %v2957_v30  ;;  %v2473_v30 = vld [vmem:[%s3565_s27 + $0x8] sm:$0xf]  ;;  %v2470_v38 = vor.u32 %v2993_v28, %v2467_v29  ;;  %v3044_v60 = vld [vmem:[%s3987_s7 + $0x18] sm:$0xff]  ;;  %v2641_v28 = vld [vmem:[%s3693_s17 + $0x20] sm:$0xf] }
  0x3b   : > { %948 = vmatpush.bf16.msra.mxu3 %v2965_v31  ;;  %776 = vmatmul.bf16.vlgmr.msra.gmra.mxu0 %v2306_v42  ;;  %v2996_v31 = vld [vmem:[%s3565_s27 + $0x14] sm:$0xf0]  ;;  %v3055_v42 = vld [vmem:[%s3987_s7 + $0x70] sm:$0xff]  ;;  %v2491_v61 = vld [vmem:[%s3565_s27 + $0x38] sm:$0xf0] }
  0x3c   : > { %1264 = vmatpush.bf16.msrb.mxu0 %v3008_v41  ;;  %795 = vmatmul.bf16.vlgmr.msra.gmra.mxu1 %v2310_v43  ;;  %v2474_v39 = vor.u32 %v2996_v31, %v2473_v30  ;;  %v3047_v41 = vld [vmem:[%s3987_s7 + $0x30] sm:$0xff]  ;;  %v3052_v62 = vld [vmem:[%s3987_s7 + $0x58] sm:$0xff]  ;;  %v3037_v30 = vld [vmem:[%s3693_s17 + $0x24] sm:$0xf] }
  0x3d   : > { %930 = vmatmul.bf16.vlgmr.msra.gmra.mxu2 %v2386_v44  ;;  %1283 = vmatpush.bf16.msrb.mxu1 %v3016_v46  ;;  %v3071_v43 = vld [vmem:[%s3987_s7 + $0xf0] sm:$0xff]  ;;  %v3062_v44 = vld [vmem:[%s3987_s7 + $0xa8] sm:$0xff]  ;;  %v3068_v63 = vld [vmem:[%s3987_s7 + $0xd8] sm:$0xff] }
  0x3e   : > { %1302 = vmatpush.bf16.msrb.mxu2 %v3024_v40  ;;  %949 = vmatmul.bf16.vlgmr.msra.gmra.mxu3 %v2390_v45  ;;  %v2478_v40 = vor.u32 %v2994_v32, %v2475_v33  ;;  %v3046_v45 = vld [vmem:[%s3987_s7 + $0x28] sm:$0xff]  ;;  %v3039_v29 = vld [vmem:[%s3693_s17 + $0x2c] sm:$0xf0]  ;;  %v2643_v31 = vld [vmem:[%s3693_s17 + $0x30] sm:$0xf0] }
  0x3f   : > { %1321 = vmatpush.bf16.msrb.mxu3 %v3032_v47  ;;  %v3054_v46 = vld [vmem:[%s3987_s7 + $0x68] sm:$0xff]  ;;  %v3040_v33 = vld [vmem:[%s3693_s17 + $0x34] sm:$0xf0] }
  0x40   : > { %1265 = vmatpush.bf16.msrb.mxu0 %v3007_v49  ;;  %v3070_v47 = vld [vmem:[%s3987_s7 + $0xe8] sm:$0xff]  ;;  %v3045_v49 = vld [vmem:[%s3987_s7 + $0x20] sm:$0xff] }
  0x41   : > { %1284 = vmatpush.bf16.msrb.mxu1 %v3015_v50  ;;  %v3053_v50 = vld [vmem:[%s3987_s7 + $0x60] sm:$0xff]  ;;  %v2649_v32 = vld [vmem:[%s3693_s17 + $0x28] sm:$0xf] }
  0x42   : > { %1303 = vmatpush.bf16.msrb.mxu2 %v3023_v48  ;;  %v3061_v48 = vld [vmem:[%s3987_s7 + $0xa0] sm:$0xff] }
  0x43   : > { %1322 = vmatpush.bf16.msrb.mxu3 %v3031_v51  ;;  %v3069_v51 = vld [vmem:[%s3987_s7 + $0xe0] sm:$0xff] }
  0x44   : > { %1266 = vmatpush.bf16.msrb.mxu0 %v3006_v53  ;;  %v2999_v53 = vld [vmem:[%s3565_s27 + $0x2c] sm:$0xf0] }
  0x45   : > { %1285 = vmatpush.bf16.msrb.mxu1 %v3014_v54  ;;  %v3060_v54 = vld [vmem:[%s3987_s7 + $0x98] sm:$0xff] }
  0x46   : > { %1304 = vmatpush.bf16.msrb.mxu2 %v3022_v52  ;;  %v2481_v52 = vld [vmem:[%s3565_s27 + $0x20] sm:$0xf] }
  0x47   : > { %1323 = vmatpush.bf16.msrb.mxu3 %v3030_v55  ;;  %v2997_v55 = vld [vmem:[%s3565_s27 + $0x24] sm:$0xf]  ;;  %v2482_v0 = vor.u32 %v2999_v53, %v2481_v52 }
  0x48   : > { %1267 = vmatpush.bf16.msrb.mxu0 %v3005_v57  ;;  %v2489_v57 = vld [vmem:[%s3565_s27 + $0x28] sm:$0xf] }
  0x49   : > { %1286 = vmatpush.bf16.msrb.mxu1 %v3013_v58  ;;  %v3000_v58 = vld [vmem:[%s3565_s27 + $0x34] sm:$0xf0] }
  0x4a   : > { %1305 = vmatpush.bf16.msrb.mxu2 %v3021_v56  ;;  %v2483_v56 = vld [vmem:[%s3565_s27 + $0x30] sm:$0xf0]  ;;  %v2490_v3 = vor.u32 %v3000_v58, %v2489_v57 }
  0x4b   : > { %1324 = vmatpush.bf16.msrb.mxu3 %v3029_v59  ;;  %781 = vmatmul.bf16.gmra.mxu0 %v2314_v6  ;;  %v2998_v59 = vld [vmem:[%s3565_s27 + $0x2c] sm:$0xf]  ;;  %v2486_v2 = vor.u32 %v2997_v55, %v2483_v56  ;;  %v3051_v6 = vld [vmem:[%s3987_s7 + $0x50] sm:$0xff]  ;;  %s2188_s27 = scalar_lea.sflag [#allocation3], %s557_s0 }
  0x4c   : > { %1268 = vmatpush.bf16.msrb.mxu0 %v3004_v5  ;;  %800 = vmatmul.bf16.gmra.mxu1 %v2318_v7  ;;  %v3043_v5 = vld [vmem:[%s3987_s7 + $0x10] sm:$0xff] }
  0x4d   : > { %935 = vmatmul.bf16.gmra.mxu2 %v2394_v8  ;;  %1287 = vmatpush.bf16.msrb.mxu1 %v3012_v10  ;;  %v3067_v7 = vld [vmem:[%s3987_s7 + $0xd0] sm:$0xff]  ;;  %v3058_v8 = vld [vmem:[%s3987_s7 + $0x88] sm:$0xff] }
  0x4e   : > { %1306 = vmatpush.bf16.msrb.mxu2 %v3020_v4  ;;  %954 = vmatmul.bf16.gmra.mxu3 %v2398_v9  ;;  %v2494_v4 = vor.u32 %v2998_v59, %v2491_v61  ;;  %v3042_v9 = vld [vmem:[%s3987_s7 + $0x8] sm:$0xff] }
  0x4f   : > { %1325 = vmatpush.bf16.msrb.mxu3 %v3028_v11  ;;  %v3050_v10 = vld [vmem:[%s3987_s7 + $0x48] sm:$0xff] }
  0x50   : > { %1269 = vmatpush.bf16.msrb.mxu0 %v3003_v13  ;;  %v3066_v11 = vld [vmem:[%s3987_s7 + $0xc8] sm:$0xff]  ;;  %v3041_v13 = vld [vmem:[%s3987_s7] sm:$0xff] }
  0x51   : > { %1288 = vmatpush.bf16.msrb.mxu1 %v3011_v14  ;;  %v3049_v14 = vld [vmem:[%s3987_s7 + $0x40] sm:$0xff] }
  0x52   : > { %1307 = vmatpush.bf16.msrb.mxu2 %v3019_v12  ;;  %v3057_v12 = vld [vmem:[%s3987_s7 + $0x80] sm:$0xff] }
  0x53   : > { %1326 = vmatpush.bf16.msrb.mxu3 %v3027_v15  ;;  %v3065_v15 = vld [vmem:[%s3987_s7 + $0xc0] sm:$0xff] }
  0x54   : > { %1270 = vmatpush.bf16.msrb.mxu0 %v3002_v17  ;;  %v3035_v17 = vld [vmem:[%s3693_s17 + $0xc] sm:$0xf0] }
  0x55   : > { %1289 = vmatpush.bf16.msrb.mxu1 %v3010_v18  ;;  %v3033_v18 = vld [vmem:[%s3693_s17 + $0x4] sm:$0xf] }
  0x56   : > { %1308 = vmatpush.bf16.msrb.mxu2 %v3018_v16  ;;  %v2625_v16 = vld [vmem:[%s3693_s17] sm:$0xf] }
  0x57   : > { %1327 = vmatpush.bf16.msrb.mxu3 %v3026_v19  ;;  %v2627_v19 = vld [vmem:[%s3693_s17 + $0x10] sm:$0xf0]  ;;  %v2626_v24 = vor.u32 %v3035_v17, %v2625_v16 }
  0x58   : > { %1271 = vmatpush.bf16.msrb.mxu0 %v3001_v21  ;;  %v3036_v21 = vld [vmem:[%s3693_s17 + $0x14] sm:$0xf0] }
  0x59   : > { %1290 = vmatpush.bf16.msrb.mxu1 %v3009_v22  ;;  %v3034_v22 = vld [vmem:[%s3693_s17 + $0xc] sm:$0xf] }
  0x5a   : > { %1309 = vmatpush.bf16.msrb.mxu2 %v3017_v20  ;;  %v2633_v20 = vld [vmem:[%s3693_s17 + $0x8] sm:$0xf] }
  0x5b   : > { %1328 = vmatpush.bf16.msrb.mxu3 %v3025_v23  ;;  %1272 = vmatmul.bf16.vlgmr.msrb.gmra.mxu0 %v2466_v36  ;;  %v2635_v23 = vld [vmem:[%s3693_s17 + $0x18] sm:$0xf0]  ;;  %v2642_v36 = vor.u32 %v3039_v29, %v2641_v28 }
  0x5c   : > { %1648 = vmatpush.bf16.msra.mxu0 %v3048_v26  ;;  %1291 = vmatmul.bf16.vlgmr.msrb.gmra.mxu1 %v2470_v38  ;;  %v2634_v26 = vor.u32 %v3036_v21, %v2633_v20  ;;  %v2638_v27 = vor.u32 %v3034_v22, %v2635_v23  ;;  %v2650_v38 = vor.u32 %v3040_v33, %v2649_v32  ;;  %v3743_v32 = vld [vmem:[%s3988_s8] ss:$0 sm:$0xff] }
  0x5d   : > { %1667 = vmatpush.bf16.msra.mxu1 %v3056_v34  ;;  %1310 = vmatmul.bf16.vlgmr.msrb.gmra.mxu2 %v2474_v39  ;;  %v3038_v34 = vld [vmem:[%s3693_s17 + $0x2c] sm:$0xf] }
  0x5e   : > { %1686 = vmatpush.bf16.msra.mxu2 %v3064_v25  ;;  %1329 = vmatmul.bf16.vlgmr.msrb.gmra.mxu3 %v2478_v40  ;;  %v2630_v25 = vor.u32 %v3033_v18, %v2627_v19 }
  0x5f   : > { %1705 = vmatpush.bf16.msra.mxu3 %v3072_v35  ;;  %v2651_v35 = vld [vmem:[%s3693_s17 + $0x38] sm:$0xf0]  ;;  %s3176_s17 = scalar_lea.hbm %s3996_s16, 2 }
  0x60   : > { %1649 = vmatpush.bf16.msra.mxu0 %v3047_v41  ;;  %v2654_v39 = vor.u32 %v3038_v34, %v2651_v35  ;;  %p3178_p1 = scmp.lt.s32.totalorder %s3176_s17, %s3172_s19 }
  0x61   : > { %1668 = vmatpush.bf16.msra.mxu1 %v3055_v42 }
  0x62   : > { %1687 = vmatpush.bf16.msra.mxu2 %v3063_v37  ;;  %v2646_v37 = vor.u32 %v3037_v30, %v2643_v31  ;;  %p3179_p2 = por %p3178_p1, %p3177_p0 }
  0x63   : > { %1706 = vmatpush.bf16.msra.mxu3 %v3071_v43 }
  0x64   : > { %1650 = vmatpush.bf16.msra.mxu0 %v3046_v45  ;;  %p3180_p3 = pnand %p3179_p2, %p3175_p13 }
  0x65   : > { %1669 = vmatpush.bf16.msra.mxu1 %v3054_v46 }
  0x66   : > { %1688 = vmatpush.bf16.msra.mxu2 %v3062_v44 }
  0x67   : > { %1707 = vmatpush.bf16.msra.mxu3 %v3070_v47 }
  0x68   : > { %1651 = vmatpush.bf16.msra.mxu0 %v3045_v49 }
  0x69   : > { %1670 = vmatpush.bf16.msra.mxu1 %v3053_v50 }
  0x6a   : > { %1689 = vmatpush.bf16.msra.mxu2 %v3061_v48 }
  0x6b   : > { %1708 = vmatpush.bf16.msra.mxu3 %v3069_v51  ;;  %1277 = vmatmul.bf16.gmra.mxu0 %v2482_v0 }
  0x6c   : > { %1652 = vmatpush.bf16.msra.mxu0 %v3044_v60  ;;  %1296 = vmatmul.bf16.gmra.mxu1 %v2486_v2 }
  0x6d   : > { %1671 = vmatpush.bf16.msra.mxu1 %v3052_v62  ;;  %1315 = vmatmul.bf16.gmra.mxu2 %v2490_v3 }
  0x6e   : > { %1690 = vmatpush.bf16.msra.mxu2 %v3060_v54  ;;  %1334 = vmatmul.bf16.gmra.mxu3 %v2494_v4 }
  0x6f   : > { %1709 = vmatpush.bf16.msra.mxu3 %v3068_v63 }
  0x70   : > { %1653 = vmatpush.bf16.msra.mxu0 %v3043_v5 }
  0x71   : > { %1672 = vmatpush.bf16.msra.mxu1 %v3051_v6 }
  0x72   : > { %1691 = vmatpush.bf16.msra.mxu2 %v3059_v1 }
  0x73   : > { %1710 = vmatpush.bf16.msra.mxu3 %v3067_v7 }
  0x74   : > { %1654 = vmatpush.bf16.msra.mxu0 %v3042_v9 }
  0x75   : > { %1673 = vmatpush.bf16.msra.mxu1 %v3050_v10 }
  0x76   : > { %1692 = vmatpush.bf16.msra.mxu2 %v3058_v8 }
  0x77   : > { %1711 = vmatpush.bf16.msra.mxu3 %v3066_v11 }
  0x78   : > { %1655 = vmatpush.bf16.msra.mxu0 %v3041_v13 }
  0x79   : > { %1674 = vmatpush.bf16.msra.mxu1 %v3049_v14 }
  0x7a   : > { %1693 = vmatpush.bf16.msra.mxu2 %v3057_v12 }
  0x7b   : > { %1712 = vmatpush.bf16.msra.mxu3 %v3065_v15  ;;  %1656 = vmatmul.bf16.vlgmr.msra.gmra.mxu0 %v2626_v24 }
  0x7c   : > { %1675 = vmatmul.bf16.vlgmr.msra.gmra.mxu1 %v2630_v25 }
  0x7d   : > { %1694 = vmatmul.bf16.vlgmr.msra.gmra.mxu2 %v2634_v26 }
  0x7e   : > { %1713 = vmatmul.bf16.vlgmr.msra.gmra.mxu3 %v2638_v27 }
  0x8b   : > { %1661 = vmatmul.bf16.gmra.mxu0 %v2642_v36 }
  0x8c   : > { %1680 = vmatmul.bf16.gmra.mxu1 %v2646_v37 }
  0x8d   : > { %1699 = vmatmul.bf16.gmra.mxu2 %v2650_v38  ;;  %v2809_v38 = vld [vmem:[%s3990_s10 + $0x30] sm:$0xf] }
  0x8e   : > { %1718 = vmatmul.bf16.gmra.mxu3 %v2654_v39  ;;  %v3088_v39 = vld [vmem:[%s3990_s10 + $0x34] sm:$0xf0] }
  0xb8   : > { %v777_v40 = vpop.f32.mrf.mxu0 }
  0xb9   : > { %v796_v41 = vpop.f32.mrf.mxu1 }
  0xba   : > { %v797_v42 = vadd.f32 %v796_v41, %v777_v40  ;;  %v2843_v40 = vld [vmem:[%s3989_s9 + $0x30] sm:$0xf] }
  0xc0   : > { %v931_v43 = vpop.f32.mrf.mxu2  ;;  %v779_v46 = vpop.f32.mrf.mxu0 }
  0xc1   : > { %v950_v44 = vpop.f32.mrf.mxu3  ;;  %v932_v45 = vadd.f32 %v931_v43, %v797_v42  ;;  %v798_v47 = vpop.f32.mrf.mxu1  ;;  %v2810_v42 = vor.u32 %v3088_v39, %v2809_v38  ;;  %v3080_v43 = vld [vmem:[%s3989_s9 + $0x34] sm:$0xf0] }
  0xc2   : > { %v799_v48 = vadd.f32 %v798_v47, %v779_v46 }
  0xc3   : > { %v951_v49 = vadd.f32 %v950_v44, %v932_v45  ;;  %v3087_v44 = vld [vmem:[%s3990_s10 + $0x34] sm:$0xf]  ;;  %v2811_v45 = vld [vmem:[%s3990_s10 + $0x38] sm:$0xf0]  ;;  %1844 = vmatpush.bf16.msrb.mxu3 %v2810_v42 }
  0xc8   : > { %v933_v50 = vpop.f32.mrf.mxu2  ;;  %v782_v53 = vpop.f32.mrf.mxu0 }
  0xc9   : > { %v952_v51 = vpop.f32.mrf.mxu3  ;;  %v934_v52 = vadd.f32 %v933_v50, %v799_v48  ;;  %v801_v54 = vpop.f32.mrf.mxu1  ;;  %v2844_v48 = vor.u32 %v3080_v43, %v2843_v40 }
  0xca   : > { %v802_v55 = vadd.f32 %v801_v54, %v782_v53 }
  0xcb   : > { %v3720_v56 = vadd.f32 %v952_v51, %v934_v52  ;;  %1913 = vmatpush.bf16.msrb.mxu2 %v2844_v48 }
  0xd0   : > { %v936_v57 = vpop.f32.mrf.mxu2  ;;  %v3722_v60 = vpop.f32.mrf.mxu0 }
  0xd1   : > { %v955_v58 = vpop.f32.mrf.mxu3  ;;  %v937_v59 = vadd.f32 %v936_v57, %v802_v55  ;;  %v3724_v61 = vpop.f32.mrf.mxu1  ;;  %v2801_v57 = vld [vmem:[%s3990_s10 + $0x20] sm:$0xf] }
  0xd3   : > { %v3726_v62 = vadd.f32 %v955_v58, %v937_v59  ;;  %v3086_v58 = vld [vmem:[%s3990_s10 + $0x24] sm:$0xf0]  ;;  %v3085_v59 = vld [vmem:[%s3990_s10 + $0x24] sm:$0xf] }
  0xd8   : > { %v3728_v63 = vpop.f32.mrf.mxu2  ;;  %v1273_v1 = vpop.f32.mrf.mxu0 }
  0xd9   : > { %v3730_v0 = vpop.f32.mrf.mxu3  ;;  %v1292_v2 = vpop.f32.mrf.mxu1 }
  0xda   : > { %v1293_v15 = vadd.f32 %v1292_v2, %v1273_v1  ;;  %v2802_v1 = vor.u32 %v3086_v58, %v2801_v57  ;;  %v2835_v2 = vld [vmem:[%s3989_s9 + $0x20] sm:$0xf]  ;;  %v3077_v58 = vld [vmem:[%s3989_s9 + $0x24] sm:$0xf] }
  0xdc   : > { %1845 = vmatpush.bf16.msrb.mxu3 %v2802_v1 }
  0xe0   : > { %v1311_v3 = vpop.f32.mrf.mxu2  ;;  %v1275_v5 = vpop.f32.mrf.mxu0 }
  0xe1   : > { %v1330_v4 = vpop.f32.mrf.mxu3  ;;  %v1294_v6 = vpop.f32.mrf.mxu1  ;;  %v1312_v20 = vadd.f32 %v1311_v3, %v1293_v15  ;;  %v3078_v3 = vld [vmem:[%s3989_s9 + $0x24] sm:$0xf0]  ;;  %v3083_v15 = vld [vmem:[%s3990_s10 + $0x14] sm:$0xf] }
  0xe2   : > { %v1295_v24 = vadd.f32 %v1294_v6, %v1275_v5 }
  0xe3   : > { %v1331_v22 = vadd.f32 %v1330_v4, %v1312_v20  ;;  %v2785_v20 = vld [vmem:[%s3990_s10] sm:$0xf] }
  0xe5   : > { %v1340_v29 = vadd.f32 %v1331_v22, %v951_v49  ;;  %v2814_v49 = vor.u32 %v3087_v44, %v2811_v45  ;;  %v2795_v22 = vld [vmem:[%s3990_s10 + $0x18] sm:$0xf0] }
  0xe7   : > { %1857 = vmatpush.bf16.msrb.mxu1 %v2814_v49 }
  0xe8   : > { %v1313_v7 = vpop.f32.mrf.mxu2  ;;  %v1278_v9 = vpop.f32.mrf.mxu0 }
  0xe9   : > { %v1332_v8 = vpop.f32.mrf.mxu3  ;;  %v1297_v10 = vpop.f32.mrf.mxu1  ;;  %v1314_v30 = vadd.f32 %v1313_v7, %v1295_v24 }
  0xea   : > { %v1298_v34 = vadd.f32 %v1297_v10, %v1278_v9  ;;  %v2793_v10 = vld [vmem:[%s3990_s10 + $0x10] sm:$0xf] }
  0xeb   : > { %v1333_v35 = vadd.f32 %v1332_v8, %v1314_v30  ;;  %v2836_v8 = vor.u32 %v3078_v3, %v2835_v2  ;;  %v804_v30 = vadd.f32 %v3724_v61, %v3722_v60 }
  0xed   : > { %v1341_v54 = vadd.f32 %v1333_v35, %v3720_v56  ;;  %v2803_v56 = vld [vmem:[%s3990_s10 + $0x28] sm:$0xf0]  ;;  %1914 = vmatpush.bf16.msrb.mxu2 %v2836_v8  ;;  %v2819_v35 = vld [vmem:[%s3989_s9] sm:$0xf]  ;;  %v939_v38 = vadd.f32 %v3728_v63, %v804_v30 }
  0xee   : > { %v2806_v6 = vor.u32 %v3085_v59, %v2803_v56  ;;  %v2837_v59 = vld [vmem:[%s3989_s9 + $0x28] sm:$0xf0] }
  0xef   : > { %v2840_v56 = vor.u32 %v3077_v58, %v2837_v59  ;;  %v1935_v58 = vld [vmem:[%s3991_s11] sm:$0x3]  ;;  %v3111_v59 = vld [vmem:[%s3994_s14 + $0x30] sm:$0xff] }
  0xf0   : > { %v1316_v11 = vpop.f32.mrf.mxu2  ;;  %v3732_v13 = vpop.f32.mrf.mxu0  ;;  %1858 = vmatpush.bf16.msrb.mxu1 %v2806_v6 }
  0xf1   : > { %v1335_v12 = vpop.f32.mrf.mxu3  ;;  %v3734_v14 = vpop.f32.mrf.mxu1  ;;  %v1317_v50 = vadd.f32 %v1316_v11, %v1298_v34  ;;  %v3084_v11 = vld [vmem:[%s3990_s10 + $0x14] sm:$0xf0]  ;;  %v2787_v34 = vld [vmem:[%s3990_s10 + $0x8] sm:$0xf0] }
  0xf3   : > { %v1336_v7 = vadd.f32 %v1335_v12, %v1317_v50  ;;  %v3079_v50 = vld [vmem:[%s3989_s9 + $0x34] sm:$0xf] }
  0xf8   : > { %v3736_v16 = vpop.f32.mrf.mxu2  ;;  %v1657_v18 = vpop.f32.mrf.mxu0 }
  0xf9   : > { %v3738_v17 = vpop.f32.mrf.mxu3  ;;  %v1676_v19 = vpop.f32.mrf.mxu1 }
  0xfa   : > { %v1677_v21 = vadd.f32 %v1676_v19, %v1657_v18  ;;  %v2794_v19 = vor.u32 %v3084_v11, %v2793_v10 }
  0xfc   : > { %1846 = vmatpush.bf16.msrb.mxu3 %v2794_v19 }
 0x100   : > { %v1695_v23 = vpop.f32.mrf.mxu2  ;;  %v1659_v27 = vpop.f32.mrf.mxu0 }
 0x101   : > { %v1696_v25 = vadd.f32 %v1695_v23, %v1677_v21  ;;  %v1714_v26 = vpop.f32.mrf.mxu3  ;;  %v1678_v28 = vpop.f32.mrf.mxu1  ;;  %v3082_v21 = vld [vmem:[%s3990_s10 + $0x4] sm:$0xf0]  ;;  %v1300_v23 = vadd.f32 %v3734_v14, %v3732_v13  ;;  %v3081_v14 = vld [vmem:[%s3990_s10 + $0x4] sm:$0xf] }
 0x102   : > { %v1679_v37 = vadd.f32 %v1678_v28, %v1659_v27  ;;  %v2798_v27 = vor.u32 %v3083_v15, %v2795_v22  ;;  %v2827_v28 = vld [vmem:[%s3989_s9 + $0x10] sm:$0xf]  ;;  %v3073_v15 = vld [vmem:[%s3989_s9 + $0x4] sm:$0xf] }
 0x103   : > { %v1715_v31 = vadd.f32 %v1714_v26, %v1696_v25 }
 0x104   : > { %1859 = vmatpush.bf16.msrb.mxu1 %v2798_v27 }
 0x105   : > { %v1724_v33 = vadd.f32 %v1715_v31, %v1340_v29  ;;  %v3076_v29 = vld [vmem:[%s3989_s9 + $0x14] sm:$0xf0]  ;;  %v1342_v31 = vadd.f32 %v1336_v7, %v3726_v62  ;;  %v2790_v62 = vor.u32 %v3081_v14, %v2787_v34 }
 0x106   : > { %v2828_v13 = vor.u32 %v3076_v29, %v2827_v28  ;;  %v3096_v29 = vld [vmem:[%s3992_s12 + $0x38] sm:$0xff] }
 0x107   : > { %v1732_v36 = vadd.f32 %v3743_v32, %v1724_v33  ;;  %v2786_v33 = vor.u32 %v3082_v21, %v2785_v20  ;;  %2078 = vmatpush.bf16.msrb.mxu0 %v3096_v29  ;;  %v1981_v29 = vld [vmem:[%s3993_s13] sm:$0x1] }
 0x108   : > { %v1697_v41 = vpop.f32.mrf.mxu2  ;;  %v1662_v52 = vpop.f32.mrf.mxu0  ;;  %1915 = vmatpush.bf16.msrb.mxu2 %v2828_v13  ;;  %1860 = vmatpush.bf16.msrb.mxu1 %v2790_v62  ;;  %v3095_v13 = vld [vmem:[%s3992_s12 + $0x30] sm:$0xff] }
 0x109   : > { %v1698_v46 = vadd.f32 %v1697_v41, %v1679_v37  ;;  %v1716_v47 = vpop.f32.mrf.mxu3  ;;  %v1736_v51 = vmul.f32 0.2, %v1732_v36  ;;  %v1681_v53 = vpop.f32.mrf.mxu1  ;;  %v3074_v37 = vld [vmem:[%s3989_s9 + $0x4] sm:$0xf0]  ;;  %1847 = vmatpush.bf16.msrb.mxu3 %v2786_v33 }
 0x10a   : > { %v1682_v5 = vadd.f32 %v1681_v53, %v1662_v52  ;;  %v2820_v42 = vor.u32 %v3074_v37, %v2819_v35  ;;  %v3220_v53 = vmov 32.0  }
 0x10b   : > { %v1717_v55 = vadd.f32 %v1716_v47, %v1698_v46  ;;  %v1740_v18 = vmax.f32 %v1732_v36, %v1736_v51  ;;  %v1319_v36 = vadd.f32 %v3736_v16, %v1300_v23  ;;  %v2845_v51 = vld [vmem:[%s3989_s9 + $0x38] sm:$0xf0]  ;;  %3154 = vrcp.f32 %v3220_v53  ;;  %2079 = vmatpush.bf16.msrb.mxu0 %v3095_v13  ;;  %v3099_v53 = vld [vmem:[%s3992_s12 + $0x50] sm:$0xff] }
 0x10c   : > { %1916 = vmatpush.bf16.msrb.mxu2 %v2820_v42 }
 0x10d   : > { %v1725_v4 = vadd.f32 %v1717_v55, %v1341_v54  ;;  %v1745_v39 = vsel %vm1744_vm0, %v1740_v18, -inf  ;;  %v1758_v43 = vsel %vm1744_vm0, %v1740_v18, 0.0  ;;  %v1338_v48 = vadd.f32 %v3738_v17, %v1319_v36  ;;  %v2821_v18 = vld [vmem:[%s3989_s9 + $0x8] sm:$0xf0] }
 0x10e   : > { %v2848_v54 = vor.u32 %v3079_v50, %v2845_v51  ;;  %v958_v55 = vadd.f32 %v3730_v0, %v939_v38  ;;  %v3075_v0 = vld [vmem:[%s3989_s9 + $0x14] sm:$0xf]  ;;  %v2824_v20 = vor.u32 %v3073_v15, %v2821_v18  ;;  %v3089_v50 = vld [vmem:[%s3992_s12] sm:$0xff] }
 0x10f   : > { %v1733_v9 = vadd.f32 %v3743_v32, %v1725_v4  ;;  %v3101_v51 = vld [vmem:[%s3992_s12 + $0x60] sm:$0xff] }
 0x110   : > { %v1700_v12 = vpop.f32.mrf.mxu2  ;;  %v1664_v40 = vpop.f32.mrf.mxu0  ;;  %1926 = vmatpush.bf16.msra.mxu3 %v2848_v54  ;;  %v1343_v2 = vadd.f32 %v1338_v48, %v958_v55  ;;  %v3103_v48 = vld [vmem:[%s3992_s12 + $0x70] sm:$0xff]  ;;  %v3098_v54 = vld [vmem:[%s3992_s12 + $0x48] sm:$0xff]  ;;  %v3097_v55 = vld [vmem:[%s3992_s12 + $0x40] sm:$0xff] }
 0x111   : > { %v1737_v24 = vmul.f32 0.2, %v1733_v9  ;;  %v1701_v25 = vadd.f32 %v1700_v12, %v1682_v5  ;;  %v1719_v26 = vpop.f32.mrf.mxu3  ;;  %v1683_v41 = vpop.f32.mrf.mxu1  ;;  %v2829_v5 = vld [vmem:[%s3989_s9 + $0x18] sm:$0xf0] }
 0x112   : > { %v1684_v49 = vadd.f32 %v1683_v41, %v1664_v40  ;;  %v3155_v8 = vpop.eup %3154  ;;  %v2832_v10 = vor.u32 %v3075_v0, %v2829_v5  ;;  %v3093_v41 = vld [vmem:[%s3992_s12 + $0x20] sm:$0xff] }
 0x113   : > { %v1741_v60 = vmax.f32 %v1733_v9, %v1737_v24  ;;  %v1720_v61 = vadd.f32 %v1719_v26, %v1701_v25  ;;  %v1772_v19 = vmul.f32 32.0, %v3155_v8  ;;  %vm1776_vm1 = vweird.f32 %v3155_v8 }
 0x114   : > { %1927 = vmatpush.bf16.msra.mxu3 %v2840_v56  ;;  %v1937_v56 = vperm.slane %v1935_v58, 0 }
 0x115   : > { %v1746_v16 = vsel %vm1744_vm0, %v1741_v60, -inf  ;;  %v1759_v44 = vsel %vm1744_vm0, %v1741_v60, 0.0  ;;  %v1726_v45 = vadd.f32 %v1720_v61, %v1342_v31  ;;  %v3094_v61 = vld [vmem:[%s3992_s12 + $0x28] sm:$0xff] }
 0x116   : > { %v1749_v46 = vmax.f32 %v1745_v39, %v1746_v16  ;;  %v1760_v47 = vadd.f32 %v1759_v44, %v1758_v43  ;;  %2080 = vmatpush.bf16.msrb.mxu0 %v3094_v61 }
 0x117   : > { %v1734_v63 = vadd.f32 %v3743_v32, %v1726_v45  ;;  %v3092_v45 = vld [vmem:[%s3992_s12 + $0x18] sm:$0xff] }
 0x118   : > { %v1702_v52 = vpop.f32.mrf.mxu2  ;;  %1928 = vmatpush.bf16.msra.mxu3 %v2832_v10  ;;  %v1938_v10 = vperm.slane %v1935_v58, 1 }
 0x119   : > { %v1738_v17 = vmul.f32 0.2, %v1734_v63  ;;  %v1703_v57 = vadd.f32 %v1702_v52, %v1684_v49  ;;  %v1721_v1 = vpop.f32.mrf.mxu3  ;;  %v3102_v49 = vld [vmem:[%s3992_s12 + $0x68] sm:$0xff]  ;;  %v3100_v52 = vld [vmem:[%s3992_s12 + $0x58] sm:$0xff] }
 0x11a   : > { %2081 = vmatpush.bf16.msrb.mxu0 %v3093_v41 }
 0x11b   : > { %v1742_v3 = vmax.f32 %v1734_v63, %v1738_v17  ;;  %v1722_v4 = vadd.f32 %v1721_v1, %v1703_v57  ;;  %v3090_v63 = vld [vmem:[%s3992_s12 + $0x8] sm:$0xff]  ;;  %v3112_v57 = vld [vmem:[%s3994_s14 + $0x38] sm:$0xff] }
 0x11c   : > { %1929 = vmatpush.bf16.msra.mxu3 %v2824_v20  ;;  %2172 = vmatpush.bf16.msra.mxu2 %v3112_v57 }
 0x11d   : > { %v1761_v6 = vsel %vm1744_vm0, %v1742_v3, 0.0  ;;  %v1727_v7 = vadd.f32 %v1722_v4, %v1343_v2  ;;  %v1747_v22 = vsel %vm1744_vm0, %v1742_v3, -inf }
 0x11e   : > { %v1762_v9 = vadd.f32 %v1761_v6, %v1760_v47  ;;  %2082 = vmatpush.bf16.msrb.mxu0 %v3092_v45  ;;  %v3091_v47 = vld [vmem:[%s3992_s12 + $0x10] sm:$0xff] }
 0x11f   : > { %v1735_v11 = vadd.f32 %v3743_v32, %v1727_v7  ;;  %v1773_v32 = vsub.f32 1.0, %v1772_v19 }
 0x120   : > { %2173 = vmatpush.bf16.msra.mxu2 %v3111_v59 }
 0x121   : > { %v1739_v12 = vmul.f32 0.2, %v1735_v11  ;;  %v1774_v30 = vmul.f32 %v3155_v8, %v1773_v32  ;;  %v3107_v32 = vld [vmem:[%s3994_s14 + $0x10] sm:$0xff] }
 0x122   : > { %2083 = vmatpush.bf16.msrb.mxu0 %v3091_v47 }
 0x123   : > { %v1743_v21 = vmax.f32 %v1735_v11, %v1739_v12  ;;  %v1775_v35 = vadd.f32 %v3155_v8, %v1774_v30 }
 0x125   : > { %v1748_v23 = vsel %vm1744_vm0, %v1743_v21, -inf  ;;  %v1763_v24 = vsel %vm1744_vm0, %v1743_v21, 0.0  ;;  %v1777_v38 = vsel %vm1776_vm1, %v3155_v8, %v1775_v35 }
 0x126   : > { %v1750_v25 = vmax.f32 %v1747_v22, %v1748_v23  ;;  %v1764_v26 = vadd.f32 %v1763_v24, %v1762_v9  ;;  %2084 = vmatpush.bf16.msrb.mxu0 %v3090_v63  ;;  %v3110_v22 = vld [vmem:[%s3994_s14 + $0x28] sm:$0xff]  ;;  %v3109_v23 = vld [vmem:[%s3994_s14 + $0x20] sm:$0xff]  ;;  %v3108_v24 = vld [vmem:[%s3994_s14 + $0x18] sm:$0xff] }
 0x127   : > { %2174 = vmatpush.bf16.msra.mxu2 %v3110_v22 }
 0x128   : > { %v1751_v27 = vmax.f32 %v1749_v46, %v1750_v25  ;;  %v1765_v28 = vrot.slane %v1764_v26, 4  ;;  %v3104_v46 = vld [vmem:[%s3992_s12 + $0x78] sm:$0xff]  ;;  %v3106_v25 = vld [vmem:[%s3994_s14 + $0x8] sm:$0xff] }
 0x129   : > { %2091 = vmatpush.bf16.msra.mxu1 %v3104_v46 }
 0x12a   : > { %v1752_v31 = vrot.slane %v1751_v27, 4  ;;  %v1766_v33 = vadd.f32 %v1765_v28, %v1764_v26  ;;  %2085 = vmatpush.bf16.msrb.mxu0 %v3089_v50  ;;  %v3105_v26 = vld [vmem:[%s3994_s14] sm:$0xff] }
 0x12b   : > { %2175 = vmatpush.bf16.msra.mxu2 %v3109_v23 }
 0x12c   : > { %v1753_v14 = vmax.f32 %v1751_v27, %v1752_v31  ;;  %v1767_v34 = vrot.slane %v1766_v33, 2 }
 0x12d   : > { %2092 = vmatpush.bf16.msra.mxu1 %v3103_v48 }
 0x12e   : > { %v1754_v36 = vrot.slane %v1753_v14, 2  ;;  %v1768_v60 = vadd.f32 %v1767_v34, %v1766_v33 }
 0x12f   : > { %2176 = vmatpush.bf16.msra.mxu2 %v3108_v24 }
 0x130   : > { %v1769_v62 = vrot.slane %v1768_v60, 1  ;;  %v1755_v37 = vmax.f32 %v1753_v14, %v1754_v36  ;;  %v2123_v36 = vld [vmem:[%s3995_s15] sm:$0x1] }
 0x131   : > { %2093 = vmatpush.bf16.msra.mxu1 %v3102_v49 }
 0x132   : > { %v1770_v39 = vadd.f32 %v1769_v62, %v1768_v60  ;;  %v1756_v40 = vrot.slane %v1755_v37, 1 }
 0x133   : > { %2177 = vmatpush.bf16.msra.mxu2 %v3107_v32 }
 0x134   : > { %v1778_v42 = vmul.f32 %v1777_v38, %v1770_v39  ;;  %v1757_v43 = vmax.f32 %v1755_v37, %v1756_v40 }
 0x135   : > { %2094 = vmatpush.bf16.msra.mxu1 %v3101_v51 }
 0x136   : > { %v1788_v16 = vpack.c.bf16 %v1778_v42, %v1778_v42  ;;  %v1779_v44 = vpack.c.bf16 %v1757_v43, %v1757_v43 }
 0x137   : > { %2178 = vmatpush.bf16.msra.mxu2 %v3106_v25 }
 0x138   : > { %2815 = vmatmul.msk.bf16.vlgmr.msrb.gmra.mxu3 %vm1744_vm0, %v1788_v16  ;;  %2816 = vmatmul.msk.bf16.vlgmr.msrb.gmra.mxu1 %vm1744_vm0, %v1788_v16 }
 0x139   : > { %2849 = vmatmul.msk.bf16.vlgmr.msrb.gmra.mxu2 %vm1744_vm0, %v1779_v44  ;;  %2095 = vmatpush.bf16.msra.mxu1 %v3100_v52 }
 0x13b   : > { %2179 = vmatpush.bf16.msra.mxu2 %v3105_v26 }
 0x13d   : > { %2096 = vmatpush.bf16.msra.mxu1 %v3099_v53 }
 0x141   : > { %2097 = vmatpush.bf16.msra.mxu1 %v3098_v54 }
 0x145   : > { %2098 = vmatpush.bf16.msra.mxu1 %v3097_v55 }
 0x148   : > { %2850 = vmatmul.msk.bf16.vlgmr.msra.gmra.mxu3 %vm1744_vm0, %v1779_v44 }
 0x1b5   : > { %v1862_v17 = vpop.f32.mrf.mxu1 }
 0x1bb   : > { %v1849_v1 = vpop.f32.mrf.mxu3 }
 0x1bc   : > { %v1918_v2 = vpop.f32.mrf.mxu2 }
 0x1bd   : > { %v1919_v3 = vadd.f32 %v1918_v2, %v1849_v1  ;;  %v1864_v4 = vpop.f32.mrf.mxu1 }
 0x1bf   : > { %v1941_v0 = vadd.f32 %v1937_v56, %v1919_v3 }
 0x1c1   : > { %v1943_v5 = vmul.f32 0.2, %v1941_v0 }
 0x1c3   : > { %v1945_v6 = vmax.f32 %v1941_v0, %v1943_v5  ;;  %v1851_v7 = vpop.f32.mrf.mxu3 }
 0x1c4   : > { %v1920_v8 = vpop.f32.mrf.mxu2 }
 0x1c5   : > { %v1947_v9 = vpack.c.bf16 %v1945_v6, %v1945_v6 }
 0x1c7   : > { %2086 = vmatmul.bf16.vlgmr.msrb.gmra.mxu0 %v1947_v9 }
 0x1cb   : > { %v1931_v11 = vpop.f32.mrf.mxu3 }
 0x1cc   : > { %v1932_v15 = vadd.f32 %v1931_v11, %v1862_v17 }
 0x1ce   : > { %v1942_v18 = vadd.f32 %v1938_v10, %v1932_v15 }
 0x1d0   : > { %v1944_v12 = vmul.f32 0.2, %v1942_v18 }
 0x1d2   : > { %v1946_v19 = vmax.f32 %v1942_v18, %v1944_v12 }
 0x1d3   : > { %v1933_v20 = vpop.f32.mrf.mxu3 }
 0x1d4   : > { %v1948_v21 = vpack.c.bf16 %v1946_v19, %v1946_v19 }
 0x1d6   : > { %2099 = vmatmul.bf16.vlgmr.msra.gmra.mxu1 %v1948_v21 }
 0x244   : > { %v2087_v27 = vpop.f32.mrf.mxu0 }
 0x245   : > { %v2088_v30 = vadd.f32 %v2087_v27, %v1981_v29 }
 0x24c   : > { %v2089_v28 = vpop.f32.mrf.mxu0 }
 0x253   : > { %v2100_v31 = vpop.f32.mrf.mxu1 }
 0x254   : > { %v2101_v33 = vadd.f32 %v2100_v31, %v2088_v30 }
 0x256   : > { %v2104_v13 = vmul.f32 0.2, %v2101_v33 }
 0x258   : > { %v2105_v14 = vmax.f32 %v2101_v33, %v2104_v13 }
 0x25a   : > { %v2106_v34 = vpack.c.bf16 %v2105_v14, %v2105_v14 }
 0x25b   : > { %v2102_v35 = vpop.f32.mrf.mxu1 }
 0x25c   : > { %2180 = vmatmul.bf16.vlgmr.msra.gmra.mxu2 %v2106_v34 }
 0x2df   : > { %v2181_v60 = vpop.f32.mrf.mxu2 }
 0x2e0   : > { %v2182_v61 = vadd.f32 %v2181_v60, %v2123_v36 }
 0x2e2   : > { %2186 = vst.msk [vmem:[%s558_s26] sm:$0x1] %vm2185_vm2, %v2182_v61 }
 0x2e3   : > { %3183 = shalt.err (!%p3180_p3)
}
 0x2e4   : > { %3113 = dma.vmem_to_hbm [thread:$0]  (%p3344_p5), %s2199_s28, 16, %s2201_s23, %s2188_s27  }
 0x2e7   : > { %v2183_v62 = vpop.f32.mrf.mxu2 }
 0x2e8 PF: > { %s4019_s0 = sld [smem:[#allocation7_spill]] }
 0x2e9   : > { %s4020_s18 = sld [smem:[#allocation5_spill]] }
 0x2ee   : > { %p3119_p4 = scmp.ge.s32.totalorder %s4019_s0, 2 }
 0x2ef   : > { %s2212_s26 = sand.u32 1, %s4020_s18  }
 0x2f0   : > { %p3116_p7 = pnand %p3119_p4, %p3348_p6  ;;  %s2213_s25 = scalar_lea.sflag [#allocation3], %s2212_s26 }
 0x2f2   : > { %p3117_p8 = pneg %p3116_p7 }
 0x2f4   : > { %3201 = dma.done.wait (%p3117_p8), %s2213_s25, 16  }
 0x2f5   : > { %3203 = vsyncadd (%p3117_p8), %s2213_s25, 4294967280  ;;  %s4022_s24 = sld [smem:[#allocation8_spill]]  ;;  %s4025_s21 = smov %s3210_s22 }
 0x2f6   : > { %s4023_s19 = sld [smem:[#allocation6_spill]] }
 0x2f7   : > { %s4024_s23 = sld [smem:[#allocation9_spill]] }
 0x2fb   : > { %p26_p9 = scmp.ge.s32.totalorder %s4022_s24, 4  }
 0x2fc   : > { %s4026_s22 = smov %s4023_s19 }
 0x2fd   :  { %28 = sbr.rel (!%p26_p9) target bundleno = 6 (0x6), region = 128 }
 0x302   :  { %2218 = vsyncpa [#allocation3], 1 }
 0x303   :  { %2220 = vsyncpa [#allocation3 + $0x1], 1 }

</bundles_post_ra>
